<compile_context>
chip_gen: v5e
topology: v5e:2x2
jax: 0.10.0
libtpu: 0.0.40
codegen_flags: <defaults>
</compile_context>

<pallas_src>
import numpy as np
import jax
import jax.numpy as jnp
from jax import lax
from jax.experimental import pallas as pl
from jax.experimental.pallas import tpu as pltpu

K1 = 30           # conv1 kernel size
K2 = 10           # conv2 kernel size
POOL = 4          # maxpool kernel == stride
LANES = 128       # TPU lane count
BATCH_TILE = 32   # batch rows per grid step (multiple of 8; keep grid >= 2 on v7x
                  # at production batch sizes so both TensorCores get work)


def video_encoder_kernel(x_ref, w1_ref, b1_ref, w2_ref, b2_ref, out_ref, idx_ref):
    # x_ref  : (C, Bt, LP)        VMEM  zero-padded input, batch on sublanes,
    #                                   sequence on lanes
    # w1_ref : (C, K1)            SMEM  conv1.weight[0]
    # b1_ref : (1,)               SMEM  conv1.bias
    # w2_ref : (K2,)              SMEM  conv2.weight[0, 0]
    # b2_ref : (1,)               SMEM  conv2.bias
    # out_ref: (Bt, LPAD)  f32    VMEM  conv2 output, dilated by POOL on lanes
    # idx_ref: (Bt, LPAD)  int32  VMEM  pool argmax indices, dilated by POOL
    C, Bt, _ = x_ref.shape
    LPAD = out_ref.shape[1]

    # ---- conv1: Conv1d(C -> 1, K1); one independent accumulator chain per channel
    per_channel = []
    for c in range(C):                       # unrolled channel loop (indep. chains)
        a = x_ref[c, :, pl.ds(0, LPAD)] * w1_ref[c, 0]
        for k in range(1, K1):               # unrolled tap loop: dense (Bt,128) FMAs
            a = a + x_ref[c, :, pl.ds(k, LPAD)] * w1_ref[c, k]
        per_channel.append(a)
    acc = per_channel[0]
    for c in range(1, C):
        acc = acc + per_channel[c]
    acc = acc + b1_ref[0]                    # conv1 output, lanes >= L1 are garbage

    # ---- MaxPool1d(POOL) + argmax, computed dilated at full lane width in vregs ---
    # best[p] = max(acc[p .. p+POOL-1]); only lanes p = POOL*w (w < L2) are valid.
    # pltpu.roll(x, LPAD - j) == left shift by j; wrap-around only reaches lanes
    # >= LPAD - j, which are never valid output positions.
    best = acc
    arg = jnp.zeros((Bt, LPAD), jnp.int32)
    for j in range(1, POOL):
        cand = pltpu.roll(acc, LPAD - j, 1)  # cand[p] = acc[p + j]   (XLU)
        take = cand > best                   # strict '>': first max wins
        best = jnp.where(take, cand, best)
        arg = jnp.where(take, jnp.int32(j), arg)
    lane = lax.broadcasted_iota(jnp.int32, (Bt, LPAD), 1)
    idx_ref[...] = lane + arg                # at p = POOL*w: index POOL*w + argmax

    # ---- conv2: Conv1d(1 -> 1, K2) on the pooled sequence (still POOL-dilated) ----
    # Two independent accumulator chains (even / odd taps).
    even = best * w2_ref[0]
    odd = pltpu.roll(best, LPAD - POOL, 1) * w2_ref[1]
    for k in range(2, K2):
        shifted = pltpu.roll(best, LPAD - POOL * k, 1)   # pooled[p + POOL*k]
        if k % 2 == 0:
            even = even + shifted * w2_ref[k]
        else:
            odd = odd + shifted * w2_ref[k]
    out_ref[...] = even + odd + b2_ref[0]


def video_encoder_forward(x, w1, b1, w2, b2):
    B, C, L = x.shape
    L1 = L - K1 + 1                          # conv1 output length
    L2 = L1 // POOL                          # pooled length (floor, matches torch)
    L3 = L2 - K2 + 1                         # conv2 output length
    LPAD = pl.cdiv(L1, LANES) * LANES        # conv1 length padded to full lanes
    LP = LPAD + K1 - 1                       # padded input length (>= L)
    Bt = BATCH_TILE
    B_pad = pl.cdiv(B, Bt) * Bt

    # (C, B, LP) layout: batch on sublanes, sequence on lanes inside the kernel.
    x_t = jnp.transpose(x.astype(jnp.float32), (1, 0, 2))
    x_pad = jnp.pad(x_t, ((0, 0), (0, B_pad - B), (0, LP - L)))

    out_d, idx_d = pl.pallas_call(
        video_encoder_kernel,
        out_shape=(jax.ShapeDtypeStruct((B_pad, LPAD), jnp.float32),
                   jax.ShapeDtypeStruct((B_pad, LPAD), jnp.int32)),
        grid=(B_pad // Bt,),
        in_specs=[
            pl.BlockSpec((C, Bt, LP), lambda b: (0, b, 0)),
            pl.BlockSpec(memory_space=pltpu.MemorySpace.SMEM),   # w1 (C, K1)
            pl.BlockSpec(memory_space=pltpu.MemorySpace.SMEM),   # b1 (1,)
            pl.BlockSpec(memory_space=pltpu.MemorySpace.SMEM),   # w2 (K2,)
            pl.BlockSpec(memory_space=pltpu.MemorySpace.SMEM),   # b2 (1,)
        ],
        out_specs=(pl.BlockSpec((Bt, LPAD), lambda b: (b, 0)),
                   pl.BlockSpec((Bt, LPAD), lambda b: (b, 0))),
        compiler_params=pltpu.CompilerParams(
            dimension_semantics=("parallel",)),
    )(x_pad, w1, b1, w2, b2)

    # Valid results sit at dilated lanes 0, POOL, 2*POOL, ...; compact + unpad.
    out = out_d[:B, 0:POOL * L3:POOL].reshape(B, 1, L3)
    # TODO(synk): PyTorch MaxPool1d returns int64 indices; emitting int32 here.
    idx = idx_d[:B, 0:POOL * L2:POOL].reshape(B, 1, L2)
    return out, idx


def ref_forward(x, w1, b1, w2, b2):
    """Pure-JAX reference of the PyTorch forward (for correctness check)."""
    B, C, L = x.shape
    L1 = L - K1 + 1
    L2 = L1 // POOL
    L3 = L2 - K2 + 1
    cols = jnp.stack([x[:, :, t:t + K1] for t in range(L1)], axis=1)   # (B, L1, C, K1)
    out1 = jnp.einsum("blck,ck->bl", cols, w1) + b1[0]                 # (B, L1)
    win = out1[:, :L2 * POOL].reshape(B, L2, POOL)
    pooled = win.max(-1)                                               # (B, L2)
    idx = (jnp.argmax(win, axis=-1).astype(jnp.int32)
           + POOL * jnp.arange(L2, dtype=jnp.int32)[None, :])
    cols2 = jnp.stack([pooled[:, t:t + K2] for t in range(L3)], axis=1)  # (B, L3, K2)
    out2 = jnp.einsum("blk,k->bl", cols2, w2) + b2[0]
    return out2[:, None, :], idx[:, None, :]


if __name__ == "__main__":
    B, VIDEO_DIM, L = 2, 4, 128     # -> L1 = 99, L2 = 24, L3 = 15

    key = jax.random.PRNGKey(0)
    k_x, k_w1, k_b1, k_w2, k_b2 = jax.random.split(key, 5)
    x = jax.random.normal(k_x, (B, VIDEO_DIM, L), jnp.float32)
    # deterministic synthetic parameters (shapes from the module __init__)
    w1 = jax.random.normal(k_w1, (VIDEO_DIM, K1), jnp.float32) * 0.1   # conv1.weight[0]
    b1 = jax.random.normal(k_b1, (1,), jnp.float32)                    # conv1.bias
    w2 = jax.random.normal(k_w2, (K2,), jnp.float32) * 0.1             # conv2.weight[0, 0]
    b2 = jax.random.normal(k_b2, (1,), jnp.float32)                    # conv2.bias

    out, i1 = video_encoder_forward(x, w1, b1, w2, b2)
    jax.block_until_ready((out, i1))

    out_ref, i1_ref = ref_forward(x, w1, b1, w2, b2)
    np.testing.assert_allclose(np.asarray(out), np.asarray(out_ref), rtol=1e-4, atol=1e-4)
    assert np.array_equal(np.asarray(i1), np.asarray(i1_ref)), "pool indices mismatch"

    print("KERNEL_OK")
</pallas_src>

<mosaic_0001>
module attributes {stable_mosaic.version = 11 : i64} {
  func.func @video_encoder_kernel(%arg0: i32, %arg1: memref<4x32x157xf32, #tpu.memory_space<vmem>>, %arg2: memref<4x30xf32, #tpu.memory_space<smem>>, %arg3: memref<1xf32, #tpu.memory_space<smem>>, %arg4: memref<10xf32, #tpu.memory_space<smem>>, %arg5: memref<1xf32, #tpu.memory_space<smem>>, %arg6: memref<32x128xf32, #tpu.memory_space<vmem>>, %arg7: memref<32x128xi32, #tpu.memory_space<vmem>>) attributes {dimension_semantics = [#tpu.dimension_semantics<parallel>], iteration_bounds = array<i64: 1>, scalar_prefetch = 0 : i64, scratch_operands = 0 : i64, tpu.core_type = #tpu.core_type<tc>, window_params = [{transform_indices = @transform_0, window_bounds = array<i64: 4, 32, 157>}, {transform_indices = @transform_1, window_bounds = array<i64: 4, 30>}, {transform_indices = @transform_2, window_bounds = array<i64: 1>}, {transform_indices = @transform_3, window_bounds = array<i64: 10>}, {transform_indices = @transform_4, window_bounds = array<i64: 1>}, {transform_indices = @transform_5, window_bounds = array<i64: 32, 128>}, {transform_indices = @transform_6, window_bounds = array<i64: 32, 128>}]} {
    %c0 = arith.constant 0 : index
    %c0_0 = arith.constant 0 : index
    %c0_1 = arith.constant 0 : index
    %0 = vector.load %arg1[%c0, %c0_0, %c0_1] : memref<4x32x157xf32, #tpu.memory_space<vmem>>, vector<1x32x128xf32>
    %1 = vector.shape_cast %0 : vector<1x32x128xf32> to vector<32x128xf32>
    %c0_2 = arith.constant 0 : index
    %c0_3 = arith.constant 0 : index
    %2 = memref.load %arg2[%c0_2, %c0_3] : memref<4x30xf32, #tpu.memory_space<smem>>
    %3 = vector.broadcast %2 : f32 to vector<32x128xf32>
    %4 = arith.mulf %1, %3 : vector<32x128xf32>
    %c0_4 = arith.constant 0 : index
    %c0_5 = arith.constant 0 : index
    %c1 = arith.constant 1 : index
    %5 = vector.load %arg1[%c0_4, %c0_5, %c1] : memref<4x32x157xf32, #tpu.memory_space<vmem>>, vector<1x32x128xf32>
    %6 = vector.shape_cast %5 : vector<1x32x128xf32> to vector<32x128xf32>
    %c0_6 = arith.constant 0 : index
    %c1_7 = arith.constant 1 : index
    %7 = memref.load %arg2[%c0_6, %c1_7] : memref<4x30xf32, #tpu.memory_space<smem>>
    %8 = vector.broadcast %7 : f32 to vector<32x128xf32>
    %9 = arith.mulf %6, %8 : vector<32x128xf32>
    %10 = arith.addf %4, %9 : vector<32x128xf32>
    %c0_8 = arith.constant 0 : index
    %c0_9 = arith.constant 0 : index
    %c2 = arith.constant 2 : index
    %11 = vector.load %arg1[%c0_8, %c0_9, %c2] : memref<4x32x157xf32, #tpu.memory_space<vmem>>, vector<1x32x128xf32>
    %12 = vector.shape_cast %11 : vector<1x32x128xf32> to vector<32x128xf32>
    %c0_10 = arith.constant 0 : index
    %c2_11 = arith.constant 2 : index
    %13 = memref.load %arg2[%c0_10, %c2_11] : memref<4x30xf32, #tpu.memory_space<smem>>
    %14 = vector.broadcast %13 : f32 to vector<32x128xf32>
    %15 = arith.mulf %12, %14 : vector<32x128xf32>
    %16 = arith.addf %10, %15 : vector<32x128xf32>
    %c0_12 = arith.constant 0 : index
    %c0_13 = arith.constant 0 : index
    %c3 = arith.constant 3 : index
    %17 = vector.load %arg1[%c0_12, %c0_13, %c3] : memref<4x32x157xf32, #tpu.memory_space<vmem>>, vector<1x32x128xf32>
    %18 = vector.shape_cast %17 : vector<1x32x128xf32> to vector<32x128xf32>
    %c0_14 = arith.constant 0 : index
    %c3_15 = arith.constant 3 : index
    %19 = memref.load %arg2[%c0_14, %c3_15] : memref<4x30xf32, #tpu.memory_space<smem>>
    %20 = vector.broadcast %19 : f32 to vector<32x128xf32>
    %21 = arith.mulf %18, %20 : vector<32x128xf32>
    %22 = arith.addf %16, %21 : vector<32x128xf32>
    %c0_16 = arith.constant 0 : index
    %c0_17 = arith.constant 0 : index
    %c4 = arith.constant 4 : index
    %23 = vector.load %arg1[%c0_16, %c0_17, %c4] : memref<4x32x157xf32, #tpu.memory_space<vmem>>, vector<1x32x128xf32>
    %24 = vector.shape_cast %23 : vector<1x32x128xf32> to vector<32x128xf32>
    %c0_18 = arith.constant 0 : index
    %c4_19 = arith.constant 4 : index
    %25 = memref.load %arg2[%c0_18, %c4_19] : memref<4x30xf32, #tpu.memory_space<smem>>
    %26 = vector.broadcast %25 : f32 to vector<32x128xf32>
    %27 = arith.mulf %24, %26 : vector<32x128xf32>
    %28 = arith.addf %22, %27 : vector<32x128xf32>
    %c0_20 = arith.constant 0 : index
    %c0_21 = arith.constant 0 : index
    %c5 = arith.constant 5 : index
    %29 = vector.load %arg1[%c0_20, %c0_21, %c5] : memref<4x32x157xf32, #tpu.memory_space<vmem>>, vector<1x32x128xf32>
    %30 = vector.shape_cast %29 : vector<1x32x128xf32> to vector<32x128xf32>
    %c0_22 = arith.constant 0 : index
    %c5_23 = arith.constant 5 : index
    %31 = memref.load %arg2[%c0_22, %c5_23] : memref<4x30xf32, #tpu.memory_space<smem>>
    %32 = vector.broadcast %31 : f32 to vector<32x128xf32>
    %33 = arith.mulf %30, %32 : vector<32x128xf32>
    %34 = arith.addf %28, %33 : vector<32x128xf32>
    %c0_24 = arith.constant 0 : index
    %c0_25 = arith.constant 0 : index
    %c6 = arith.constant 6 : index
    %35 = vector.load %arg1[%c0_24, %c0_25, %c6] : memref<4x32x157xf32, #tpu.memory_space<vmem>>, vector<1x32x128xf32>
    %36 = vector.shape_cast %35 : vector<1x32x128xf32> to vector<32x128xf32>
    %c0_26 = arith.constant 0 : index
    %c6_27 = arith.constant 6 : index
    %37 = memref.load %arg2[%c0_26, %c6_27] : memref<4x30xf32, #tpu.memory_space<smem>>
    %38 = vector.broadcast %37 : f32 to vector<32x128xf32>
    %39 = arith.mulf %36, %38 : vector<32x128xf32>
    %40 = arith.addf %34, %39 : vector<32x128xf32>
    %c0_28 = arith.constant 0 : index
    %c0_29 = arith.constant 0 : index
    %c7 = arith.constant 7 : index
    %41 = vector.load %arg1[%c0_28, %c0_29, %c7] : memref<4x32x157xf32, #tpu.memory_space<vmem>>, vector<1x32x128xf32>
    %42 = vector.shape_cast %41 : vector<1x32x128xf32> to vector<32x128xf32>
    %c0_30 = arith.constant 0 : index
    %c7_31 = arith.constant 7 : index
    %43 = memref.load %arg2[%c0_30, %c7_31] : memref<4x30xf32, #tpu.memory_space<smem>>
    %44 = vector.broadcast %43 : f32 to vector<32x128xf32>
    %45 = arith.mulf %42, %44 : vector<32x128xf32>
    %46 = arith.addf %40, %45 : vector<32x128xf32>
    %c0_32 = arith.constant 0 : index
    %c0_33 = arith.constant 0 : index
    %c8 = arith.constant 8 : index
    %47 = vector.load %arg1[%c0_32, %c0_33, %c8] : memref<4x32x157xf32, #tpu.memory_space<vmem>>, vector<1x32x128xf32>
    %48 = vector.shape_cast %47 : vector<1x32x128xf32> to vector<32x128xf32>
    %c0_34 = arith.constant 0 : index
    %c8_35 = arith.constant 8 : index
    %49 = memref.load %arg2[%c0_34, %c8_35] : memref<4x30xf32, #tpu.memory_space<smem>>
    %50 = vector.broadcast %49 : f32 to vector<32x128xf32>
    %51 = arith.mulf %48, %50 : vector<32x128xf32>
    %52 = arith.addf %46, %51 : vector<32x128xf32>
    %c0_36 = arith.constant 0 : index
    %c0_37 = arith.constant 0 : index
    %c9 = arith.constant 9 : index
    %53 = vector.load %arg1[%c0_36, %c0_37, %c9] : memref<4x32x157xf32, #tpu.memory_space<vmem>>, vector<1x32x128xf32>
    %54 = vector.shape_cast %53 : vector<1x32x128xf32> to vector<32x128xf32>
    %c0_38 = arith.constant 0 : index
    %c9_39 = arith.constant 9 : index
    %55 = memref.load %arg2[%c0_38, %c9_39] : memref<4x30xf32, #tpu.memory_space<smem>>
    %56 = vector.broadcast %55 : f32 to vector<32x128xf32>
    %57 = arith.mulf %54, %56 : vector<32x128xf32>
    %58 = arith.addf %52, %57 : vector<32x128xf32>
    %c0_40 = arith.constant 0 : index
    %c0_41 = arith.constant 0 : index
    %c10 = arith.constant 10 : index
    %59 = vector.load %arg1[%c0_40, %c0_41, %c10] : memref<4x32x157xf32, #tpu.memory_space<vmem>>, vector<1x32x128xf32>
    %60 = vector.shape_cast %59 : vector<1x32x128xf32> to vector<32x128xf32>
    %c0_42 = arith.constant 0 : index
    %c10_43 = arith.constant 10 : index
    %61 = memref.load %arg2[%c0_42, %c10_43] : memref<4x30xf32, #tpu.memory_space<smem>>
    %62 = vector.broadcast %61 : f32 to vector<32x128xf32>
    %63 = arith.mulf %60, %62 : vector<32x128xf32>
    %64 = arith.addf %58, %63 : vector<32x128xf32>
    %c0_44 = arith.constant 0 : index
    %c0_45 = arith.constant 0 : index
    %c11 = arith.constant 11 : index
    %65 = vector.load %arg1[%c0_44, %c0_45, %c11] : memref<4x32x157xf32, #tpu.memory_space<vmem>>, vector<1x32x128xf32>
    %66 = vector.shape_cast %65 : vector<1x32x128xf32> to vector<32x128xf32>
    %c0_46 = arith.constant 0 : index
    %c11_47 = arith.constant 11 : index
    %67 = memref.load %arg2[%c0_46, %c11_47] : memref<4x30xf32, #tpu.memory_space<smem>>
    %68 = vector.broadcast %67 : f32 to vector<32x128xf32>
    %69 = arith.mulf %66, %68 : vector<32x128xf32>
    %70 = arith.addf %64, %69 : vector<32x128xf32>
    %c0_48 = arith.constant 0 : index
    %c0_49 = arith.constant 0 : index
    %c12 = arith.constant 12 : index
    %71 = vector.load %arg1[%c0_48, %c0_49, %c12] : memref<4x32x157xf32, #tpu.memory_space<vmem>>, vector<1x32x128xf32>
    %72 = vector.shape_cast %71 : vector<1x32x128xf32> to vector<32x128xf32>
    %c0_50 = arith.constant 0 : index
    %c12_51 = arith.constant 12 : index
    %73 = memref.load %arg2[%c0_50, %c12_51] : memref<4x30xf32, #tpu.memory_space<smem>>
    %74 = vector.broadcast %73 : f32 to vector<32x128xf32>
    %75 = arith.mulf %72, %74 : vector<32x128xf32>
    %76 = arith.addf %70, %75 : vector<32x128xf32>
    %c0_52 = arith.constant 0 : index
    %c0_53 = arith.constant 0 : index
    %c13 = arith.constant 13 : index
    %77 = vector.load %arg1[%c0_52, %c0_53, %c13] : memref<4x32x157xf32, #tpu.memory_space<vmem>>, vector<1x32x128xf32>
    %78 = vector.shape_cast %77 : vector<1x32x128xf32> to vector<32x128xf32>
    %c0_54 = arith.constant 0 : index
    %c13_55 = arith.constant 13 : index
    %79 = memref.load %arg2[%c0_54, %c13_55] : memref<4x30xf32, #tpu.memory_space<smem>>
    %80 = vector.broadcast %79 : f32 to vector<32x128xf32>
    %81 = arith.mulf %78, %80 : vector<32x128xf32>
    %82 = arith.addf %76, %81 : vector<32x128xf32>
    %c0_56 = arith.constant 0 : index
    %c0_57 = arith.constant 0 : index
    %c14 = arith.constant 14 : index
    %83 = vector.load %arg1[%c0_56, %c0_57, %c14] : memref<4x32x157xf32, #tpu.memory_space<vmem>>, vector<1x32x128xf32>
    %84 = vector.shape_cast %83 : vector<1x32x128xf32> to vector<32x128xf32>
    %c0_58 = arith.constant 0 : index
    %c14_59 = arith.constant 14 : index
    %85 = memref.load %arg2[%c0_58, %c14_59] : memref<4x30xf32, #tpu.memory_space<smem>>
    %86 = vector.broadcast %85 : f32 to vector<32x128xf32>
    %87 = arith.mulf %84, %86 : vector<32x128xf32>
    %88 = arith.addf %82, %87 : vector<32x128xf32>
    %c0_60 = arith.constant 0 : index
    %c0_61 = arith.constant 0 : index
    %c15 = arith.constant 15 : index
    %89 = vector.load %arg1[%c0_60, %c0_61, %c15] : memref<4x32x157xf32, #tpu.memory_space<vmem>>, vector<1x32x128xf32>
    %90 = vector.shape_cast %89 : vector<1x32x128xf32> to vector<32x128xf32>
    %c0_62 = arith.constant 0 : index
    %c15_63 = arith.constant 15 : index
    %91 = memref.load %arg2[%c0_62, %c15_63] : memref<4x30xf32, #tpu.memory_space<smem>>
    %92 = vector.broadcast %91 : f32 to vector<32x128xf32>
    %93 = arith.mulf %90, %92 : vector<32x128xf32>
    %94 = arith.addf %88, %93 : vector<32x128xf32>
    %c0_64 = arith.constant 0 : index
    %c0_65 = arith.constant 0 : index
    %c16 = arith.constant 16 : index
    %95 = vector.load %arg1[%c0_64, %c0_65, %c16] : memref<4x32x157xf32, #tpu.memory_space<vmem>>, vector<1x32x128xf32>
    %96 = vector.shape_cast %95 : vector<1x32x128xf32> to vector<32x128xf32>
    %c0_66 = arith.constant 0 : index
    %c16_67 = arith.constant 16 : index
    %97 = memref.load %arg2[%c0_66, %c16_67] : memref<4x30xf32, #tpu.memory_space<smem>>
    %98 = vector.broadcast %97 : f32 to vector<32x128xf32>
    %99 = arith.mulf %96, %98 : vector<32x128xf32>
    %100 = arith.addf %94, %99 : vector<32x128xf32>
    %c0_68 = arith.constant 0 : index
    %c0_69 = arith.constant 0 : index
    %c17 = arith.constant 17 : index
    %101 = vector.load %arg1[%c0_68, %c0_69, %c17] : memref<4x32x157xf32, #tpu.memory_space<vmem>>, vector<1x32x128xf32>
    %102 = vector.shape_cast %101 : vector<1x32x128xf32> to vector<32x128xf32>
    %c0_70 = arith.constant 0 : index
    %c17_71 = arith.constant 17 : index
    %103 = memref.load %arg2[%c0_70, %c17_71] : memref<4x30xf32, #tpu.memory_space<smem>>
    %104 = vector.broadcast %103 : f32 to vector<32x128xf32>
    %105 = arith.mulf %102, %104 : vector<32x128xf32>
    %106 = arith.addf %100, %105 : vector<32x128xf32>
    %c0_72 = arith.constant 0 : index
    %c0_73 = arith.constant 0 : index
    %c18 = arith.constant 18 : index
    %107 = vector.load %arg1[%c0_72, %c0_73, %c18] : memref<4x32x157xf32, #tpu.memory_space<vmem>>, vector<1x32x128xf32>
    %108 = vector.shape_cast %107 : vector<1x32x128xf32> to vector<32x128xf32>
    %c0_74 = arith.constant 0 : index
    %c18_75 = arith.constant 18 : index
    %109 = memref.load %arg2[%c0_74, %c18_75] : memref<4x30xf32, #tpu.memory_space<smem>>
    %110 = vector.broadcast %109 : f32 to vector<32x128xf32>
    %111 = arith.mulf %108, %110 : vector<32x128xf32>
    %112 = arith.addf %106, %111 : vector<32x128xf32>
    %c0_76 = arith.constant 0 : index
    %c0_77 = arith.constant 0 : index
    %c19 = arith.constant 19 : index
    %113 = vector.load %arg1[%c0_76, %c0_77, %c19] : memref<4x32x157xf32, #tpu.memory_space<vmem>>, vector<1x32x128xf32>
    %114 = vector.shape_cast %113 : vector<1x32x128xf32> to vector<32x128xf32>
    %c0_78 = arith.constant 0 : index
    %c19_79 = arith.constant 19 : index
    %115 = memref.load %arg2[%c0_78, %c19_79] : memref<4x30xf32, #tpu.memory_space<smem>>
    %116 = vector.broadcast %115 : f32 to vector<32x128xf32>
    %117 = arith.mulf %114, %116 : vector<32x128xf32>
    %118 = arith.addf %112, %117 : vector<32x128xf32>
    %c0_80 = arith.constant 0 : index
    %c0_81 = arith.constant 0 : index
    %c20 = arith.constant 20 : index
    %119 = vector.load %arg1[%c0_80, %c0_81, %c20] : memref<4x32x157xf32, #tpu.memory_space<vmem>>, vector<1x32x128xf32>
    %120 = vector.shape_cast %119 : vector<1x32x128xf32> to vector<32x128xf32>
    %c0_82 = arith.constant 0 : index
    %c20_83 = arith.constant 20 : index
    %121 = memref.load %arg2[%c0_82, %c20_83] : memref<4x30xf32, #tpu.memory_space<smem>>
    %122 = vector.broadcast %121 : f32 to vector<32x128xf32>
    %123 = arith.mulf %120, %122 : vector<32x128xf32>
    %124 = arith.addf %118, %123 : vector<32x128xf32>
    %c0_84 = arith.constant 0 : index
    %c0_85 = arith.constant 0 : index
    %c21 = arith.constant 21 : index
    %125 = vector.load %arg1[%c0_84, %c0_85, %c21] : memref<4x32x157xf32, #tpu.memory_space<vmem>>, vector<1x32x128xf32>
    %126 = vector.shape_cast %125 : vector<1x32x128xf32> to vector<32x128xf32>
    %c0_86 = arith.constant 0 : index
    %c21_87 = arith.constant 21 : index
    %127 = memref.load %arg2[%c0_86, %c21_87] : memref<4x30xf32, #tpu.memory_space<smem>>
    %128 = vector.broadcast %127 : f32 to vector<32x128xf32>
    %129 = arith.mulf %126, %128 : vector<32x128xf32>
    %130 = arith.addf %124, %129 : vector<32x128xf32>
    %c0_88 = arith.constant 0 : index
    %c0_89 = arith.constant 0 : index
    %c22 = arith.constant 22 : index
    %131 = vector.load %arg1[%c0_88, %c0_89, %c22] : memref<4x32x157xf32, #tpu.memory_space<vmem>>, vector<1x32x128xf32>
    %132 = vector.shape_cast %131 : vector<1x32x128xf32> to vector<32x128xf32>
    %c0_90 = arith.constant 0 : index
    %c22_91 = arith.constant 22 : index
    %133 = memref.load %arg2[%c0_90, %c22_91] : memref<4x30xf32, #tpu.memory_space<smem>>
    %134 = vector.broadcast %133 : f32 to vector<32x128xf32>
    %135 = arith.mulf %132, %134 : vector<32x128xf32>
    %136 = arith.addf %130, %135 : vector<32x128xf32>
    %c0_92 = arith.constant 0 : index
    %c0_93 = arith.constant 0 : index
    %c23 = arith.constant 23 : index
    %137 = vector.load %arg1[%c0_92, %c0_93, %c23] : memref<4x32x157xf32, #tpu.memory_space<vmem>>, vector<1x32x128xf32>
    %138 = vector.shape_cast %137 : vector<1x32x128xf32> to vector<32x128xf32>
    %c0_94 = arith.constant 0 : index
    %c23_95 = arith.constant 23 : index
    %139 = memref.load %arg2[%c0_94, %c23_95] : memref<4x30xf32, #tpu.memory_space<smem>>
    %140 = vector.broadcast %139 : f32 to vector<32x128xf32>
    %141 = arith.mulf %138, %140 : vector<32x128xf32>
    %142 = arith.addf %136, %141 : vector<32x128xf32>
    %c0_96 = arith.constant 0 : index
    %c0_97 = arith.constant 0 : index
    %c24 = arith.constant 24 : index
    %143 = vector.load %arg1[%c0_96, %c0_97, %c24] : memref<4x32x157xf32, #tpu.memory_space<vmem>>, vector<1x32x128xf32>
    %144 = vector.shape_cast %143 : vector<1x32x128xf32> to vector<32x128xf32>
    %c0_98 = arith.constant 0 : index
    %c24_99 = arith.constant 24 : index
    %145 = memref.load %arg2[%c0_98, %c24_99] : memref<4x30xf32, #tpu.memory_space<smem>>
    %146 = vector.broadcast %145 : f32 to vector<32x128xf32>
    %147 = arith.mulf %144, %146 : vector<32x128xf32>
    %148 = arith.addf %142, %147 : vector<32x128xf32>
    %c0_100 = arith.constant 0 : index
    %c0_101 = arith.constant 0 : index
    %c25 = arith.constant 25 : index
    %149 = vector.load %arg1[%c0_100, %c0_101, %c25] : memref<4x32x157xf32, #tpu.memory_space<vmem>>, vector<1x32x128xf32>
    %150 = vector.shape_cast %149 : vector<1x32x128xf32> to vector<32x128xf32>
    %c0_102 = arith.constant 0 : index
    %c25_103 = arith.constant 25 : index
    %151 = memref.load %arg2[%c0_102, %c25_103] : memref<4x30xf32, #tpu.memory_space<smem>>
    %152 = vector.broadcast %151 : f32 to vector<32x128xf32>
    %153 = arith.mulf %150, %152 : vector<32x128xf32>
    %154 = arith.addf %148, %153 : vector<32x128xf32>
    %c0_104 = arith.constant 0 : index
    %c0_105 = arith.constant 0 : index
    %c26 = arith.constant 26 : index
    %155 = vector.load %arg1[%c0_104, %c0_105, %c26] : memref<4x32x157xf32, #tpu.memory_space<vmem>>, vector<1x32x128xf32>
    %156 = vector.shape_cast %155 : vector<1x32x128xf32> to vector<32x128xf32>
    %c0_106 = arith.constant 0 : index
    %c26_107 = arith.constant 26 : index
    %157 = memref.load %arg2[%c0_106, %c26_107] : memref<4x30xf32, #tpu.memory_space<smem>>
    %158 = vector.broadcast %157 : f32 to vector<32x128xf32>
    %159 = arith.mulf %156, %158 : vector<32x128xf32>
    %160 = arith.addf %154, %159 : vector<32x128xf32>
    %c0_108 = arith.constant 0 : index
    %c0_109 = arith.constant 0 : index
    %c27 = arith.constant 27 : index
    %161 = vector.load %arg1[%c0_108, %c0_109, %c27] : memref<4x32x157xf32, #tpu.memory_space<vmem>>, vector<1x32x128xf32>
    %162 = vector.shape_cast %161 : vector<1x32x128xf32> to vector<32x128xf32>
    %c0_110 = arith.constant 0 : index
    %c27_111 = arith.constant 27 : index
    %163 = memref.load %arg2[%c0_110, %c27_111] : memref<4x30xf32, #tpu.memory_space<smem>>
    %164 = vector.broadcast %163 : f32 to vector<32x128xf32>
    %165 = arith.mulf %162, %164 : vector<32x128xf32>
    %166 = arith.addf %160, %165 : vector<32x128xf32>
    %c0_112 = arith.constant 0 : index
    %c0_113 = arith.constant 0 : index
    %c28 = arith.constant 28 : index
    %167 = vector.load %arg1[%c0_112, %c0_113, %c28] : memref<4x32x157xf32, #tpu.memory_space<vmem>>, vector<1x32x128xf32>
    %168 = vector.shape_cast %167 : vector<1x32x128xf32> to vector<32x128xf32>
    %c0_114 = arith.constant 0 : index
    %c28_115 = arith.constant 28 : index
    %169 = memref.load %arg2[%c0_114, %c28_115] : memref<4x30xf32, #tpu.memory_space<smem>>
    %170 = vector.broadcast %169 : f32 to vector<32x128xf32>
    %171 = arith.mulf %168, %170 : vector<32x128xf32>
    %172 = arith.addf %166, %171 : vector<32x128xf32>
    %c0_116 = arith.constant 0 : index
    %c0_117 = arith.constant 0 : index
    %c29 = arith.constant 29 : index
    %173 = vector.load %arg1[%c0_116, %c0_117, %c29] : memref<4x32x157xf32, #tpu.memory_space<vmem>>, vector<1x32x128xf32>
    %174 = vector.shape_cast %173 : vector<1x32x128xf32> to vector<32x128xf32>
    %c0_118 = arith.constant 0 : index
    %c29_119 = arith.constant 29 : index
    %175 = memref.load %arg2[%c0_118, %c29_119] : memref<4x30xf32, #tpu.memory_space<smem>>
    %176 = vector.broadcast %175 : f32 to vector<32x128xf32>
    %177 = arith.mulf %174, %176 : vector<32x128xf32>
    %178 = arith.addf %172, %177 : vector<32x128xf32>
    %c1_120 = arith.constant 1 : index
    %c0_121 = arith.constant 0 : index
    %c0_122 = arith.constant 0 : index
    %179 = vector.load %arg1[%c1_120, %c0_121, %c0_122] : memref<4x32x157xf32, #tpu.memory_space<vmem>>, vector<1x32x128xf32>
    %180 = vector.shape_cast %179 : vector<1x32x128xf32> to vector<32x128xf32>
    %c1_123 = arith.constant 1 : index
    %c0_124 = arith.constant 0 : index
    %181 = memref.load %arg2[%c1_123, %c0_124] : memref<4x30xf32, #tpu.memory_space<smem>>
    %182 = vector.broadcast %181 : f32 to vector<32x128xf32>
    %183 = arith.mulf %180, %182 : vector<32x128xf32>
    %c1_125 = arith.constant 1 : index
    %c0_126 = arith.constant 0 : index
    %c1_127 = arith.constant 1 : index
    %184 = vector.load %arg1[%c1_125, %c0_126, %c1_127] : memref<4x32x157xf32, #tpu.memory_space<vmem>>, vector<1x32x128xf32>
    %185 = vector.shape_cast %184 : vector<1x32x128xf32> to vector<32x128xf32>
    %c1_128 = arith.constant 1 : index
    %c1_129 = arith.constant 1 : index
    %186 = memref.load %arg2[%c1_128, %c1_129] : memref<4x30xf32, #tpu.memory_space<smem>>
    %187 = vector.broadcast %186 : f32 to vector<32x128xf32>
    %188 = arith.mulf %185, %187 : vector<32x128xf32>
    %189 = arith.addf %183, %188 : vector<32x128xf32>
    %c1_130 = arith.constant 1 : index
    %c0_131 = arith.constant 0 : index
    %c2_132 = arith.constant 2 : index
    %190 = vector.load %arg1[%c1_130, %c0_131, %c2_132] : memref<4x32x157xf32, #tpu.memory_space<vmem>>, vector<1x32x128xf32>
    %191 = vector.shape_cast %190 : vector<1x32x128xf32> to vector<32x128xf32>
    %c1_133 = arith.constant 1 : index
    %c2_134 = arith.constant 2 : index
    %192 = memref.load %arg2[%c1_133, %c2_134] : memref<4x30xf32, #tpu.memory_space<smem>>
    %193 = vector.broadcast %192 : f32 to vector<32x128xf32>
    %194 = arith.mulf %191, %193 : vector<32x128xf32>
    %195 = arith.addf %189, %194 : vector<32x128xf32>
    %c1_135 = arith.constant 1 : index
    %c0_136 = arith.constant 0 : index
    %c3_137 = arith.constant 3 : index
    %196 = vector.load %arg1[%c1_135, %c0_136, %c3_137] : memref<4x32x157xf32, #tpu.memory_space<vmem>>, vector<1x32x128xf32>
    %197 = vector.shape_cast %196 : vector<1x32x128xf32> to vector<32x128xf32>
    %c1_138 = arith.constant 1 : index
    %c3_139 = arith.constant 3 : index
    %198 = memref.load %arg2[%c1_138, %c3_139] : memref<4x30xf32, #tpu.memory_space<smem>>
    %199 = vector.broadcast %198 : f32 to vector<32x128xf32>
    %200 = arith.mulf %197, %199 : vector<32x128xf32>
    %201 = arith.addf %195, %200 : vector<32x128xf32>
    %c1_140 = arith.constant 1 : index
    %c0_141 = arith.constant 0 : index
    %c4_142 = arith.constant 4 : index
    %202 = vector.load %arg1[%c1_140, %c0_141, %c4_142] : memref<4x32x157xf32, #tpu.memory_space<vmem>>, vector<1x32x128xf32>
    %203 = vector.shape_cast %202 : vector<1x32x128xf32> to vector<32x128xf32>
    %c1_143 = arith.constant 1 : index
    %c4_144 = arith.constant 4 : index
    %204 = memref.load %arg2[%c1_143, %c4_144] : memref<4x30xf32, #tpu.memory_space<smem>>
    %205 = vector.broadcast %204 : f32 to vector<32x128xf32>
    %206 = arith.mulf %203, %205 : vector<32x128xf32>
    %207 = arith.addf %201, %206 : vector<32x128xf32>
    %c1_145 = arith.constant 1 : index
    %c0_146 = arith.constant 0 : index
    %c5_147 = arith.constant 5 : index
    %208 = vector.load %arg1[%c1_145, %c0_146, %c5_147] : memref<4x32x157xf32, #tpu.memory_space<vmem>>, vector<1x32x128xf32>
    %209 = vector.shape_cast %208 : vector<1x32x128xf32> to vector<32x128xf32>
    %c1_148 = arith.constant 1 : index
    %c5_149 = arith.constant 5 : index
    %210 = memref.load %arg2[%c1_148, %c5_149] : memref<4x30xf32, #tpu.memory_space<smem>>
    %211 = vector.broadcast %210 : f32 to vector<32x128xf32>
    %212 = arith.mulf %209, %211 : vector<32x128xf32>
    %213 = arith.addf %207, %212 : vector<32x128xf32>
    %c1_150 = arith.constant 1 : index
    %c0_151 = arith.constant 0 : index
    %c6_152 = arith.constant 6 : index
    %214 = vector.load %arg1[%c1_150, %c0_151, %c6_152] : memref<4x32x157xf32, #tpu.memory_space<vmem>>, vector<1x32x128xf32>
    %215 = vector.shape_cast %214 : vector<1x32x128xf32> to vector<32x128xf32>
    %c1_153 = arith.constant 1 : index
    %c6_154 = arith.constant 6 : index
    %216 = memref.load %arg2[%c1_153, %c6_154] : memref<4x30xf32, #tpu.memory_space<smem>>
    %217 = vector.broadcast %216 : f32 to vector<32x128xf32>
    %218 = arith.mulf %215, %217 : vector<32x128xf32>
    %219 = arith.addf %213, %218 : vector<32x128xf32>
    %c1_155 = arith.constant 1 : index
    %c0_156 = arith.constant 0 : index
    %c7_157 = arith.constant 7 : index
    %220 = vector.load %arg1[%c1_155, %c0_156, %c7_157] : memref<4x32x157xf32, #tpu.memory_space<vmem>>, vector<1x32x128xf32>
    %221 = vector.shape_cast %220 : vector<1x32x128xf32> to vector<32x128xf32>
    %c1_158 = arith.constant 1 : index
    %c7_159 = arith.constant 7 : index
    %222 = memref.load %arg2[%c1_158, %c7_159] : memref<4x30xf32, #tpu.memory_space<smem>>
    %223 = vector.broadcast %222 : f32 to vector<32x128xf32>
    %224 = arith.mulf %221, %223 : vector<32x128xf32>
    %225 = arith.addf %219, %224 : vector<32x128xf32>
    %c1_160 = arith.constant 1 : index
    %c0_161 = arith.constant 0 : index
    %c8_162 = arith.constant 8 : index
    %226 = vector.load %arg1[%c1_160, %c0_161, %c8_162] : memref<4x32x157xf32, #tpu.memory_space<vmem>>, vector<1x32x128xf32>
    %227 = vector.shape_cast %226 : vector<1x32x128xf32> to vector<32x128xf32>
    %c1_163 = arith.constant 1 : index
    %c8_164 = arith.constant 8 : index
    %228 = memref.load %arg2[%c1_163, %c8_164] : memref<4x30xf32, #tpu.memory_space<smem>>
    %229 = vector.broadcast %228 : f32 to vector<32x128xf32>
    %230 = arith.mulf %227, %229 : vector<32x128xf32>
    %231 = arith.addf %225, %230 : vector<32x128xf32>
    %c1_165 = arith.constant 1 : index
    %c0_166 = arith.constant 0 : index
    %c9_167 = arith.constant 9 : index
    %232 = vector.load %arg1[%c1_165, %c0_166, %c9_167] : memref<4x32x157xf32, #tpu.memory_space<vmem>>, vector<1x32x128xf32>
    %233 = vector.shape_cast %232 : vector<1x32x128xf32> to vector<32x128xf32>
    %c1_168 = arith.constant 1 : index
    %c9_169 = arith.constant 9 : index
    %234 = memref.load %arg2[%c1_168, %c9_169] : memref<4x30xf32, #tpu.memory_space<smem>>
    %235 = vector.broadcast %234 : f32 to vector<32x128xf32>
    %236 = arith.mulf %233, %235 : vector<32x128xf32>
    %237 = arith.addf %231, %236 : vector<32x128xf32>
    %c1_170 = arith.constant 1 : index
    %c0_171 = arith.constant 0 : index
    %c10_172 = arith.constant 10 : index
    %238 = vector.load %arg1[%c1_170, %c0_171, %c10_172] : memref<4x32x157xf32, #tpu.memory_space<vmem>>, vector<1x32x128xf32>
    %239 = vector.shape_cast %238 : vector<1x32x128xf32> to vector<32x128xf32>
    %c1_173 = arith.constant 1 : index
    %c10_174 = arith.constant 10 : index
    %240 = memref.load %arg2[%c1_173, %c10_174] : memref<4x30xf32, #tpu.memory_space<smem>>
    %241 = vector.broadcast %240 : f32 to vector<32x128xf32>
    %242 = arith.mulf %239, %241 : vector<32x128xf32>
    %243 = arith.addf %237, %242 : vector<32x128xf32>
    %c1_175 = arith.constant 1 : index
    %c0_176 = arith.constant 0 : index
    %c11_177 = arith.constant 11 : index
    %244 = vector.load %arg1[%c1_175, %c0_176, %c11_177] : memref<4x32x157xf32, #tpu.memory_space<vmem>>, vector<1x32x128xf32>
    %245 = vector.shape_cast %244 : vector<1x32x128xf32> to vector<32x128xf32>
    %c1_178 = arith.constant 1 : index
    %c11_179 = arith.constant 11 : index
    %246 = memref.load %arg2[%c1_178, %c11_179] : memref<4x30xf32, #tpu.memory_space<smem>>
    %247 = vector.broadcast %246 : f32 to vector<32x128xf32>
    %248 = arith.mulf %245, %247 : vector<32x128xf32>
    %249 = arith.addf %243, %248 : vector<32x128xf32>
    %c1_180 = arith.constant 1 : index
    %c0_181 = arith.constant 0 : index
    %c12_182 = arith.constant 12 : index
    %250 = vector.load %arg1[%c1_180, %c0_181, %c12_182] : memref<4x32x157xf32, #tpu.memory_space<vmem>>, vector<1x32x128xf32>
    %251 = vector.shape_cast %250 : vector<1x32x128xf32> to vector<32x128xf32>
    %c1_183 = arith.constant 1 : index
    %c12_184 = arith.constant 12 : index
    %252 = memref.load %arg2[%c1_183, %c12_184] : memref<4x30xf32, #tpu.memory_space<smem>>
    %253 = vector.broadcast %252 : f32 to vector<32x128xf32>
    %254 = arith.mulf %251, %253 : vector<32x128xf32>
    %255 = arith.addf %249, %254 : vector<32x128xf32>
    %c1_185 = arith.constant 1 : index
    %c0_186 = arith.constant 0 : index
    %c13_187 = arith.constant 13 : index
    %256 = vector.load %arg1[%c1_185, %c0_186, %c13_187] : memref<4x32x157xf32, #tpu.memory_space<vmem>>, vector<1x32x128xf32>
    %257 = vector.shape_cast %256 : vector<1x32x128xf32> to vector<32x128xf32>
    %c1_188 = arith.constant 1 : index
    %c13_189 = arith.constant 13 : index
    %258 = memref.load %arg2[%c1_188, %c13_189] : memref<4x30xf32, #tpu.memory_space<smem>>
    %259 = vector.broadcast %258 : f32 to vector<32x128xf32>
    %260 = arith.mulf %257, %259 : vector<32x128xf32>
    %261 = arith.addf %255, %260 : vector<32x128xf32>
    %c1_190 = arith.constant 1 : index
    %c0_191 = arith.constant 0 : index
    %c14_192 = arith.constant 14 : index
    %262 = vector.load %arg1[%c1_190, %c0_191, %c14_192] : memref<4x32x157xf32, #tpu.memory_space<vmem>>, vector<1x32x128xf32>
    %263 = vector.shape_cast %262 : vector<1x32x128xf32> to vector<32x128xf32>
    %c1_193 = arith.constant 1 : index
    %c14_194 = arith.constant 14 : index
    %264 = memref.load %arg2[%c1_193, %c14_194] : memref<4x30xf32, #tpu.memory_space<smem>>
    %265 = vector.broadcast %264 : f32 to vector<32x128xf32>
    %266 = arith.mulf %263, %265 : vector<32x128xf32>
    %267 = arith.addf %261, %266 : vector<32x128xf32>
    %c1_195 = arith.constant 1 : index
    %c0_196 = arith.constant 0 : index
    %c15_197 = arith.constant 15 : index
    %268 = vector.load %arg1[%c1_195, %c0_196, %c15_197] : memref<4x32x157xf32, #tpu.memory_space<vmem>>, vector<1x32x128xf32>
    %269 = vector.shape_cast %268 : vector<1x32x128xf32> to vector<32x128xf32>
    %c1_198 = arith.constant 1 : index
    %c15_199 = arith.constant 15 : index
    %270 = memref.load %arg2[%c1_198, %c15_199] : memref<4x30xf32, #tpu.memory_space<smem>>
    %271 = vector.broadcast %270 : f32 to vector<32x128xf32>
    %272 = arith.mulf %269, %271 : vector<32x128xf32>
    %273 = arith.addf %267, %272 : vector<32x128xf32>
    %c1_200 = arith.constant 1 : index
    %c0_201 = arith.constant 0 : index
    %c16_202 = arith.constant 16 : index
    %274 = vector.load %arg1[%c1_200, %c0_201, %c16_202] : memref<4x32x157xf32, #tpu.memory_space<vmem>>, vector<1x32x128xf32>
    %275 = vector.shape_cast %274 : vector<1x32x128xf32> to vector<32x128xf32>
    %c1_203 = arith.constant 1 : index
    %c16_204 = arith.constant 16 : index
    %276 = memref.load %arg2[%c1_203, %c16_204] : memref<4x30xf32, #tpu.memory_space<smem>>
    %277 = vector.broadcast %276 : f32 to vector<32x128xf32>
    %278 = arith.mulf %275, %277 : vector<32x128xf32>
    %279 = arith.addf %273, %278 : vector<32x128xf32>
    %c1_205 = arith.constant 1 : index
    %c0_206 = arith.constant 0 : index
    %c17_207 = arith.constant 17 : index
    %280 = vector.load %arg1[%c1_205, %c0_206, %c17_207] : memref<4x32x157xf32, #tpu.memory_space<vmem>>, vector<1x32x128xf32>
    %281 = vector.shape_cast %280 : vector<1x32x128xf32> to vector<32x128xf32>
    %c1_208 = arith.constant 1 : index
    %c17_209 = arith.constant 17 : index
    %282 = memref.load %arg2[%c1_208, %c17_209] : memref<4x30xf32, #tpu.memory_space<smem>>
    %283 = vector.broadcast %282 : f32 to vector<32x128xf32>
    %284 = arith.mulf %281, %283 : vector<32x128xf32>
    %285 = arith.addf %279, %284 : vector<32x128xf32>
    %c1_210 = arith.constant 1 : index
    %c0_211 = arith.constant 0 : index
    %c18_212 = arith.constant 18 : index
    %286 = vector.load %arg1[%c1_210, %c0_211, %c18_212] : memref<4x32x157xf32, #tpu.memory_space<vmem>>, vector<1x32x128xf32>
    %287 = vector.shape_cast %286 : vector<1x32x128xf32> to vector<32x128xf32>
    %c1_213 = arith.constant 1 : index
    %c18_214 = arith.constant 18 : index
    %288 = memref.load %arg2[%c1_213, %c18_214] : memref<4x30xf32, #tpu.memory_space<smem>>
    %289 = vector.broadcast %288 : f32 to vector<32x128xf32>
    %290 = arith.mulf %287, %289 : vector<32x128xf32>
    %291 = arith.addf %285, %290 : vector<32x128xf32>
    %c1_215 = arith.constant 1 : index
    %c0_216 = arith.constant 0 : index
    %c19_217 = arith.constant 19 : index
    %292 = vector.load %arg1[%c1_215, %c0_216, %c19_217] : memref<4x32x157xf32, #tpu.memory_space<vmem>>, vector<1x32x128xf32>
    %293 = vector.shape_cast %292 : vector<1x32x128xf32> to vector<32x128xf32>
    %c1_218 = arith.constant 1 : index
    %c19_219 = arith.constant 19 : index
    %294 = memref.load %arg2[%c1_218, %c19_219] : memref<4x30xf32, #tpu.memory_space<smem>>
    %295 = vector.broadcast %294 : f32 to vector<32x128xf32>
    %296 = arith.mulf %293, %295 : vector<32x128xf32>
    %297 = arith.addf %291, %296 : vector<32x128xf32>
    %c1_220 = arith.constant 1 : index
    %c0_221 = arith.constant 0 : index
    %c20_222 = arith.constant 20 : index
    %298 = vector.load %arg1[%c1_220, %c0_221, %c20_222] : memref<4x32x157xf32, #tpu.memory_space<vmem>>, vector<1x32x128xf32>
    %299 = vector.shape_cast %298 : vector<1x32x128xf32> to vector<32x128xf32>
    %c1_223 = arith.constant 1 : index
    %c20_224 = arith.constant 20 : index
    %300 = memref.load %arg2[%c1_223, %c20_224] : memref<4x30xf32, #tpu.memory_space<smem>>
    %301 = vector.broadcast %300 : f32 to vector<32x128xf32>
    %302 = arith.mulf %299, %301 : vector<32x128xf32>
    %303 = arith.addf %297, %302 : vector<32x128xf32>
    %c1_225 = arith.constant 1 : index
    %c0_226 = arith.constant 0 : index
    %c21_227 = arith.constant 21 : index
    %304 = vector.load %arg1[%c1_225, %c0_226, %c21_227] : memref<4x32x157xf32, #tpu.memory_space<vmem>>, vector<1x32x128xf32>
    %305 = vector.shape_cast %304 : vector<1x32x128xf32> to vector<32x128xf32>
    %c1_228 = arith.constant 1 : index
    %c21_229 = arith.constant 21 : index
    %306 = memref.load %arg2[%c1_228, %c21_229] : memref<4x30xf32, #tpu.memory_space<smem>>
    %307 = vector.broadcast %306 : f32 to vector<32x128xf32>
    %308 = arith.mulf %305, %307 : vector<32x128xf32>
    %309 = arith.addf %303, %308 : vector<32x128xf32>
    %c1_230 = arith.constant 1 : index
    %c0_231 = arith.constant 0 : index
    %c22_232 = arith.constant 22 : index
    %310 = vector.load %arg1[%c1_230, %c0_231, %c22_232] : memref<4x32x157xf32, #tpu.memory_space<vmem>>, vector<1x32x128xf32>
    %311 = vector.shape_cast %310 : vector<1x32x128xf32> to vector<32x128xf32>
    %c1_233 = arith.constant 1 : index
    %c22_234 = arith.constant 22 : index
    %312 = memref.load %arg2[%c1_233, %c22_234] : memref<4x30xf32, #tpu.memory_space<smem>>
    %313 = vector.broadcast %312 : f32 to vector<32x128xf32>
    %314 = arith.mulf %311, %313 : vector<32x128xf32>
    %315 = arith.addf %309, %314 : vector<32x128xf32>
    %c1_235 = arith.constant 1 : index
    %c0_236 = arith.constant 0 : index
    %c23_237 = arith.constant 23 : index
    %316 = vector.load %arg1[%c1_235, %c0_236, %c23_237] : memref<4x32x157xf32, #tpu.memory_space<vmem>>, vector<1x32x128xf32>
    %317 = vector.shape_cast %316 : vector<1x32x128xf32> to vector<32x128xf32>
    %c1_238 = arith.constant 1 : index
    %c23_239 = arith.constant 23 : index
    %318 = memref.load %arg2[%c1_238, %c23_239] : memref<4x30xf32, #tpu.memory_space<smem>>
    %319 = vector.broadcast %318 : f32 to vector<32x128xf32>
    %320 = arith.mulf %317, %319 : vector<32x128xf32>
    %321 = arith.addf %315, %320 : vector<32x128xf32>
    %c1_240 = arith.constant 1 : index
    %c0_241 = arith.constant 0 : index
    %c24_242 = arith.constant 24 : index
    %322 = vector.load %arg1[%c1_240, %c0_241, %c24_242] : memref<4x32x157xf32, #tpu.memory_space<vmem>>, vector<1x32x128xf32>
    %323 = vector.shape_cast %322 : vector<1x32x128xf32> to vector<32x128xf32>
    %c1_243 = arith.constant 1 : index
    %c24_244 = arith.constant 24 : index
    %324 = memref.load %arg2[%c1_243, %c24_244] : memref<4x30xf32, #tpu.memory_space<smem>>
    %325 = vector.broadcast %324 : f32 to vector<32x128xf32>
    %326 = arith.mulf %323, %325 : vector<32x128xf32>
    %327 = arith.addf %321, %326 : vector<32x128xf32>
    %c1_245 = arith.constant 1 : index
    %c0_246 = arith.constant 0 : index
    %c25_247 = arith.constant 25 : index
    %328 = vector.load %arg1[%c1_245, %c0_246, %c25_247] : memref<4x32x157xf32, #tpu.memory_space<vmem>>, vector<1x32x128xf32>
    %329 = vector.shape_cast %328 : vector<1x32x128xf32> to vector<32x128xf32>
    %c1_248 = arith.constant 1 : index
    %c25_249 = arith.constant 25 : index
    %330 = memref.load %arg2[%c1_248, %c25_249] : memref<4x30xf32, #tpu.memory_space<smem>>
    %331 = vector.broadcast %330 : f32 to vector<32x128xf32>
    %332 = arith.mulf %329, %331 : vector<32x128xf32>
    %333 = arith.addf %327, %332 : vector<32x128xf32>
    %c1_250 = arith.constant 1 : index
    %c0_251 = arith.constant 0 : index
    %c26_252 = arith.constant 26 : index
    %334 = vector.load %arg1[%c1_250, %c0_251, %c26_252] : memref<4x32x157xf32, #tpu.memory_space<vmem>>, vector<1x32x128xf32>
    %335 = vector.shape_cast %334 : vector<1x32x128xf32> to vector<32x128xf32>
    %c1_253 = arith.constant 1 : index
    %c26_254 = arith.constant 26 : index
    %336 = memref.load %arg2[%c1_253, %c26_254] : memref<4x30xf32, #tpu.memory_space<smem>>
    %337 = vector.broadcast %336 : f32 to vector<32x128xf32>
    %338 = arith.mulf %335, %337 : vector<32x128xf32>
    %339 = arith.addf %333, %338 : vector<32x128xf32>
    %c1_255 = arith.constant 1 : index
    %c0_256 = arith.constant 0 : index
    %c27_257 = arith.constant 27 : index
    %340 = vector.load %arg1[%c1_255, %c0_256, %c27_257] : memref<4x32x157xf32, #tpu.memory_space<vmem>>, vector<1x32x128xf32>
    %341 = vector.shape_cast %340 : vector<1x32x128xf32> to vector<32x128xf32>
    %c1_258 = arith.constant 1 : index
    %c27_259 = arith.constant 27 : index
    %342 = memref.load %arg2[%c1_258, %c27_259] : memref<4x30xf32, #tpu.memory_space<smem>>
    %343 = vector.broadcast %342 : f32 to vector<32x128xf32>
    %344 = arith.mulf %341, %343 : vector<32x128xf32>
    %345 = arith.addf %339, %344 : vector<32x128xf32>
    %c1_260 = arith.constant 1 : index
    %c0_261 = arith.constant 0 : index
    %c28_262 = arith.constant 28 : index
    %346 = vector.load %arg1[%c1_260, %c0_261, %c28_262] : memref<4x32x157xf32, #tpu.memory_space<vmem>>, vector<1x32x128xf32>
    %347 = vector.shape_cast %346 : vector<1x32x128xf32> to vector<32x128xf32>
    %c1_263 = arith.constant 1 : index
    %c28_264 = arith.constant 28 : index
    %348 = memref.load %arg2[%c1_263, %c28_264] : memref<4x30xf32, #tpu.memory_space<smem>>
    %349 = vector.broadcast %348 : f32 to vector<32x128xf32>
    %350 = arith.mulf %347, %349 : vector<32x128xf32>
    %351 = arith.addf %345, %350 : vector<32x128xf32>
    %c1_265 = arith.constant 1 : index
    %c0_266 = arith.constant 0 : index
    %c29_267 = arith.constant 29 : index
    %352 = vector.load %arg1[%c1_265, %c0_266, %c29_267] : memref<4x32x157xf32, #tpu.memory_space<vmem>>, vector<1x32x128xf32>
    %353 = vector.shape_cast %352 : vector<1x32x128xf32> to vector<32x128xf32>
    %c1_268 = arith.constant 1 : index
    %c29_269 = arith.constant 29 : index
    %354 = memref.load %arg2[%c1_268, %c29_269] : memref<4x30xf32, #tpu.memory_space<smem>>
    %355 = vector.broadcast %354 : f32 to vector<32x128xf32>
    %356 = arith.mulf %353, %355 : vector<32x128xf32>
    %357 = arith.addf %351, %356 : vector<32x128xf32>
    %c2_270 = arith.constant 2 : index
    %c0_271 = arith.constant 0 : index
    %c0_272 = arith.constant 0 : index
    %358 = vector.load %arg1[%c2_270, %c0_271, %c0_272] : memref<4x32x157xf32, #tpu.memory_space<vmem>>, vector<1x32x128xf32>
    %359 = vector.shape_cast %358 : vector<1x32x128xf32> to vector<32x128xf32>
    %c2_273 = arith.constant 2 : index
    %c0_274 = arith.constant 0 : index
    %360 = memref.load %arg2[%c2_273, %c0_274] : memref<4x30xf32, #tpu.memory_space<smem>>
    %361 = vector.broadcast %360 : f32 to vector<32x128xf32>
    %362 = arith.mulf %359, %361 : vector<32x128xf32>
    %c2_275 = arith.constant 2 : index
    %c0_276 = arith.constant 0 : index
    %c1_277 = arith.constant 1 : index
    %363 = vector.load %arg1[%c2_275, %c0_276, %c1_277] : memref<4x32x157xf32, #tpu.memory_space<vmem>>, vector<1x32x128xf32>
    %364 = vector.shape_cast %363 : vector<1x32x128xf32> to vector<32x128xf32>
    %c2_278 = arith.constant 2 : index
    %c1_279 = arith.constant 1 : index
    %365 = memref.load %arg2[%c2_278, %c1_279] : memref<4x30xf32, #tpu.memory_space<smem>>
    %366 = vector.broadcast %365 : f32 to vector<32x128xf32>
    %367 = arith.mulf %364, %366 : vector<32x128xf32>
    %368 = arith.addf %362, %367 : vector<32x128xf32>
    %c2_280 = arith.constant 2 : index
    %c0_281 = arith.constant 0 : index
    %c2_282 = arith.constant 2 : index
    %369 = vector.load %arg1[%c2_280, %c0_281, %c2_282] : memref<4x32x157xf32, #tpu.memory_space<vmem>>, vector<1x32x128xf32>
    %370 = vector.shape_cast %369 : vector<1x32x128xf32> to vector<32x128xf32>
    %c2_283 = arith.constant 2 : index
    %c2_284 = arith.constant 2 : index
    %371 = memref.load %arg2[%c2_283, %c2_284] : memref<4x30xf32, #tpu.memory_space<smem>>
    %372 = vector.broadcast %371 : f32 to vector<32x128xf32>
    %373 = arith.mulf %370, %372 : vector<32x128xf32>
    %374 = arith.addf %368, %373 : vector<32x128xf32>
    %c2_285 = arith.constant 2 : index
    %c0_286 = arith.constant 0 : index
    %c3_287 = arith.constant 3 : index
    %375 = vector.load %arg1[%c2_285, %c0_286, %c3_287] : memref<4x32x157xf32, #tpu.memory_space<vmem>>, vector<1x32x128xf32>
    %376 = vector.shape_cast %375 : vector<1x32x128xf32> to vector<32x128xf32>
    %c2_288 = arith.constant 2 : index
    %c3_289 = arith.constant 3 : index
    %377 = memref.load %arg2[%c2_288, %c3_289] : memref<4x30xf32, #tpu.memory_space<smem>>
    %378 = vector.broadcast %377 : f32 to vector<32x128xf32>
    %379 = arith.mulf %376, %378 : vector<32x128xf32>
    %380 = arith.addf %374, %379 : vector<32x128xf32>
    %c2_290 = arith.constant 2 : index
    %c0_291 = arith.constant 0 : index
    %c4_292 = arith.constant 4 : index
    %381 = vector.load %arg1[%c2_290, %c0_291, %c4_292] : memref<4x32x157xf32, #tpu.memory_space<vmem>>, vector<1x32x128xf32>
    %382 = vector.shape_cast %381 : vector<1x32x128xf32> to vector<32x128xf32>
    %c2_293 = arith.constant 2 : index
    %c4_294 = arith.constant 4 : index
    %383 = memref.load %arg2[%c2_293, %c4_294] : memref<4x30xf32, #tpu.memory_space<smem>>
    %384 = vector.broadcast %383 : f32 to vector<32x128xf32>
    %385 = arith.mulf %382, %384 : vector<32x128xf32>
    %386 = arith.addf %380, %385 : vector<32x128xf32>
    %c2_295 = arith.constant 2 : index
    %c0_296 = arith.constant 0 : index
    %c5_297 = arith.constant 5 : index
    %387 = vector.load %arg1[%c2_295, %c0_296, %c5_297] : memref<4x32x157xf32, #tpu.memory_space<vmem>>, vector<1x32x128xf32>
    %388 = vector.shape_cast %387 : vector<1x32x128xf32> to vector<32x128xf32>
    %c2_298 = arith.constant 2 : index
    %c5_299 = arith.constant 5 : index
    %389 = memref.load %arg2[%c2_298, %c5_299] : memref<4x30xf32, #tpu.memory_space<smem>>
    %390 = vector.broadcast %389 : f32 to vector<32x128xf32>
    %391 = arith.mulf %388, %390 : vector<32x128xf32>
    %392 = arith.addf %386, %391 : vector<32x128xf32>
    %c2_300 = arith.constant 2 : index
    %c0_301 = arith.constant 0 : index
    %c6_302 = arith.constant 6 : index
    %393 = vector.load %arg1[%c2_300, %c0_301, %c6_302] : memref<4x32x157xf32, #tpu.memory_space<vmem>>, vector<1x32x128xf32>
    %394 = vector.shape_cast %393 : vector<1x32x128xf32> to vector<32x128xf32>
    %c2_303 = arith.constant 2 : index
    %c6_304 = arith.constant 6 : index
    %395 = memref.load %arg2[%c2_303, %c6_304] : memref<4x30xf32, #tpu.memory_space<smem>>
    %396 = vector.broadcast %395 : f32 to vector<32x128xf32>
    %397 = arith.mulf %394, %396 : vector<32x128xf32>
    %398 = arith.addf %392, %397 : vector<32x128xf32>
    %c2_305 = arith.constant 2 : index
    %c0_306 = arith.constant 0 : index
    %c7_307 = arith.constant 7 : index
    %399 = vector.load %arg1[%c2_305, %c0_306, %c7_307] : memref<4x32x157xf32, #tpu.memory_space<vmem>>, vector<1x32x128xf32>
    %400 = vector.shape_cast %399 : vector<1x32x128xf32> to vector<32x128xf32>
    %c2_308 = arith.constant 2 : index
    %c7_309 = arith.constant 7 : index
    %401 = memref.load %arg2[%c2_308, %c7_309] : memref<4x30xf32, #tpu.memory_space<smem>>
    %402 = vector.broadcast %401 : f32 to vector<32x128xf32>
    %403 = arith.mulf %400, %402 : vector<32x128xf32>
    %404 = arith.addf %398, %403 : vector<32x128xf32>
    %c2_310 = arith.constant 2 : index
    %c0_311 = arith.constant 0 : index
    %c8_312 = arith.constant 8 : index
    %405 = vector.load %arg1[%c2_310, %c0_311, %c8_312] : memref<4x32x157xf32, #tpu.memory_space<vmem>>, vector<1x32x128xf32>
    %406 = vector.shape_cast %405 : vector<1x32x128xf32> to vector<32x128xf32>
    %c2_313 = arith.constant 2 : index
    %c8_314 = arith.constant 8 : index
    %407 = memref.load %arg2[%c2_313, %c8_314] : memref<4x30xf32, #tpu.memory_space<smem>>
    %408 = vector.broadcast %407 : f32 to vector<32x128xf32>
    %409 = arith.mulf %406, %408 : vector<32x128xf32>
    %410 = arith.addf %404, %409 : vector<32x128xf32>
    %c2_315 = arith.constant 2 : index
    %c0_316 = arith.constant 0 : index
    %c9_317 = arith.constant 9 : index
    %411 = vector.load %arg1[%c2_315, %c0_316, %c9_317] : memref<4x32x157xf32, #tpu.memory_space<vmem>>, vector<1x32x128xf32>
    %412 = vector.shape_cast %411 : vector<1x32x128xf32> to vector<32x128xf32>
    %c2_318 = arith.constant 2 : index
    %c9_319 = arith.constant 9 : index
    %413 = memref.load %arg2[%c2_318, %c9_319] : memref<4x30xf32, #tpu.memory_space<smem>>
    %414 = vector.broadcast %413 : f32 to vector<32x128xf32>
    %415 = arith.mulf %412, %414 : vector<32x128xf32>
    %416 = arith.addf %410, %415 : vector<32x128xf32>
    %c2_320 = arith.constant 2 : index
    %c0_321 = arith.constant 0 : index
    %c10_322 = arith.constant 10 : index
    %417 = vector.load %arg1[%c2_320, %c0_321, %c10_322] : memref<4x32x157xf32, #tpu.memory_space<vmem>>, vector<1x32x128xf32>
    %418 = vector.shape_cast %417 : vector<1x32x128xf32> to vector<32x128xf32>
    %c2_323 = arith.constant 2 : index
    %c10_324 = arith.constant 10 : index
    %419 = memref.load %arg2[%c2_323, %c10_324] : memref<4x30xf32, #tpu.memory_space<smem>>
    %420 = vector.broadcast %419 : f32 to vector<32x128xf32>
    %421 = arith.mulf %418, %420 : vector<32x128xf32>
    %422 = arith.addf %416, %421 : vector<32x128xf32>
    %c2_325 = arith.constant 2 : index
    %c0_326 = arith.constant 0 : index
    %c11_327 = arith.constant 11 : index
    %423 = vector.load %arg1[%c2_325, %c0_326, %c11_327] : memref<4x32x157xf32, #tpu.memory_space<vmem>>, vector<1x32x128xf32>
    %424 = vector.shape_cast %423 : vector<1x32x128xf32> to vector<32x128xf32>
    %c2_328 = arith.constant 2 : index
    %c11_329 = arith.constant 11 : index
    %425 = memref.load %arg2[%c2_328, %c11_329] : memref<4x30xf32, #tpu.memory_space<smem>>
    %426 = vector.broadcast %425 : f32 to vector<32x128xf32>
    %427 = arith.mulf %424, %426 : vector<32x128xf32>
    %428 = arith.addf %422, %427 : vector<32x128xf32>
    %c2_330 = arith.constant 2 : index
    %c0_331 = arith.constant 0 : index
    %c12_332 = arith.constant 12 : index
    %429 = vector.load %arg1[%c2_330, %c0_331, %c12_332] : memref<4x32x157xf32, #tpu.memory_space<vmem>>, vector<1x32x128xf32>
    %430 = vector.shape_cast %429 : vector<1x32x128xf32> to vector<32x128xf32>
    %c2_333 = arith.constant 2 : index
    %c12_334 = arith.constant 12 : index
    %431 = memref.load %arg2[%c2_333, %c12_334] : memref<4x30xf32, #tpu.memory_space<smem>>
    %432 = vector.broadcast %431 : f32 to vector<32x128xf32>
    %433 = arith.mulf %430, %432 : vector<32x128xf32>
    %434 = arith.addf %428, %433 : vector<32x128xf32>
    %c2_335 = arith.constant 2 : index
    %c0_336 = arith.constant 0 : index
    %c13_337 = arith.constant 13 : index
    %435 = vector.load %arg1[%c2_335, %c0_336, %c13_337] : memref<4x32x157xf32, #tpu.memory_space<vmem>>, vector<1x32x128xf32>
    %436 = vector.shape_cast %435 : vector<1x32x128xf32> to vector<32x128xf32>
    %c2_338 = arith.constant 2 : index
    %c13_339 = arith.constant 13 : index
    %437 = memref.load %arg2[%c2_338, %c13_339] : memref<4x30xf32, #tpu.memory_space<smem>>
    %438 = vector.broadcast %437 : f32 to vector<32x128xf32>
    %439 = arith.mulf %436, %438 : vector<32x128xf32>
    %440 = arith.addf %434, %439 : vector<32x128xf32>
    %c2_340 = arith.constant 2 : index
    %c0_341 = arith.constant 0 : index
    %c14_342 = arith.constant 14 : index
    %441 = vector.load %arg1[%c2_340, %c0_341, %c14_342] : memref<4x32x157xf32, #tpu.memory_space<vmem>>, vector<1x32x128xf32>
    %442 = vector.shape_cast %441 : vector<1x32x128xf32> to vector<32x128xf32>
    %c2_343 = arith.constant 2 : index
    %c14_344 = arith.constant 14 : index
    %443 = memref.load %arg2[%c2_343, %c14_344] : memref<4x30xf32, #tpu.memory_space<smem>>
    %444 = vector.broadcast %443 : f32 to vector<32x128xf32>
    %445 = arith.mulf %442, %444 : vector<32x128xf32>
    %446 = arith.addf %440, %445 : vector<32x128xf32>
    %c2_345 = arith.constant 2 : index
    %c0_346 = arith.constant 0 : index
    %c15_347 = arith.constant 15 : index
    %447 = vector.load %arg1[%c2_345, %c0_346, %c15_347] : memref<4x32x157xf32, #tpu.memory_space<vmem>>, vector<1x32x128xf32>
    %448 = vector.shape_cast %447 : vector<1x32x128xf32> to vector<32x128xf32>
    %c2_348 = arith.constant 2 : index
    %c15_349 = arith.constant 15 : index
    %449 = memref.load %arg2[%c2_348, %c15_349] : memref<4x30xf32, #tpu.memory_space<smem>>
    %450 = vector.broadcast %449 : f32 to vector<32x128xf32>
    %451 = arith.mulf %448, %450 : vector<32x128xf32>
    %452 = arith.addf %446, %451 : vector<32x128xf32>
    %c2_350 = arith.constant 2 : index
    %c0_351 = arith.constant 0 : index
    %c16_352 = arith.constant 16 : index
    %453 = vector.load %arg1[%c2_350, %c0_351, %c16_352] : memref<4x32x157xf32, #tpu.memory_space<vmem>>, vector<1x32x128xf32>
    %454 = vector.shape_cast %453 : vector<1x32x128xf32> to vector<32x128xf32>
    %c2_353 = arith.constant 2 : index
    %c16_354 = arith.constant 16 : index
    %455 = memref.load %arg2[%c2_353, %c16_354] : memref<4x30xf32, #tpu.memory_space<smem>>
    %456 = vector.broadcast %455 : f32 to vector<32x128xf32>
    %457 = arith.mulf %454, %456 : vector<32x128xf32>
    %458 = arith.addf %452, %457 : vector<32x128xf32>
    %c2_355 = arith.constant 2 : index
    %c0_356 = arith.constant 0 : index
    %c17_357 = arith.constant 17 : index
    %459 = vector.load %arg1[%c2_355, %c0_356, %c17_357] : memref<4x32x157xf32, #tpu.memory_space<vmem>>, vector<1x32x128xf32>
    %460 = vector.shape_cast %459 : vector<1x32x128xf32> to vector<32x128xf32>
    %c2_358 = arith.constant 2 : index
    %c17_359 = arith.constant 17 : index
    %461 = memref.load %arg2[%c2_358, %c17_359] : memref<4x30xf32, #tpu.memory_space<smem>>
    %462 = vector.broadcast %461 : f32 to vector<32x128xf32>
    %463 = arith.mulf %460, %462 : vector<32x128xf32>
    %464 = arith.addf %458, %463 : vector<32x128xf32>
    %c2_360 = arith.constant 2 : index
    %c0_361 = arith.constant 0 : index
    %c18_362 = arith.constant 18 : index
    %465 = vector.load %arg1[%c2_360, %c0_361, %c18_362] : memref<4x32x157xf32, #tpu.memory_space<vmem>>, vector<1x32x128xf32>
    %466 = vector.shape_cast %465 : vector<1x32x128xf32> to vector<32x128xf32>
    %c2_363 = arith.constant 2 : index
    %c18_364 = arith.constant 18 : index
    %467 = memref.load %arg2[%c2_363, %c18_364] : memref<4x30xf32, #tpu.memory_space<smem>>
    %468 = vector.broadcast %467 : f32 to vector<32x128xf32>
    %469 = arith.mulf %466, %468 : vector<32x128xf32>
    %470 = arith.addf %464, %469 : vector<32x128xf32>
    %c2_365 = arith.constant 2 : index
    %c0_366 = arith.constant 0 : index
    %c19_367 = arith.constant 19 : index
    %471 = vector.load %arg1[%c2_365, %c0_366, %c19_367] : memref<4x32x157xf32, #tpu.memory_space<vmem>>, vector<1x32x128xf32>
    %472 = vector.shape_cast %471 : vector<1x32x128xf32> to vector<32x128xf32>
    %c2_368 = arith.constant 2 : index
    %c19_369 = arith.constant 19 : index
    %473 = memref.load %arg2[%c2_368, %c19_369] : memref<4x30xf32, #tpu.memory_space<smem>>
    %474 = vector.broadcast %473 : f32 to vector<32x128xf32>
    %475 = arith.mulf %472, %474 : vector<32x128xf32>
    %476 = arith.addf %470, %475 : vector<32x128xf32>
    %c2_370 = arith.constant 2 : index
    %c0_371 = arith.constant 0 : index
    %c20_372 = arith.constant 20 : index
    %477 = vector.load %arg1[%c2_370, %c0_371, %c20_372] : memref<4x32x157xf32, #tpu.memory_space<vmem>>, vector<1x32x128xf32>
    %478 = vector.shape_cast %477 : vector<1x32x128xf32> to vector<32x128xf32>
    %c2_373 = arith.constant 2 : index
    %c20_374 = arith.constant 20 : index
    %479 = memref.load %arg2[%c2_373, %c20_374] : memref<4x30xf32, #tpu.memory_space<smem>>
    %480 = vector.broadcast %479 : f32 to vector<32x128xf32>
    %481 = arith.mulf %478, %480 : vector<32x128xf32>
    %482 = arith.addf %476, %481 : vector<32x128xf32>
    %c2_375 = arith.constant 2 : index
    %c0_376 = arith.constant 0 : index
    %c21_377 = arith.constant 21 : index
    %483 = vector.load %arg1[%c2_375, %c0_376, %c21_377] : memref<4x32x157xf32, #tpu.memory_space<vmem>>, vector<1x32x128xf32>
    %484 = vector.shape_cast %483 : vector<1x32x128xf32> to vector<32x128xf32>
    %c2_378 = arith.constant 2 : index
    %c21_379 = arith.constant 21 : index
    %485 = memref.load %arg2[%c2_378, %c21_379] : memref<4x30xf32, #tpu.memory_space<smem>>
    %486 = vector.broadcast %485 : f32 to vector<32x128xf32>
    %487 = arith.mulf %484, %486 : vector<32x128xf32>
    %488 = arith.addf %482, %487 : vector<32x128xf32>
    %c2_380 = arith.constant 2 : index
    %c0_381 = arith.constant 0 : index
    %c22_382 = arith.constant 22 : index
    %489 = vector.load %arg1[%c2_380, %c0_381, %c22_382] : memref<4x32x157xf32, #tpu.memory_space<vmem>>, vector<1x32x128xf32>
    %490 = vector.shape_cast %489 : vector<1x32x128xf32> to vector<32x128xf32>
    %c2_383 = arith.constant 2 : index
    %c22_384 = arith.constant 22 : index
    %491 = memref.load %arg2[%c2_383, %c22_384] : memref<4x30xf32, #tpu.memory_space<smem>>
    %492 = vector.broadcast %491 : f32 to vector<32x128xf32>
    %493 = arith.mulf %490, %492 : vector<32x128xf32>
    %494 = arith.addf %488, %493 : vector<32x128xf32>
    %c2_385 = arith.constant 2 : index
    %c0_386 = arith.constant 0 : index
    %c23_387 = arith.constant 23 : index
    %495 = vector.load %arg1[%c2_385, %c0_386, %c23_387] : memref<4x32x157xf32, #tpu.memory_space<vmem>>, vector<1x32x128xf32>
    %496 = vector.shape_cast %495 : vector<1x32x128xf32> to vector<32x128xf32>
    %c2_388 = arith.constant 2 : index
    %c23_389 = arith.constant 23 : index
    %497 = memref.load %arg2[%c2_388, %c23_389] : memref<4x30xf32, #tpu.memory_space<smem>>
    %498 = vector.broadcast %497 : f32 to vector<32x128xf32>
    %499 = arith.mulf %496, %498 : vector<32x128xf32>
    %500 = arith.addf %494, %499 : vector<32x128xf32>
    %c2_390 = arith.constant 2 : index
    %c0_391 = arith.constant 0 : index
    %c24_392 = arith.constant 24 : index
    %501 = vector.load %arg1[%c2_390, %c0_391, %c24_392] : memref<4x32x157xf32, #tpu.memory_space<vmem>>, vector<1x32x128xf32>
    %502 = vector.shape_cast %501 : vector<1x32x128xf32> to vector<32x128xf32>
    %c2_393 = arith.constant 2 : index
    %c24_394 = arith.constant 24 : index
    %503 = memref.load %arg2[%c2_393, %c24_394] : memref<4x30xf32, #tpu.memory_space<smem>>
    %504 = vector.broadcast %503 : f32 to vector<32x128xf32>
    %505 = arith.mulf %502, %504 : vector<32x128xf32>
    %506 = arith.addf %500, %505 : vector<32x128xf32>
    %c2_395 = arith.constant 2 : index
    %c0_396 = arith.constant 0 : index
    %c25_397 = arith.constant 25 : index
    %507 = vector.load %arg1[%c2_395, %c0_396, %c25_397] : memref<4x32x157xf32, #tpu.memory_space<vmem>>, vector<1x32x128xf32>
    %508 = vector.shape_cast %507 : vector<1x32x128xf32> to vector<32x128xf32>
    %c2_398 = arith.constant 2 : index
    %c25_399 = arith.constant 25 : index
    %509 = memref.load %arg2[%c2_398, %c25_399] : memref<4x30xf32, #tpu.memory_space<smem>>
    %510 = vector.broadcast %509 : f32 to vector<32x128xf32>
    %511 = arith.mulf %508, %510 : vector<32x128xf32>
    %512 = arith.addf %506, %511 : vector<32x128xf32>
    %c2_400 = arith.constant 2 : index
    %c0_401 = arith.constant 0 : index
    %c26_402 = arith.constant 26 : index
    %513 = vector.load %arg1[%c2_400, %c0_401, %c26_402] : memref<4x32x157xf32, #tpu.memory_space<vmem>>, vector<1x32x128xf32>
    %514 = vector.shape_cast %513 : vector<1x32x128xf32> to vector<32x128xf32>
    %c2_403 = arith.constant 2 : index
    %c26_404 = arith.constant 26 : index
    %515 = memref.load %arg2[%c2_403, %c26_404] : memref<4x30xf32, #tpu.memory_space<smem>>
    %516 = vector.broadcast %515 : f32 to vector<32x128xf32>
    %517 = arith.mulf %514, %516 : vector<32x128xf32>
    %518 = arith.addf %512, %517 : vector<32x128xf32>
    %c2_405 = arith.constant 2 : index
    %c0_406 = arith.constant 0 : index
    %c27_407 = arith.constant 27 : index
    %519 = vector.load %arg1[%c2_405, %c0_406, %c27_407] : memref<4x32x157xf32, #tpu.memory_space<vmem>>, vector<1x32x128xf32>
    %520 = vector.shape_cast %519 : vector<1x32x128xf32> to vector<32x128xf32>
    %c2_408 = arith.constant 2 : index
    %c27_409 = arith.constant 27 : index
    %521 = memref.load %arg2[%c2_408, %c27_409] : memref<4x30xf32, #tpu.memory_space<smem>>
    %522 = vector.broadcast %521 : f32 to vector<32x128xf32>
    %523 = arith.mulf %520, %522 : vector<32x128xf32>
    %524 = arith.addf %518, %523 : vector<32x128xf32>
    %c2_410 = arith.constant 2 : index
    %c0_411 = arith.constant 0 : index
    %c28_412 = arith.constant 28 : index
    %525 = vector.load %arg1[%c2_410, %c0_411, %c28_412] : memref<4x32x157xf32, #tpu.memory_space<vmem>>, vector<1x32x128xf32>
    %526 = vector.shape_cast %525 : vector<1x32x128xf32> to vector<32x128xf32>
    %c2_413 = arith.constant 2 : index
    %c28_414 = arith.constant 28 : index
    %527 = memref.load %arg2[%c2_413, %c28_414] : memref<4x30xf32, #tpu.memory_space<smem>>
    %528 = vector.broadcast %527 : f32 to vector<32x128xf32>
    %529 = arith.mulf %526, %528 : vector<32x128xf32>
    %530 = arith.addf %524, %529 : vector<32x128xf32>
    %c2_415 = arith.constant 2 : index
    %c0_416 = arith.constant 0 : index
    %c29_417 = arith.constant 29 : index
    %531 = vector.load %arg1[%c2_415, %c0_416, %c29_417] : memref<4x32x157xf32, #tpu.memory_space<vmem>>, vector<1x32x128xf32>
    %532 = vector.shape_cast %531 : vector<1x32x128xf32> to vector<32x128xf32>
    %c2_418 = arith.constant 2 : index
    %c29_419 = arith.constant 29 : index
    %533 = memref.load %arg2[%c2_418, %c29_419] : memref<4x30xf32, #tpu.memory_space<smem>>
    %534 = vector.broadcast %533 : f32 to vector<32x128xf32>
    %535 = arith.mulf %532, %534 : vector<32x128xf32>
    %536 = arith.addf %530, %535 : vector<32x128xf32>
    %c3_420 = arith.constant 3 : index
    %c0_421 = arith.constant 0 : index
    %c0_422 = arith.constant 0 : index
    %537 = vector.load %arg1[%c3_420, %c0_421, %c0_422] : memref<4x32x157xf32, #tpu.memory_space<vmem>>, vector<1x32x128xf32>
    %538 = vector.shape_cast %537 : vector<1x32x128xf32> to vector<32x128xf32>
    %c3_423 = arith.constant 3 : index
    %c0_424 = arith.constant 0 : index
    %539 = memref.load %arg2[%c3_423, %c0_424] : memref<4x30xf32, #tpu.memory_space<smem>>
    %540 = vector.broadcast %539 : f32 to vector<32x128xf32>
    %541 = arith.mulf %538, %540 : vector<32x128xf32>
    %c3_425 = arith.constant 3 : index
    %c0_426 = arith.constant 0 : index
    %c1_427 = arith.constant 1 : index
    %542 = vector.load %arg1[%c3_425, %c0_426, %c1_427] : memref<4x32x157xf32, #tpu.memory_space<vmem>>, vector<1x32x128xf32>
    %543 = vector.shape_cast %542 : vector<1x32x128xf32> to vector<32x128xf32>
    %c3_428 = arith.constant 3 : index
    %c1_429 = arith.constant 1 : index
    %544 = memref.load %arg2[%c3_428, %c1_429] : memref<4x30xf32, #tpu.memory_space<smem>>
    %545 = vector.broadcast %544 : f32 to vector<32x128xf32>
    %546 = arith.mulf %543, %545 : vector<32x128xf32>
    %547 = arith.addf %541, %546 : vector<32x128xf32>
    %c3_430 = arith.constant 3 : index
    %c0_431 = arith.constant 0 : index
    %c2_432 = arith.constant 2 : index
    %548 = vector.load %arg1[%c3_430, %c0_431, %c2_432] : memref<4x32x157xf32, #tpu.memory_space<vmem>>, vector<1x32x128xf32>
    %549 = vector.shape_cast %548 : vector<1x32x128xf32> to vector<32x128xf32>
    %c3_433 = arith.constant 3 : index
    %c2_434 = arith.constant 2 : index
    %550 = memref.load %arg2[%c3_433, %c2_434] : memref<4x30xf32, #tpu.memory_space<smem>>
    %551 = vector.broadcast %550 : f32 to vector<32x128xf32>
    %552 = arith.mulf %549, %551 : vector<32x128xf32>
    %553 = arith.addf %547, %552 : vector<32x128xf32>
    %c3_435 = arith.constant 3 : index
    %c0_436 = arith.constant 0 : index
    %c3_437 = arith.constant 3 : index
    %554 = vector.load %arg1[%c3_435, %c0_436, %c3_437] : memref<4x32x157xf32, #tpu.memory_space<vmem>>, vector<1x32x128xf32>
    %555 = vector.shape_cast %554 : vector<1x32x128xf32> to vector<32x128xf32>
    %c3_438 = arith.constant 3 : index
    %c3_439 = arith.constant 3 : index
    %556 = memref.load %arg2[%c3_438, %c3_439] : memref<4x30xf32, #tpu.memory_space<smem>>
    %557 = vector.broadcast %556 : f32 to vector<32x128xf32>
    %558 = arith.mulf %555, %557 : vector<32x128xf32>
    %559 = arith.addf %553, %558 : vector<32x128xf32>
    %c3_440 = arith.constant 3 : index
    %c0_441 = arith.constant 0 : index
    %c4_442 = arith.constant 4 : index
    %560 = vector.load %arg1[%c3_440, %c0_441, %c4_442] : memref<4x32x157xf32, #tpu.memory_space<vmem>>, vector<1x32x128xf32>
    %561 = vector.shape_cast %560 : vector<1x32x128xf32> to vector<32x128xf32>
    %c3_443 = arith.constant 3 : index
    %c4_444 = arith.constant 4 : index
    %562 = memref.load %arg2[%c3_443, %c4_444] : memref<4x30xf32, #tpu.memory_space<smem>>
    %563 = vector.broadcast %562 : f32 to vector<32x128xf32>
    %564 = arith.mulf %561, %563 : vector<32x128xf32>
    %565 = arith.addf %559, %564 : vector<32x128xf32>
    %c3_445 = arith.constant 3 : index
    %c0_446 = arith.constant 0 : index
    %c5_447 = arith.constant 5 : index
    %566 = vector.load %arg1[%c3_445, %c0_446, %c5_447] : memref<4x32x157xf32, #tpu.memory_space<vmem>>, vector<1x32x128xf32>
    %567 = vector.shape_cast %566 : vector<1x32x128xf32> to vector<32x128xf32>
    %c3_448 = arith.constant 3 : index
    %c5_449 = arith.constant 5 : index
    %568 = memref.load %arg2[%c3_448, %c5_449] : memref<4x30xf32, #tpu.memory_space<smem>>
    %569 = vector.broadcast %568 : f32 to vector<32x128xf32>
    %570 = arith.mulf %567, %569 : vector<32x128xf32>
    %571 = arith.addf %565, %570 : vector<32x128xf32>
    %c3_450 = arith.constant 3 : index
    %c0_451 = arith.constant 0 : index
    %c6_452 = arith.constant 6 : index
    %572 = vector.load %arg1[%c3_450, %c0_451, %c6_452] : memref<4x32x157xf32, #tpu.memory_space<vmem>>, vector<1x32x128xf32>
    %573 = vector.shape_cast %572 : vector<1x32x128xf32> to vector<32x128xf32>
    %c3_453 = arith.constant 3 : index
    %c6_454 = arith.constant 6 : index
    %574 = memref.load %arg2[%c3_453, %c6_454] : memref<4x30xf32, #tpu.memory_space<smem>>
    %575 = vector.broadcast %574 : f32 to vector<32x128xf32>
    %576 = arith.mulf %573, %575 : vector<32x128xf32>
    %577 = arith.addf %571, %576 : vector<32x128xf32>
    %c3_455 = arith.constant 3 : index
    %c0_456 = arith.constant 0 : index
    %c7_457 = arith.constant 7 : index
    %578 = vector.load %arg1[%c3_455, %c0_456, %c7_457] : memref<4x32x157xf32, #tpu.memory_space<vmem>>, vector<1x32x128xf32>
    %579 = vector.shape_cast %578 : vector<1x32x128xf32> to vector<32x128xf32>
    %c3_458 = arith.constant 3 : index
    %c7_459 = arith.constant 7 : index
    %580 = memref.load %arg2[%c3_458, %c7_459] : memref<4x30xf32, #tpu.memory_space<smem>>
    %581 = vector.broadcast %580 : f32 to vector<32x128xf32>
    %582 = arith.mulf %579, %581 : vector<32x128xf32>
    %583 = arith.addf %577, %582 : vector<32x128xf32>
    %c3_460 = arith.constant 3 : index
    %c0_461 = arith.constant 0 : index
    %c8_462 = arith.constant 8 : index
    %584 = vector.load %arg1[%c3_460, %c0_461, %c8_462] : memref<4x32x157xf32, #tpu.memory_space<vmem>>, vector<1x32x128xf32>
    %585 = vector.shape_cast %584 : vector<1x32x128xf32> to vector<32x128xf32>
    %c3_463 = arith.constant 3 : index
    %c8_464 = arith.constant 8 : index
    %586 = memref.load %arg2[%c3_463, %c8_464] : memref<4x30xf32, #tpu.memory_space<smem>>
    %587 = vector.broadcast %586 : f32 to vector<32x128xf32>
    %588 = arith.mulf %585, %587 : vector<32x128xf32>
    %589 = arith.addf %583, %588 : vector<32x128xf32>
    %c3_465 = arith.constant 3 : index
    %c0_466 = arith.constant 0 : index
    %c9_467 = arith.constant 9 : index
    %590 = vector.load %arg1[%c3_465, %c0_466, %c9_467] : memref<4x32x157xf32, #tpu.memory_space<vmem>>, vector<1x32x128xf32>
    %591 = vector.shape_cast %590 : vector<1x32x128xf32> to vector<32x128xf32>
    %c3_468 = arith.constant 3 : index
    %c9_469 = arith.constant 9 : index
    %592 = memref.load %arg2[%c3_468, %c9_469] : memref<4x30xf32, #tpu.memory_space<smem>>
    %593 = vector.broadcast %592 : f32 to vector<32x128xf32>
    %594 = arith.mulf %591, %593 : vector<32x128xf32>
    %595 = arith.addf %589, %594 : vector<32x128xf32>
    %c3_470 = arith.constant 3 : index
    %c0_471 = arith.constant 0 : index
    %c10_472 = arith.constant 10 : index
    %596 = vector.load %arg1[%c3_470, %c0_471, %c10_472] : memref<4x32x157xf32, #tpu.memory_space<vmem>>, vector<1x32x128xf32>
    %597 = vector.shape_cast %596 : vector<1x32x128xf32> to vector<32x128xf32>
    %c3_473 = arith.constant 3 : index
    %c10_474 = arith.constant 10 : index
    %598 = memref.load %arg2[%c3_473, %c10_474] : memref<4x30xf32, #tpu.memory_space<smem>>
    %599 = vector.broadcast %598 : f32 to vector<32x128xf32>
    %600 = arith.mulf %597, %599 : vector<32x128xf32>
    %601 = arith.addf %595, %600 : vector<32x128xf32>
    %c3_475 = arith.constant 3 : index
    %c0_476 = arith.constant 0 : index
    %c11_477 = arith.constant 11 : index
    %602 = vector.load %arg1[%c3_475, %c0_476, %c11_477] : memref<4x32x157xf32, #tpu.memory_space<vmem>>, vector<1x32x128xf32>
    %603 = vector.shape_cast %602 : vector<1x32x128xf32> to vector<32x128xf32>
    %c3_478 = arith.constant 3 : index
    %c11_479 = arith.constant 11 : index
    %604 = memref.load %arg2[%c3_478, %c11_479] : memref<4x30xf32, #tpu.memory_space<smem>>
    %605 = vector.broadcast %604 : f32 to vector<32x128xf32>
    %606 = arith.mulf %603, %605 : vector<32x128xf32>
    %607 = arith.addf %601, %606 : vector<32x128xf32>
    %c3_480 = arith.constant 3 : index
    %c0_481 = arith.constant 0 : index
    %c12_482 = arith.constant 12 : index
    %608 = vector.load %arg1[%c3_480, %c0_481, %c12_482] : memref<4x32x157xf32, #tpu.memory_space<vmem>>, vector<1x32x128xf32>
    %609 = vector.shape_cast %608 : vector<1x32x128xf32> to vector<32x128xf32>
    %c3_483 = arith.constant 3 : index
    %c12_484 = arith.constant 12 : index
    %610 = memref.load %arg2[%c3_483, %c12_484] : memref<4x30xf32, #tpu.memory_space<smem>>
    %611 = vector.broadcast %610 : f32 to vector<32x128xf32>
    %612 = arith.mulf %609, %611 : vector<32x128xf32>
    %613 = arith.addf %607, %612 : vector<32x128xf32>
    %c3_485 = arith.constant 3 : index
    %c0_486 = arith.constant 0 : index
    %c13_487 = arith.constant 13 : index
    %614 = vector.load %arg1[%c3_485, %c0_486, %c13_487] : memref<4x32x157xf32, #tpu.memory_space<vmem>>, vector<1x32x128xf32>
    %615 = vector.shape_cast %614 : vector<1x32x128xf32> to vector<32x128xf32>
    %c3_488 = arith.constant 3 : index
    %c13_489 = arith.constant 13 : index
    %616 = memref.load %arg2[%c3_488, %c13_489] : memref<4x30xf32, #tpu.memory_space<smem>>
    %617 = vector.broadcast %616 : f32 to vector<32x128xf32>
    %618 = arith.mulf %615, %617 : vector<32x128xf32>
    %619 = arith.addf %613, %618 : vector<32x128xf32>
    %c3_490 = arith.constant 3 : index
    %c0_491 = arith.constant 0 : index
    %c14_492 = arith.constant 14 : index
    %620 = vector.load %arg1[%c3_490, %c0_491, %c14_492] : memref<4x32x157xf32, #tpu.memory_space<vmem>>, vector<1x32x128xf32>
    %621 = vector.shape_cast %620 : vector<1x32x128xf32> to vector<32x128xf32>
    %c3_493 = arith.constant 3 : index
    %c14_494 = arith.constant 14 : index
    %622 = memref.load %arg2[%c3_493, %c14_494] : memref<4x30xf32, #tpu.memory_space<smem>>
    %623 = vector.broadcast %622 : f32 to vector<32x128xf32>
    %624 = arith.mulf %621, %623 : vector<32x128xf32>
    %625 = arith.addf %619, %624 : vector<32x128xf32>
    %c3_495 = arith.constant 3 : index
    %c0_496 = arith.constant 0 : index
    %c15_497 = arith.constant 15 : index
    %626 = vector.load %arg1[%c3_495, %c0_496, %c15_497] : memref<4x32x157xf32, #tpu.memory_space<vmem>>, vector<1x32x128xf32>
    %627 = vector.shape_cast %626 : vector<1x32x128xf32> to vector<32x128xf32>
    %c3_498 = arith.constant 3 : index
    %c15_499 = arith.constant 15 : index
    %628 = memref.load %arg2[%c3_498, %c15_499] : memref<4x30xf32, #tpu.memory_space<smem>>
    %629 = vector.broadcast %628 : f32 to vector<32x128xf32>
    %630 = arith.mulf %627, %629 : vector<32x128xf32>
    %631 = arith.addf %625, %630 : vector<32x128xf32>
    %c3_500 = arith.constant 3 : index
    %c0_501 = arith.constant 0 : index
    %c16_502 = arith.constant 16 : index
    %632 = vector.load %arg1[%c3_500, %c0_501, %c16_502] : memref<4x32x157xf32, #tpu.memory_space<vmem>>, vector<1x32x128xf32>
    %633 = vector.shape_cast %632 : vector<1x32x128xf32> to vector<32x128xf32>
    %c3_503 = arith.constant 3 : index
    %c16_504 = arith.constant 16 : index
    %634 = memref.load %arg2[%c3_503, %c16_504] : memref<4x30xf32, #tpu.memory_space<smem>>
    %635 = vector.broadcast %634 : f32 to vector<32x128xf32>
    %636 = arith.mulf %633, %635 : vector<32x128xf32>
    %637 = arith.addf %631, %636 : vector<32x128xf32>
    %c3_505 = arith.constant 3 : index
    %c0_506 = arith.constant 0 : index
    %c17_507 = arith.constant 17 : index
    %638 = vector.load %arg1[%c3_505, %c0_506, %c17_507] : memref<4x32x157xf32, #tpu.memory_space<vmem>>, vector<1x32x128xf32>
    %639 = vector.shape_cast %638 : vector<1x32x128xf32> to vector<32x128xf32>
    %c3_508 = arith.constant 3 : index
    %c17_509 = arith.constant 17 : index
    %640 = memref.load %arg2[%c3_508, %c17_509] : memref<4x30xf32, #tpu.memory_space<smem>>
    %641 = vector.broadcast %640 : f32 to vector<32x128xf32>
    %642 = arith.mulf %639, %641 : vector<32x128xf32>
    %643 = arith.addf %637, %642 : vector<32x128xf32>
    %c3_510 = arith.constant 3 : index
    %c0_511 = arith.constant 0 : index
    %c18_512 = arith.constant 18 : index
    %644 = vector.load %arg1[%c3_510, %c0_511, %c18_512] : memref<4x32x157xf32, #tpu.memory_space<vmem>>, vector<1x32x128xf32>
    %645 = vector.shape_cast %644 : vector<1x32x128xf32> to vector<32x128xf32>
    %c3_513 = arith.constant 3 : index
    %c18_514 = arith.constant 18 : index
    %646 = memref.load %arg2[%c3_513, %c18_514] : memref<4x30xf32, #tpu.memory_space<smem>>
    %647 = vector.broadcast %646 : f32 to vector<32x128xf32>
    %648 = arith.mulf %645, %647 : vector<32x128xf32>
    %649 = arith.addf %643, %648 : vector<32x128xf32>
    %c3_515 = arith.constant 3 : index
    %c0_516 = arith.constant 0 : index
    %c19_517 = arith.constant 19 : index
    %650 = vector.load %arg1[%c3_515, %c0_516, %c19_517] : memref<4x32x157xf32, #tpu.memory_space<vmem>>, vector<1x32x128xf32>
    %651 = vector.shape_cast %650 : vector<1x32x128xf32> to vector<32x128xf32>
    %c3_518 = arith.constant 3 : index
    %c19_519 = arith.constant 19 : index
    %652 = memref.load %arg2[%c3_518, %c19_519] : memref<4x30xf32, #tpu.memory_space<smem>>
    %653 = vector.broadcast %652 : f32 to vector<32x128xf32>
    %654 = arith.mulf %651, %653 : vector<32x128xf32>
    %655 = arith.addf %649, %654 : vector<32x128xf32>
    %c3_520 = arith.constant 3 : index
    %c0_521 = arith.constant 0 : index
    %c20_522 = arith.constant 20 : index
    %656 = vector.load %arg1[%c3_520, %c0_521, %c20_522] : memref<4x32x157xf32, #tpu.memory_space<vmem>>, vector<1x32x128xf32>
    %657 = vector.shape_cast %656 : vector<1x32x128xf32> to vector<32x128xf32>
    %c3_523 = arith.constant 3 : index
    %c20_524 = arith.constant 20 : index
    %658 = memref.load %arg2[%c3_523, %c20_524] : memref<4x30xf32, #tpu.memory_space<smem>>
    %659 = vector.broadcast %658 : f32 to vector<32x128xf32>
    %660 = arith.mulf %657, %659 : vector<32x128xf32>
    %661 = arith.addf %655, %660 : vector<32x128xf32>
    %c3_525 = arith.constant 3 : index
    %c0_526 = arith.constant 0 : index
    %c21_527 = arith.constant 21 : index
    %662 = vector.load %arg1[%c3_525, %c0_526, %c21_527] : memref<4x32x157xf32, #tpu.memory_space<vmem>>, vector<1x32x128xf32>
    %663 = vector.shape_cast %662 : vector<1x32x128xf32> to vector<32x128xf32>
    %c3_528 = arith.constant 3 : index
    %c21_529 = arith.constant 21 : index
    %664 = memref.load %arg2[%c3_528, %c21_529] : memref<4x30xf32, #tpu.memory_space<smem>>
    %665 = vector.broadcast %664 : f32 to vector<32x128xf32>
    %666 = arith.mulf %663, %665 : vector<32x128xf32>
    %667 = arith.addf %661, %666 : vector<32x128xf32>
    %c3_530 = arith.constant 3 : index
    %c0_531 = arith.constant 0 : index
    %c22_532 = arith.constant 22 : index
    %668 = vector.load %arg1[%c3_530, %c0_531, %c22_532] : memref<4x32x157xf32, #tpu.memory_space<vmem>>, vector<1x32x128xf32>
    %669 = vector.shape_cast %668 : vector<1x32x128xf32> to vector<32x128xf32>
    %c3_533 = arith.constant 3 : index
    %c22_534 = arith.constant 22 : index
    %670 = memref.load %arg2[%c3_533, %c22_534] : memref<4x30xf32, #tpu.memory_space<smem>>
    %671 = vector.broadcast %670 : f32 to vector<32x128xf32>
    %672 = arith.mulf %669, %671 : vector<32x128xf32>
    %673 = arith.addf %667, %672 : vector<32x128xf32>
    %c3_535 = arith.constant 3 : index
    %c0_536 = arith.constant 0 : index
    %c23_537 = arith.constant 23 : index
    %674 = vector.load %arg1[%c3_535, %c0_536, %c23_537] : memref<4x32x157xf32, #tpu.memory_space<vmem>>, vector<1x32x128xf32>
    %675 = vector.shape_cast %674 : vector<1x32x128xf32> to vector<32x128xf32>
    %c3_538 = arith.constant 3 : index
    %c23_539 = arith.constant 23 : index
    %676 = memref.load %arg2[%c3_538, %c23_539] : memref<4x30xf32, #tpu.memory_space<smem>>
    %677 = vector.broadcast %676 : f32 to vector<32x128xf32>
    %678 = arith.mulf %675, %677 : vector<32x128xf32>
    %679 = arith.addf %673, %678 : vector<32x128xf32>
    %c3_540 = arith.constant 3 : index
    %c0_541 = arith.constant 0 : index
    %c24_542 = arith.constant 24 : index
    %680 = vector.load %arg1[%c3_540, %c0_541, %c24_542] : memref<4x32x157xf32, #tpu.memory_space<vmem>>, vector<1x32x128xf32>
    %681 = vector.shape_cast %680 : vector<1x32x128xf32> to vector<32x128xf32>
    %c3_543 = arith.constant 3 : index
    %c24_544 = arith.constant 24 : index
    %682 = memref.load %arg2[%c3_543, %c24_544] : memref<4x30xf32, #tpu.memory_space<smem>>
    %683 = vector.broadcast %682 : f32 to vector<32x128xf32>
    %684 = arith.mulf %681, %683 : vector<32x128xf32>
    %685 = arith.addf %679, %684 : vector<32x128xf32>
    %c3_545 = arith.constant 3 : index
    %c0_546 = arith.constant 0 : index
    %c25_547 = arith.constant 25 : index
    %686 = vector.load %arg1[%c3_545, %c0_546, %c25_547] : memref<4x32x157xf32, #tpu.memory_space<vmem>>, vector<1x32x128xf32>
    %687 = vector.shape_cast %686 : vector<1x32x128xf32> to vector<32x128xf32>
    %c3_548 = arith.constant 3 : index
    %c25_549 = arith.constant 25 : index
    %688 = memref.load %arg2[%c3_548, %c25_549] : memref<4x30xf32, #tpu.memory_space<smem>>
    %689 = vector.broadcast %688 : f32 to vector<32x128xf32>
    %690 = arith.mulf %687, %689 : vector<32x128xf32>
    %691 = arith.addf %685, %690 : vector<32x128xf32>
    %c3_550 = arith.constant 3 : index
    %c0_551 = arith.constant 0 : index
    %c26_552 = arith.constant 26 : index
    %692 = vector.load %arg1[%c3_550, %c0_551, %c26_552] : memref<4x32x157xf32, #tpu.memory_space<vmem>>, vector<1x32x128xf32>
    %693 = vector.shape_cast %692 : vector<1x32x128xf32> to vector<32x128xf32>
    %c3_553 = arith.constant 3 : index
    %c26_554 = arith.constant 26 : index
    %694 = memref.load %arg2[%c3_553, %c26_554] : memref<4x30xf32, #tpu.memory_space<smem>>
    %695 = vector.broadcast %694 : f32 to vector<32x128xf32>
    %696 = arith.mulf %693, %695 : vector<32x128xf32>
    %697 = arith.addf %691, %696 : vector<32x128xf32>
    %c3_555 = arith.constant 3 : index
    %c0_556 = arith.constant 0 : index
    %c27_557 = arith.constant 27 : index
    %698 = vector.load %arg1[%c3_555, %c0_556, %c27_557] : memref<4x32x157xf32, #tpu.memory_space<vmem>>, vector<1x32x128xf32>
    %699 = vector.shape_cast %698 : vector<1x32x128xf32> to vector<32x128xf32>
    %c3_558 = arith.constant 3 : index
    %c27_559 = arith.constant 27 : index
    %700 = memref.load %arg2[%c3_558, %c27_559] : memref<4x30xf32, #tpu.memory_space<smem>>
    %701 = vector.broadcast %700 : f32 to vector<32x128xf32>
    %702 = arith.mulf %699, %701 : vector<32x128xf32>
    %703 = arith.addf %697, %702 : vector<32x128xf32>
    %c3_560 = arith.constant 3 : index
    %c0_561 = arith.constant 0 : index
    %c28_562 = arith.constant 28 : index
    %704 = vector.load %arg1[%c3_560, %c0_561, %c28_562] : memref<4x32x157xf32, #tpu.memory_space<vmem>>, vector<1x32x128xf32>
    %705 = vector.shape_cast %704 : vector<1x32x128xf32> to vector<32x128xf32>
    %c3_563 = arith.constant 3 : index
    %c28_564 = arith.constant 28 : index
    %706 = memref.load %arg2[%c3_563, %c28_564] : memref<4x30xf32, #tpu.memory_space<smem>>
    %707 = vector.broadcast %706 : f32 to vector<32x128xf32>
    %708 = arith.mulf %705, %707 : vector<32x128xf32>
    %709 = arith.addf %703, %708 : vector<32x128xf32>
    %c3_565 = arith.constant 3 : index
    %c0_566 = arith.constant 0 : index
    %c29_567 = arith.constant 29 : index
    %710 = vector.load %arg1[%c3_565, %c0_566, %c29_567] : memref<4x32x157xf32, #tpu.memory_space<vmem>>, vector<1x32x128xf32>
    %711 = vector.shape_cast %710 : vector<1x32x128xf32> to vector<32x128xf32>
    %c3_568 = arith.constant 3 : index
    %c29_569 = arith.constant 29 : index
    %712 = memref.load %arg2[%c3_568, %c29_569] : memref<4x30xf32, #tpu.memory_space<smem>>
    %713 = vector.broadcast %712 : f32 to vector<32x128xf32>
    %714 = arith.mulf %711, %713 : vector<32x128xf32>
    %715 = arith.addf %709, %714 : vector<32x128xf32>
    %716 = arith.addf %178, %357 : vector<32x128xf32>
    %717 = arith.addf %716, %536 : vector<32x128xf32>
    %718 = arith.addf %717, %715 : vector<32x128xf32>
    %c0_570 = arith.constant 0 : index
    %719 = memref.load %arg3[%c0_570] : memref<1xf32, #tpu.memory_space<smem>>
    %720 = vector.broadcast %719 : f32 to vector<32x128xf32>
    %721 = arith.addf %718, %720 : vector<32x128xf32>
    %c0_i32 = arith.constant 0 : i32
    %722 = vector.broadcast %c0_i32 : i32 to vector<32x128xi32>
    %c127_i32 = arith.constant 127 : i32
    %723 = tpu.dynamic_rotate %721 by %c127_i32 dim 1 : vector<32x128xf32>, i32 -> vector<32x128xf32>
    %724 = arith.cmpf ogt, %723, %721 : vector<32x128xf32>
    %725 = arith.select %724, %723, %721 : vector<32x128xi1>, vector<32x128xf32>
    %c1_i32 = arith.constant 1 : i32
    %726 = vector.broadcast %c1_i32 : i32 to vector<32x128xi32>
    %727 = arith.select %724, %726, %722 : vector<32x128xi1>, vector<32x128xi32>
    %c126_i32 = arith.constant 126 : i32
    %728 = tpu.dynamic_rotate %721 by %c126_i32 dim 1 : vector<32x128xf32>, i32 -> vector<32x128xf32>
    %729 = arith.cmpf ogt, %728, %725 : vector<32x128xf32>
    %730 = arith.select %729, %728, %725 : vector<32x128xi1>, vector<32x128xf32>
    %c2_i32 = arith.constant 2 : i32
    %731 = vector.broadcast %c2_i32 : i32 to vector<32x128xi32>
    %732 = arith.select %729, %731, %727 : vector<32x128xi1>, vector<32x128xi32>
    %c125_i32 = arith.constant 125 : i32
    %733 = tpu.dynamic_rotate %721 by %c125_i32 dim 1 : vector<32x128xf32>, i32 -> vector<32x128xf32>
    %734 = arith.cmpf ogt, %733, %730 : vector<32x128xf32>
    %735 = arith.select %734, %733, %730 : vector<32x128xi1>, vector<32x128xf32>
    %c3_i32 = arith.constant 3 : i32
    %736 = vector.broadcast %c3_i32 : i32 to vector<32x128xi32>
    %737 = arith.select %734, %736, %732 : vector<32x128xi1>, vector<32x128xi32>
    %738 = tpu.iota {dimensions = array<i32: 1>} : vector<32x128xi32>
    %739 = arith.addi %738, %737 : vector<32x128xi32>
    %c0_571 = arith.constant 0 : index
    %c0_572 = arith.constant 0 : index
    %740 = vector.load %arg7[%c0_571, %c0_572] : memref<32x128xi32, #tpu.memory_space<vmem>>, vector<32x128xi32>
    tpu.vector_store %arg7[%c0_571, %c0_572], %739 {strides = array<i32>} : memref<32x128xi32, #tpu.memory_space<vmem>>, vector<32x128xi32>,
    %c0_573 = arith.constant 0 : index
    %741 = memref.load %arg4[%c0_573] : memref<10xf32, #tpu.memory_space<smem>>
    %742 = vector.broadcast %741 : f32 to vector<32x128xf32>
    %743 = arith.mulf %735, %742 : vector<32x128xf32>
    %c124_i32 = arith.constant 124 : i32
    %744 = tpu.dynamic_rotate %735 by %c124_i32 dim 1 : vector<32x128xf32>, i32 -> vector<32x128xf32>
    %c1_574 = arith.constant 1 : index
    %745 = memref.load %arg4[%c1_574] : memref<10xf32, #tpu.memory_space<smem>>
    %746 = vector.broadcast %745 : f32 to vector<32x128xf32>
    %747 = arith.mulf %744, %746 : vector<32x128xf32>
    %c120_i32 = arith.constant 120 : i32
    %748 = tpu.dynamic_rotate %735 by %c120_i32 dim 1 : vector<32x128xf32>, i32 -> vector<32x128xf32>
    %c2_575 = arith.constant 2 : index
    %749 = memref.load %arg4[%c2_575] : memref<10xf32, #tpu.memory_space<smem>>
    %750 = vector.broadcast %749 : f32 to vector<32x128xf32>
    %751 = arith.mulf %748, %750 : vector<32x128xf32>
    %752 = arith.addf %743, %751 : vector<32x128xf32>
    %c116_i32 = arith.constant 116 : i32
    %753 = tpu.dynamic_rotate %735 by %c116_i32 dim 1 : vector<32x128xf32>, i32 -> vector<32x128xf32>
    %c3_576 = arith.constant 3 : index
    %754 = memref.load %arg4[%c3_576] : memref<10xf32, #tpu.memory_space<smem>>
    %755 = vector.broadcast %754 : f32 to vector<32x128xf32>
    %756 = arith.mulf %753, %755 : vector<32x128xf32>
    %757 = arith.addf %747, %756 : vector<32x128xf32>
    %c112_i32 = arith.constant 112 : i32
    %758 = tpu.dynamic_rotate %735 by %c112_i32 dim 1 : vector<32x128xf32>, i32 -> vector<32x128xf32>
    %c4_577 = arith.constant 4 : index
    %759 = memref.load %arg4[%c4_577] : memref<10xf32, #tpu.memory_space<smem>>
    %760 = vector.broadcast %759 : f32 to vector<32x128xf32>
    %761 = arith.mulf %758, %760 : vector<32x128xf32>
    %762 = arith.addf %752, %761 : vector<32x128xf32>
    %c108_i32 = arith.constant 108 : i32
    %763 = tpu.dynamic_rotate %735 by %c108_i32 dim 1 : vector<32x128xf32>, i32 -> vector<32x128xf32>
    %c5_578 = arith.constant 5 : index
    %764 = memref.load %arg4[%c5_578] : memref<10xf32, #tpu.memory_space<smem>>
    %765 = vector.broadcast %764 : f32 to vector<32x128xf32>
    %766 = arith.mulf %763, %765 : vector<32x128xf32>
    %767 = arith.addf %757, %766 : vector<32x128xf32>
    %c104_i32 = arith.constant 104 : i32
    %768 = tpu.dynamic_rotate %735 by %c104_i32 dim 1 : vector<32x128xf32>, i32 -> vector<32x128xf32>
    %c6_579 = arith.constant 6 : index
    %769 = memref.load %arg4[%c6_579] : memref<10xf32, #tpu.memory_space<smem>>
    %770 = vector.broadcast %769 : f32 to vector<32x128xf32>
    %771 = arith.mulf %768, %770 : vector<32x128xf32>
    %772 = arith.addf %762, %771 : vector<32x128xf32>
    %c100_i32 = arith.constant 100 : i32
    %773 = tpu.dynamic_rotate %735 by %c100_i32 dim 1 : vector<32x128xf32>, i32 -> vector<32x128xf32>
    %c7_580 = arith.constant 7 : index
    %774 = memref.load %arg4[%c7_580] : memref<10xf32, #tpu.memory_space<smem>>
    %775 = vector.broadcast %774 : f32 to vector<32x128xf32>
    %776 = arith.mulf %773, %775 : vector<32x128xf32>
    %777 = arith.addf %767, %776 : vector<32x128xf32>
    %c96_i32 = arith.constant 96 : i32
    %778 = tpu.dynamic_rotate %735 by %c96_i32 dim 1 : vector<32x128xf32>, i32 -> vector<32x128xf32>
    %c8_581 = arith.constant 8 : index
    %779 = memref.load %arg4[%c8_581] : memref<10xf32, #tpu.memory_space<smem>>
    %780 = vector.broadcast %779 : f32 to vector<32x128xf32>
    %781 = arith.mulf %778, %780 : vector<32x128xf32>
    %782 = arith.addf %772, %781 : vector<32x128xf32>
    %c92_i32 = arith.constant 92 : i32
    %783 = tpu.dynamic_rotate %735 by %c92_i32 dim 1 : vector<32x128xf32>, i32 -> vector<32x128xf32>
    %c9_582 = arith.constant 9 : index
    %784 = memref.load %arg4[%c9_582] : memref<10xf32, #tpu.memory_space<smem>>
    %785 = vector.broadcast %784 : f32 to vector<32x128xf32>
    %786 = arith.mulf %783, %785 : vector<32x128xf32>
    %787 = arith.addf %777, %786 : vector<32x128xf32>
    %788 = arith.addf %782, %787 : vector<32x128xf32>
    %c0_583 = arith.constant 0 : index
    %789 = memref.load %arg5[%c0_583] : memref<1xf32, #tpu.memory_space<smem>>
    %790 = vector.broadcast %789 : f32 to vector<32x128xf32>
    %791 = arith.addf %788, %790 : vector<32x128xf32>
    %c0_584 = arith.constant 0 : index
    %c0_585 = arith.constant 0 : index
    %792 = vector.load %arg6[%c0_584, %c0_585] : memref<32x128xf32, #tpu.memory_space<vmem>>, vector<32x128xf32>
    tpu.vector_store %arg6[%c0_584, %c0_585], %791 {strides = array<i32>} : memref<32x128xf32, #tpu.memory_space<vmem>>, vector<32x128xf32>,
    return
  }
  func.func @transform_0(%arg0: i32) -> (i32, i32, i32) {
    %c0_i32 = arith.constant 0 : i32
    %c0_i32_0 = arith.constant 0 : i32
    %c0_i32_1 = arith.constant 0 : i32
    return %c0_i32, %arg0, %c0_i32_0 : i32, i32, i32
  }
  func.func @transform_1(%arg0: i32) -> (i32, i32) {
    %c0_i32 = arith.constant 0 : i32
    %c0_i32_0 = arith.constant 0 : i32
    %c0_i32_1 = arith.constant 0 : i32
    return %c0_i32, %c0_i32_0 : i32, i32
  }
  func.func @transform_2(%arg0: i32) -> i32 {
    %c0_i32 = arith.constant 0 : i32
    %c0_i32_0 = arith.constant 0 : i32
    return %c0_i32 : i32
  }
  func.func @transform_3(%arg0: i32) -> i32 {
    %c0_i32 = arith.constant 0 : i32
    %c0_i32_0 = arith.constant 0 : i32
    return %c0_i32 : i32
  }
  func.func @transform_4(%arg0: i32) -> i32 {
    %c0_i32 = arith.constant 0 : i32
    %c0_i32_0 = arith.constant 0 : i32
    return %c0_i32 : i32
  }
  func.func @transform_5(%arg0: i32) -> (i32, i32) {
    %c0_i32 = arith.constant 0 : i32
    %c0_i32_0 = arith.constant 0 : i32
    return %arg0, %c0_i32 : i32, i32
  }
  func.func @transform_6(%arg0: i32) -> (i32, i32) {
    %c0_i32 = arith.constant 0 : i32
    %c0_i32_0 = arith.constant 0 : i32
    return %arg0, %c0_i32 : i32, i32
  }
}

</mosaic_0001>

<bundles_post_ra>
// kernel: tpu_custom_call.1
= control target key start
LH: loop header
LB: loop body
LE: loop exit
PB: predicated region body
PF: predicated region fallthrough
CT: control target
= control target key end

     0   :  { %14 = vsyncpa [#allocation5], 0  ;;  %s11757_s0 = inlined_call_operand.hbm [shape: f32[4,32,157], index: 0, kind: input, shape index: {}]   ;;  %s11758_s1 = inlined_call_operand.vmem [shape: f32[4,30], index: 1, kind: input, shape index: {}]   ;;  %s11759_s2 = inlined_call_operand.<no memory space> [shape: f32[1], index: 2, kind: input, shape index: {}]   ;;  %s11760_s3 = inlined_call_operand.vmem [shape: f32[10], index: 3, kind: input, shape index: {}]   ;;  %s11761_s4 = inlined_call_operand.<no memory space> [shape: f32[1], index: 4, kind: input, shape index: {}]   ;;  %s11762_s5 = inlined_call_operand.hbm [shape: f32[32,128], index: 5, kind: output, shape index: {0}]   ;;  %s11763_s6 = inlined_call_operand.hbm [shape: s32[32,128], index: 6, kind: output, shape index: {1}]  }
   0x1   :  { %15 = vsyncpa [#allocation7], 0 }
   0x2   :  { %16 = vsyncpa [#allocation10], 0 }
   0x3   :  { %17 = vsyncpa [#allocation6], 0 }
   0x4   :  { %18 = vsyncpa [#allocation13], 0  ;;  %s23_s23 = sshll.u32 %s11757_s0, 4  ;;  %s6139_s24 = smov [#allocation4]   ;;  %s24_s23 = int_to_ptr.hbm [resolvable:$true] %s23_s23 }
   0x5   :  { %s25_s25 = sshll.u32 %s6139_s24, 4  ;;  %s37_s28 = sshll.u32 %s11758_s1, 4  ;;  %s26_s25 = int_to_ptr.vmem [resolvable:$true] %s25_s25  ;;  %s38_s28 = int_to_ptr.vmem [resolvable:$true] %s37_s28 }
   0x6   :  { %s6140_s29 = smov 256   ;;  %s6141_s30 = smov 16  }
   0x7   :  { %31 = dma.hbm_to_vmem [thread:$0]  %s24_s23, 4096, %s26_s25, [#allocation5], %s6140_s29, %s6140_s29, %s6141_s30  }
   0x8   :  { %s6142_s7 = smov [#allocation8]   ;;  %s48_s10 = sshll.u32 %s11760_s3, 4  ;;  %s49_s10 = int_to_ptr.vmem [resolvable:$true] %s48_s10 }
   0x9   :  { %40 = dma.vmem_to_smem %s38_s28, 64, %s6142_s7, [#allocation7]  }
   0xa   :  { %s6143_s0 = smov [#allocation9]  }
   0xb   :  { %51 = dma.vmem_to_smem %s49_s10, 16, %s6143_s0, [#allocation10]  }
   0xc   :  { %6129 = dma.done.wait [#allocation5], 4096  }
   0xd   :  { %6130 = vsyncadd [#allocation5], 4294963200 }
   0xe   :  { %6131 = dma.done.wait [#allocation7], 64  }
   0xf   :  { %6132 = vsyncadd [#allocation7], 4294967232 }
  0x10   :  { %6133 = dma.done.wait [#allocation10], 16  }
  0x11   :  { %6134 = vsyncadd [#allocation10], 4294967280 }
  0x12   :  { %66 = sfence }
  0x13   :  { %s5812_s1 = sld [smem:[#allocation8 + $0x1]]  ;;  %v6224_v0 = vld [vmem:[#allocation4 + $0x10] sm:$0xff]  ;;  %v6226_v1 = vld [vmem:[#allocation4] sm:$0xff]  ;;  %s6144_s3 = smov 127   ;;  %v6235_v7 = vld [vmem:[#allocation4 + $0x18] sm:$0xff]  ;;  %vm11795_vm0 = vcmask 1039360  }
  0x14   :  { %v6228_v2 = vld [vmem:[#allocation4 + $0x20] sm:$0xff]  ;;  %v6237_v8 = vld [vmem:[#allocation4 + $0x8] sm:$0xff]  ;;  %s5813_s11 = sld [smem:[#allocation8 + $0x2]]  ;;  %v6247_v13 = vld [vmem:[#allocation4 + $0x38] sm:$0xff]  ;;  %s6145_s12 = smov 126   ;;  %vm11796_vm1 = vcmask 1031168  }
  0x15   :  { %v6240_v9 = vld [vmem:[#allocation4 + $0x28] sm:$0xff]  ;;  %v6249_v14 = vld [vmem:[#allocation4 + $0x30] sm:$0xff]  ;;  %s5814_s13 = sld [smem:[#allocation8 + $0x3]]  ;;  %s6146_s14 = smov 125   ;;  %vm11791_vm2 = vcmask 1022976   ;;  %vm11790_vm3 = vcmask 1014784  }
  0x16   :  { %s5815_s15 = sld [smem:[#allocation8 + $0x4]]  ;;  %s6147_s16 = smov 124   ;;  %vm11788_vm4 = vcmask 1006592   ;;  %vm11787_vm5 = vcmask 998400   ;;  %vm11789_vm6 = vcmask 990208   ;;  %vm11785_vm7 = vcmask 982016  }
  0x17   :  { %s5816_s17 = sld [smem:[#allocation8 + $0x5]]  ;;  %s6148_s18 = smov 123   ;;  %vm11784_vm8 = vcmask 973824   ;;  %vm542_vm9 = vcmask 965632   ;;  %vm589_vm10 = vcmask 957440   ;;  %vm636_vm11 = vcmask 949248  }
  0x18   :  { %s5817_s19 = sld [smem:[#allocation8 + $0x6]]  ;;  %s6149_s20 = smov 122   ;;  %vm683_vm12 = vcmask 941056   ;;  %vm730_vm13 = vcmask 932864   ;;  %vm11801_vm14 = vcmask 908288   ;;  %vm11786_vm15 = vcmask 900096  }
  0x19   :  { %v86_v3 = vstv %s5812_s1  ;;  %s5818_s21 = sld [smem:[#allocation8 + $0x7]]  ;;  %s6150_s22 = smov 121  }
  0x1a   :  { %v89_v4 = vmul.f32 %v86_v3, %v6224_v0  ;;  %v87_v5 = vmul.f32 %v86_v3, %v6226_v1  ;;  %v91_v6 = vmul.f32 %v86_v3, %v6228_v2  ;;  %v90_v10 = vmul.f32 %v86_v3, %v6235_v7  ;;  %s5819_s23 = sld [smem:[#allocation8 + $0x8]]  ;;  %s6151_s24 = smov 120  }
  0x1b   :  { %v88_v11 = vmul.f32 %v86_v3, %v6237_v8  ;;  %v92_v12 = vmul.f32 %v86_v3, %v6240_v9  ;;  %v94_v15 = vmul.f32 %v86_v3, %v6247_v13  ;;  %v93_v16 = vmul.f32 %v86_v3, %v6249_v14  ;;  %s5820_s25 = sld [smem:[#allocation8 + $0x9]]  ;;  %s6152_s26 = smov 119  }
  0x1c   :  { %107 = vrot.lane.b32.xlu1 %v89_v4, %s6144_s3  ;;  %103 = vrot.lane.b32.xlu0 %v87_v5, %s6144_s3  ;;  %v133_v17 = vstv %s5813_s11  ;;  %v180_v25 = vstv %s5814_s13  ;;  %s5821_s27 = sld [smem:[#allocation8 + $0xa]]  ;;  %s6153_s28 = smov 118  }
  0x1d   :  { %111 = vrot.lane.b32.xlu2 %v91_v6, %s6144_s3  ;;  %v134_v18 = vmul.f32 %v133_v17, %v6226_v1  ;;  %v136_v19 = vmul.f32 %v133_v17, %v6224_v0  ;;  %v135_v20 = vmul.f32 %v133_v17, %v6237_v8  ;;  %v137_v21 = vmul.f32 %v133_v17, %v6235_v7  ;;  %s5822_s29 = sld [smem:[#allocation8 + $0xb]]  ;;  %s6154_s30 = smov 117  }
  0x1e   :  { %v139_v22 = vmul.f32 %v133_v17, %v6240_v9  ;;  %v138_v23 = vmul.f32 %v133_v17, %v6228_v2  ;;  %v140_v24 = vmul.f32 %v133_v17, %v6249_v14  ;;  %v181_v26 = vmul.f32 %v180_v25, %v6226_v1  ;;  %s5823_s7 = sld [smem:[#allocation8 + $0xc]]  ;;  %s6155_s8 = smov 116  }
  0x1f   :  { %v141_v27 = vmul.f32 %v133_v17, %v6247_v13  ;;  %v182_v28 = vmul.f32 %v180_v25, %v6237_v8  ;;  %v184_v29 = vmul.f32 %v180_v25, %v6235_v7  ;;  %v183_v30 = vmul.f32 %v180_v25, %v6224_v0  ;;  %s5824_s9 = sld [smem:[#allocation8 + $0xd]]  ;;  %s6156_s10 = smov 115  }
  0x20   :  { %v185_v31 = vmul.f32 %v180_v25, %v6228_v2  ;;  %v187_v32 = vmul.f32 %v180_v25, %v6249_v14  ;;  %v186_v33 = vmul.f32 %v180_v25, %v6240_v9  ;;  %v188_v34 = vmul.f32 %v180_v25, %v6247_v13  ;;  %s5825_s0 = sld [smem:[#allocation8 + $0xe]]  ;;  %s6157_s1 = smov 114  }
  0x21   :  { %v227_v35 = vstv %s5815_s15  ;;  %v274_v44 = vstv %s5816_s17  ;;  %v321_v53 = vstv %s5817_s19  ;;  %s5826_s11 = sld [smem:[#allocation8 + $0xf]]  ;;  %s6158_s13 = smov 113  }
  0x22   :  { %v229_v36 = vmul.f32 %v227_v35, %v6237_v8  ;;  %v228_v37 = vmul.f32 %v227_v35, %v6226_v1  ;;  %v230_v38 = vmul.f32 %v227_v35, %v6224_v0  ;;  %v232_v39 = vmul.f32 %v227_v35, %v6228_v2  ;;  %s5827_s15 = sld [smem:[#allocation8 + $0x10]]  ;;  %s6159_s17 = smov 112  }
  0x23   :  { %v231_v40 = vmul.f32 %v227_v35, %v6235_v7  ;;  %v233_v41 = vmul.f32 %v227_v35, %v6240_v9  ;;  %v235_v42 = vmul.f32 %v227_v35, %v6247_v13  ;;  %v234_v43 = vmul.f32 %v227_v35, %v6249_v14  ;;  %s5828_s19 = sld [smem:[#allocation8 + $0x11]] }
  0x24   :  { %109 = vrot.lane.b32.xlu1 %v90_v10, %s6144_s3  ;;  %105 = vrot.lane.b32.xlu0 %v88_v11, %s6144_s3  ;;  %v275_v45 = vmul.f32 %v274_v44, %v6226_v1  ;;  %v277_v46 = vmul.f32 %v274_v44, %v6224_v0  ;;  %v276_v47 = vmul.f32 %v274_v44, %v6237_v8  ;;  %v368_v10 = vstv %s5818_s21  ;;  %s6160_s21 = smov 111  }
  0x25   :  { %113 = vrot.lane.b32.xlu2 %v92_v12, %s6144_s3  ;;  %v278_v48 = vmul.f32 %v274_v44, %v6235_v7  ;;  %v280_v50 = vmul.f32 %v274_v44, %v6240_v9  ;;  %v279_v51 = vmul.f32 %v274_v44, %v6228_v2  ;;  %v281_v52 = vmul.f32 %v274_v44, %v6249_v14 }
  0x26   :  { %v322_v55 = vmul.f32 %v321_v53, %v6226_v1  ;;  %v282_v56 = vmul.f32 %v274_v44, %v6247_v13  ;;  %v323_v57 = vmul.f32 %v321_v53, %v6237_v8  ;;  %v325_v59 = vmul.f32 %v321_v53, %v6235_v7 }
  0x27   :  { %v324_v60 = vmul.f32 %v321_v53, %v6224_v0  ;;  %v326_v61 = vmul.f32 %v321_v53, %v6228_v2  ;;  %v328_v4 = vmul.f32 %v321_v53, %v6249_v14  ;;  %v327_v5 = vmul.f32 %v321_v53, %v6240_v9 }
  0x28   :  { %v329_v6 = vmul.f32 %v321_v53, %v6247_v13  ;;  %v369_v17 = vmul.f32 %v368_v10, %v6226_v1  ;;  %v462_v44 = vstv %s5820_s25  ;;  %s6161_s25 = smov 110  }
  0x2c   :  { %117 = vrot.lane.b32.xlu1 %v94_v15, %s6144_s3  ;;  %115 = vrot.lane.b32.xlu0 %v93_v16, %s6144_s3  ;;  %v370_v16 = vmul.f32 %v368_v10, %v6237_v8 }
  0x2d   :  { %150 = vrot.lane.b32.xlu2 %v134_v18, %s6145_s12  ;;  %v371_v18 = vmul.f32 %v368_v10, %v6224_v0 }
  0x34   :  { %154 = vrot.lane.b32.xlu1 %v136_v19, %s6145_s12  ;;  %152 = vrot.lane.b32.xlu0 %v135_v20, %s6145_s12 }
  0x35   :  { %156 = vrot.lane.b32.xlu2 %v137_v21, %s6145_s12 }
  0x3c   :  { %160 = vrot.lane.b32.xlu1 %v139_v22, %s6145_s12  ;;  %158 = vrot.lane.b32.xlu0 %v138_v23, %s6145_s12  ;;  %v373_v22 = vmul.f32 %v368_v10, %v6228_v2  ;;  %v372_v23 = vmul.f32 %v368_v10, %v6235_v7 }
  0x3d   :  { %162 = vrot.lane.b32.xlu2 %v140_v24, %s6145_s12  ;;  %v374_v24 = vmul.f32 %v368_v10, %v6240_v9 }
  0x44   :  { %197 = vrot.lane.b32.xlu1 %v181_v26, %s6146_s14  ;;  %164 = vrot.lane.b32.xlu0 %v141_v27, %s6145_s12 }
  0x45   :  { %199 = vrot.lane.b32.xlu2 %v182_v28, %s6146_s14  ;;  %v376_v28 = vmul.f32 %v368_v10, %v6247_v13 }
  0x4c   :  { %203 = vrot.lane.b32.xlu1 %v184_v29, %s6146_s14  ;;  %201 = vrot.lane.b32.xlu0 %v183_v30, %s6146_s14  ;;  %v375_v29 = vmul.f32 %v368_v10, %v6249_v14  ;;  %v415_v30 = vstv %s5819_s23  ;;  %v470_v10 = vmul.f32 %v462_v44, %v6247_v13  ;;  %s5829_s23 = sld [smem:[#allocation8 + $0x12]] }
  0x4d   :  { %205 = vrot.lane.b32.xlu2 %v185_v31, %s6146_s14  ;;  %v416_v31 = vmul.f32 %v415_v30, %v6226_v1  ;;  %v418_v35 = vmul.f32 %v415_v30, %v6224_v0 }
  0x54   :  { %209 = vrot.lane.b32.xlu1 %v187_v32, %s6146_s14  ;;  %207 = vrot.lane.b32.xlu0 %v186_v33, %s6146_s14 }
  0x55   :  { %211 = vrot.lane.b32.xlu2 %v188_v34, %s6146_s14 }
  0x5c   :  { %246 = vrot.lane.b32.xlu1 %v229_v36, %s6147_s16  ;;  %244 = vrot.lane.b32.xlu0 %v228_v37, %s6147_s16  ;;  %v417_v36 = vmul.f32 %v415_v30, %v6237_v8  ;;  %v419_v37 = vmul.f32 %v415_v30, %v6235_v7 }
  0x5d   :  { %248 = vrot.lane.b32.xlu2 %v230_v38, %s6147_s16 }
  0x64   :  { %252 = vrot.lane.b32.xlu1 %v232_v39, %s6147_s16  ;;  %250 = vrot.lane.b32.xlu0 %v231_v40, %s6147_s16 }
  0x65   :  { %254 = vrot.lane.b32.xlu2 %v233_v41, %s6147_s16  ;;  %v421_v41 = vmul.f32 %v415_v30, %v6240_v9 }
  0x6c   :  { %258 = vrot.lane.b32.xlu1 %v235_v42, %s6147_s16  ;;  %256 = vrot.lane.b32.xlu0 %v234_v43, %s6147_s16  ;;  %v420_v42 = vmul.f32 %v415_v30, %v6228_v2  ;;  %v422_v43 = vmul.f32 %v415_v30, %v6249_v14 }
  0x6d   :  { %291 = vrot.lane.b32.xlu2 %v275_v45, %s6148_s18 }
  0x74   :  { %295 = vrot.lane.b32.xlu1 %v277_v46, %s6148_s18  ;;  %293 = vrot.lane.b32.xlu0 %v276_v47, %s6148_s18 }
  0x75   :  { %297 = vrot.lane.b32.xlu2 %v278_v48, %s6148_s18  ;;  %v463_v48 = vmul.f32 %v462_v44, %v6226_v1 }
  0x77   :  { %v6312_v49 = vpop.permute.xlu2 %111 }
  0x78   :  { %11803 = vst [vmem:[#allocation19_spill] sm:$0xff] %v6312_v49 }
  0x7c   :  { %301 = vrot.lane.b32.xlu1 %v280_v50, %s6148_s18  ;;  %299 = vrot.lane.b32.xlu0 %v279_v51, %s6148_s18  ;;  %v423_v50 = vmul.f32 %v415_v30, %v6247_v13  ;;  %v464_v51 = vmul.f32 %v462_v44, %v6237_v8 }
  0x7d   :  { %303 = vrot.lane.b32.xlu2 %v281_v52, %s6148_s18 }
  0x7f   :  { %v6320_v54 = vpop.permute.xlu2 %113 }
  0x80   :  { %11804 = vst [vmem:[#allocation20_spill] sm:$0xff] %v6320_v54 }
  0x84   :  { %338 = vrot.lane.b32.xlu1 %v322_v55, %s6149_s20  ;;  %305 = vrot.lane.b32.xlu0 %v282_v56, %s6148_s18  ;;  %v466_v56 = vmul.f32 %v462_v44, %v6235_v7 }
  0x85   :  { %340 = vrot.lane.b32.xlu2 %v323_v57, %s6149_s20  ;;  %v465_v57 = vmul.f32 %v462_v44, %v6224_v0 }
  0x87   :  { %v6328_v58 = vpop.permute.xlu2 %150 }
  0x88   :  { %11805 = vst [vmem:[#allocation21_spill] sm:$0xff] %v6328_v58 }
  0x8c   :  { %344 = vrot.lane.b32.xlu1 %v325_v59, %s6149_s20  ;;  %342 = vrot.lane.b32.xlu0 %v324_v60, %s6149_s20  ;;  %v467_v59 = vmul.f32 %v462_v44, %v6228_v2 }
  0x8d   :  { %346 = vrot.lane.b32.xlu2 %v326_v61, %s6149_s20 }
  0x8e   :  { %v6336_v62 = vpop.permute.xlu1 %107  ;;  %v6338_v63 = vpop.permute.xlu0 %103 }
  0x8f   :  { %11806 = vst [vmem:[#allocation22_spill] sm:$0xff] %v6336_v62  ;;  %v6340_v3 = vpop.permute.xlu2 %156 }
  0x90   :  { %11807 = vst [vmem:[#allocation23_spill] sm:$0xff] %v6338_v63 }
  0x91   :  { %11808 = vst [vmem:[#allocation24_spill] sm:$0xff] %v6340_v3 }
  0x94   :  { %350 = vrot.lane.b32.xlu1 %v328_v4, %s6149_s20  ;;  %348 = vrot.lane.b32.xlu0 %v327_v5, %s6149_s20  ;;  %v469_v5 = vmul.f32 %v462_v44, %v6249_v14 }
  0x95   :  { %352 = vrot.lane.b32.xlu2 %v329_v6, %s6149_s20  ;;  %v468_v6 = vmul.f32 %v462_v44, %v6240_v9 }
  0x96   :  { %v6348_v11 = vpop.permute.xlu1 %109  ;;  %v6350_v12 = vpop.permute.xlu0 %105 }
  0x97   :  { %11809 = vst [vmem:[#allocation25_spill] sm:$0xff] %v6348_v11  ;;  %v6352_v15 = vpop.permute.xlu2 %162 }
  0x98   :  { %11810 = vst [vmem:[#allocation26_spill] sm:$0xff] %v6350_v12 }
  0x99   :  { %11811 = vst [vmem:[#allocation27_spill] sm:$0xff] %v6352_v15 }
  0x9c   :  { %387 = vrot.lane.b32.xlu1 %v370_v16, %s6150_s22  ;;  %385 = vrot.lane.b32.xlu0 %v369_v17, %s6150_s22  ;;  %v509_v16 = vstv %s5821_s27  ;;  %s5830_s27 = sld [smem:[#allocation8 + $0x13]] }
  0x9d   :  { %389 = vrot.lane.b32.xlu2 %v371_v18, %s6150_s22  ;;  %v517_v44 = vmul.f32 %v509_v16, %v6247_v13 }
  0x9e   :  { %v6360_v19 = vpop.permute.xlu1 %117  ;;  %v6362_v20 = vpop.permute.xlu0 %115 }
  0x9f   :  { %11812 = vst [vmem:[#allocation28_spill] sm:$0xff] %v6360_v19  ;;  %v6364_v21 = vpop.permute.xlu2 %199 }
  0xa0   :  { %11813 = vst [vmem:[#allocation29_spill] sm:$0xff] %v6362_v20 }
  0xa1   :  { %11814 = vst [vmem:[#allocation30_spill] sm:$0xff] %v6364_v21 }
  0xa4   :  { %393 = vrot.lane.b32.xlu1 %v373_v22, %s6150_s22  ;;  %391 = vrot.lane.b32.xlu0 %v372_v23, %s6150_s22  ;;  %v511_v23 = vmul.f32 %v509_v16, %v6237_v8 }
  0xa5   :  { %395 = vrot.lane.b32.xlu2 %v374_v24, %s6150_s22  ;;  %v510_v24 = vmul.f32 %v509_v16, %v6226_v1 }
  0xa6   :  { %v6372_v25 = vpop.permute.xlu1 %154  ;;  %v6374_v26 = vpop.permute.xlu0 %152 }
  0xa7   :  { %11815 = vst [vmem:[#allocation31_spill] sm:$0xff] %v6372_v25  ;;  %v6376_v27 = vpop.permute.xlu2 %205 }
  0xa8   :  { %11816 = vst [vmem:[#allocation32_spill] sm:$0xff] %v6374_v26 }
  0xa9   :  { %11817 = vst [vmem:[#allocation33_spill] sm:$0xff] %v6376_v27 }
  0xac   :  { %399 = vrot.lane.b32.xlu1 %v376_v28, %s6150_s22  ;;  %397 = vrot.lane.b32.xlu0 %v375_v29, %s6150_s22  ;;  %v512_v28 = vmul.f32 %v509_v16, %v6224_v0 }
  0xad   :  { %432 = vrot.lane.b32.xlu2 %v416_v31, %s6151_s24 }
  0xae   :  { %v6384_v32 = vpop.permute.xlu1 %160  ;;  %v6386_v33 = vpop.permute.xlu0 %158 }
  0xaf   :  { %11818 = vst [vmem:[#allocation34_spill] sm:$0xff] %v6384_v32  ;;  %v6388_v34 = vpop.permute.xlu2 %211 }
  0xb0   :  { %11819 = vst [vmem:[#allocation35_spill] sm:$0xff] %v6386_v33 }
  0xb1   :  { %11820 = vst [vmem:[#allocation36_spill] sm:$0xff] %v6388_v34 }
  0xb4   :  { %436 = vrot.lane.b32.xlu1 %v418_v35, %s6151_s24  ;;  %434 = vrot.lane.b32.xlu0 %v417_v36, %s6151_s24  ;;  %v514_v35 = vmul.f32 %v509_v16, %v6228_v2  ;;  %v513_v36 = vmul.f32 %v509_v16, %v6235_v7 }
  0xb5   :  { %438 = vrot.lane.b32.xlu2 %v419_v37, %s6151_s24  ;;  %v515_v37 = vmul.f32 %v509_v16, %v6240_v9 }
  0xb6   :  { %v6396_v38 = vpop.permute.xlu1 %197  ;;  %v6398_v39 = vpop.permute.xlu0 %164 }
  0xb7   :  { %11821 = vst [vmem:[#allocation37_spill] sm:$0xff] %v6396_v38  ;;  %v6400_v40 = vpop.permute.xlu2 %248 }
  0xb8   :  { %11822 = vst [vmem:[#allocation38_spill] sm:$0xff] %v6398_v39 }
  0xb9   :  { %11823 = vst [vmem:[#allocation39_spill] sm:$0xff] %v6400_v40 }
  0xbc   :  { %442 = vrot.lane.b32.xlu1 %v421_v41, %s6151_s24  ;;  %440 = vrot.lane.b32.xlu0 %v420_v42, %s6151_s24 }
  0xbd   :  { %444 = vrot.lane.b32.xlu2 %v422_v43, %s6151_s24 }
  0xbe   :  { %v6408_v45 = vpop.permute.xlu1 %203  ;;  %v6410_v46 = vpop.permute.xlu0 %201 }
  0xbf   :  { %11824 = vst [vmem:[#allocation40_spill] sm:$0xff] %v6408_v45  ;;  %v6412_v47 = vpop.permute.xlu2 %254 }
  0xc0   :  { %11825 = vst [vmem:[#allocation41_spill] sm:$0xff] %v6410_v46 }
  0xc1   :  { %11826 = vst [vmem:[#allocation42_spill] sm:$0xff] %v6412_v47 }
  0xc4   :  { %479 = vrot.lane.b32.xlu1 %v463_v48, %s6152_s26  ;;  %446 = vrot.lane.b32.xlu0 %v423_v50, %s6151_s24  ;;  %v516_v48 = vmul.f32 %v509_v16, %v6249_v14  ;;  %v556_v50 = vstv %s5822_s29  ;;  %s11780_s29 = smov 109  }
  0xc5   :  { %481 = vrot.lane.b32.xlu2 %v464_v51, %s6152_s26  ;;  %v557_v51 = vmul.f32 %v556_v50, %v6226_v1 }
  0xc6   :  { %v6420_v52 = vpop.permute.xlu1 %209  ;;  %v6422_v53 = vpop.permute.xlu0 %207 }
  0xc7   :  { %11827 = vst [vmem:[#allocation43_spill] sm:$0xff] %v6420_v52  ;;  %v6424_v55 = vpop.permute.xlu2 %291 }
  0xc8   :  { %11828 = vst [vmem:[#allocation44_spill] sm:$0xff] %v6422_v53 }
  0xc9   :  { %11829 = vst [vmem:[#allocation45_spill] sm:$0xff] %v6424_v55 }
  0xcc   :  { %485 = vrot.lane.b32.xlu1 %v466_v56, %s6152_s26  ;;  %483 = vrot.lane.b32.xlu0 %v465_v57, %s6152_s26 }
  0xcd   :  { %487 = vrot.lane.b32.xlu2 %v467_v59, %s6152_s26 }
  0xce   :  { %v6432_v60 = vpop.permute.xlu1 %246  ;;  %v6434_v61 = vpop.permute.xlu0 %244 }
  0xcf   :  { %11830 = vst [vmem:[#allocation46_spill] sm:$0xff] %v6432_v60  ;;  %v6436_v4 = vpop.permute.xlu2 %297 }
  0xd0   :  { %11831 = vst [vmem:[#allocation47_spill] sm:$0xff] %v6434_v61 }
  0xd1   :  { %11832 = vst [vmem:[#allocation48_spill] sm:$0xff] %v6436_v4 }
  0xd4   :  { %491 = vrot.lane.b32.xlu1 %v469_v5, %s6152_s26  ;;  %489 = vrot.lane.b32.xlu0 %v468_v6, %s6152_s26  ;;  %v559_v5 = vmul.f32 %v556_v50, %v6224_v0  ;;  %v558_v6 = vmul.f32 %v556_v50, %v6237_v8 }
  0xd5   :  { %493 = vrot.lane.b32.xlu2 %v470_v10, %s6152_s26  ;;  %v560_v10 = vmul.f32 %v556_v50, %v6235_v7 }
  0xd6   :  { %v6444_v17 = vpop.permute.xlu1 %252  ;;  %v6446_v18 = vpop.permute.xlu0 %250 }
  0xd7   :  { %11833 = vst [vmem:[#allocation49_spill] sm:$0xff] %v6444_v17  ;;  %v6448_v22 = vpop.permute.xlu2 %303 }
  0xd8   :  { %11834 = vst [vmem:[#allocation50_spill] sm:$0xff] %v6446_v18 }
  0xd9   :  { %11835 = vst [vmem:[#allocation51_spill] sm:$0xff] %v6448_v22 }
  0xdc   :  { %528 = vrot.lane.b32.xlu1 %v511_v23, %s6153_s28  ;;  %526 = vrot.lane.b32.xlu0 %v510_v24, %s6153_s28 }
  0xdd   :  { %530 = vrot.lane.b32.xlu2 %v512_v28, %s6153_s28  ;;  %v562_v28 = vmul.f32 %v556_v50, %v6240_v9 }
  0xde   :  { %v6456_v29 = vpop.permute.xlu1 %258  ;;  %v6458_v30 = vpop.permute.xlu0 %256 }
  0xdf   :  { %11836 = vst [vmem:[#allocation52_spill] sm:$0xff] %v6456_v29  ;;  %v6460_v31 = vpop.permute.xlu2 %340 }
  0xe0   :  { %11837 = vst [vmem:[#allocation53_spill] sm:$0xff] %v6458_v30 }
  0xe1   :  { %11838 = vst [vmem:[#allocation54_spill] sm:$0xff] %v6460_v31 }
  0xe4   :  { %534 = vrot.lane.b32.xlu1 %v514_v35, %s6153_s28  ;;  %532 = vrot.lane.b32.xlu0 %v513_v36, %s6153_s28  ;;  %v561_v35 = vmul.f32 %v556_v50, %v6228_v2  ;;  %v563_v36 = vmul.f32 %v556_v50, %v6249_v14 }
  0xe5   :  { %536 = vrot.lane.b32.xlu2 %v515_v37, %s6153_s28  ;;  %v603_v37 = vstv %s5823_s7  ;;  %s5831_s7 = sld [smem:[#allocation8 + $0x14]] }
  0xe6   :  { %v6468_v41 = vpop.permute.xlu1 %295  ;;  %v6470_v42 = vpop.permute.xlu0 %293 }
  0xe7   :  { %11839 = vst [vmem:[#allocation55_spill] sm:$0xff] %v6468_v41  ;;  %v6472_v43 = vpop.permute.xlu2 %346 }
  0xe8   :  { %11840 = vst [vmem:[#allocation56_spill] sm:$0xff] %v6470_v42 }
  0xe9   :  { %11841 = vst [vmem:[#allocation57_spill] sm:$0xff] %v6472_v43  ;;  %v609_v43 = vmul.f32 %v603_v37, %v6240_v9 }
  0xec   :  { %540 = vrot.lane.b32.xlu1 %v517_v44, %s6153_s28  ;;  %538 = vrot.lane.b32.xlu0 %v516_v48, %s6153_s28 }
  0xed   :  { %573 = vrot.lane.b32.xlu2 %v557_v51, %s6154_s30 }
  0xee   :  { %v6480_v56 = vpop.permute.xlu1 %301  ;;  %v6482_v57 = vpop.permute.xlu0 %299 }
  0xef   :  { %11842 = vst [vmem:[#allocation58_spill] sm:$0xff] %v6480_v56  ;;  %v6484_v59 = vpop.permute.xlu2 %352 }
  0xf0   :  { %11843 = vst [vmem:[#allocation59_spill] sm:$0xff] %v6482_v57 }
  0xf1   :  { %11844 = vst [vmem:[#allocation60_spill] sm:$0xff] %v6484_v59 }
  0xf4   :  { %577 = vrot.lane.b32.xlu1 %v559_v5, %s6154_s30  ;;  %575 = vrot.lane.b32.xlu0 %v558_v6, %s6154_s30  ;;  %v604_v5 = vmul.f32 %v603_v37, %v6226_v1  ;;  %v564_v6 = vmul.f32 %v556_v50, %v6247_v13  ;;  %v608_v50 = vmul.f32 %v603_v37, %v6228_v2 }
  0xf5   :  { %579 = vrot.lane.b32.xlu2 %v560_v10, %s6154_s30  ;;  %v605_v10 = vmul.f32 %v603_v37, %v6237_v8 }
  0xf6   :  { %v6492_v16 = vpop.permute.xlu1 %338  ;;  %v6494_v23 = vpop.permute.xlu0 %305 }
  0xf7   :  { %11845 = vst [vmem:[#allocation61_spill] sm:$0xff] %v6492_v16  ;;  %v6496_v24 = vpop.permute.xlu2 %389 }
  0xf8   :  { %11846 = vst [vmem:[#allocation62_spill] sm:$0xff] %v6494_v23 }
  0xf9   :  { %11847 = vst [vmem:[#allocation63_spill] sm:$0xff] %v6496_v24  ;;  %v607_v24 = vmul.f32 %v603_v37, %v6235_v7 }
  0xfc   :  { %583 = vrot.lane.b32.xlu1 %v562_v28, %s6154_s30  ;;  %581 = vrot.lane.b32.xlu0 %v561_v35, %s6154_s30 }
  0xfd   :  { %585 = vrot.lane.b32.xlu2 %v563_v36, %s6154_s30 }
  0xfe   :  { %v6504_v44 = vpop.permute.xlu1 %344  ;;  %v6506_v48 = vpop.permute.xlu0 %342 }
  0xff   :  { %11848 = vst [vmem:[#allocation64_spill] sm:$0xff] %v6504_v44  ;;  %v6508_v51 = vpop.permute.xlu2 %395 }
 0x100   :  { %11849 = vst [vmem:[#allocation65_spill] sm:$0xff] %v6506_v48 }
 0x101   :  { %11850 = vst [vmem:[#allocation66_spill] sm:$0xff] %v6508_v51  ;;  %v606_v51 = vmul.f32 %v603_v37, %v6224_v0 }
 0x104   :  { %620 = vrot.lane.b32.xlu1 %v604_v5, %s6155_s8  ;;  %587 = vrot.lane.b32.xlu0 %v564_v6, %s6154_s30 }
 0x105   :  { %622 = vrot.lane.b32.xlu2 %v605_v10, %s6155_s8 }
 0x106   :  { %v6516_v28 = vpop.permute.xlu1 %350  ;;  %v6518_v35 = vpop.permute.xlu0 %348 }
 0x107   :  { %11851 = vst [vmem:[#allocation67_spill] sm:$0xff] %v6516_v28  ;;  %v6520_v36 = vpop.permute.xlu2 %432 }
 0x108   :  { %11852 = vst [vmem:[#allocation68_spill] sm:$0xff] %v6518_v35  ;;  %v611_v35 = vmul.f32 %v603_v37, %v6247_v13 }
 0x109   :  { %11853 = vst [vmem:[#allocation69_spill] sm:$0xff] %v6520_v36  ;;  %v610_v36 = vmul.f32 %v603_v37, %v6249_v14 }
 0x10c   :  { %626 = vrot.lane.b32.xlu1 %v607_v24, %s6155_s8  ;;  %624 = vrot.lane.b32.xlu0 %v606_v51, %s6155_s8  ;;  %v650_v24 = vstv %s5824_s9  ;;  %s11776_s9 = smov 108  }
 0x10d   :  { %628 = vrot.lane.b32.xlu2 %v608_v50, %s6155_s8  ;;  %v653_v28 = vmul.f32 %v650_v24, %v6224_v0 }
 0x10e   :  { %v6528_v5 = vpop.permute.xlu1 %387  ;;  %v6530_v6 = vpop.permute.xlu0 %385 }
 0x10f   :  { %11854 = vst [vmem:[#allocation70_spill] sm:$0xff] %v6528_v5  ;;  %v6532_v10 = vpop.permute.xlu2 %438  ;;  %v651_v5 = vmul.f32 %v650_v24, %v6226_v1 }
 0x110   :  { %11855 = vst [vmem:[#allocation71_spill] sm:$0xff] %v6530_v6 }
 0x111   :  { %11856 = vst [vmem:[#allocation72_spill] sm:$0xff] %v6532_v10  ;;  %v652_v10 = vmul.f32 %v650_v24, %v6237_v8 }
 0x114   :  { %632 = vrot.lane.b32.xlu1 %v610_v36, %s6155_s8  ;;  %630 = vrot.lane.b32.xlu0 %v609_v43, %s6155_s8  ;;  %v655_v36 = vmul.f32 %v650_v24, %v6228_v2 }
 0x115   :  { %634 = vrot.lane.b32.xlu2 %v611_v35, %s6155_s8 }
 0x116   :  { %v6540_v51 = vpop.permute.xlu1 %393  ;;  %v6542_v50 = vpop.permute.xlu0 %391 }
 0x117   :  { %11857 = vst [vmem:[#allocation73_spill] sm:$0xff] %v6540_v51  ;;  %v6544_v6 = vpop.permute.xlu2 %444 }
 0x118   :  { %11858 = vst [vmem:[#allocation74_spill] sm:$0xff] %v6542_v50  ;;  %v656_v50 = vmul.f32 %v650_v24, %v6240_v9 }
 0x119   :  { %11859 = vst [vmem:[#allocation75_spill] sm:$0xff] %v6544_v6  ;;  %v654_v6 = vmul.f32 %v650_v24, %v6235_v7 }
 0x11c   :  { %669 = vrot.lane.b32.xlu1 %v652_v10, %s6156_s10  ;;  %667 = vrot.lane.b32.xlu0 %v651_v5, %s6156_s10 }
 0x11d   :  { %671 = vrot.lane.b32.xlu2 %v653_v28, %s6156_s10 }
 0x11e   :  { %v6552_v43 = vpop.permute.xlu1 %399  ;;  %v6554_v37 = vpop.permute.xlu0 %397 }
 0x11f   :  { %11860 = vst [vmem:[#allocation76_spill] sm:$0xff] %v6552_v43  ;;  %v6556_v35 = vpop.permute.xlu2 %481  ;;  %v697_v43 = vstv %s5825_s0  ;;  %s5832_s0 = sld [smem:[#allocation8 + $0x15]] }
 0x120   :  { %11861 = vst [vmem:[#allocation77_spill] sm:$0xff] %v6554_v37  ;;  %v657_v37 = vmul.f32 %v650_v24, %v6249_v14  ;;  %v698_v51 = vmul.f32 %v697_v43, %v6226_v1 }
 0x121   :  { %11862 = vst [vmem:[#allocation78_spill] sm:$0xff] %v6556_v35  ;;  %v658_v35 = vmul.f32 %v650_v24, %v6247_v13  ;;  %v699_v24 = vmul.f32 %v697_v43, %v6237_v8 }
 0x124   :  { %675 = vrot.lane.b32.xlu1 %v655_v36, %s6156_s10  ;;  %673 = vrot.lane.b32.xlu0 %v654_v6, %s6156_s10 }
 0x125   :  { %677 = vrot.lane.b32.xlu2 %v656_v50, %s6156_s10 }
 0x126   :  { %v6564_v28 = vpop.permute.xlu1 %436  ;;  %v6566_v5 = vpop.permute.xlu0 %434 }
 0x127   :  { %11863 = vst [vmem:[#allocation79_spill] sm:$0xff] %v6564_v28  ;;  %v6568_v10 = vpop.permute.xlu2 %487  ;;  %v701_v28 = vmul.f32 %v697_v43, %v6235_v7 }
 0x128   :  { %11864 = vst [vmem:[#allocation80_spill] sm:$0xff] %v6566_v5 }
 0x129   :  { %11865 = vst [vmem:[#allocation81_spill] sm:$0xff] %v6568_v10  ;;  %v700_v10 = vmul.f32 %v697_v43, %v6224_v0 }
 0x12c   :  { %681 = vrot.lane.b32.xlu1 %v658_v35, %s6156_s10  ;;  %679 = vrot.lane.b32.xlu0 %v657_v37, %s6156_s10 }
 0x12d   :  { %714 = vrot.lane.b32.xlu2 %v698_v51, %s6157_s1 }
 0x12e   :  { %v6576_v6 = vpop.permute.xlu1 %442  ;;  %v6578_v50 = vpop.permute.xlu0 %440 }
 0x12f   :  { %11866 = vst [vmem:[#allocation82_spill] sm:$0xff] %v6576_v6  ;;  %v6580_v36 = vpop.permute.xlu2 %493  ;;  %v704_v6 = vmul.f32 %v697_v43, %v6249_v14 }
 0x130   :  { %11867 = vst [vmem:[#allocation83_spill] sm:$0xff] %v6578_v50  ;;  %v702_v50 = vmul.f32 %v697_v43, %v6228_v2 }
 0x131   :  { %11868 = vst [vmem:[#allocation84_spill] sm:$0xff] %v6580_v36  ;;  %v703_v36 = vmul.f32 %v697_v43, %v6240_v9 }
 0x134   :  { %718 = vrot.lane.b32.xlu1 %v700_v10, %s6157_s1  ;;  %716 = vrot.lane.b32.xlu0 %v699_v24, %s6157_s1  ;;  %v744_v10 = vstv %s5826_s11  ;;  %s11778_s11 = smov 107  }
 0x135   :  { %720 = vrot.lane.b32.xlu2 %v701_v28, %s6157_s1  ;;  %v746_v5 = vmul.f32 %v744_v10, %v6237_v8 }
 0x136   :  { %v6588_v51 = vpop.permute.xlu1 %479  ;;  %v6590_v37 = vpop.permute.xlu0 %446 }
 0x137   :  { %11869 = vst [vmem:[#allocation85_spill] sm:$0xff] %v6588_v51  ;;  %v6592_v35 = vpop.permute.xlu2 %530  ;;  %v705_v51 = vmul.f32 %v697_v43, %v6247_v13  ;;  %v749_v43 = vmul.f32 %v744_v10, %v6228_v2 }
 0x138   :  { %11870 = vst [vmem:[#allocation86_spill] sm:$0xff] %v6590_v37 }
 0x139   :  { %11871 = vst [vmem:[#allocation87_spill] sm:$0xff] %v6592_v35  ;;  %v745_v35 = vmul.f32 %v744_v10, %v6226_v1 }
 0x13c   :  { %724 = vrot.lane.b32.xlu1 %v703_v36, %s6157_s1  ;;  %722 = vrot.lane.b32.xlu0 %v702_v50, %s6157_s1 }
 0x13d   :  { %726 = vrot.lane.b32.xlu2 %v704_v6, %s6157_s1 }
 0x13e   :  { %v6600_v28 = vpop.permute.xlu1 %485  ;;  %v6602_v24 = vpop.permute.xlu0 %483 }
 0x13f   :  { %11872 = vst [vmem:[#allocation88_spill] sm:$0xff] %v6600_v28  ;;  %v6604_v37 = vpop.permute.xlu2 %536 }
 0x140   :  { %11873 = vst [vmem:[#allocation89_spill] sm:$0xff] %v6602_v24  ;;  %v747_v24 = vmul.f32 %v744_v10, %v6224_v0 }
 0x141   :  { %11874 = vst [vmem:[#allocation90_spill] sm:$0xff] %v6604_v37  ;;  %v748_v37 = vmul.f32 %v744_v10, %v6235_v7 }
 0x144   :  { %761 = vrot.lane.b32.xlu1 %v745_v35, %s6158_s13  ;;  %728 = vrot.lane.b32.xlu0 %v705_v51, %s6157_s1 }
 0x145   :  { %763 = vrot.lane.b32.xlu2 %v746_v5, %s6158_s13 }
 0x146   :  { %v6612_v6 = vpop.permute.xlu1 %491  ;;  %v6614_v50 = vpop.permute.xlu0 %489 }
 0x147   :  { %11875 = vst [vmem:[#allocation91_spill] sm:$0xff] %v6612_v6  ;;  %v6616_v36 = vpop.permute.xlu2 %573  ;;  %v752_v6 = vmul.f32 %v744_v10, %v6247_v13 }
 0x148   :  { %11876 = vst [vmem:[#allocation92_spill] sm:$0xff] %v6614_v50  ;;  %v750_v50 = vmul.f32 %v744_v10, %v6240_v9 }
 0x149   :  { %11877 = vst [vmem:[#allocation93_spill] sm:$0xff] %v6616_v36  ;;  %v751_v36 = vmul.f32 %v744_v10, %v6249_v14 }
 0x14c   :  { %767 = vrot.lane.b32.xlu1 %v748_v37, %s6158_s13  ;;  %765 = vrot.lane.b32.xlu0 %v747_v24, %s6158_s13  ;;  %v791_v37 = vstv %s5827_s15  ;;  %s5833_s15 = sld [smem:[#allocation8 + $0x16]] }
 0x14d   :  { %769 = vrot.lane.b32.xlu2 %v749_v43, %s6158_s13  ;;  %v794_v28 = vmul.f32 %v791_v37, %v6224_v0 }
 0x14e   :  { %v6624_v5 = vpop.permute.xlu1 %528  ;;  %v6626_v51 = vpop.permute.xlu0 %526 }
 0x14f   :  { %11878 = vst [vmem:[#allocation94_spill] sm:$0xff] %v6624_v5  ;;  %v6628_v35 = vpop.permute.xlu2 %579  ;;  %v792_v5 = vmul.f32 %v791_v37, %v6226_v1 }
 0x150   :  { %11879 = vst [vmem:[#allocation95_spill] sm:$0xff] %v6626_v51 }
 0x151   :  { %11880 = vst [vmem:[#allocation96_spill] sm:$0xff] %v6628_v35  ;;  %v793_v35 = vmul.f32 %v791_v37, %v6237_v8 }
 0x154   :  { %773 = vrot.lane.b32.xlu1 %v751_v36, %s6158_s13  ;;  %771 = vrot.lane.b32.xlu0 %v750_v50, %s6158_s13  ;;  %v796_v36 = vmul.f32 %v791_v37, %v6228_v2 }
 0x155   :  { %775 = vrot.lane.b32.xlu2 %v752_v6, %s6158_s13 }
 0x156   :  { %v6636_v24 = vpop.permute.xlu1 %534  ;;  %v6638_v43 = vpop.permute.xlu0 %532 }
 0x157   :  { %11881 = vst [vmem:[#allocation97_spill] sm:$0xff] %v6636_v24  ;;  %v6640_v51 = vpop.permute.xlu2 %585 }
 0x158   :  { %11882 = vst [vmem:[#allocation98_spill] sm:$0xff] %v6638_v43  ;;  %v797_v43 = vmul.f32 %v791_v37, %v6240_v9 }
 0x159   :  { %11883 = vst [vmem:[#allocation99_spill] sm:$0xff] %v6640_v51  ;;  %v795_v51 = vmul.f32 %v791_v37, %v6235_v7 }
 0x15c   :  { %810 = vrot.lane.b32.xlu1 %v793_v35, %s6159_s17  ;;  %808 = vrot.lane.b32.xlu0 %v792_v5, %s6159_s17 }
 0x15d   :  { %812 = vrot.lane.b32.xlu2 %v794_v28, %s6159_s17 }
 0x15e   :  { %v6648_v10 = vpop.permute.xlu1 %540  ;;  %v6650_v6 = vpop.permute.xlu0 %538 }
 0x15f   :  { %11884 = vst [vmem:[#allocation100_spill] sm:$0xff] %v6648_v10  ;;  %v6652_v50 = vpop.permute.xlu2 %622  ;;  %v838_v10 = vstv %s5828_s19  ;;  %s11774_s19 = smov 106  }
 0x160   :  { %11885 = vst [vmem:[#allocation101_spill] sm:$0xff] %v6650_v6  ;;  %v798_v6 = vmul.f32 %v791_v37, %v6249_v14  ;;  %v839_v24 = vmul.f32 %v838_v10, %v6226_v1 }
 0x161   :  { %11886 = vst [vmem:[#allocation102_spill] sm:$0xff] %v6652_v50  ;;  %v799_v50 = vmul.f32 %v791_v37, %v6247_v13  ;;  %v840_v37 = vmul.f32 %v838_v10, %v6237_v8 }
 0x164   :  { %816 = vrot.lane.b32.xlu1 %v796_v36, %s6159_s17  ;;  %814 = vrot.lane.b32.xlu0 %v795_v51, %s6159_s17 }
 0x165   :  { %818 = vrot.lane.b32.xlu2 %v797_v43, %s6159_s17 }
 0x166   :  { %v6660_v28 = vpop.permute.xlu1 %577  ;;  %v6662_v5 = vpop.permute.xlu0 %575 }
 0x167   :  { %11887 = vst [vmem:[#allocation103_spill] sm:$0xff] %v6660_v28  ;;  %v6664_v35 = vpop.permute.xlu2 %628  ;;  %v842_v28 = vmul.f32 %v838_v10, %v6235_v7 }
 0x168   :  { %11888 = vst [vmem:[#allocation104_spill] sm:$0xff] %v6662_v5 }
 0x169   :  { %11889 = vst [vmem:[#allocation105_spill] sm:$0xff] %v6664_v35  ;;  %v841_v35 = vmul.f32 %v838_v10, %v6224_v0 }
 0x16c   :  { %822 = vrot.lane.b32.xlu1 %v799_v50, %s6159_s17  ;;  %820 = vrot.lane.b32.xlu0 %v798_v6, %s6159_s17 }
 0x16d   :  { %855 = vrot.lane.b32.xlu2 %v839_v24, %s6160_s21 }
 0x16e   :  { %v6672_v51 = vpop.permute.xlu1 %583  ;;  %v6674_v43 = vpop.permute.xlu0 %581 }
 0x16f   :  { %11890 = vst [vmem:[#allocation106_spill] sm:$0xff] %v6672_v51  ;;  %v6676_v36 = vpop.permute.xlu2 %634  ;;  %v845_v51 = vmul.f32 %v838_v10, %v6249_v14 }
 0x170   :  { %11891 = vst [vmem:[#allocation107_spill] sm:$0xff] %v6674_v43  ;;  %v843_v43 = vmul.f32 %v838_v10, %v6228_v2 }
 0x171   :  { %11892 = vst [vmem:[#allocation108_spill] sm:$0xff] %v6676_v36  ;;  %v844_v36 = vmul.f32 %v838_v10, %v6240_v9 }
 0x174   :  { %859 = vrot.lane.b32.xlu1 %v841_v35, %s6160_s21  ;;  %857 = vrot.lane.b32.xlu0 %v840_v37, %s6160_s21  ;;  %v885_v35 = vstv %s5829_s23  ;;  %s5834_s23 = sld [smem:[#allocation8 + $0x17]] }
 0x175   :  { %861 = vrot.lane.b32.xlu2 %v842_v28, %s6160_s21  ;;  %v887_v5 = vmul.f32 %v885_v35, %v6237_v8 }
 0x176   :  { %v6684_v24 = vpop.permute.xlu1 %620  ;;  %v6686_v6 = vpop.permute.xlu0 %587 }
 0x177   :  { %11893 = vst [vmem:[#allocation109_spill] sm:$0xff] %v6684_v24  ;;  %v6688_v50 = vpop.permute.xlu2 %671  ;;  %v846_v24 = vmul.f32 %v838_v10, %v6247_v13  ;;  %v890_v10 = vmul.f32 %v885_v35, %v6228_v2 }
 0x178   :  { %11894 = vst [vmem:[#allocation110_spill] sm:$0xff] %v6686_v6 }
 0x179   :  { %11895 = vst [vmem:[#allocation111_spill] sm:$0xff] %v6688_v50  ;;  %v886_v50 = vmul.f32 %v885_v35, %v6226_v1 }
 0x17c   :  { %865 = vrot.lane.b32.xlu1 %v844_v36, %s6160_s21  ;;  %863 = vrot.lane.b32.xlu0 %v843_v43, %s6160_s21 }
 0x17d   :  { %867 = vrot.lane.b32.xlu2 %v845_v51, %s6160_s21 }
 0x17e   :  { %v6696_v28 = vpop.permute.xlu1 %626  ;;  %v6698_v37 = vpop.permute.xlu0 %624 }
 0x17f   :  { %11896 = vst [vmem:[#allocation112_spill] sm:$0xff] %v6696_v28  ;;  %v6700_v6 = vpop.permute.xlu2 %677 }
 0x180   :  { %11897 = vst [vmem:[#allocation113_spill] sm:$0xff] %v6698_v37  ;;  %v888_v37 = vmul.f32 %v885_v35, %v6224_v0 }
 0x181   :  { %11898 = vst [vmem:[#allocation114_spill] sm:$0xff] %v6700_v6  ;;  %v889_v6 = vmul.f32 %v885_v35, %v6235_v7 }
 0x184   :  { %902 = vrot.lane.b32.xlu1 %v886_v50, %s6161_s25  ;;  %869 = vrot.lane.b32.xlu0 %v846_v24, %s6160_s21 }
 0x185   :  { %904 = vrot.lane.b32.xlu2 %v887_v5, %s6161_s25 }
 0x186   :  { %v6708_v51 = vpop.permute.xlu1 %632  ;;  %v6710_v43 = vpop.permute.xlu0 %630 }
 0x187   :  { %11899 = vst [vmem:[#allocation115_spill] sm:$0xff] %v6708_v51  ;;  %v6712_v36 = vpop.permute.xlu2 %714  ;;  %v893_v51 = vmul.f32 %v885_v35, %v6247_v13 }
 0x188   :  { %11900 = vst [vmem:[#allocation116_spill] sm:$0xff] %v6710_v43  ;;  %v891_v43 = vmul.f32 %v885_v35, %v6240_v9 }
 0x189   :  { %11901 = vst [vmem:[#allocation117_spill] sm:$0xff] %v6712_v36  ;;  %v892_v36 = vmul.f32 %v885_v35, %v6249_v14 }
 0x18c   :  { %908 = vrot.lane.b32.xlu1 %v889_v6, %s6161_s25  ;;  %906 = vrot.lane.b32.xlu0 %v888_v37, %s6161_s25  ;;  %v932_v6 = vstv %s5830_s27  ;;  %s11770_s27 = smov 105  }
 0x18d   :  { %910 = vrot.lane.b32.xlu2 %v890_v10, %s6161_s25  ;;  %v935_v28 = vmul.f32 %v932_v6, %v6224_v0 }
 0x18e   :  { %v6720_v5 = vpop.permute.xlu1 %669  ;;  %v6722_v24 = vpop.permute.xlu0 %667 }
 0x18f   :  { %11902 = vst [vmem:[#allocation118_spill] sm:$0xff] %v6720_v5  ;;  %v6724_v50 = vpop.permute.xlu2 %720  ;;  %v933_v5 = vmul.f32 %v932_v6, %v6226_v1 }
 0x190   :  { %11903 = vst [vmem:[#allocation119_spill] sm:$0xff] %v6722_v24 }
 0x191   :  { %11904 = vst [vmem:[#allocation120_spill] sm:$0xff] %v6724_v50  ;;  %v934_v50 = vmul.f32 %v932_v6, %v6237_v8 }
 0x194   :  { %914 = vrot.lane.b32.xlu1 %v892_v36, %s6161_s25  ;;  %912 = vrot.lane.b32.xlu0 %v891_v43, %s6161_s25  ;;  %v937_v36 = vmul.f32 %v932_v6, %v6228_v2 }
 0x195   :  { %916 = vrot.lane.b32.xlu2 %v893_v51, %s6161_s25 }
 0x196   :  { %v6732_v37 = vpop.permute.xlu1 %675  ;;  %v6734_v10 = vpop.permute.xlu0 %673 }
 0x197   :  { %11905 = vst [vmem:[#allocation121_spill] sm:$0xff] %v6732_v37  ;;  %v6736_v24 = vpop.permute.xlu2 %726  ;;  %v938_v37 = vmul.f32 %v932_v6, %v6240_v9 }
 0x198   :  { %11906 = vst [vmem:[#allocation122_spill] sm:$0xff] %v6734_v10 }
 0x199   :  { %11907 = vst [vmem:[#allocation123_spill] sm:$0xff] %v6736_v24  ;;  %v936_v24 = vmul.f32 %v932_v6, %v6235_v7 }
 0x19c   :  { %951 = vrot.lane.b32.xlu1 %v934_v50, %s11780_s29  ;;  %949 = vrot.lane.b32.xlu0 %v933_v5, %s11780_s29 }
 0x19d   :  { %953 = vrot.lane.b32.xlu2 %v935_v28, %s11780_s29 }
 0x19e   :  { %v6744_v35 = vpop.permute.xlu1 %681  ;;  %v6746_v51 = vpop.permute.xlu0 %679 }
 0x19f   :  { %11908 = vst [vmem:[#allocation124_spill] sm:$0xff] %v6744_v35  ;;  %v6748_v43 = vpop.permute.xlu2 %763  ;;  %v979_v35 = vstv %s5831_s7  ;;  %s5835_s7 = sld [smem:[#allocation8 + $0x18]] }
 0x1a0   :  { %11909 = vst [vmem:[#allocation125_spill] sm:$0xff] %v6746_v51  ;;  %v939_v51 = vmul.f32 %v932_v6, %v6249_v14  ;;  %v980_v10 = vmul.f32 %v979_v35, %v6226_v1 }
 0x1a1   :  { %11910 = vst [vmem:[#allocation126_spill] sm:$0xff] %v6748_v43  ;;  %v940_v43 = vmul.f32 %v932_v6, %v6247_v13  ;;  %v981_v6 = vmul.f32 %v979_v35, %v6237_v8 }
 0x1a4   :  { %957 = vrot.lane.b32.xlu1 %v937_v36, %s11780_s29  ;;  %955 = vrot.lane.b32.xlu0 %v936_v24, %s11780_s29 }
 0x1a5   :  { %959 = vrot.lane.b32.xlu2 %v938_v37, %s11780_s29 }
 0x1a6   :  { %v6756_v28 = vpop.permute.xlu1 %718  ;;  %v6758_v5 = vpop.permute.xlu0 %716 }
 0x1a7   :  { %11911 = vst [vmem:[#allocation127_spill] sm:$0xff] %v6756_v28  ;;  %v6760_v50 = vpop.permute.xlu2 %769  ;;  %v983_v28 = vmul.f32 %v979_v35, %v6235_v7 }
 0x1a8   :  { %11912 = vst [vmem:[#allocation128_spill] sm:$0xff] %v6758_v5 }
 0x1a9   :  { %11913 = vst [vmem:[#allocation129_spill] sm:$0xff] %v6760_v50  ;;  %v982_v50 = vmul.f32 %v979_v35, %v6224_v0  ;;  %v984_v0 = vmul.f32 %v979_v35, %v6228_v2 }
 0x1ac   :  { %963 = vrot.lane.b32.xlu1 %v940_v43, %s11780_s29  ;;  %961 = vrot.lane.b32.xlu0 %v939_v51, %s11780_s29 }
 0x1ad   :  { %996 = vrot.lane.b32.xlu2 %v980_v10, %s11776_s9 }
 0x1ae   :  { %v6768_v24 = vpop.permute.xlu1 %724  ;;  %v6770_v37 = vpop.permute.xlu0 %722 }
 0x1af   :  { %11914 = vst [vmem:[#allocation130_spill] sm:$0xff] %v6768_v24  ;;  %v6772_v36 = vpop.permute.xlu2 %775  ;;  %v1120_v24 = vstv %s5834_s23  ;;  %s11764_s23 = smov 103  }
 0x1b0   :  { %11915 = vst [vmem:[#allocation131_spill] sm:$0xff] %v6770_v37  ;;  %v986_v37 = vmul.f32 %v979_v35, %v6249_v14 }
 0x1b1   :  { %11916 = vst [vmem:[#allocation132_spill] sm:$0xff] %v6772_v36  ;;  %v985_v36 = vmul.f32 %v979_v35, %v6240_v9  ;;  %v987_v9 = vmul.f32 %v979_v35, %v6247_v13 }
 0x1b4   :  { %1000 = vrot.lane.b32.xlu1 %v982_v50, %s11776_s9  ;;  %998 = vrot.lane.b32.xlu0 %v981_v6, %s11776_s9  ;;  %v1026_v50 = vstv %s5832_s0  ;;  %s11772_s0 = smov 104  }
 0x1b5   :  { %1002 = vrot.lane.b32.xlu2 %v983_v28, %s11776_s9  ;;  %v1028_v2 = vmul.f32 %v1026_v50, %v6237_v8  ;;  %v6814_v8 = vld [vmem:[#allocation4 + $0x20] sm:$0xff] }
 0x1b6   :  { %v6780_v10 = vpop.permute.xlu1 %761  ;;  %v6782_v51 = vpop.permute.xlu0 %728 }
 0x1b7   :  { %11917 = vst [vmem:[#allocation133_spill] sm:$0xff] %v6780_v10  ;;  %v6784_v43 = vpop.permute.xlu2 %812 }
 0x1b8   :  { %11918 = vst [vmem:[#allocation134_spill] sm:$0xff] %v6782_v51 }
 0x1b9   :  { %11919 = vst [vmem:[#allocation135_spill] sm:$0xff] %v6784_v43  ;;  %v1027_v43 = vmul.f32 %v1026_v50, %v6226_v1  ;;  %v6811_v1 = vld [vmem:[#allocation4 + $0x10] sm:$0xff] }
 0x1ba   :  { %v1029_v35 = vmul.f32 %v6811_v1, %v1026_v50 }
 0x1bc   :  { %1006 = vrot.lane.b32.xlu1 %v985_v36, %s11776_s9  ;;  %1004 = vrot.lane.b32.xlu0 %v984_v0, %s11776_s9 }
 0x1bd   :  { %1008 = vrot.lane.b32.xlu2 %v986_v37, %s11776_s9 }
 0x1be   :  { %v6792_v28 = vpop.permute.xlu1 %767  ;;  %v6794_v6 = vpop.permute.xlu0 %765 }
 0x1bf   :  { %11920 = vst [vmem:[#allocation136_spill] sm:$0xff] %v6792_v28  ;;  %v6796_v51 = vpop.permute.xlu2 %818 }
 0x1c0   :  { %11921 = vst [vmem:[#allocation137_spill] sm:$0xff] %v6794_v6  ;;  %v1034_v6 = vmul.f32 %v1026_v50, %v6247_v13 }
 0x1c1   :  { %11922 = vst [vmem:[#allocation138_spill] sm:$0xff] %v6796_v51  ;;  %v1030_v51 = vmul.f32 %v1026_v50, %v6235_v7 }
 0x1c4   :  { %1043 = vrot.lane.b32.xlu1 %v1027_v43, %s11778_s11  ;;  %1010 = vrot.lane.b32.xlu0 %v987_v9, %s11776_s9  ;;  %v1031_v43 = vmul.f32 %v6814_v8, %v1026_v50 }
 0x1c5   :  { %1045 = vrot.lane.b32.xlu2 %v1028_v2, %s11778_s11 }
 0x1c6   :  { %v6804_v37 = vpop.permute.xlu1 %773  ;;  %v6806_v36 = vpop.permute.xlu0 %771 }
 0x1c7   :  { %11923 = vst [vmem:[#allocation139_spill] sm:$0xff] %v6804_v37  ;;  %v6808_v0 = vpop.permute.xlu2 %855 }
 0x1c8   :  { %11924 = vst [vmem:[#allocation140_spill] sm:$0xff] %v6806_v36  ;;  %v6827_v36 = vld [vmem:[#allocation4 + $0x28] sm:$0xff] }
 0x1c9   :  { %11925 = vst [vmem:[#allocation141_spill] sm:$0xff] %v6808_v0  ;;  %v1033_v0 = vmul.f32 %v1026_v50, %v6249_v14  ;;  %v1032_v37 = vmul.f32 %v6827_v36, %v1026_v50  ;;  %v6840_v14 = vld [vmem:[#allocation4 + $0x8] sm:$0xff] }
 0x1cc   :  { %1049 = vrot.lane.b32.xlu1 %v1030_v51, %s11778_s11  ;;  %1047 = vrot.lane.b32.xlu0 %v1029_v35, %s11778_s11  ;;  %v1073_v51 = vstv %s5833_s15  ;;  %s5836_s15 = sld [smem:[#allocation8 + $0x19]] }
 0x1cd   :  { %1051 = vrot.lane.b32.xlu2 %v1031_v43, %s11778_s11  ;;  %v1076_v50 = vmul.f32 %v6811_v1, %v1073_v51  ;;  %v1079_v28 = vmul.f32 %v6827_v36, %v1073_v51 }
 0x1ce   :  { %v6820_v9 = vpop.permute.xlu1 %810  ;;  %v6822_v2 = vpop.permute.xlu0 %808 }
 0x1cf   :  { %11926 = vst [vmem:[#allocation142_spill] sm:$0xff] %v6820_v9  ;;  %v6824_v7 = vpop.permute.xlu2 %861  ;;  %v6843_v9 = vld [vmem:[#allocation4] sm:$0xff] }
 0x1d0   :  { %11927 = vst [vmem:[#allocation143_spill] sm:$0xff] %v6822_v2  ;;  %v1075_v2 = vmul.f32 %v6840_v14, %v1073_v51  ;;  %v1074_v13 = vmul.f32 %v6843_v9, %v1073_v51 }
 0x1d1   :  { %11928 = vst [vmem:[#allocation144_spill] sm:$0xff] %v6824_v7 }
 0x1d4   :  { %1055 = vrot.lane.b32.xlu1 %v1033_v0, %s11778_s11  ;;  %1053 = vrot.lane.b32.xlu0 %v1032_v37, %s11778_s11 }
 0x1d5   :  { %1057 = vrot.lane.b32.xlu2 %v1034_v6, %s11778_s11 }
 0x1d6   :  { %v6834_v35 = vpop.permute.xlu1 %816  ;;  %v6836_v43 = vpop.permute.xlu0 %814 }
 0x1d7   :  { %11929 = vst [vmem:[#allocation145_spill] sm:$0xff] %v6834_v35  ;;  %v6838_v7 = vpop.permute.xlu2 %867  ;;  %v6857_v35 = vld [vmem:[#allocation4 + $0x18] sm:$0xff] }
 0x1d8   :  { %11930 = vst [vmem:[#allocation146_spill] sm:$0xff] %v6836_v43  ;;  %v1077_v43 = vmul.f32 %v6857_v35, %v1073_v51 }
 0x1d9   :  { %11931 = vst [vmem:[#allocation147_spill] sm:$0xff] %v6838_v7  ;;  %v1078_v7 = vmul.f32 %v6814_v8, %v1073_v51 }
 0x1dc   :  { %1092 = vrot.lane.b32.xlu1 %v1075_v2, %s11774_s19  ;;  %1090 = vrot.lane.b32.xlu0 %v1074_v13, %s11774_s19 }
 0x1dd   :  { %1094 = vrot.lane.b32.xlu2 %v1076_v50, %s11774_s19 }
 0x1de   :  { %v6850_v6 = vpop.permute.xlu1 %822  ;;  %v6852_v37 = vpop.permute.xlu0 %820 }
 0x1df   :  { %11932 = vst [vmem:[#allocation148_spill] sm:$0xff] %v6850_v6  ;;  %v6854_v0 = vpop.permute.xlu2 %904  ;;  %v6873_v6 = vld [vmem:[#allocation4 + $0x30] sm:$0xff] }
 0x1e0   :  { %11933 = vst [vmem:[#allocation149_spill] sm:$0xff] %v6852_v37  ;;  %v1080_v10 = vmul.f32 %v6873_v6, %v1073_v51 }
 0x1e1   :  { %11934 = vst [vmem:[#allocation150_spill] sm:$0xff] %v6854_v0  ;;  %v6870_v0 = vld [vmem:[#allocation4 + $0x38] sm:$0xff] }
 0x1e2   :  { %v1081_v37 = vmul.f32 %v6870_v0, %v1073_v51  ;;  %v1122_v51 = vmul.f32 %v6840_v14, %v1120_v24 }
 0x1e4   :  { %1098 = vrot.lane.b32.xlu1 %v1078_v7, %s11774_s19  ;;  %1096 = vrot.lane.b32.xlu0 %v1077_v43, %s11774_s19  ;;  %v1121_v7 = vmul.f32 %v6843_v9, %v1120_v24 }
 0x1e5   :  { %1100 = vrot.lane.b32.xlu2 %v1079_v28, %s11774_s19 }
 0x1e6   :  { %v6864_v2 = vpop.permute.xlu1 %859  ;;  %v6866_v13 = vpop.permute.xlu0 %857 }
 0x1e7   :  { %11935 = vst [vmem:[#allocation151_spill] sm:$0xff] %v6864_v2  ;;  %v6868_v50 = vpop.permute.xlu2 %910  ;;  %v1124_v2 = vmul.f32 %v6857_v35, %v1120_v24 }
 0x1e8   :  { %11936 = vst [vmem:[#allocation152_spill] sm:$0xff] %v6866_v13  ;;  %v1123_v13 = vmul.f32 %v6811_v1, %v1120_v24 }
 0x1e9   :  { %11937 = vst [vmem:[#allocation153_spill] sm:$0xff] %v6868_v50 }
 0x1ec   :  { %1104 = vrot.lane.b32.xlu1 %v1081_v37, %s11774_s19  ;;  %1102 = vrot.lane.b32.xlu0 %v1080_v10, %s11774_s19 }
 0x1ed   :  { %1137 = vrot.lane.b32.xlu2 %v1121_v7, %s11770_s27 }
 0x1ee   :  { %v6880_v28 = vpop.permute.xlu1 %865  ;;  %v6882_v43 = vpop.permute.xlu0 %863 }
 0x1ef   :  { %11938 = vst [vmem:[#allocation154_spill] sm:$0xff] %v6880_v28  ;;  %v6884_v50 = vpop.permute.xlu2 %916  ;;  %v1127_v28 = vmul.f32 %v6873_v6, %v1120_v24 }
 0x1f0   :  { %11939 = vst [vmem:[#allocation155_spill] sm:$0xff] %v6882_v43  ;;  %v1125_v43 = vmul.f32 %v6814_v8, %v1120_v24 }
 0x1f1   :  { %11940 = vst [vmem:[#allocation156_spill] sm:$0xff] %v6884_v50  ;;  %v1126_v50 = vmul.f32 %v6827_v36, %v1120_v24 }
 0x1f4   :  { %1141 = vrot.lane.b32.xlu1 %v1123_v13, %s11770_s27  ;;  %1139 = vrot.lane.b32.xlu0 %v1122_v51, %s11770_s27  ;;  %v1167_v13 = vstv %s5835_s7  ;;  %s5837_s7 = sld [smem:[#allocation8 + $0x1a]] }
 0x1f5   :  { %1143 = vrot.lane.b32.xlu2 %v1124_v2, %s11770_s27  ;;  %v1169_v5 = vmul.f32 %v6840_v14, %v1167_v13 }
 0x1f6   :  { %v6892_v10 = vpop.permute.xlu1 %902  ;;  %v6894_v37 = vpop.permute.xlu0 %869 }
 0x1f7   :  { %11941 = vst [vmem:[#allocation157_spill] sm:$0xff] %v6892_v10  ;;  %v6896_v7 = vpop.permute.xlu2 %953  ;;  %v1128_v10 = vmul.f32 %v6870_v0, %v1120_v24  ;;  %v1172_v24 = vmul.f32 %v6814_v8, %v1167_v13 }
 0x1f8   :  { %11942 = vst [vmem:[#allocation158_spill] sm:$0xff] %v6894_v37 }
 0x1f9   :  { %11943 = vst [vmem:[#allocation159_spill] sm:$0xff] %v6896_v7  ;;  %v1168_v7 = vmul.f32 %v6843_v9, %v1167_v13 }
 0x1fc   :  { %1147 = vrot.lane.b32.xlu1 %v1126_v50, %s11770_s27  ;;  %1145 = vrot.lane.b32.xlu0 %v1125_v43, %s11770_s27 }
 0x1fd   :  { %1149 = vrot.lane.b32.xlu2 %v1127_v28, %s11770_s27 }
 0x1fe   :  { %v6904_v2 = vpop.permute.xlu1 %908  ;;  %v6906_v51 = vpop.permute.xlu0 %906 }
 0x1ff   :  { %11944 = vst [vmem:[#allocation160_spill] sm:$0xff] %v6904_v2  ;;  %v6908_v37 = vpop.permute.xlu2 %959 }
 0x200   :  { %11945 = vst [vmem:[#allocation161_spill] sm:$0xff] %v6906_v51  ;;  %v1170_v51 = vmul.f32 %v6811_v1, %v1167_v13 }
 0x201   :  { %11946 = vst [vmem:[#allocation162_spill] sm:$0xff] %v6908_v37  ;;  %v1171_v37 = vmul.f32 %v6857_v35, %v1167_v13 }
 0x204   :  { %1184 = vrot.lane.b32.xlu1 %v1168_v7, %s11772_s0  ;;  %1151 = vrot.lane.b32.xlu0 %v1128_v10, %s11770_s27 }
 0x205   :  { %1186 = vrot.lane.b32.xlu2 %v1169_v5, %s11772_s0 }
 0x206   :  { %v6916_v50 = vpop.permute.xlu1 %914  ;;  %v6918_v28 = vpop.permute.xlu0 %912 }
 0x207   :  { %11947 = vst [vmem:[#allocation163_spill] sm:$0xff] %v6916_v50  ;;  %v6920_v43 = vpop.permute.xlu2 %996  ;;  %v1175_v50 = vmul.f32 %v6870_v0, %v1167_v13 }
 0x208   :  { %11948 = vst [vmem:[#allocation164_spill] sm:$0xff] %v6918_v28  ;;  %v1173_v28 = vmul.f32 %v6827_v36, %v1167_v13 }
 0x209   :  { %11949 = vst [vmem:[#allocation165_spill] sm:$0xff] %v6920_v43  ;;  %v1174_v43 = vmul.f32 %v6873_v6, %v1167_v13 }
 0x20c   :  { %1190 = vrot.lane.b32.xlu1 %v1171_v37, %s11772_s0  ;;  %1188 = vrot.lane.b32.xlu0 %v1170_v51, %s11772_s0  ;;  %v1214_v37 = vstv %s5836_s15  ;;  %s11766_s15 = smov 102  }
 0x20d   :  { %1192 = vrot.lane.b32.xlu2 %v1172_v24, %s11772_s0  ;;  %v1217_v2 = vmul.f32 %v6811_v1, %v1214_v37 }
 0x20e   :  { %v6928_v5 = vpop.permute.xlu1 %951  ;;  %v6930_v10 = vpop.permute.xlu0 %949 }
 0x20f   :  { %11950 = vst [vmem:[#allocation166_spill] sm:$0xff] %v6928_v5  ;;  %v6932_v7 = vpop.permute.xlu2 %1002  ;;  %v1215_v5 = vmul.f32 %v6843_v9, %v1214_v37 }
 0x210   :  { %11951 = vst [vmem:[#allocation167_spill] sm:$0xff] %v6930_v10 }
 0x211   :  { %11952 = vst [vmem:[#allocation168_spill] sm:$0xff] %v6932_v7  ;;  %v1216_v7 = vmul.f32 %v6840_v14, %v1214_v37 }
 0x214   :  { %1196 = vrot.lane.b32.xlu1 %v1174_v43, %s11772_s0  ;;  %1194 = vrot.lane.b32.xlu0 %v1173_v28, %s11772_s0  ;;  %v1219_v43 = vmul.f32 %v6814_v8, %v1214_v37 }
 0x215   :  { %1198 = vrot.lane.b32.xlu2 %v1175_v50, %s11772_s0 }
 0x216   :  { %v6940_v51 = vpop.permute.xlu1 %957  ;;  %v6942_v24 = vpop.permute.xlu0 %955 }
 0x217   :  { %11953 = vst [vmem:[#allocation169_spill] sm:$0xff] %v6940_v51  ;;  %v6944_v10 = vpop.permute.xlu2 %1008  ;;  %v1220_v51 = vmul.f32 %v6827_v36, %v1214_v37 }
 0x218   :  { %11954 = vst [vmem:[#allocation170_spill] sm:$0xff] %v6942_v24 }
 0x219   :  { %11955 = vst [vmem:[#allocation171_spill] sm:$0xff] %v6944_v10  ;;  %v1218_v10 = vmul.f32 %v6857_v35, %v1214_v37 }
 0x21c   :  { %1233 = vrot.lane.b32.xlu1 %v1216_v7, %s11764_s23  ;;  %1231 = vrot.lane.b32.xlu0 %v1215_v5, %s11764_s23 }
 0x21d   :  { %1235 = vrot.lane.b32.xlu2 %v1217_v2, %s11764_s23 }
 0x21e   :  { %v6952_v13 = vpop.permute.xlu1 %963  ;;  %v6954_v50 = vpop.permute.xlu0 %961 }
 0x21f   :  { %11956 = vst [vmem:[#allocation172_spill] sm:$0xff] %v6952_v13  ;;  %v6956_v28 = vpop.permute.xlu2 %1045  ;;  %v1261_v13 = vstv %s5837_s7  ;;  %s5838_s7 = sld [smem:[#allocation8 + $0x1b]] }
 0x220   :  { %11957 = vst [vmem:[#allocation173_spill] sm:$0xff] %v6954_v50  ;;  %v1221_v50 = vmul.f32 %v6873_v6, %v1214_v37  ;;  %v1262_v24 = vmul.f32 %v6843_v9, %v1261_v13 }
 0x221   :  { %11958 = vst [vmem:[#allocation174_spill] sm:$0xff] %v6956_v28  ;;  %v1222_v28 = vmul.f32 %v6870_v0, %v1214_v37  ;;  %v1263_v37 = vmul.f32 %v6840_v14, %v1261_v13 }
 0x224   :  { %1239 = vrot.lane.b32.xlu1 %v1219_v43, %s11764_s23  ;;  %1237 = vrot.lane.b32.xlu0 %v1218_v10, %s11764_s23 }
 0x225   :  { %1241 = vrot.lane.b32.xlu2 %v1220_v51, %s11764_s23 }
 0x226   :  { %v6964_v2 = vpop.permute.xlu1 %1000  ;;  %v6966_v5 = vpop.permute.xlu0 %998 }
 0x227   :  { %11959 = vst [vmem:[#allocation175_spill] sm:$0xff] %v6964_v2  ;;  %v6968_v7 = vpop.permute.xlu2 %1051 }
 0x228   :  { %11960 = vst [vmem:[#allocation176_spill] sm:$0xff] %v6966_v5  ;;  %v1265_v5 = vmul.f32 %v6857_v35, %v1261_v13 }
 0x229   :  { %11961 = vst [vmem:[#allocation177_spill] sm:$0xff] %v6968_v7  ;;  %v1264_v7 = vmul.f32 %v6811_v1, %v1261_v13 }
 0x22c   :  { %1245 = vrot.lane.b32.xlu1 %v1222_v28, %s11764_s23  ;;  %1243 = vrot.lane.b32.xlu0 %v1221_v50, %s11764_s23  ;;  %s11768_s23 = smov 101  }
 0x22d   :  { %1278 = vrot.lane.b32.xlu2 %v1262_v24, %s11766_s15 }
 0x22e   :  { %v6976_v10 = vpop.permute.xlu1 %1006  ;;  %v6978_v51 = vpop.permute.xlu0 %1004 }
 0x22f   :  { %11962 = vst [vmem:[#allocation178_spill] sm:$0xff] %v6976_v10  ;;  %v6980_v43 = vpop.permute.xlu2 %1057  ;;  %v1268_v10 = vmul.f32 %v6873_v6, %v1261_v13 }
 0x230   :  { %11963 = vst [vmem:[#allocation179_spill] sm:$0xff] %v6978_v51  ;;  %v1266_v51 = vmul.f32 %v6814_v8, %v1261_v13 }
 0x231   :  { %11964 = vst [vmem:[#allocation180_spill] sm:$0xff] %v6980_v43  ;;  %v1267_v43 = vmul.f32 %v6827_v36, %v1261_v13 }
 0x234   :  { %1282 = vrot.lane.b32.xlu1 %v1264_v7, %s11766_s15  ;;  %1280 = vrot.lane.b32.xlu0 %v1263_v37, %s11766_s15  ;;  %v1308_v7 = vstv %s5838_s7  ;;  %s5839_s7 = sld [smem:[#allocation8 + $0x1c]] }
 0x235   :  { %1284 = vrot.lane.b32.xlu2 %v1265_v5, %s11766_s15  ;;  %v1310_v2 = vmul.f32 %v6840_v14, %v1308_v7 }
 0x236   :  { %v6988_v24 = vpop.permute.xlu1 %1043  ;;  %v6990_v50 = vpop.permute.xlu0 %1010 }
 0x237   :  { %11965 = vst [vmem:[#allocation181_spill] sm:$0xff] %v6988_v24  ;;  %v6992_v28 = vpop.permute.xlu2 %1094  ;;  %v1269_v24 = vmul.f32 %v6870_v0, %v1261_v13  ;;  %v1313_v13 = vmul.f32 %v6814_v8, %v1308_v7 }
 0x238   :  { %11966 = vst [vmem:[#allocation182_spill] sm:$0xff] %v6990_v50 }
 0x239   :  { %11967 = vst [vmem:[#allocation183_spill] sm:$0xff] %v6992_v28  ;;  %v1309_v28 = vmul.f32 %v6843_v9, %v1308_v7 }
 0x23c   :  { %1288 = vrot.lane.b32.xlu1 %v1267_v43, %s11766_s15  ;;  %1286 = vrot.lane.b32.xlu0 %v1266_v51, %s11766_s15 }
 0x23d   :  { %1290 = vrot.lane.b32.xlu2 %v1268_v10, %s11766_s15 }
 0x23e   :  { %v7000_v5 = vpop.permute.xlu1 %1049  ;;  %v7002_v37 = vpop.permute.xlu0 %1047 }
 0x23f   :  { %11968 = vst [vmem:[#allocation184_spill] sm:$0xff] %v7000_v5  ;;  %v7004_v50 = vpop.permute.xlu2 %1100 }
 0x240   :  { %11969 = vst [vmem:[#allocation185_spill] sm:$0xff] %v7002_v37  ;;  %v1311_v37 = vmul.f32 %v6811_v1, %v1308_v7 }
 0x241   :  { %11970 = vst [vmem:[#allocation186_spill] sm:$0xff] %v7004_v50  ;;  %v1312_v50 = vmul.f32 %v6857_v35, %v1308_v7 }
 0x244   :  { %1325 = vrot.lane.b32.xlu1 %v1309_v28, %s11768_s23  ;;  %1292 = vrot.lane.b32.xlu0 %v1269_v24, %s11766_s15  ;;  %s6171_s15 = smov 100  }
 0x245   :  { %1327 = vrot.lane.b32.xlu2 %v1310_v2, %s11768_s23 }
 0x246   :  { %v7012_v10 = vpop.permute.xlu1 %1055  ;;  %v7014_v51 = vpop.permute.xlu0 %1053 }
 0x247   :  { %11971 = vst [vmem:[#allocation187_spill] sm:$0xff] %v7012_v10  ;;  %v7016_v43 = vpop.permute.xlu2 %1137  ;;  %v1314_v10 = vmul.f32 %v6827_v36, %v1308_v7 }
 0x248   :  { %11972 = vst [vmem:[#allocation188_spill] sm:$0xff] %v7014_v51  ;;  %v1316_v51 = vmul.f32 %v6870_v0, %v1308_v7 }
 0x249   :  { %11973 = vst [vmem:[#allocation189_spill] sm:$0xff] %v7016_v43  ;;  %v1315_v43 = vmul.f32 %v6873_v6, %v1308_v7 }
 0x24c   :  { %1331 = vrot.lane.b32.xlu1 %v1312_v50, %s11768_s23  ;;  %1329 = vrot.lane.b32.xlu0 %v1311_v37, %s11768_s23  ;;  %v1355_v50 = vstv %s5839_s7  ;;  %s5840_s7 = sld [smem:[#allocation8 + $0x1d]] }
 0x24d   :  { %1333 = vrot.lane.b32.xlu2 %v1313_v13, %s11768_s23  ;;  %v1358_v5 = vmul.f32 %v6811_v1, %v1355_v50 }
 0x24e   :  { %v7024_v2 = vpop.permute.xlu1 %1092  ;;  %v7026_v24 = vpop.permute.xlu0 %1090 }
 0x24f   :  { %11974 = vst [vmem:[#allocation190_spill] sm:$0xff] %v7024_v2  ;;  %v7028_v28 = vpop.permute.xlu2 %1143  ;;  %v1356_v2 = vmul.f32 %v6843_v9, %v1355_v50 }
 0x250   :  { %11975 = vst [vmem:[#allocation191_spill] sm:$0xff] %v7026_v24 }
 0x251   :  { %11976 = vst [vmem:[#allocation192_spill] sm:$0xff] %v7028_v28  ;;  %v1357_v28 = vmul.f32 %v6840_v14, %v1355_v50 }
 0x254   :  { %1337 = vrot.lane.b32.xlu1 %v1315_v43, %s11768_s23  ;;  %1335 = vrot.lane.b32.xlu0 %v1314_v10, %s11768_s23  ;;  %v1360_v43 = vmul.f32 %v6814_v8, %v1355_v50 }
 0x255   :  { %1339 = vrot.lane.b32.xlu2 %v1316_v51, %s11768_s23  ;;  %s6172_s23 = smov 99  }
 0x256   :  { %v7036_v37 = vpop.permute.xlu1 %1098  ;;  %v7038_v13 = vpop.permute.xlu0 %1096 }
 0x257   :  { %11977 = vst [vmem:[#allocation193_spill] sm:$0xff] %v7036_v37  ;;  %v7040_v24 = vpop.permute.xlu2 %1149 }
 0x258   :  { %11978 = vst [vmem:[#allocation194_spill] sm:$0xff] %v7038_v13  ;;  %v1361_v13 = vmul.f32 %v6827_v36, %v1355_v50 }
 0x259   :  { %11979 = vst [vmem:[#allocation195_spill] sm:$0xff] %v7040_v24  ;;  %v1359_v24 = vmul.f32 %v6857_v35, %v1355_v50 }
 0x25c   :  { %1374 = vrot.lane.b32.xlu1 %v1357_v28, %s6171_s15  ;;  %1372 = vrot.lane.b32.xlu0 %v1356_v2, %s6171_s15 }
 0x25d   :  { %1376 = vrot.lane.b32.xlu2 %v1358_v5, %s6171_s15 }
 0x25e   :  { %v7048_v7 = vpop.permute.xlu1 %1104  ;;  %v7050_v10 = vpop.permute.xlu0 %1102 }
 0x25f   :  { %11980 = vst [vmem:[#allocation196_spill] sm:$0xff] %v7048_v7  ;;  %v7052_v51 = vpop.permute.xlu2 %1186  ;;  %v1402_v7 = vstv %s5840_s7  ;;  %s5842_s7 = sld [smem:[#allocation8 + $0x81]] }
 0x260   :  { %11981 = vst [vmem:[#allocation197_spill] sm:$0xff] %v7050_v10  ;;  %v1362_v10 = vmul.f32 %v6873_v6, %v1355_v50  ;;  %v1403_v37 = vmul.f32 %v6843_v9, %v1402_v7 }
 0x261   :  { %11982 = vst [vmem:[#allocation198_spill] sm:$0xff] %v7052_v51  ;;  %v1363_v51 = vmul.f32 %v6870_v0, %v1355_v50  ;;  %v1404_v50 = vmul.f32 %v6840_v14, %v1402_v7  ;;  %v1409_v14 = vmul.f32 %v6873_v6, %v1402_v7  ;;  %v1410_v6 = vmul.f32 %v6870_v0, %v1402_v7 }
 0x264   :  { %1380 = vrot.lane.b32.xlu1 %v1360_v43, %s6171_s15  ;;  %1378 = vrot.lane.b32.xlu0 %v1359_v24, %s6171_s15 }
 0x265   :  { %1382 = vrot.lane.b32.xlu2 %v1361_v13, %s6171_s15 }
 0x266   :  { %v7060_v5 = vpop.permute.xlu1 %1141  ;;  %v7062_v2 = vpop.permute.xlu0 %1139 }
 0x267   :  { %11983 = vst [vmem:[#allocation199_spill] sm:$0xff] %v7060_v5  ;;  %v7064_v28 = vpop.permute.xlu2 %1192 }
 0x268   :  { %11984 = vst [vmem:[#allocation200_spill] sm:$0xff] %v7062_v2  ;;  %v1406_v2 = vmul.f32 %v6857_v35, %v1402_v7  ;;  %v7095_v35 = vld [vmem:[#allocation4 + $0x40] sm:$0xff] }
 0x269   :  { %11985 = vst [vmem:[#allocation201_spill] sm:$0xff] %v7064_v28  ;;  %v1405_v28 = vmul.f32 %v6811_v1, %v1402_v7  ;;  %v1407_v1 = vmul.f32 %v6814_v8, %v1402_v7 }
 0x26c   :  { %1386 = vrot.lane.b32.xlu1 %v1363_v51, %s6171_s15  ;;  %1384 = vrot.lane.b32.xlu0 %v1362_v10, %s6171_s15  ;;  %v1408_v51 = vmul.f32 %v6827_v36, %v1402_v7 }
 0x26d   :  { %1419 = vrot.lane.b32.xlu2 %v1403_v37, %s6172_s23 }
 0x26e   :  { %v7072_v24 = vpop.permute.xlu1 %1147  ;;  %v7074_v13 = vpop.permute.xlu0 %1145 }
 0x26f   :  { %11986 = vst [vmem:[#allocation202_spill] sm:$0xff] %v7072_v24  ;;  %v7076_v43 = vpop.permute.xlu2 %1198 }
 0x270   :  { %11987 = vst [vmem:[#allocation203_spill] sm:$0xff] %v7074_v13 }
 0x271   :  { %11988 = vst [vmem:[#allocation204_spill] sm:$0xff] %v7076_v43 }
 0x274   :  { %1423 = vrot.lane.b32.xlu1 %v1405_v28, %s6172_s23  ;;  %1421 = vrot.lane.b32.xlu0 %v1404_v50, %s6172_s23  ;;  %v1468_v28 = vstv %s5842_s7  ;;  %s5843_s7 = sld [smem:[#allocation8 + $0x82]] }
 0x275   :  { %1425 = vrot.lane.b32.xlu2 %v1406_v2, %s6172_s23  ;;  %v1469_v8 = vmul.f32 %v1468_v28, %v7095_v35 }
 0x276   :  { %v7084_v9 = vpop.permute.xlu1 %1184  ;;  %v7086_v37 = vpop.permute.xlu0 %1151 }
 0x277   :  { %11989 = vst [vmem:[#allocation205_spill] sm:$0xff] %v7084_v9  ;;  %v7088_v10 = vpop.permute.xlu2 %1235 }
 0x278   :  { %11990 = vst [vmem:[#allocation206_spill] sm:$0xff] %v7086_v37 }
 0x279   :  { %11991 = vst [vmem:[#allocation207_spill] sm:$0xff] %v7088_v10  ;;  %v7102_v10 = vld [vmem:[#allocation4 + $0x48] sm:$0xff] }
 0x27a   :  { %v1514_v13 = vstv %s5843_s7  ;;  %s5844_s7 = sld [smem:[#allocation8 + $0x83]] }
 0x27b   :  { %v1515_v24 = vmul.f32 %v1514_v13, %v7095_v35 }
 0x27c   :  { %1429 = vrot.lane.b32.xlu1 %v1408_v51, %s6172_s23  ;;  %1427 = vrot.lane.b32.xlu0 %v1407_v1, %s6172_s23  ;;  %v1470_v51 = vmul.f32 %v1468_v28, %v7102_v10  ;;  %v7111_v1 = vld [vmem:[#allocation4 + $0x58] sm:$0xff] }
 0x27d   :  { %1431 = vrot.lane.b32.xlu2 %v1409_v14, %s6172_s23  ;;  %v7113_v14 = vld [vmem:[#allocation4 + $0x50] sm:$0xff]  ;;  %v1472_v0 = vmul.f32 %v1468_v28, %v7111_v1 }
 0x27e   :  { %v7098_v2 = vpop.permute.xlu1 %1190  ;;  %v7100_v50 = vpop.permute.xlu0 %1188  ;;  %v1471_v7 = vmul.f32 %v1468_v28, %v7113_v14  ;;  %v1517_v5 = vmul.f32 %v1514_v13, %v7113_v14 }
 0x27f   :  { %11992 = vst [vmem:[#allocation208_spill] sm:$0xff] %v7098_v2  ;;  %v7104_v36 = vpop.permute.xlu2 %1241 }
 0x280   :  { %11993 = vst [vmem:[#allocation209_spill] sm:$0xff] %v7100_v50 }
 0x281   :  { %11994 = vst [vmem:[#allocation210_spill] sm:$0xff] %v7104_v36  ;;  %v7120_v36 = vld [vmem:[#allocation4 + $0x60] sm:$0xff] }
 0x284   :  { %1485 = vrot.lane.b32.xlu1 %v1469_v8, %s6144_s3  ;;  %1433 = vrot.lane.b32.xlu0 %v1410_v6, %s6172_s23  ;;  %v1473_v8 = vmul.f32 %v1468_v28, %v7120_v36  ;;  %v7129_v6 = vld [vmem:[#allocation4 + $0x70] sm:$0xff] }
 0x285   :  { %1487 = vrot.lane.b32.xlu2 %v1470_v51, %s6144_s3  ;;  %v7131_v51 = vld [vmem:[#allocation4 + $0x68] sm:$0xff]  ;;  %v1475_v37 = vmul.f32 %v1468_v28, %v7129_v6 }
 0x286   :  { %v7116_v43 = vpop.permute.xlu1 %1196  ;;  %v7118_v50 = vpop.permute.xlu0 %1194 }
 0x287   :  { %11995 = vst [vmem:[#allocation211_spill] sm:$0xff] %v7116_v43  ;;  %v7122_v2 = vpop.permute.xlu2 %1278 }
 0x288   :  { %11996 = vst [vmem:[#allocation212_spill] sm:$0xff] %v7118_v50  ;;  %v7138_v50 = vld [vmem:[#allocation4 + $0x78] sm:$0xff] }
 0x289   :  { %11997 = vst [vmem:[#allocation213_spill] sm:$0xff] %v7122_v2 }
 0x28c   :  { %1491 = vrot.lane.b32.xlu1 %v1472_v0, %s6144_s3  ;;  %1489 = vrot.lane.b32.xlu0 %v1471_v7, %s6144_s3  ;;  %v1474_v0 = vmul.f32 %v1468_v28, %v7131_v51  ;;  %v1476_v7 = vmul.f32 %v1468_v28, %v7138_v50 }
 0x28d   :  { %1493 = vrot.lane.b32.xlu2 %v1473_v8, %s6144_s3 }
 0x28e   :  { %v7134_v43 = vpop.permute.xlu1 %1233  ;;  %v7136_v2 = vpop.permute.xlu0 %1231 }
 0x28f   :  { %11998 = vst [vmem:[#allocation214_spill] sm:$0xff] %v7134_v43  ;;  %v7140_v9 = vpop.permute.xlu2 %1284 }
 0x290   :  { %11999 = vst [vmem:[#allocation215_spill] sm:$0xff] %v7136_v2 }
 0x291   :  { %12000 = vst [vmem:[#allocation216_spill] sm:$0xff] %v7140_v9  ;;  %v1516_v9 = vmul.f32 %v1514_v13, %v7102_v10 }
 0x294   :  { %1497 = vrot.lane.b32.xlu1 %v1475_v37, %s6144_s3  ;;  %1495 = vrot.lane.b32.xlu0 %v1474_v0, %s6144_s3 }
 0x295   :  { %1499 = vrot.lane.b32.xlu2 %v1476_v7, %s6144_s3  ;;  %v1519_v7 = vmul.f32 %v1514_v13, %v7120_v36 }
 0x296   :  { %v7148_v8 = vpop.permute.xlu1 %1239  ;;  %v7150_v2 = vpop.permute.xlu0 %1237 }
 0x297   :  { %12001 = vst [vmem:[#allocation217_spill] sm:$0xff] %v7148_v8  ;;  %v7152_v43 = vpop.permute.xlu2 %1290 }
 0x298   :  { %12002 = vst [vmem:[#allocation218_spill] sm:$0xff] %v7150_v2  ;;  %v1520_v2 = vmul.f32 %v1514_v13, %v7131_v51 }
 0x299   :  { %12003 = vst [vmem:[#allocation219_spill] sm:$0xff] %v7152_v43  ;;  %v1518_v43 = vmul.f32 %v1514_v13, %v7111_v1 }
 0x29c   :  { %1533 = vrot.lane.b32.xlu1 %v1516_v9, %s6145_s12  ;;  %1531 = vrot.lane.b32.xlu0 %v1515_v24, %s6145_s12 }
 0x29d   :  { %1535 = vrot.lane.b32.xlu2 %v1517_v5, %s6145_s12 }
 0x29e   :  { %v7160_v37 = vpop.permute.xlu1 %1245  ;;  %v7162_v28 = vpop.permute.xlu0 %1243 }
 0x29f   :  { %12004 = vst [vmem:[#allocation220_spill] sm:$0xff] %v7160_v37  ;;  %v7164_v0 = vpop.permute.xlu2 %1327  ;;  %v1560_v37 = vstv %s5844_s7  ;;  %s5845_s7 = sld [smem:[#allocation8 + $0x84]] }
 0x2a0   :  { %12005 = vst [vmem:[#allocation221_spill] sm:$0xff] %v7162_v28  ;;  %v1521_v28 = vmul.f32 %v1514_v13, %v7129_v6  ;;  %v1561_v8 = vmul.f32 %v1560_v37, %v7095_v35 }
 0x2a1   :  { %12006 = vst [vmem:[#allocation222_spill] sm:$0xff] %v7164_v0  ;;  %v1522_v0 = vmul.f32 %v1514_v13, %v7138_v50  ;;  %v1564_v13 = vmul.f32 %v1560_v37, %v7111_v1 }
 0x2a4   :  { %1539 = vrot.lane.b32.xlu1 %v1519_v7, %s6145_s12  ;;  %1537 = vrot.lane.b32.xlu0 %v1518_v43, %s6145_s12 }
 0x2a5   :  { %1541 = vrot.lane.b32.xlu2 %v1520_v2, %s6145_s12 }
 0x2a6   :  { %v7172_v5 = vpop.permute.xlu1 %1282  ;;  %v7174_v24 = vpop.permute.xlu0 %1280 }
 0x2a7   :  { %12007 = vst [vmem:[#allocation223_spill] sm:$0xff] %v7172_v5  ;;  %v7176_v9 = vpop.permute.xlu2 %1333 }
 0x2a8   :  { %12008 = vst [vmem:[#allocation224_spill] sm:$0xff] %v7174_v24  ;;  %v1562_v24 = vmul.f32 %v1560_v37, %v7102_v10 }
 0x2a9   :  { %12009 = vst [vmem:[#allocation225_spill] sm:$0xff] %v7176_v9  ;;  %v1563_v9 = vmul.f32 %v1560_v37, %v7113_v14 }
 0x2ac   :  { %1545 = vrot.lane.b32.xlu1 %v1522_v0, %s6145_s12  ;;  %1543 = vrot.lane.b32.xlu0 %v1521_v28, %s6145_s12 }
 0x2ad   :  { %1577 = vrot.lane.b32.xlu2 %v1561_v8, %s6146_s14 }
 0x2ae   :  { %v7184_v43 = vpop.permute.xlu1 %1288  ;;  %v7186_v2 = vpop.permute.xlu0 %1286 }
 0x2af   :  { %12010 = vst [vmem:[#allocation226_spill] sm:$0xff] %v7184_v43  ;;  %v7188_v7 = vpop.permute.xlu2 %1339  ;;  %v1567_v43 = vmul.f32 %v1560_v37, %v7129_v6 }
 0x2b0   :  { %12011 = vst [vmem:[#allocation227_spill] sm:$0xff] %v7186_v2  ;;  %v1565_v2 = vmul.f32 %v1560_v37, %v7120_v36 }
 0x2b1   :  { %12012 = vst [vmem:[#allocation228_spill] sm:$0xff] %v7188_v7  ;;  %v1566_v7 = vmul.f32 %v1560_v37, %v7131_v51 }
 0x2b4   :  { %1581 = vrot.lane.b32.xlu1 %v1563_v9, %s6146_s14  ;;  %1579 = vrot.lane.b32.xlu0 %v1562_v24, %s6146_s14  ;;  %v1606_v24 = vstv %s5845_s7  ;;  %s5846_s7 = sld [smem:[#allocation8 + $0x85]] }
 0x2b5   :  { %1583 = vrot.lane.b32.xlu2 %v1564_v13, %s6146_s14  ;;  %v1608_v5 = vmul.f32 %v1606_v24, %v7102_v10 }
 0x2b6   :  { %v7196_v8 = vpop.permute.xlu1 %1325  ;;  %v7198_v28 = vpop.permute.xlu0 %1292 }
 0x2b7   :  { %12013 = vst [vmem:[#allocation229_spill] sm:$0xff] %v7196_v8  ;;  %v7200_v0 = vpop.permute.xlu2 %1376  ;;  %v1568_v8 = vmul.f32 %v1560_v37, %v7138_v50  ;;  %v1611_v37 = vmul.f32 %v1606_v24, %v7120_v36 }
 0x2b8   :  { %12014 = vst [vmem:[#allocation230_spill] sm:$0xff] %v7198_v28 }
 0x2b9   :  { %12015 = vst [vmem:[#allocation231_spill] sm:$0xff] %v7200_v0  ;;  %v1607_v0 = vmul.f32 %v1606_v24, %v7095_v35 }
 0x2bc   :  { %1587 = vrot.lane.b32.xlu1 %v1566_v7, %s6146_s14  ;;  %1585 = vrot.lane.b32.xlu0 %v1565_v2, %s6146_s14 }
 0x2bd   :  { %1589 = vrot.lane.b32.xlu2 %v1567_v43, %s6146_s14 }
 0x2be   :  { %v7208_v9 = vpop.permute.xlu1 %1331  ;;  %v7210_v13 = vpop.permute.xlu0 %1329 }
 0x2bf   :  { %12016 = vst [vmem:[#allocation232_spill] sm:$0xff] %v7208_v9  ;;  %v7212_v28 = vpop.permute.xlu2 %1382 }
 0x2c0   :  { %12017 = vst [vmem:[#allocation233_spill] sm:$0xff] %v7210_v13  ;;  %v1609_v13 = vmul.f32 %v1606_v24, %v7113_v14 }
 0x2c1   :  { %12018 = vst [vmem:[#allocation234_spill] sm:$0xff] %v7212_v28  ;;  %v1610_v28 = vmul.f32 %v1606_v24, %v7111_v1 }
 0x2c4   :  { %1623 = vrot.lane.b32.xlu1 %v1607_v0, %s6147_s16  ;;  %1591 = vrot.lane.b32.xlu0 %v1568_v8, %s6146_s14 }
 0x2c5   :  { %1625 = vrot.lane.b32.xlu2 %v1608_v5, %s6147_s16 }
 0x2c6   :  { %v7220_v2 = vpop.permute.xlu1 %1337  ;;  %v7222_v43 = vpop.permute.xlu0 %1335 }
 0x2c7   :  { %12019 = vst [vmem:[#allocation235_spill] sm:$0xff] %v7220_v2  ;;  %v7224_v7 = vpop.permute.xlu2 %1419  ;;  %v1612_v2 = vmul.f32 %v1606_v24, %v7131_v51 }
 0x2c8   :  { %12020 = vst [vmem:[#allocation236_spill] sm:$0xff] %v7222_v43  ;;  %v1614_v43 = vmul.f32 %v1606_v24, %v7138_v50 }
 0x2c9   :  { %12021 = vst [vmem:[#allocation237_spill] sm:$0xff] %v7224_v7  ;;  %v1613_v7 = vmul.f32 %v1606_v24, %v7129_v6 }
 0x2cc   :  { %1629 = vrot.lane.b32.xlu1 %v1610_v28, %s6147_s16  ;;  %1627 = vrot.lane.b32.xlu0 %v1609_v13, %s6147_s16  ;;  %v1652_v28 = vstv %s5846_s7  ;;  %s5847_s7 = sld [smem:[#allocation8 + $0x86]] }
 0x2cd   :  { %1631 = vrot.lane.b32.xlu2 %v1611_v37, %s6147_s16  ;;  %v1655_v9 = vmul.f32 %v1652_v28, %v7113_v14 }
 0x2ce   :  { %v7232_v5 = vpop.permute.xlu1 %1374  ;;  %v7234_v8 = vpop.permute.xlu0 %1372 }
 0x2cf   :  { %12022 = vst [vmem:[#allocation238_spill] sm:$0xff] %v7232_v5  ;;  %v7236_v0 = vpop.permute.xlu2 %1425  ;;  %v1653_v5 = vmul.f32 %v1652_v28, %v7095_v35 }
 0x2d0   :  { %12023 = vst [vmem:[#allocation239_spill] sm:$0xff] %v7234_v8 }
 0x2d1   :  { %12024 = vst [vmem:[#allocation240_spill] sm:$0xff] %v7236_v0  ;;  %v1654_v0 = vmul.f32 %v1652_v28, %v7102_v10 }
 0x2d4   :  { %1635 = vrot.lane.b32.xlu1 %v1613_v7, %s6147_s16  ;;  %1633 = vrot.lane.b32.xlu0 %v1612_v2, %s6147_s16  ;;  %v1657_v7 = vmul.f32 %v1652_v28, %v7120_v36 }
 0x2d5   :  { %1637 = vrot.lane.b32.xlu2 %v1614_v43, %s6147_s16 }
 0x2d6   :  { %v7244_v13 = vpop.permute.xlu1 %1380  ;;  %v7246_v37 = vpop.permute.xlu0 %1378 }
 0x2d7   :  { %12025 = vst [vmem:[#allocation241_spill] sm:$0xff] %v7244_v13  ;;  %v7248_v8 = vpop.permute.xlu2 %1431  ;;  %v1698_v13 = vstv %s5847_s7  ;;  %s5848_s7 = sld [smem:[#allocation8 + $0x87]] }
 0x2d8   :  { %12026 = vst [vmem:[#allocation242_spill] sm:$0xff] %v7246_v37  ;;  %v1658_v37 = vmul.f32 %v1652_v28, %v7131_v51 }
 0x2d9   :  { %12027 = vst [vmem:[#allocation243_spill] sm:$0xff] %v7248_v8  ;;  %v1656_v8 = vmul.f32 %v1652_v28, %v7111_v1 }
 0x2dc   :  { %1671 = vrot.lane.b32.xlu1 %v1654_v0, %s6148_s18  ;;  %1669 = vrot.lane.b32.xlu0 %v1653_v5, %s6148_s18 }
 0x2dd   :  { %1673 = vrot.lane.b32.xlu2 %v1655_v9, %s6148_s18 }
 0x2de   :  { %v7256_v24 = vpop.permute.xlu1 %1386  ;;  %v7258_v2 = vpop.permute.xlu0 %1384 }
 0x2df   :  { %12028 = vst [vmem:[#allocation244_spill] sm:$0xff] %v7256_v24  ;;  %v7260_v43 = vpop.permute.xlu2 %1487  ;;  %v1659_v24 = vmul.f32 %v1652_v28, %v7129_v6 }
 0x2e0   :  { %12029 = vst [vmem:[#allocation245_spill] sm:$0xff] %v7258_v2  ;;  %v1660_v2 = vmul.f32 %v1652_v28, %v7138_v50  ;;  %v1702_v28 = vmul.f32 %v1698_v13, %v7111_v1 }
 0x2e1   :  { %12030 = vst [vmem:[#allocation246_spill] sm:$0xff] %v7260_v43  ;;  %v1699_v43 = vmul.f32 %v1698_v13, %v7095_v35 }
 0x2e4   :  { %1677 = vrot.lane.b32.xlu1 %v1657_v7, %s6148_s18  ;;  %1675 = vrot.lane.b32.xlu0 %v1656_v8, %s6148_s18 }
 0x2e5   :  { %1679 = vrot.lane.b32.xlu2 %v1658_v37, %s6148_s18 }
 0x2e6   :  { %v7268_v9 = vpop.permute.xlu1 %1423  ;;  %v7270_v5 = vpop.permute.xlu0 %1421 }
 0x2e7   :  { %12031 = vst [vmem:[#allocation247_spill] sm:$0xff] %v7268_v9  ;;  %v7272_v0 = vpop.permute.xlu2 %1493  ;;  %v1700_v9 = vmul.f32 %v1698_v13, %v7102_v10 }
 0x2e8   :  { %12032 = vst [vmem:[#allocation248_spill] sm:$0xff] %v7270_v5  ;;  %v1701_v5 = vmul.f32 %v1698_v13, %v7113_v14 }
 0x2e9   :  { %12033 = vst [vmem:[#allocation249_spill] sm:$0xff] %v7272_v0  ;;  %v1705_v0 = vmul.f32 %v1698_v13, %v7129_v6 }
 0x2ec   :  { %1683 = vrot.lane.b32.xlu1 %v1660_v2, %s6148_s18  ;;  %1681 = vrot.lane.b32.xlu0 %v1659_v24, %s6148_s18 }
 0x2ed   :  { %1715 = vrot.lane.b32.xlu2 %v1699_v43, %s6149_s20 }
 0x2ee   :  { %v7280_v8 = vpop.permute.xlu1 %1429  ;;  %v7282_v37 = vpop.permute.xlu0 %1427 }
 0x2ef   :  { %12034 = vst [vmem:[#allocation250_spill] sm:$0xff] %v7280_v8  ;;  %v7284_v7 = vpop.permute.xlu2 %1499  ;;  %v1703_v8 = vmul.f32 %v1698_v13, %v7120_v36 }
 0x2f0   :  { %12035 = vst [vmem:[#allocation251_spill] sm:$0xff] %v7282_v37  ;;  %v1704_v37 = vmul.f32 %v1698_v13, %v7131_v51 }
 0x2f1   :  { %12036 = vst [vmem:[#allocation252_spill] sm:$0xff] %v7284_v7  ;;  %v1706_v7 = vmul.f32 %v1698_v13, %v7138_v50 }
 0x2f4   :  { %1719 = vrot.lane.b32.xlu1 %v1701_v5, %s6149_s20  ;;  %1717 = vrot.lane.b32.xlu0 %v1700_v9, %s6149_s20  ;;  %v1744_v9 = vstv %s5848_s7  ;;  %s5849_s7 = sld [smem:[#allocation8 + $0x88]] }
 0x2f5   :  { %1721 = vrot.lane.b32.xlu2 %v1702_v28, %s6149_s20  ;;  %v1749_v13 = vmul.f32 %v1744_v9, %v7120_v36 }
 0x2f6   :  { %v7292_v24 = vpop.permute.xlu1 %1485  ;;  %v7294_v2 = vpop.permute.xlu0 %1433 }
 0x2f7   :  { %12037 = vst [vmem:[#allocation253_spill] sm:$0xff] %v7292_v24  ;;  %v7296_v43 = vpop.permute.xlu2 %1535  ;;  %v1746_v24 = vmul.f32 %v1744_v9, %v7102_v10 }
 0x2f8   :  { %12038 = vst [vmem:[#allocation254_spill] sm:$0xff] %v7294_v2 }
 0x2f9   :  { %12039 = vst [vmem:[#allocation255_spill] sm:$0xff] %v7296_v43  ;;  %v1745_v43 = vmul.f32 %v1744_v9, %v7095_v35 }
 0x2fc   :  { %1725 = vrot.lane.b32.xlu1 %v1704_v37, %s6149_s20  ;;  %1723 = vrot.lane.b32.xlu0 %v1703_v8, %s6149_s20 }
 0x2fd   :  { %1727 = vrot.lane.b32.xlu2 %v1705_v0, %s6149_s20 }
 0x2fe   :  { %v7304_v5 = vpop.permute.xlu1 %1491  ;;  %v7306_v28 = vpop.permute.xlu0 %1489 }
 0x2ff   :  { %12040 = vst [vmem:[#allocation256_spill] sm:$0xff] %v7304_v5  ;;  %v7308_v2 = vpop.permute.xlu2 %1541 }
 0x300   :  { %12041 = vst [vmem:[#allocation257_spill] sm:$0xff] %v7306_v28  ;;  %v1747_v28 = vmul.f32 %v1744_v9, %v7113_v14 }
 0x301   :  { %12042 = vst [vmem:[#allocation258_spill] sm:$0xff] %v7308_v2  ;;  %v1748_v2 = vmul.f32 %v1744_v9, %v7111_v1 }
 0x304   :  { %1761 = vrot.lane.b32.xlu1 %v1745_v43, %s6150_s22  ;;  %1729 = vrot.lane.b32.xlu0 %v1706_v7, %s6149_s20 }
 0x305   :  { %1763 = vrot.lane.b32.xlu2 %v1746_v24, %s6150_s22 }
 0x306   :  { %v7316_v8 = vpop.permute.xlu1 %1497  ;;  %v7318_v0 = vpop.permute.xlu0 %1495 }
 0x307   :  { %12043 = vst [vmem:[#allocation259_spill] sm:$0xff] %v7316_v8  ;;  %v7320_v37 = vpop.permute.xlu2 %1577  ;;  %v1752_v8 = vmul.f32 %v1744_v9, %v7138_v50 }
 0x308   :  { %12044 = vst [vmem:[#allocation260_spill] sm:$0xff] %v7318_v0  ;;  %v1750_v0 = vmul.f32 %v1744_v9, %v7131_v51 }
 0x309   :  { %12045 = vst [vmem:[#allocation261_spill] sm:$0xff] %v7320_v37  ;;  %v1751_v37 = vmul.f32 %v1744_v9, %v7129_v6 }
 0x30c   :  { %1767 = vrot.lane.b32.xlu1 %v1748_v2, %s6150_s22  ;;  %1765 = vrot.lane.b32.xlu0 %v1747_v28, %s6150_s22  ;;  %v1790_v2 = vstv %s5849_s7  ;;  %s5850_s7 = sld [smem:[#allocation8 + $0x89]] }
 0x30d   :  { %1769 = vrot.lane.b32.xlu2 %v1749_v13, %s6150_s22  ;;  %v1793_v5 = vmul.f32 %v1790_v2, %v7113_v14 }
 0x30e   :  { %v7328_v7 = vpop.permute.xlu1 %1533  ;;  %v7330_v24 = vpop.permute.xlu0 %1531 }
 0x30f   :  { %12046 = vst [vmem:[#allocation262_spill] sm:$0xff] %v7328_v7  ;;  %v7332_v43 = vpop.permute.xlu2 %1583  ;;  %v1791_v7 = vmul.f32 %v1790_v2, %v7095_v35 }
 0x310   :  { %12047 = vst [vmem:[#allocation263_spill] sm:$0xff] %v7330_v24 }
 0x311   :  { %12048 = vst [vmem:[#allocation264_spill] sm:$0xff] %v7332_v43  ;;  %v1792_v43 = vmul.f32 %v1790_v2, %v7102_v10 }
 0x314   :  { %1773 = vrot.lane.b32.xlu1 %v1751_v37, %s6150_s22  ;;  %1771 = vrot.lane.b32.xlu0 %v1750_v0, %s6150_s22  ;;  %v1795_v37 = vmul.f32 %v1790_v2, %v7120_v36 }
 0x315   :  { %1775 = vrot.lane.b32.xlu2 %v1752_v8, %s6150_s22 }
 0x316   :  { %v7340_v28 = vpop.permute.xlu1 %1539  ;;  %v7342_v13 = vpop.permute.xlu0 %1537 }
 0x317   :  { %12049 = vst [vmem:[#allocation265_spill] sm:$0xff] %v7340_v28  ;;  %v7344_v24 = vpop.permute.xlu2 %1589 }
 0x318   :  { %12050 = vst [vmem:[#allocation266_spill] sm:$0xff] %v7342_v13  ;;  %v1796_v13 = vmul.f32 %v1790_v2, %v7131_v51 }
 0x319   :  { %12051 = vst [vmem:[#allocation267_spill] sm:$0xff] %v7344_v24  ;;  %v1794_v24 = vmul.f32 %v1790_v2, %v7111_v1 }
 0x31c   :  { %1809 = vrot.lane.b32.xlu1 %v1792_v43, %s6151_s24  ;;  %1807 = vrot.lane.b32.xlu0 %v1791_v7, %s6151_s24 }
 0x31d   :  { %1811 = vrot.lane.b32.xlu2 %v1793_v5, %s6151_s24 }
 0x31e   :  { %v7352_v9 = vpop.permute.xlu1 %1545  ;;  %v7354_v8 = vpop.permute.xlu0 %1543 }
 0x31f   :  { %12052 = vst [vmem:[#allocation268_spill] sm:$0xff] %v7352_v9  ;;  %v7356_v0 = vpop.permute.xlu2 %1625  ;;  %v1836_v9 = vstv %s5850_s7  ;;  %s5851_s7 = sld [smem:[#allocation8 + $0x8a]] }
 0x320   :  { %12053 = vst [vmem:[#allocation269_spill] sm:$0xff] %v7354_v8  ;;  %v1797_v8 = vmul.f32 %v1790_v2, %v7129_v6  ;;  %v1837_v28 = vmul.f32 %v1836_v9, %v7095_v35 }
 0x321   :  { %12054 = vst [vmem:[#allocation270_spill] sm:$0xff] %v7356_v0  ;;  %v1798_v0 = vmul.f32 %v1790_v2, %v7138_v50  ;;  %v1840_v2 = vmul.f32 %v1836_v9, %v7111_v1 }
 0x324   :  { %1815 = vrot.lane.b32.xlu1 %v1795_v37, %s6151_s24  ;;  %1813 = vrot.lane.b32.xlu0 %v1794_v24, %s6151_s24 }
 0x325   :  { %1817 = vrot.lane.b32.xlu2 %v1796_v13, %s6151_s24 }
 0x326   :  { %v7364_v5 = vpop.permute.xlu1 %1581  ;;  %v7366_v7 = vpop.permute.xlu0 %1579 }
 0x327   :  { %12055 = vst [vmem:[#allocation271_spill] sm:$0xff] %v7364_v5  ;;  %v7368_v43 = vpop.permute.xlu2 %1631  ;;  %v1838_v5 = vmul.f32 %v1836_v9, %v7102_v10 }
 0x328   :  { %12056 = vst [vmem:[#allocation272_spill] sm:$0xff] %v7366_v7 }
 0x329   :  { %12057 = vst [vmem:[#allocation273_spill] sm:$0xff] %v7368_v43  ;;  %v1839_v43 = vmul.f32 %v1836_v9, %v7113_v14 }
 0x32c   :  { %1821 = vrot.lane.b32.xlu1 %v1798_v0, %s6151_s24  ;;  %1819 = vrot.lane.b32.xlu0 %v1797_v8, %s6151_s24 }
 0x32d   :  { %1853 = vrot.lane.b32.xlu2 %v1837_v28, %s6152_s26 }
 0x32e   :  { %v7376_v24 = vpop.permute.xlu1 %1587  ;;  %v7378_v13 = vpop.permute.xlu0 %1585 }
 0x32f   :  { %12058 = vst [vmem:[#allocation274_spill] sm:$0xff] %v7376_v24  ;;  %v7380_v37 = vpop.permute.xlu2 %1637  ;;  %v1843_v24 = vmul.f32 %v1836_v9, %v7129_v6 }
 0x330   :  { %12059 = vst [vmem:[#allocation275_spill] sm:$0xff] %v7378_v13  ;;  %v1841_v13 = vmul.f32 %v1836_v9, %v7120_v36 }
 0x331   :  { %12060 = vst [vmem:[#allocation276_spill] sm:$0xff] %v7380_v37  ;;  %v1842_v37 = vmul.f32 %v1836_v9, %v7131_v51 }
 0x334   :  { %1857 = vrot.lane.b32.xlu1 %v1839_v43, %s6152_s26  ;;  %1855 = vrot.lane.b32.xlu0 %v1838_v5, %s6152_s26  ;;  %v1882_v5 = vstv %s5851_s7  ;;  %s5852_s7 = sld [smem:[#allocation8 + $0x8b]] }
 0x335   :  { %1859 = vrot.lane.b32.xlu2 %v1840_v2, %s6152_s26  ;;  %v1884_v7 = vmul.f32 %v1882_v5, %v7102_v10 }
 0x336   :  { %v7388_v28 = vpop.permute.xlu1 %1623  ;;  %v7390_v8 = vpop.permute.xlu0 %1591 }
 0x337   :  { %12061 = vst [vmem:[#allocation277_spill] sm:$0xff] %v7388_v28  ;;  %v7392_v0 = vpop.permute.xlu2 %1673 }
 0x338   :  { %12062 = vst [vmem:[#allocation278_spill] sm:$0xff] %v7390_v8  ;;  %v1844_v8 = vmul.f32 %v1836_v9, %v7138_v50  ;;  %v1887_v9 = vmul.f32 %v1882_v5, %v7120_v36 }
 0x339   :  { %12063 = vst [vmem:[#allocation279_spill] sm:$0xff] %v7392_v0  ;;  %v1883_v0 = vmul.f32 %v1882_v5, %v7095_v35 }
 0x33c   :  { %1863 = vrot.lane.b32.xlu1 %v1842_v37, %s6152_s26  ;;  %1861 = vrot.lane.b32.xlu0 %v1841_v13, %s6152_s26 }
 0x33d   :  { %1865 = vrot.lane.b32.xlu2 %v1843_v24, %s6152_s26 }
 0x33e   :  { %v7400_v43 = vpop.permute.xlu1 %1629  ;;  %v7402_v2 = vpop.permute.xlu0 %1627 }
 0x33f   :  { %12064 = vst [vmem:[#allocation280_spill] sm:$0xff] %v7400_v43  ;;  %v7404_v28 = vpop.permute.xlu2 %1679 }
 0x340   :  { %12065 = vst [vmem:[#allocation281_spill] sm:$0xff] %v7402_v2  ;;  %v1885_v2 = vmul.f32 %v1882_v5, %v7113_v14 }
 0x341   :  { %12066 = vst [vmem:[#allocation282_spill] sm:$0xff] %v7404_v28  ;;  %v1886_v28 = vmul.f32 %v1882_v5, %v7111_v1 }
 0x344   :  { %1899 = vrot.lane.b32.xlu1 %v1883_v0, %s6153_s28  ;;  %1867 = vrot.lane.b32.xlu0 %v1844_v8, %s6152_s26 }
 0x345   :  { %1901 = vrot.lane.b32.xlu2 %v1884_v7, %s6153_s28 }
 0x346   :  { %v7412_v13 = vpop.permute.xlu1 %1635  ;;  %v7414_v24 = vpop.permute.xlu0 %1633 }
 0x347   :  { %12067 = vst [vmem:[#allocation283_spill] sm:$0xff] %v7412_v13  ;;  %v7416_v37 = vpop.permute.xlu2 %1715  ;;  %v1890_v13 = vmul.f32 %v1882_v5, %v7138_v50 }
 0x348   :  { %12068 = vst [vmem:[#allocation284_spill] sm:$0xff] %v7414_v24  ;;  %v1888_v24 = vmul.f32 %v1882_v5, %v7131_v51 }
 0x349   :  { %12069 = vst [vmem:[#allocation285_spill] sm:$0xff] %v7416_v37  ;;  %v1889_v37 = vmul.f32 %v1882_v5, %v7129_v6 }
 0x34c   :  { %1905 = vrot.lane.b32.xlu1 %v1886_v28, %s6153_s28  ;;  %1903 = vrot.lane.b32.xlu0 %v1885_v2, %s6153_s28  ;;  %v1928_v28 = vstv %s5852_s7  ;;  %s5853_s7 = sld [smem:[#allocation8 + $0x8c]] }
 0x34d   :  { %1907 = vrot.lane.b32.xlu2 %v1887_v9, %s6153_s28  ;;  %v1931_v43 = vmul.f32 %v1928_v28, %v7113_v14 }
 0x34e   :  { %v7424_v7 = vpop.permute.xlu1 %1671  ;;  %v7426_v8 = vpop.permute.xlu0 %1669 }
 0x34f   :  { %12070 = vst [vmem:[#allocation286_spill] sm:$0xff] %v7424_v7  ;;  %v7428_v0 = vpop.permute.xlu2 %1721  ;;  %v1929_v7 = vmul.f32 %v1928_v28, %v7095_v35 }
 0x350   :  { %12071 = vst [vmem:[#allocation287_spill] sm:$0xff] %v7426_v8 }
 0x351   :  { %12072 = vst [vmem:[#allocation288_spill] sm:$0xff] %v7428_v0  ;;  %v1930_v0 = vmul.f32 %v1928_v28, %v7102_v10 }
 0x354   :  { %1911 = vrot.lane.b32.xlu1 %v1889_v37, %s6153_s28  ;;  %1909 = vrot.lane.b32.xlu0 %v1888_v24, %s6153_s28  ;;  %v1933_v37 = vmul.f32 %v1928_v28, %v7120_v36 }
 0x355   :  { %1913 = vrot.lane.b32.xlu2 %v1890_v13, %s6153_s28 }
 0x356   :  { %v7436_v2 = vpop.permute.xlu1 %1677  ;;  %v7438_v9 = vpop.permute.xlu0 %1675 }
 0x357   :  { %12073 = vst [vmem:[#allocation289_spill] sm:$0xff] %v7436_v2  ;;  %v7440_v8 = vpop.permute.xlu2 %1727 }
 0x358   :  { %12074 = vst [vmem:[#allocation290_spill] sm:$0xff] %v7438_v9  ;;  %v1934_v9 = vmul.f32 %v1928_v28, %v7131_v51 }
 0x359   :  { %12075 = vst [vmem:[#allocation291_spill] sm:$0xff] %v7440_v8  ;;  %v1932_v8 = vmul.f32 %v1928_v28, %v7111_v1 }
 0x35c   :  { %1947 = vrot.lane.b32.xlu1 %v1930_v0, %s6154_s30  ;;  %1945 = vrot.lane.b32.xlu0 %v1929_v7, %s6154_s30 }
 0x35d   :  { %1949 = vrot.lane.b32.xlu2 %v1931_v43, %s6154_s30 }
 0x35e   :  { %v7448_v5 = vpop.permute.xlu1 %1683  ;;  %v7450_v13 = vpop.permute.xlu0 %1681 }
 0x35f   :  { %12076 = vst [vmem:[#allocation292_spill] sm:$0xff] %v7448_v5  ;;  %v7452_v24 = vpop.permute.xlu2 %1763  ;;  %v1974_v5 = vstv %s5853_s7  ;;  %s5854_s7 = sld [smem:[#allocation8 + $0x8d]] }
 0x360   :  { %12077 = vst [vmem:[#allocation293_spill] sm:$0xff] %v7450_v13  ;;  %v1935_v13 = vmul.f32 %v1928_v28, %v7129_v6  ;;  %v1975_v2 = vmul.f32 %v1974_v5, %v7095_v35 }
 0x361   :  { %12078 = vst [vmem:[#allocation294_spill] sm:$0xff] %v7452_v24  ;;  %v1936_v24 = vmul.f32 %v1928_v28, %v7138_v50  ;;  %v1978_v28 = vmul.f32 %v1974_v5, %v7111_v1 }
 0x364   :  { %1953 = vrot.lane.b32.xlu1 %v1933_v37, %s6154_s30  ;;  %1951 = vrot.lane.b32.xlu0 %v1932_v8, %s6154_s30 }
 0x365   :  { %1955 = vrot.lane.b32.xlu2 %v1934_v9, %s6154_s30 }
 0x366   :  { %v7460_v43 = vpop.permute.xlu1 %1719  ;;  %v7462_v7 = vpop.permute.xlu0 %1717 }
 0x367   :  { %12079 = vst [vmem:[#allocation295_spill] sm:$0xff] %v7460_v43  ;;  %v7464_v0 = vpop.permute.xlu2 %1769  ;;  %v1976_v43 = vmul.f32 %v1974_v5, %v7102_v10 }
 0x368   :  { %12080 = vst [vmem:[#allocation296_spill] sm:$0xff] %v7462_v7 }
 0x369   :  { %12081 = vst [vmem:[#allocation297_spill] sm:$0xff] %v7464_v0  ;;  %v1977_v0 = vmul.f32 %v1974_v5, %v7113_v14 }
 0x36c   :  { %1959 = vrot.lane.b32.xlu1 %v1936_v24, %s6154_s30  ;;  %1957 = vrot.lane.b32.xlu0 %v1935_v13, %s6154_s30 }
 0x36d   :  { %1991 = vrot.lane.b32.xlu2 %v1975_v2, %s6155_s8 }
 0x36e   :  { %v7472_v8 = vpop.permute.xlu1 %1725  ;;  %v7474_v9 = vpop.permute.xlu0 %1723 }
 0x36f   :  { %12082 = vst [vmem:[#allocation298_spill] sm:$0xff] %v7472_v8  ;;  %v7476_v37 = vpop.permute.xlu2 %1775  ;;  %v1981_v8 = vmul.f32 %v1974_v5, %v7129_v6 }
 0x370   :  { %12083 = vst [vmem:[#allocation299_spill] sm:$0xff] %v7474_v9  ;;  %v1979_v9 = vmul.f32 %v1974_v5, %v7120_v36 }
 0x371   :  { %12084 = vst [vmem:[#allocation300_spill] sm:$0xff] %v7476_v37  ;;  %v1980_v37 = vmul.f32 %v1974_v5, %v7131_v51 }
 0x374   :  { %1995 = vrot.lane.b32.xlu1 %v1977_v0, %s6155_s8  ;;  %1993 = vrot.lane.b32.xlu0 %v1976_v43, %s6155_s8  ;;  %v2020_v43 = vstv %s5854_s7  ;;  %s5855_s7 = sld [smem:[#allocation8 + $0x8e]] }
 0x375   :  { %1997 = vrot.lane.b32.xlu2 %v1978_v28, %s6155_s8  ;;  %v2022_v7 = vmul.f32 %v2020_v43, %v7102_v10 }
 0x376   :  { %v7484_v2 = vpop.permute.xlu1 %1761  ;;  %v7486_v13 = vpop.permute.xlu0 %1729 }
 0x377   :  { %12085 = vst [vmem:[#allocation301_spill] sm:$0xff] %v7484_v2  ;;  %v7488_v24 = vpop.permute.xlu2 %1811  ;;  %v1982_v2 = vmul.f32 %v1974_v5, %v7138_v50  ;;  %v2025_v5 = vmul.f32 %v2020_v43, %v7120_v36 }
 0x378   :  { %12086 = vst [vmem:[#allocation302_spill] sm:$0xff] %v7486_v13 }
 0x379   :  { %12087 = vst [vmem:[#allocation303_spill] sm:$0xff] %v7488_v24  ;;  %v2021_v24 = vmul.f32 %v2020_v43, %v7095_v35 }
 0x37c   :  { %2001 = vrot.lane.b32.xlu1 %v1980_v37, %s6155_s8  ;;  %1999 = vrot.lane.b32.xlu0 %v1979_v9, %s6155_s8 }
 0x37d   :  { %2003 = vrot.lane.b32.xlu2 %v1981_v8, %s6155_s8 }
 0x37e   :  { %v7496_v0 = vpop.permute.xlu1 %1767  ;;  %v7498_v28 = vpop.permute.xlu0 %1765 }
 0x37f   :  { %12088 = vst [vmem:[#allocation304_spill] sm:$0xff] %v7496_v0  ;;  %v7500_v13 = vpop.permute.xlu2 %1817 }
 0x380   :  { %12089 = vst [vmem:[#allocation305_spill] sm:$0xff] %v7498_v28  ;;  %v2023_v28 = vmul.f32 %v2020_v43, %v7113_v14 }
 0x381   :  { %12090 = vst [vmem:[#allocation306_spill] sm:$0xff] %v7500_v13  ;;  %v2024_v13 = vmul.f32 %v2020_v43, %v7111_v1 }
 0x384   :  { %2037 = vrot.lane.b32.xlu1 %v2021_v24, %s6156_s10  ;;  %2005 = vrot.lane.b32.xlu0 %v1982_v2, %s6155_s8 }
 0x385   :  { %2039 = vrot.lane.b32.xlu2 %v2022_v7, %s6156_s10 }
 0x386   :  { %v7508_v9 = vpop.permute.xlu1 %1773  ;;  %v7510_v8 = vpop.permute.xlu0 %1771 }
 0x387   :  { %12091 = vst [vmem:[#allocation307_spill] sm:$0xff] %v7508_v9  ;;  %v7512_v37 = vpop.permute.xlu2 %1853  ;;  %v2028_v9 = vmul.f32 %v2020_v43, %v7138_v50 }
 0x388   :  { %12092 = vst [vmem:[#allocation308_spill] sm:$0xff] %v7510_v8  ;;  %v2026_v8 = vmul.f32 %v2020_v43, %v7131_v51 }
 0x389   :  { %12093 = vst [vmem:[#allocation309_spill] sm:$0xff] %v7512_v37  ;;  %v2027_v37 = vmul.f32 %v2020_v43, %v7129_v6 }
 0x38c   :  { %2043 = vrot.lane.b32.xlu1 %v2024_v13, %s6156_s10  ;;  %2041 = vrot.lane.b32.xlu0 %v2023_v28, %s6156_s10  ;;  %v2066_v13 = vstv %s5855_s7  ;;  %s5856_s7 = sld [smem:[#allocation8 + $0x8f]] }
 0x38d   :  { %2045 = vrot.lane.b32.xlu2 %v2025_v5, %s6156_s10  ;;  %v2069_v0 = vmul.f32 %v2066_v13, %v7113_v14 }
 0x38e   :  { %v7520_v7 = vpop.permute.xlu1 %1809  ;;  %v7522_v2 = vpop.permute.xlu0 %1807 }
 0x38f   :  { %12094 = vst [vmem:[#allocation310_spill] sm:$0xff] %v7520_v7  ;;  %v7524_v24 = vpop.permute.xlu2 %1859  ;;  %v2067_v7 = vmul.f32 %v2066_v13, %v7095_v35 }
 0x390   :  { %12095 = vst [vmem:[#allocation311_spill] sm:$0xff] %v7522_v2 }
 0x391   :  { %12096 = vst [vmem:[#allocation312_spill] sm:$0xff] %v7524_v24  ;;  %v2068_v24 = vmul.f32 %v2066_v13, %v7102_v10 }
 0x394   :  { %2049 = vrot.lane.b32.xlu1 %v2027_v37, %s6156_s10  ;;  %2047 = vrot.lane.b32.xlu0 %v2026_v8, %s6156_s10  ;;  %v2071_v37 = vmul.f32 %v2066_v13, %v7120_v36 }
 0x395   :  { %2051 = vrot.lane.b32.xlu2 %v2028_v9, %s6156_s10 }
 0x396   :  { %v7532_v28 = vpop.permute.xlu1 %1815  ;;  %v7534_v5 = vpop.permute.xlu0 %1813 }
 0x397   :  { %12097 = vst [vmem:[#allocation313_spill] sm:$0xff] %v7532_v28  ;;  %v7536_v2 = vpop.permute.xlu2 %1865 }
 0x398   :  { %12098 = vst [vmem:[#allocation314_spill] sm:$0xff] %v7534_v5  ;;  %v2072_v5 = vmul.f32 %v2066_v13, %v7131_v51 }
 0x399   :  { %12099 = vst [vmem:[#allocation315_spill] sm:$0xff] %v7536_v2  ;;  %v2070_v2 = vmul.f32 %v2066_v13, %v7111_v1 }
 0x39c   :  { %2085 = vrot.lane.b32.xlu1 %v2068_v24, %s6157_s1  ;;  %2083 = vrot.lane.b32.xlu0 %v2067_v7, %s6157_s1 }
 0x39d   :  { %2087 = vrot.lane.b32.xlu2 %v2069_v0, %s6157_s1 }
 0x39e   :  { %v7544_v43 = vpop.permute.xlu1 %1821  ;;  %v7546_v9 = vpop.permute.xlu0 %1819 }
 0x39f   :  { %12100 = vst [vmem:[#allocation316_spill] sm:$0xff] %v7544_v43  ;;  %v7548_v8 = vpop.permute.xlu2 %1901  ;;  %v2112_v43 = vstv %s5856_s7  ;;  %s5857_s7 = sld [smem:[#allocation8 + $0x90]] }
 0x3a0   :  { %12101 = vst [vmem:[#allocation317_spill] sm:$0xff] %v7546_v9  ;;  %v2073_v9 = vmul.f32 %v2066_v13, %v7129_v6  ;;  %v2113_v28 = vmul.f32 %v2112_v43, %v7095_v35 }
 0x3a1   :  { %12102 = vst [vmem:[#allocation318_spill] sm:$0xff] %v7548_v8  ;;  %v2074_v8 = vmul.f32 %v2066_v13, %v7138_v50  ;;  %v2116_v13 = vmul.f32 %v2112_v43, %v7111_v1 }
 0x3a4   :  { %2091 = vrot.lane.b32.xlu1 %v2071_v37, %s6157_s1  ;;  %2089 = vrot.lane.b32.xlu0 %v2070_v2, %s6157_s1 }
 0x3a5   :  { %2093 = vrot.lane.b32.xlu2 %v2072_v5, %s6157_s1 }
 0x3a6   :  { %v7556_v0 = vpop.permute.xlu1 %1857  ;;  %v7558_v7 = vpop.permute.xlu0 %1855 }
 0x3a7   :  { %12103 = vst [vmem:[#allocation319_spill] sm:$0xff] %v7556_v0  ;;  %v7560_v24 = vpop.permute.xlu2 %1907  ;;  %v2114_v0 = vmul.f32 %v2112_v43, %v7102_v10 }
 0x3a8   :  { %12104 = vst [vmem:[#allocation320_spill] sm:$0xff] %v7558_v7 }
 0x3a9   :  { %12105 = vst [vmem:[#allocation321_spill] sm:$0xff] %v7560_v24  ;;  %v2115_v24 = vmul.f32 %v2112_v43, %v7113_v14 }
 0x3ac   :  { %2097 = vrot.lane.b32.xlu1 %v2074_v8, %s6157_s1  ;;  %2095 = vrot.lane.b32.xlu0 %v2073_v9, %s6157_s1 }
 0x3ad   :  { %2129 = vrot.lane.b32.xlu2 %v2113_v28, %s6158_s13 }
 0x3ae   :  { %v7568_v2 = vpop.permute.xlu1 %1863  ;;  %v7570_v5 = vpop.permute.xlu0 %1861 }
 0x3af   :  { %12106 = vst [vmem:[#allocation322_spill] sm:$0xff] %v7568_v2  ;;  %v7572_v37 = vpop.permute.xlu2 %1913  ;;  %v2119_v2 = vmul.f32 %v2112_v43, %v7129_v6 }
 0x3b0   :  { %12107 = vst [vmem:[#allocation323_spill] sm:$0xff] %v7570_v5  ;;  %v2117_v5 = vmul.f32 %v2112_v43, %v7120_v36 }
 0x3b1   :  { %12108 = vst [vmem:[#allocation324_spill] sm:$0xff] %v7572_v37  ;;  %v2118_v37 = vmul.f32 %v2112_v43, %v7131_v51 }
 0x3b4   :  { %2133 = vrot.lane.b32.xlu1 %v2115_v24, %s6158_s13  ;;  %2131 = vrot.lane.b32.xlu0 %v2114_v0, %s6158_s13  ;;  %v2158_v0 = vstv %s5857_s7  ;;  %s5858_s7 = sld [smem:[#allocation8 + $0x91]] }
 0x3b5   :  { %2135 = vrot.lane.b32.xlu2 %v2116_v13, %s6158_s13  ;;  %v2160_v7 = vmul.f32 %v2158_v0, %v7102_v10 }
 0x3b6   :  { %v7580_v28 = vpop.permute.xlu1 %1899  ;;  %v7582_v9 = vpop.permute.xlu0 %1867 }
 0x3b7   :  { %12109 = vst [vmem:[#allocation325_spill] sm:$0xff] %v7580_v28  ;;  %v7584_v8 = vpop.permute.xlu2 %1949  ;;  %v2120_v28 = vmul.f32 %v2112_v43, %v7138_v50  ;;  %v2163_v43 = vmul.f32 %v2158_v0, %v7120_v36 }
 0x3b8   :  { %12110 = vst [vmem:[#allocation326_spill] sm:$0xff] %v7582_v9 }
 0x3b9   :  { %12111 = vst [vmem:[#allocation327_spill] sm:$0xff] %v7584_v8  ;;  %v2159_v8 = vmul.f32 %v2158_v0, %v7095_v35 }
 0x3bc   :  { %2139 = vrot.lane.b32.xlu1 %v2118_v37, %s6158_s13  ;;  %2137 = vrot.lane.b32.xlu0 %v2117_v5, %s6158_s13 }
 0x3bd   :  { %2141 = vrot.lane.b32.xlu2 %v2119_v2, %s6158_s13 }
 0x3be   :  { %v7592_v24 = vpop.permute.xlu1 %1905  ;;  %v7594_v13 = vpop.permute.xlu0 %1903 }
 0x3bf   :  { %12112 = vst [vmem:[#allocation328_spill] sm:$0xff] %v7592_v24  ;;  %v7596_v9 = vpop.permute.xlu2 %1955 }
 0x3c0   :  { %12113 = vst [vmem:[#allocation329_spill] sm:$0xff] %v7594_v13  ;;  %v2161_v13 = vmul.f32 %v2158_v0, %v7113_v14 }
 0x3c1   :  { %12114 = vst [vmem:[#allocation330_spill] sm:$0xff] %v7596_v9  ;;  %v2162_v9 = vmul.f32 %v2158_v0, %v7111_v1 }
 0x3c4   :  { %2175 = vrot.lane.b32.xlu1 %v2159_v8, %s6159_s17  ;;  %2143 = vrot.lane.b32.xlu0 %v2120_v28, %s6158_s13 }
 0x3c5   :  { %2177 = vrot.lane.b32.xlu2 %v2160_v7, %s6159_s17 }
 0x3c6   :  { %v7604_v5 = vpop.permute.xlu1 %1911  ;;  %v7606_v2 = vpop.permute.xlu0 %1909 }
 0x3c7   :  { %12115 = vst [vmem:[#allocation331_spill] sm:$0xff] %v7604_v5  ;;  %v7608_v37 = vpop.permute.xlu2 %1991  ;;  %v2164_v5 = vmul.f32 %v2158_v0, %v7131_v51 }
 0x3c8   :  { %12116 = vst [vmem:[#allocation332_spill] sm:$0xff] %v7606_v2  ;;  %v2166_v2 = vmul.f32 %v2158_v0, %v7138_v50 }
 0x3c9   :  { %12117 = vst [vmem:[#allocation333_spill] sm:$0xff] %v7608_v37  ;;  %v2165_v37 = vmul.f32 %v2158_v0, %v7129_v6 }
 0x3cc   :  { %2181 = vrot.lane.b32.xlu1 %v2162_v9, %s6159_s17  ;;  %2179 = vrot.lane.b32.xlu0 %v2161_v13, %s6159_s17  ;;  %v2204_v9 = vstv %s5858_s7  ;;  %s5859_s7 = sld [smem:[#allocation8 + $0x92]] }
 0x3cd   :  { %2183 = vrot.lane.b32.xlu2 %v2163_v43, %s6159_s17  ;;  %v2207_v24 = vmul.f32 %v2204_v9, %v7113_v14 }
 0x3ce   :  { %v7616_v7 = vpop.permute.xlu1 %1947  ;;  %v7618_v28 = vpop.permute.xlu0 %1945 }
 0x3cf   :  { %12118 = vst [vmem:[#allocation334_spill] sm:$0xff] %v7616_v7  ;;  %v7620_v8 = vpop.permute.xlu2 %1997  ;;  %v2205_v7 = vmul.f32 %v2204_v9, %v7095_v35 }
 0x3d0   :  { %12119 = vst [vmem:[#allocation335_spill] sm:$0xff] %v7618_v28 }
 0x3d1   :  { %12120 = vst [vmem:[#allocation336_spill] sm:$0xff] %v7620_v8  ;;  %v2206_v8 = vmul.f32 %v2204_v9, %v7102_v10 }
 0x3d4   :  { %2187 = vrot.lane.b32.xlu1 %v2165_v37, %s6159_s17  ;;  %2185 = vrot.lane.b32.xlu0 %v2164_v5, %s6159_s17  ;;  %v2209_v37 = vmul.f32 %v2204_v9, %v7120_v36 }
 0x3d5   :  { %2189 = vrot.lane.b32.xlu2 %v2166_v2, %s6159_s17 }
 0x3d6   :  { %v7628_v13 = vpop.permute.xlu1 %1953  ;;  %v7630_v43 = vpop.permute.xlu0 %1951 }
 0x3d7   :  { %12121 = vst [vmem:[#allocation337_spill] sm:$0xff] %v7628_v13  ;;  %v7632_v28 = vpop.permute.xlu2 %2003  ;;  %v2210_v13 = vmul.f32 %v2204_v9, %v7131_v51 }
 0x3d8   :  { %12122 = vst [vmem:[#allocation338_spill] sm:$0xff] %v7630_v43 }
 0x3d9   :  { %12123 = vst [vmem:[#allocation339_spill] sm:$0xff] %v7632_v28  ;;  %v2208_v28 = vmul.f32 %v2204_v9, %v7111_v1 }
 0x3dc   :  { %2223 = vrot.lane.b32.xlu1 %v2206_v8, %s6160_s21  ;;  %2221 = vrot.lane.b32.xlu0 %v2205_v7, %s6160_s21 }
 0x3dd   :  { %2225 = vrot.lane.b32.xlu2 %v2207_v24, %s6160_s21 }
 0x3de   :  { %v7640_v0 = vpop.permute.xlu1 %1959  ;;  %v7642_v5 = vpop.permute.xlu0 %1957 }
 0x3df   :  { %12124 = vst [vmem:[#allocation340_spill] sm:$0xff] %v7640_v0  ;;  %v7644_v2 = vpop.permute.xlu2 %2039  ;;  %v2250_v0 = vstv %s5859_s7  ;;  %s5860_s7 = sld [smem:[#allocation8 + $0x93]] }
 0x3e0   :  { %12125 = vst [vmem:[#allocation341_spill] sm:$0xff] %v7642_v5  ;;  %v2211_v5 = vmul.f32 %v2204_v9, %v7129_v6  ;;  %v2251_v43 = vmul.f32 %v2250_v0, %v7095_v35 }
 0x3e1   :  { %12126 = vst [vmem:[#allocation342_spill] sm:$0xff] %v7644_v2  ;;  %v2212_v2 = vmul.f32 %v2204_v9, %v7138_v50  ;;  %v2254_v9 = vmul.f32 %v2250_v0, %v7111_v1 }
 0x3e4   :  { %2229 = vrot.lane.b32.xlu1 %v2209_v37, %s6160_s21  ;;  %2227 = vrot.lane.b32.xlu0 %v2208_v28, %s6160_s21 }
 0x3e5   :  { %2231 = vrot.lane.b32.xlu2 %v2210_v13, %s6160_s21 }
 0x3e6   :  { %v7652_v24 = vpop.permute.xlu1 %1995  ;;  %v7654_v7 = vpop.permute.xlu0 %1993 }
 0x3e7   :  { %12127 = vst [vmem:[#allocation343_spill] sm:$0xff] %v7652_v24  ;;  %v7656_v8 = vpop.permute.xlu2 %2045  ;;  %v2252_v24 = vmul.f32 %v2250_v0, %v7102_v10 }
 0x3e8   :  { %12128 = vst [vmem:[#allocation344_spill] sm:$0xff] %v7654_v7 }
 0x3e9   :  { %12129 = vst [vmem:[#allocation345_spill] sm:$0xff] %v7656_v8  ;;  %v2253_v8 = vmul.f32 %v2250_v0, %v7113_v14 }
 0x3ec   :  { %2235 = vrot.lane.b32.xlu1 %v2212_v2, %s6160_s21  ;;  %2233 = vrot.lane.b32.xlu0 %v2211_v5, %s6160_s21 }
 0x3ed   :  { %2267 = vrot.lane.b32.xlu2 %v2251_v43, %s6161_s25 }
 0x3ee   :  { %v7664_v28 = vpop.permute.xlu1 %2001  ;;  %v7666_v13 = vpop.permute.xlu0 %1999 }
 0x3ef   :  { %12130 = vst [vmem:[#allocation346_spill] sm:$0xff] %v7664_v28  ;;  %v7668_v37 = vpop.permute.xlu2 %2051  ;;  %v2257_v28 = vmul.f32 %v2250_v0, %v7129_v6 }
 0x3f0   :  { %12131 = vst [vmem:[#allocation347_spill] sm:$0xff] %v7666_v13  ;;  %v2255_v13 = vmul.f32 %v2250_v0, %v7120_v36 }
 0x3f1   :  { %12132 = vst [vmem:[#allocation348_spill] sm:$0xff] %v7668_v37  ;;  %v2256_v37 = vmul.f32 %v2250_v0, %v7131_v51 }
 0x3f4   :  { %2271 = vrot.lane.b32.xlu1 %v2253_v8, %s6161_s25  ;;  %2269 = vrot.lane.b32.xlu0 %v2252_v24, %s6161_s25  ;;  %v2296_v24 = vstv %s5860_s7  ;;  %s5861_s7 = sld [smem:[#allocation8 + $0x94]] }
 0x3f5   :  { %2273 = vrot.lane.b32.xlu2 %v2254_v9, %s6161_s25  ;;  %v2298_v7 = vmul.f32 %v2296_v24, %v7102_v10 }
 0x3f6   :  { %v7676_v43 = vpop.permute.xlu1 %2037  ;;  %v7678_v5 = vpop.permute.xlu0 %2005 }
 0x3f7   :  { %12133 = vst [vmem:[#allocation349_spill] sm:$0xff] %v7676_v43  ;;  %v7680_v2 = vpop.permute.xlu2 %2087  ;;  %v2258_v43 = vmul.f32 %v2250_v0, %v7138_v50  ;;  %v2301_v0 = vmul.f32 %v2296_v24, %v7120_v36 }
 0x3f8   :  { %12134 = vst [vmem:[#allocation350_spill] sm:$0xff] %v7678_v5 }
 0x3f9   :  { %12135 = vst [vmem:[#allocation351_spill] sm:$0xff] %v7680_v2  ;;  %v2297_v2 = vmul.f32 %v2296_v24, %v7095_v35 }
 0x3fc   :  { %2277 = vrot.lane.b32.xlu1 %v2256_v37, %s6161_s25  ;;  %2275 = vrot.lane.b32.xlu0 %v2255_v13, %s6161_s25 }
 0x3fd   :  { %2279 = vrot.lane.b32.xlu2 %v2257_v28, %s6161_s25 }
 0x3fe   :  { %v7688_v8 = vpop.permute.xlu1 %2043  ;;  %v7690_v9 = vpop.permute.xlu0 %2041 }
 0x3ff   :  { %12136 = vst [vmem:[#allocation352_spill] sm:$0xff] %v7688_v8  ;;  %v7692_v5 = vpop.permute.xlu2 %2093 }
 0x400   :  { %12137 = vst [vmem:[#allocation353_spill] sm:$0xff] %v7690_v9  ;;  %v2299_v9 = vmul.f32 %v2296_v24, %v7113_v14 }
 0x401   :  { %12138 = vst [vmem:[#allocation354_spill] sm:$0xff] %v7692_v5  ;;  %v2300_v5 = vmul.f32 %v2296_v24, %v7111_v1 }
 0x404   :  { %2313 = vrot.lane.b32.xlu1 %v2297_v2, %s11780_s29  ;;  %2281 = vrot.lane.b32.xlu0 %v2258_v43, %s6161_s25 }
 0x405   :  { %2315 = vrot.lane.b32.xlu2 %v2298_v7, %s11780_s29 }
 0x406   :  { %v7700_v13 = vpop.permute.xlu1 %2049  ;;  %v7702_v28 = vpop.permute.xlu0 %2047 }
 0x407   :  { %12139 = vst [vmem:[#allocation355_spill] sm:$0xff] %v7700_v13  ;;  %v7704_v37 = vpop.permute.xlu2 %2129  ;;  %v2304_v13 = vmul.f32 %v2296_v24, %v7138_v50 }
 0x408   :  { %12140 = vst [vmem:[#allocation356_spill] sm:$0xff] %v7702_v28  ;;  %v2302_v28 = vmul.f32 %v2296_v24, %v7131_v51 }
 0x409   :  { %12141 = vst [vmem:[#allocation357_spill] sm:$0xff] %v7704_v37  ;;  %v2303_v37 = vmul.f32 %v2296_v24, %v7129_v6 }
 0x40c   :  { %2319 = vrot.lane.b32.xlu1 %v2300_v5, %s11780_s29  ;;  %2317 = vrot.lane.b32.xlu0 %v2299_v9, %s11780_s29  ;;  %v2342_v5 = vstv %s5861_s7  ;;  %s5862_s7 = sld [smem:[#allocation8 + $0x95]] }
 0x40d   :  { %2321 = vrot.lane.b32.xlu2 %v2301_v0, %s11780_s29  ;;  %v2345_v8 = vmul.f32 %v2342_v5, %v7113_v14 }
 0x40e   :  { %v7712_v7 = vpop.permute.xlu1 %2085  ;;  %v7714_v43 = vpop.permute.xlu0 %2083 }
 0x40f   :  { %12142 = vst [vmem:[#allocation358_spill] sm:$0xff] %v7712_v7  ;;  %v7716_v2 = vpop.permute.xlu2 %2135  ;;  %v2343_v7 = vmul.f32 %v2342_v5, %v7095_v35  ;;  %v2348_v35 = vmul.f32 %v2342_v5, %v7131_v51 }
 0x410   :  { %12143 = vst [vmem:[#allocation359_spill] sm:$0xff] %v7714_v43 }
 0x411   :  { %12144 = vst [vmem:[#allocation360_spill] sm:$0xff] %v7716_v2  ;;  %v2344_v2 = vmul.f32 %v2342_v5, %v7102_v10  ;;  %v2346_v10 = vmul.f32 %v2342_v5, %v7111_v1 }
 0x412   :  { %v2388_v1 = vstv %s5862_s7  ;;  %s5863_s7 = sld [smem:[#allocation8 + $0x96]] }
 0x414   :  { %2325 = vrot.lane.b32.xlu1 %v2303_v37, %s11780_s29  ;;  %2323 = vrot.lane.b32.xlu0 %v2302_v28, %s11780_s29  ;;  %v2347_v37 = vmul.f32 %v2342_v5, %v7120_v36  ;;  %v2349_v36 = vmul.f32 %v2342_v5, %v7129_v6 }
 0x415   :  { %2327 = vrot.lane.b32.xlu2 %v2304_v13, %s11780_s29 }
 0x416   :  { %v7724_v9 = vpop.permute.xlu1 %2091  ;;  %v7726_v0 = vpop.permute.xlu0 %2089 }
 0x417   :  { %12145 = vst [vmem:[#allocation361_spill] sm:$0xff] %v7724_v9  ;;  %v7728_v43 = vpop.permute.xlu2 %2141 }
 0x418   :  { %12146 = vst [vmem:[#allocation362_spill] sm:$0xff] %v7726_v0 }
 0x419   :  { %12147 = vst [vmem:[#allocation363_spill] sm:$0xff] %v7728_v43  ;;  %v7774_v43 = vld [vmem:[#allocation4 + $0x58] sm:$0xff] }
 0x41c   :  { %2361 = vrot.lane.b32.xlu1 %v2344_v2, %s11776_s9  ;;  %2359 = vrot.lane.b32.xlu0 %v2343_v7, %s11776_s9  ;;  %v2350_v2 = vmul.f32 %v2342_v5, %v7138_v50  ;;  %v7768_v50 = vld [vmem:[#allocation4 + $0x50] sm:$0xff]  ;;  %v7771_v5 = vld [vmem:[#allocation4 + $0x48] sm:$0xff] }
 0x41d   :  { %2363 = vrot.lane.b32.xlu2 %v2345_v8, %s11776_s9  ;;  %v2391_v6 = vmul.f32 %v7768_v50, %v2388_v1 }
 0x41e   :  { %v7736_v24 = vpop.permute.xlu1 %2097  ;;  %v7738_v13 = vpop.permute.xlu0 %2095 }
 0x41f   :  { %12148 = vst [vmem:[#allocation364_spill] sm:$0xff] %v7736_v24  ;;  %v7740_v28 = vpop.permute.xlu2 %2177  ;;  %v7805_v24 = vld [vmem:[#allocation4 + $0x78] sm:$0xff] }
 0x420   :  { %12149 = vst [vmem:[#allocation365_spill] sm:$0xff] %v7738_v13  ;;  %v2396_v9 = vmul.f32 %v7805_v24, %v2388_v1 }
 0x421   :  { %12150 = vst [vmem:[#allocation366_spill] sm:$0xff] %v7740_v28  ;;  %v7756_v28 = vld [vmem:[#allocation4 + $0x40] sm:$0xff] }
 0x422   :  { %v2389_v51 = vmul.f32 %v7756_v28, %v2388_v1 }
 0x424   :  { %2367 = vrot.lane.b32.xlu1 %v2347_v37, %s11776_s9  ;;  %2365 = vrot.lane.b32.xlu0 %v2346_v10, %s11776_s9 }
 0x425   :  { %2369 = vrot.lane.b32.xlu2 %v2348_v35, %s11776_s9 }
 0x426   :  { %v7748_v14 = vpop.permute.xlu1 %2133  ;;  %v7750_v8 = vpop.permute.xlu0 %2131 }
 0x427   :  { %12151 = vst [vmem:[#allocation367_spill] sm:$0xff] %v7748_v14  ;;  %v7752_v7 = vpop.permute.xlu2 %2183 }
 0x428   :  { %12152 = vst [vmem:[#allocation368_spill] sm:$0xff] %v7750_v8  ;;  %v7789_v8 = vld [vmem:[#allocation4 + $0x60] sm:$0xff] }
 0x429   :  { %12153 = vst [vmem:[#allocation369_spill] sm:$0xff] %v7752_v7  ;;  %v2390_v7 = vmul.f32 %v7771_v5, %v2388_v1  ;;  %v2393_v14 = vmul.f32 %v7789_v8, %v2388_v1 }
 0x42c   :  { %2373 = vrot.lane.b32.xlu1 %v2350_v2, %s11776_s9  ;;  %2371 = vrot.lane.b32.xlu0 %v2349_v36, %s11776_s9  ;;  %v2392_v2 = vmul.f32 %v7774_v43, %v2388_v1 }
 0x42d   :  { %2405 = vrot.lane.b32.xlu2 %v2389_v51, %s11778_s11 }
 0x42e   :  { %v7762_v37 = vpop.permute.xlu1 %2139  ;;  %v7764_v10 = vpop.permute.xlu0 %2137 }
 0x42f   :  { %12154 = vst [vmem:[#allocation370_spill] sm:$0xff] %v7762_v37  ;;  %v7766_v35 = vpop.permute.xlu2 %2189 }
 0x430   :  { %12155 = vst [vmem:[#allocation371_spill] sm:$0xff] %v7764_v10  ;;  %v7786_v10 = vld [vmem:[#allocation4 + $0x68] sm:$0xff] }
 0x431   :  { %12156 = vst [vmem:[#allocation372_spill] sm:$0xff] %v7766_v35  ;;  %v2394_v37 = vmul.f32 %v7786_v10, %v2388_v1 }
 0x434   :  { %2409 = vrot.lane.b32.xlu1 %v2391_v6, %s11778_s11  ;;  %2407 = vrot.lane.b32.xlu0 %v2390_v7, %s11778_s11  ;;  %v7792_v6 = vld [vmem:[#allocation4 + $0x70] sm:$0xff] }
 0x435   :  { %2411 = vrot.lane.b32.xlu2 %v2392_v2, %s11778_s11  ;;  %v2395_v7 = vmul.f32 %v7792_v6, %v2388_v1  ;;  %v2434_v2 = vstv %s5863_s7  ;;  %s5864_s7 = sld [smem:[#allocation8 + $0x97]] }
 0x436   :  { %v7780_v36 = vpop.permute.xlu1 %2175  ;;  %v7782_v51 = vpop.permute.xlu0 %2143  ;;  %v2435_v13 = vmul.f32 %v7756_v28, %v2434_v2  ;;  %v2436_v0 = vmul.f32 %v7771_v5, %v2434_v2  ;;  %v2439_v1 = vmul.f32 %v7789_v8, %v2434_v2 }
 0x437   :  { %12157 = vst [vmem:[#allocation373_spill] sm:$0xff] %v7780_v36  ;;  %v7784_v35 = vpop.permute.xlu2 %2225 }
 0x438   :  { %12158 = vst [vmem:[#allocation374_spill] sm:$0xff] %v7782_v51 }
 0x439   :  { %12159 = vst [vmem:[#allocation375_spill] sm:$0xff] %v7784_v35 }
 0x43c   :  { %2415 = vrot.lane.b32.xlu1 %v2394_v37, %s11778_s11  ;;  %2413 = vrot.lane.b32.xlu0 %v2393_v14, %s11778_s11 }
 0x43d   :  { %2417 = vrot.lane.b32.xlu2 %v2395_v7, %s11778_s11 }
 0x43e   :  { %v7798_v35 = vpop.permute.xlu1 %2181  ;;  %v7800_v36 = vpop.permute.xlu0 %2179 }
 0x43f   :  { %12160 = vst [vmem:[#allocation376_spill] sm:$0xff] %v7798_v35  ;;  %v7802_v51 = vpop.permute.xlu2 %2231 }
 0x440   :  { %12161 = vst [vmem:[#allocation377_spill] sm:$0xff] %v7800_v36  ;;  %v2437_v36 = vmul.f32 %v7768_v50, %v2434_v2 }
 0x441   :  { %12162 = vst [vmem:[#allocation378_spill] sm:$0xff] %v7802_v51  ;;  %v2438_v51 = vmul.f32 %v7774_v43, %v2434_v2 }
 0x444   :  { %2451 = vrot.lane.b32.xlu1 %v2435_v13, %s11774_s19  ;;  %2419 = vrot.lane.b32.xlu0 %v2396_v9, %s11778_s11 }
 0x445   :  { %2453 = vrot.lane.b32.xlu2 %v2436_v0, %s11774_s19 }
 0x446   :  { %v7812_v14 = vpop.permute.xlu1 %2187  ;;  %v7814_v37 = vpop.permute.xlu0 %2185 }
 0x447   :  { %12163 = vst [vmem:[#allocation379_spill] sm:$0xff] %v7812_v14  ;;  %v7816_v7 = vpop.permute.xlu2 %2267  ;;  %v2442_v14 = vmul.f32 %v7805_v24, %v2434_v2 }
 0x448   :  { %12164 = vst [vmem:[#allocation380_spill] sm:$0xff] %v7814_v37  ;;  %v2440_v37 = vmul.f32 %v7786_v10, %v2434_v2 }
 0x449   :  { %12165 = vst [vmem:[#allocation381_spill] sm:$0xff] %v7816_v7  ;;  %v2441_v7 = vmul.f32 %v7792_v6, %v2434_v2 }
 0x44c   :  { %2457 = vrot.lane.b32.xlu1 %v2438_v51, %s11774_s19  ;;  %2455 = vrot.lane.b32.xlu0 %v2437_v36, %s11774_s19  ;;  %v2480_v36 = vstv %s5864_s7  ;;  %s5865_s7 = sld [smem:[#allocation8 + $0x98]] }
 0x44d   :  { %2459 = vrot.lane.b32.xlu2 %v2439_v1, %s11774_s19  ;;  %v2483_v35 = vmul.f32 %v7768_v50, %v2480_v36 }
 0x44e   :  { %v7824_v9 = vpop.permute.xlu1 %2223  ;;  %v7826_v0 = vpop.permute.xlu0 %2221 }
 0x44f   :  { %12166 = vst [vmem:[#allocation382_spill] sm:$0xff] %v7824_v9  ;;  %v7828_v13 = vpop.permute.xlu2 %2273  ;;  %v2481_v9 = vmul.f32 %v7756_v28, %v2480_v36 }
 0x450   :  { %12167 = vst [vmem:[#allocation383_spill] sm:$0xff] %v7826_v0 }
 0x451   :  { %12168 = vst [vmem:[#allocation384_spill] sm:$0xff] %v7828_v13  ;;  %v2482_v13 = vmul.f32 %v7771_v5, %v2480_v36 }
 0x454   :  { %2463 = vrot.lane.b32.xlu1 %v2441_v7, %s11774_s19  ;;  %2461 = vrot.lane.b32.xlu0 %v2440_v37, %s11774_s19  ;;  %v2485_v7 = vmul.f32 %v7789_v8, %v2480_v36 }
 0x455   :  { %2465 = vrot.lane.b32.xlu2 %v2442_v14, %s11774_s19  ;;  %s12204_s19 = smov 101  }
 0x456   :  { %v7836_v51 = vpop.permute.xlu1 %2229  ;;  %v7838_v1 = vpop.permute.xlu0 %2227 }
 0x457   :  { %12169 = vst [vmem:[#allocation385_spill] sm:$0xff] %v7836_v51  ;;  %v7840_v0 = vpop.permute.xlu2 %2279  ;;  %v2486_v51 = vmul.f32 %v7786_v10, %v2480_v36 }
 0x458   :  { %12170 = vst [vmem:[#allocation386_spill] sm:$0xff] %v7838_v1 }
 0x459   :  { %12171 = vst [vmem:[#allocation387_spill] sm:$0xff] %v7840_v0  ;;  %v2484_v0 = vmul.f32 %v7774_v43, %v2480_v36 }
 0x45c   :  { %2499 = vrot.lane.b32.xlu1 %v2482_v13, %s11770_s27  ;;  %2497 = vrot.lane.b32.xlu0 %v2481_v9, %s11770_s27 }
 0x45d   :  { %2501 = vrot.lane.b32.xlu2 %v2483_v35, %s11770_s27 }
 0x45e   :  { %v7848_v2 = vpop.permute.xlu1 %2235  ;;  %v7850_v14 = vpop.permute.xlu0 %2233 }
 0x45f   :  { %12172 = vst [vmem:[#allocation388_spill] sm:$0xff] %v7848_v2  ;;  %v7852_v37 = vpop.permute.xlu2 %2315  ;;  %v2526_v2 = vstv %s5865_s7  ;;  %s5866_s7 = sld [smem:[#allocation8 + $0x99]] }
 0x460   :  { %12173 = vst [vmem:[#allocation389_spill] sm:$0xff] %v7850_v14  ;;  %v2487_v14 = vmul.f32 %v7792_v6, %v2480_v36  ;;  %v2527_v1 = vmul.f32 %v7756_v28, %v2526_v2 }
 0x461   :  { %12174 = vst [vmem:[#allocation390_spill] sm:$0xff] %v7852_v37  ;;  %v2488_v37 = vmul.f32 %v7805_v24, %v2480_v36  ;;  %v2530_v36 = vmul.f32 %v7774_v43, %v2526_v2 }
 0x464   :  { %2505 = vrot.lane.b32.xlu1 %v2485_v7, %s11770_s27  ;;  %2503 = vrot.lane.b32.xlu0 %v2484_v0, %s11770_s27 }
 0x465   :  { %2507 = vrot.lane.b32.xlu2 %v2486_v51, %s11770_s27 }
 0x466   :  { %v7860_v35 = vpop.permute.xlu1 %2271  ;;  %v7862_v9 = vpop.permute.xlu0 %2269 }
 0x467   :  { %12175 = vst [vmem:[#allocation391_spill] sm:$0xff] %v7860_v35  ;;  %v7864_v13 = vpop.permute.xlu2 %2321 }
 0x468   :  { %12176 = vst [vmem:[#allocation392_spill] sm:$0xff] %v7862_v9  ;;  %v2528_v9 = vmul.f32 %v7771_v5, %v2526_v2 }
 0x469   :  { %12177 = vst [vmem:[#allocation393_spill] sm:$0xff] %v7864_v13  ;;  %v2529_v13 = vmul.f32 %v7768_v50, %v2526_v2 }
 0x46c   :  { %2511 = vrot.lane.b32.xlu1 %v2488_v37, %s11770_s27  ;;  %2509 = vrot.lane.b32.xlu0 %v2487_v14, %s11770_s27  ;;  %s12187_s27 = smov 103  }
 0x46d   :  { %2543 = vrot.lane.b32.xlu2 %v2527_v1, %s11772_s0 }
 0x46e   :  { %v7872_v0 = vpop.permute.xlu1 %2277  ;;  %v7874_v51 = vpop.permute.xlu0 %2275 }
 0x46f   :  { %12178 = vst [vmem:[#allocation394_spill] sm:$0xff] %v7872_v0  ;;  %v7876_v7 = vpop.permute.xlu2 %2327  ;;  %v2533_v0 = vmul.f32 %v7792_v6, %v2526_v2 }
 0x470   :  { %12179 = vst [vmem:[#allocation395_spill] sm:$0xff] %v7874_v51  ;;  %v2531_v51 = vmul.f32 %v7789_v8, %v2526_v2 }
 0x471   :  { %12180 = vst [vmem:[#allocation396_spill] sm:$0xff] %v7876_v7  ;;  %v2532_v7 = vmul.f32 %v7786_v10, %v2526_v2 }
 0x474   :  { %2547 = vrot.lane.b32.xlu1 %v2529_v13, %s11772_s0  ;;  %2545 = vrot.lane.b32.xlu0 %v2528_v9, %s11772_s0  ;;  %v2572_v9 = vstv %s5866_s7  ;;  %s5867_s7 = sld [smem:[#allocation8 + $0x9a]] }
 0x475   :  { %2549 = vrot.lane.b32.xlu2 %v2530_v36, %s11772_s0  ;;  %v2574_v35 = vmul.f32 %v7771_v5, %v2572_v9 }
 0x476   :  { %v7884_v1 = vpop.permute.xlu1 %2313  ;;  %v7886_v14 = vpop.permute.xlu0 %2281 }
 0x477   :  { %12181 = vst [vmem:[#allocation397_spill] sm:$0xff] %v7884_v1  ;;  %v7888_v37 = vpop.permute.xlu2 %2363 }
 0x478   :  { %12182 = vst [vmem:[#allocation398_spill] sm:$0xff] %v7886_v14  ;;  %v2534_v14 = vmul.f32 %v7805_v24, %v2526_v2  ;;  %v2577_v2 = vmul.f32 %v7789_v8, %v2572_v9 }
 0x479   :  { %12183 = vst [vmem:[#allocation399_spill] sm:$0xff] %v7888_v37  ;;  %v2573_v37 = vmul.f32 %v7756_v28, %v2572_v9 }
 0x47c   :  { %2553 = vrot.lane.b32.xlu1 %v2532_v7, %s11772_s0  ;;  %2551 = vrot.lane.b32.xlu0 %v2531_v51, %s11772_s0 }
 0x47d   :  { %2555 = vrot.lane.b32.xlu2 %v2533_v0, %s11772_s0 }
 0x47e   :  { %v7896_v13 = vpop.permute.xlu1 %2319  ;;  %v7898_v36 = vpop.permute.xlu0 %2317 }
 0x47f   :  { %12184 = vst [vmem:[#allocation400_spill] sm:$0xff] %v7896_v13  ;;  %v7900_v1 = vpop.permute.xlu2 %2369 }
 0x480   :  { %12185 = vst [vmem:[#allocation401_spill] sm:$0xff] %v7898_v36  ;;  %v2575_v36 = vmul.f32 %v7768_v50, %v2572_v9 }
 0x481   :  { %12186 = vst [vmem:[#allocation402_spill] sm:$0xff] %v7900_v1  ;;  %v2576_v1 = vmul.f32 %v7774_v43, %v2572_v9 }
 0x484   :  { %2589 = vrot.lane.b32.xlu1 %v2573_v37, %s12187_s27  ;;  %2557 = vrot.lane.b32.xlu0 %v2534_v14, %s11772_s0  ;;  %s12197_s0 = smov 102  }
 0x485   :  { %2591 = vrot.lane.b32.xlu2 %v2574_v35, %s12187_s27 }
 0x486   :  { %v7908_v51 = vpop.permute.xlu1 %2325  ;;  %v7910_v0 = vpop.permute.xlu0 %2323 }
 0x487   :  { %12188 = vst [vmem:[#allocation403_spill] sm:$0xff] %v7908_v51  ;;  %v7912_v7 = vpop.permute.xlu2 %2405  ;;  %v2580_v51 = vmul.f32 %v7805_v24, %v2572_v9 }
 0x488   :  { %12189 = vst [vmem:[#allocation404_spill] sm:$0xff] %v7910_v0  ;;  %v2578_v0 = vmul.f32 %v7786_v10, %v2572_v9 }
 0x489   :  { %12190 = vst [vmem:[#allocation405_spill] sm:$0xff] %v7912_v7  ;;  %v2579_v7 = vmul.f32 %v7792_v6, %v2572_v9 }
 0x48c   :  { %2595 = vrot.lane.b32.xlu1 %v2576_v1, %s12187_s27  ;;  %2593 = vrot.lane.b32.xlu0 %v2575_v36, %s12187_s27  ;;  %v2618_v1 = vstv %s5867_s7  ;;  %s5868_s7 = sld [smem:[#allocation8 + $0x9b]] }
 0x48d   :  { %2597 = vrot.lane.b32.xlu2 %v2577_v2, %s12187_s27  ;;  %v2621_v13 = vmul.f32 %v7768_v50, %v2618_v1 }
 0x48e   :  { %v7920_v35 = vpop.permute.xlu1 %2361  ;;  %v7922_v14 = vpop.permute.xlu0 %2359 }
 0x48f   :  { %12191 = vst [vmem:[#allocation406_spill] sm:$0xff] %v7920_v35  ;;  %v7924_v37 = vpop.permute.xlu2 %2411  ;;  %v2619_v35 = vmul.f32 %v7756_v28, %v2618_v1 }
 0x490   :  { %12192 = vst [vmem:[#allocation407_spill] sm:$0xff] %v7922_v14 }
 0x491   :  { %12193 = vst [vmem:[#allocation408_spill] sm:$0xff] %v7924_v37  ;;  %v2620_v37 = vmul.f32 %v7771_v5, %v2618_v1 }
 0x494   :  { %2601 = vrot.lane.b32.xlu1 %v2579_v7, %s12187_s27  ;;  %2599 = vrot.lane.b32.xlu0 %v2578_v0, %s12187_s27  ;;  %v2623_v7 = vmul.f32 %v7789_v8, %v2618_v1 }
 0x495   :  { %2603 = vrot.lane.b32.xlu2 %v2580_v51, %s12187_s27 }
 0x496   :  { %v7932_v36 = vpop.permute.xlu1 %2367  ;;  %v7934_v2 = vpop.permute.xlu0 %2365 }
 0x497   :  { %12194 = vst [vmem:[#allocation409_spill] sm:$0xff] %v7932_v36  ;;  %v7936_v14 = vpop.permute.xlu2 %2417 }
 0x498   :  { %12195 = vst [vmem:[#allocation410_spill] sm:$0xff] %v7934_v2  ;;  %v2624_v2 = vmul.f32 %v7786_v10, %v2618_v1 }
 0x499   :  { %12196 = vst [vmem:[#allocation411_spill] sm:$0xff] %v7936_v14  ;;  %v2622_v14 = vmul.f32 %v7774_v43, %v2618_v1 }
 0x49c   :  { %2637 = vrot.lane.b32.xlu1 %v2620_v37, %s12197_s0  ;;  %2635 = vrot.lane.b32.xlu0 %v2619_v35, %s12197_s0 }
 0x49d   :  { %2639 = vrot.lane.b32.xlu2 %v2621_v13, %s12197_s0 }
 0x49e   :  { %v7944_v9 = vpop.permute.xlu1 %2373  ;;  %v7946_v51 = vpop.permute.xlu0 %2371 }
 0x49f   :  { %12198 = vst [vmem:[#allocation412_spill] sm:$0xff] %v7944_v9  ;;  %v7948_v0 = vpop.permute.xlu2 %2453  ;;  %v2664_v9 = vstv %s5868_s7  ;;  %s5869_s7 = sld [smem:[#allocation8 + $0x9c]] }
 0x4a0   :  { %12199 = vst [vmem:[#allocation413_spill] sm:$0xff] %v7946_v51  ;;  %v2625_v51 = vmul.f32 %v7792_v6, %v2618_v1  ;;  %v2665_v36 = vmul.f32 %v7756_v28, %v2664_v9 }
 0x4a1   :  { %12200 = vst [vmem:[#allocation414_spill] sm:$0xff] %v7948_v0  ;;  %v2626_v0 = vmul.f32 %v7805_v24, %v2618_v1  ;;  %v2668_v1 = vmul.f32 %v7774_v43, %v2664_v9 }
 0x4a4   :  { %2643 = vrot.lane.b32.xlu1 %v2623_v7, %s12197_s0  ;;  %2641 = vrot.lane.b32.xlu0 %v2622_v14, %s12197_s0 }
 0x4a5   :  { %2645 = vrot.lane.b32.xlu2 %v2624_v2, %s12197_s0 }
 0x4a6   :  { %v7956_v13 = vpop.permute.xlu1 %2409  ;;  %v7958_v35 = vpop.permute.xlu0 %2407 }
 0x4a7   :  { %12201 = vst [vmem:[#allocation415_spill] sm:$0xff] %v7956_v13  ;;  %v7960_v37 = vpop.permute.xlu2 %2459  ;;  %v2666_v13 = vmul.f32 %v7771_v5, %v2664_v9 }
 0x4a8   :  { %12202 = vst [vmem:[#allocation416_spill] sm:$0xff] %v7958_v35 }
 0x4a9   :  { %12203 = vst [vmem:[#allocation417_spill] sm:$0xff] %v7960_v37  ;;  %v2667_v37 = vmul.f32 %v7768_v50, %v2664_v9 }
 0x4ac   :  { %2649 = vrot.lane.b32.xlu1 %v2626_v0, %s12197_s0  ;;  %2647 = vrot.lane.b32.xlu0 %v2625_v51, %s12197_s0 }
 0x4ad   :  { %2681 = vrot.lane.b32.xlu2 %v2665_v36, %s12204_s19 }
 0x4ae   :  { %v7968_v14 = vpop.permute.xlu1 %2415  ;;  %v7970_v2 = vpop.permute.xlu0 %2413 }
 0x4af   :  { %12205 = vst [vmem:[#allocation418_spill] sm:$0xff] %v7968_v14  ;;  %v7972_v7 = vpop.permute.xlu2 %2465  ;;  %v2671_v14 = vmul.f32 %v7792_v6, %v2664_v9 }
 0x4b0   :  { %12206 = vst [vmem:[#allocation419_spill] sm:$0xff] %v7970_v2  ;;  %v2669_v2 = vmul.f32 %v7789_v8, %v2664_v9 }
 0x4b1   :  { %12207 = vst [vmem:[#allocation420_spill] sm:$0xff] %v7972_v7  ;;  %v2670_v7 = vmul.f32 %v7786_v10, %v2664_v9 }
 0x4b4   :  { %2685 = vrot.lane.b32.xlu1 %v2667_v37, %s12204_s19  ;;  %2683 = vrot.lane.b32.xlu0 %v2666_v13, %s12204_s19  ;;  %v2710_v13 = vstv %s5869_s7  ;;  %s5870_s7 = sld [smem:[#allocation8 + $0x9d]] }
 0x4b5   :  { %2687 = vrot.lane.b32.xlu2 %v2668_v1, %s12204_s19  ;;  %v2712_v35 = vmul.f32 %v7771_v5, %v2710_v13 }
 0x4b6   :  { %v7980_v36 = vpop.permute.xlu1 %2451  ;;  %v7982_v51 = vpop.permute.xlu0 %2419 }
 0x4b7   :  { %12208 = vst [vmem:[#allocation421_spill] sm:$0xff] %v7980_v36  ;;  %v7984_v0 = vpop.permute.xlu2 %2501  ;;  %v2672_v36 = vmul.f32 %v7805_v24, %v2664_v9  ;;  %v2715_v9 = vmul.f32 %v7789_v8, %v2710_v13 }
 0x4b8   :  { %12209 = vst [vmem:[#allocation422_spill] sm:$0xff] %v7982_v51 }
 0x4b9   :  { %12210 = vst [vmem:[#allocation423_spill] sm:$0xff] %v7984_v0  ;;  %v2711_v0 = vmul.f32 %v7756_v28, %v2710_v13 }
 0x4bc   :  { %2691 = vrot.lane.b32.xlu1 %v2670_v7, %s12204_s19  ;;  %2689 = vrot.lane.b32.xlu0 %v2669_v2, %s12204_s19 }
 0x4bd   :  { %2693 = vrot.lane.b32.xlu2 %v2671_v14, %s12204_s19 }
 0x4be   :  { %v7992_v37 = vpop.permute.xlu1 %2457  ;;  %v7994_v1 = vpop.permute.xlu0 %2455 }
 0x4bf   :  { %12211 = vst [vmem:[#allocation424_spill] sm:$0xff] %v7992_v37  ;;  %v7996_v51 = vpop.permute.xlu2 %2507 }
 0x4c0   :  { %12212 = vst [vmem:[#allocation425_spill] sm:$0xff] %v7994_v1  ;;  %v2713_v1 = vmul.f32 %v7768_v50, %v2710_v13 }
 0x4c1   :  { %12213 = vst [vmem:[#allocation426_spill] sm:$0xff] %v7996_v51  ;;  %v2714_v51 = vmul.f32 %v7774_v43, %v2710_v13 }
 0x4c4   :  { %2727 = vrot.lane.b32.xlu1 %v2711_v0, %s6171_s15  ;;  %2695 = vrot.lane.b32.xlu0 %v2672_v36, %s12204_s19 }
 0x4c5   :  { %2729 = vrot.lane.b32.xlu2 %v2712_v35, %s6171_s15 }
 0x4c6   :  { %v8004_v2 = vpop.permute.xlu1 %2463  ;;  %v8006_v14 = vpop.permute.xlu0 %2461 }
 0x4c7   :  { %12214 = vst [vmem:[#allocation427_spill] sm:$0xff] %v8004_v2  ;;  %v8008_v7 = vpop.permute.xlu2 %2543  ;;  %v2718_v2 = vmul.f32 %v7805_v24, %v2710_v13 }
 0x4c8   :  { %12215 = vst [vmem:[#allocation428_spill] sm:$0xff] %v8006_v14  ;;  %v2716_v14 = vmul.f32 %v7786_v10, %v2710_v13 }
 0x4c9   :  { %12216 = vst [vmem:[#allocation429_spill] sm:$0xff] %v8008_v7  ;;  %v2717_v7 = vmul.f32 %v7792_v6, %v2710_v13 }
 0x4cc   :  { %2733 = vrot.lane.b32.xlu1 %v2714_v51, %s6171_s15  ;;  %2731 = vrot.lane.b32.xlu0 %v2713_v1, %s6171_s15  ;;  %v2756_v51 = vstv %s5870_s7  ;;  %s5872_s7 = sld [smem:[#allocation8 + $0x101]] }
 0x4cd   :  { %2735 = vrot.lane.b32.xlu2 %v2715_v9, %s6171_s15  ;;  %v2759_v37 = vmul.f32 %v7768_v50, %v2756_v51 }
 0x4ce   :  { %v8016_v35 = vpop.permute.xlu1 %2499  ;;  %v8018_v36 = vpop.permute.xlu0 %2497 }
 0x4cf   :  { %12217 = vst [vmem:[#allocation430_spill] sm:$0xff] %v8016_v35  ;;  %v8020_v0 = vpop.permute.xlu2 %2549  ;;  %v2757_v35 = vmul.f32 %v7756_v28, %v2756_v51  ;;  %v2762_v28 = vmul.f32 %v7786_v10, %v2756_v51 }
 0x4d0   :  { %12218 = vst [vmem:[#allocation431_spill] sm:$0xff] %v8018_v36 }
 0x4d1   :  { %12219 = vst [vmem:[#allocation432_spill] sm:$0xff] %v8020_v0  ;;  %v2758_v0 = vmul.f32 %v7771_v5, %v2756_v51  ;;  %v2760_v5 = vmul.f32 %v7774_v43, %v2756_v51  ;;  %v2763_v43 = vmul.f32 %v7792_v6, %v2756_v51 }
 0x4d4   :  { %2739 = vrot.lane.b32.xlu1 %v2717_v7, %s6171_s15  ;;  %2737 = vrot.lane.b32.xlu0 %v2716_v14, %s6171_s15  ;;  %v2761_v7 = vmul.f32 %v7789_v8, %v2756_v51  ;;  %v2764_v8 = vmul.f32 %v7805_v24, %v2756_v51  ;;  %v8074_v24 = vld [vmem:[#allocation4 + $0x98] sm:$0xff] }
 0x4d5   :  { %2741 = vrot.lane.b32.xlu2 %v2718_v2, %s6171_s15 }
 0x4d6   :  { %v8028_v1 = vpop.permute.xlu1 %2505  ;;  %v8030_v9 = vpop.permute.xlu0 %2503 }
 0x4d7   :  { %12220 = vst [vmem:[#allocation433_spill] sm:$0xff] %v8028_v1  ;;  %v8032_v36 = vpop.permute.xlu2 %2555 }
 0x4d8   :  { %12221 = vst [vmem:[#allocation434_spill] sm:$0xff] %v8030_v9 }
 0x4d9   :  { %12222 = vst [vmem:[#allocation435_spill] sm:$0xff] %v8032_v36  ;;  %v2821_v36 = vstv %s5872_s7  ;;  %s5873_s7 = sld [smem:[#allocation8 + $0x102]] }
 0x4dc   :  { %2775 = vrot.lane.b32.xlu1 %v2758_v0, %s6172_s23  ;;  %2773 = vrot.lane.b32.xlu0 %v2757_v35, %s6172_s23  ;;  %v8056_v35 = vld [vmem:[#allocation4 + $0x80] sm:$0xff] }
 0x4dd   :  { %2777 = vrot.lane.b32.xlu2 %v2759_v37, %s6172_s23  ;;  %v2822_v10 = vmul.f32 %v2821_v36, %v8056_v35 }
 0x4de   :  { %v8040_v13 = vpop.permute.xlu1 %2511  ;;  %v8042_v2 = vpop.permute.xlu0 %2509 }
 0x4df   :  { %12223 = vst [vmem:[#allocation436_spill] sm:$0xff] %v8040_v13  ;;  %v8044_v14 = vpop.permute.xlu2 %2591 }
 0x4e0   :  { %12224 = vst [vmem:[#allocation437_spill] sm:$0xff] %v8042_v2  ;;  %v2867_v2 = vstv %s5873_s7  ;;  %s5874_s7 = sld [smem:[#allocation8 + $0x103]] }
 0x4e1   :  { %12225 = vst [vmem:[#allocation438_spill] sm:$0xff] %v8044_v14  ;;  %v8083_v14 = vld [vmem:[#allocation4 + $0xa8] sm:$0xff]  ;;  %v2868_v13 = vmul.f32 %v2867_v2, %v8056_v35 }
 0x4e2   :  { %v2827_v1 = vmul.f32 %v2821_v36, %v8083_v14 }
 0x4e4   :  { %2781 = vrot.lane.b32.xlu1 %v2761_v7, %s6172_s23  ;;  %2779 = vrot.lane.b32.xlu0 %v2760_v5, %s6172_s23  ;;  %v8065_v7 = vld [vmem:[#allocation4 + $0x90] sm:$0xff]  ;;  %v8067_v5 = vld [vmem:[#allocation4 + $0x88] sm:$0xff] }
 0x4e5   :  { %2783 = vrot.lane.b32.xlu2 %v2762_v28, %s6172_s23  ;;  %v2824_v51 = vmul.f32 %v2821_v36, %v8065_v7  ;;  %v2869_v9 = vmul.f32 %v2867_v2, %v8067_v5 }
 0x4e6   :  { %v8052_v50 = vpop.permute.xlu1 %2547  ;;  %v8054_v37 = vpop.permute.xlu0 %2545 }
 0x4e7   :  { %12226 = vst [vmem:[#allocation439_spill] sm:$0xff] %v8052_v50  ;;  %v8058_v0 = vpop.permute.xlu2 %2597 }
 0x4e8   :  { %12227 = vst [vmem:[#allocation440_spill] sm:$0xff] %v8054_v37 }
 0x4e9   :  { %12228 = vst [vmem:[#allocation441_spill] sm:$0xff] %v8058_v0 }
 0x4ec   :  { %2787 = vrot.lane.b32.xlu1 %v2764_v8, %s6172_s23  ;;  %2785 = vrot.lane.b32.xlu0 %v2763_v43, %s6172_s23  ;;  %v2823_v8 = vmul.f32 %v2821_v36, %v8067_v5  ;;  %v2825_v43 = vmul.f32 %v2821_v36, %v8074_v24 }
 0x4ed   :  { %2838 = vrot.lane.b32.xlu2 %v2822_v10, %s6144_s3  ;;  %v8085_v10 = vld [vmem:[#allocation4 + $0xa0] sm:$0xff] }
 0x4ee   :  { %v8070_v28 = vpop.permute.xlu1 %2553  ;;  %v8072_v0 = vpop.permute.xlu0 %2551 }
 0x4ef   :  { %12229 = vst [vmem:[#allocation442_spill] sm:$0xff] %v8070_v28  ;;  %v8076_v6 = vpop.permute.xlu2 %2603  ;;  %v8092_v28 = vld [vmem:[#allocation4 + $0xb0] sm:$0xff] }
 0x4f0   :  { %12230 = vst [vmem:[#allocation443_spill] sm:$0xff] %v8072_v0 }
 0x4f1   :  { %12231 = vst [vmem:[#allocation444_spill] sm:$0xff] %v8076_v6 }
 0x4f4   :  { %2842 = vrot.lane.b32.xlu1 %v2824_v51, %s6144_s3  ;;  %2840 = vrot.lane.b32.xlu0 %v2823_v8, %s6144_s3  ;;  %v2826_v51 = vmul.f32 %v2821_v36, %v8085_v10  ;;  %v2828_v8 = vmul.f32 %v2821_v36, %v8092_v28 }
 0x4f5   :  { %2844 = vrot.lane.b32.xlu2 %v2825_v43, %s6144_s3  ;;  %v8101_v43 = vld [vmem:[#allocation4 + $0xb8] sm:$0xff] }
 0x4f6   :  { %v8088_v0 = vpop.permute.xlu1 %2589  ;;  %v8090_v6 = vpop.permute.xlu0 %2557  ;;  %v2829_v37 = vmul.f32 %v2821_v36, %v8101_v43  ;;  %v2872_v36 = vmul.f32 %v2867_v2, %v8085_v10 }
 0x4f7   :  { %12232 = vst [vmem:[#allocation445_spill] sm:$0xff] %v8088_v0  ;;  %v8094_v50 = vpop.permute.xlu2 %2639 }
 0x4f8   :  { %12233 = vst [vmem:[#allocation446_spill] sm:$0xff] %v8090_v6 }
 0x4f9   :  { %12234 = vst [vmem:[#allocation447_spill] sm:$0xff] %v8094_v50 }
 0x4fc   :  { %2848 = vrot.lane.b32.xlu1 %v2827_v1, %s6144_s3  ;;  %2846 = vrot.lane.b32.xlu0 %v2826_v51, %s6144_s3 }
 0x4fd   :  { %2850 = vrot.lane.b32.xlu2 %v2828_v8, %s6144_s3 }
 0x4fe   :  { %v8104_v6 = vpop.permute.xlu1 %2595  ;;  %v8106_v0 = vpop.permute.xlu0 %2593 }
 0x4ff   :  { %12235 = vst [vmem:[#allocation448_spill] sm:$0xff] %v8104_v6  ;;  %v8108_v50 = vpop.permute.xlu2 %2645 }
 0x500   :  { %12236 = vst [vmem:[#allocation449_spill] sm:$0xff] %v8106_v0  ;;  %v2870_v0 = vmul.f32 %v2867_v2, %v8065_v7 }
 0x501   :  { %12237 = vst [vmem:[#allocation450_spill] sm:$0xff] %v8108_v50  ;;  %v2871_v50 = vmul.f32 %v2867_v2, %v8074_v24 }
 0x504   :  { %2884 = vrot.lane.b32.xlu1 %v2868_v13, %s6145_s12  ;;  %2852 = vrot.lane.b32.xlu0 %v2829_v37, %s6144_s3 }
 0x505   :  { %2886 = vrot.lane.b32.xlu2 %v2869_v9, %s6145_s12 }
 0x506   :  { %v8116_v1 = vpop.permute.xlu1 %2601  ;;  %v8118_v51 = vpop.permute.xlu0 %2599 }
 0x507   :  { %12238 = vst [vmem:[#allocation451_spill] sm:$0xff] %v8116_v1  ;;  %v8120_v8 = vpop.permute.xlu2 %2681  ;;  %v2875_v1 = vmul.f32 %v2867_v2, %v8101_v43 }
 0x508   :  { %12239 = vst [vmem:[#allocation452_spill] sm:$0xff] %v8118_v51  ;;  %v2873_v51 = vmul.f32 %v2867_v2, %v8083_v14 }
 0x509   :  { %12240 = vst [vmem:[#allocation453_spill] sm:$0xff] %v8120_v8  ;;  %v2874_v8 = vmul.f32 %v2867_v2, %v8092_v28 }
 0x50c   :  { %2890 = vrot.lane.b32.xlu1 %v2871_v50, %s6145_s12  ;;  %2888 = vrot.lane.b32.xlu0 %v2870_v0, %s6145_s12  ;;  %v2913_v50 = vstv %s5874_s7  ;;  %s5875_s7 = sld [smem:[#allocation8 + $0x104]] }
 0x50d   :  { %2892 = vrot.lane.b32.xlu2 %v2872_v36, %s6145_s12  ;;  %v2916_v6 = vmul.f32 %v2913_v50, %v8065_v7 }
 0x50e   :  { %v8128_v9 = vpop.permute.xlu1 %2637  ;;  %v8130_v13 = vpop.permute.xlu0 %2635 }
 0x50f   :  { %12241 = vst [vmem:[#allocation454_spill] sm:$0xff] %v8128_v9  ;;  %v8132_v37 = vpop.permute.xlu2 %2687  ;;  %v2914_v9 = vmul.f32 %v2913_v50, %v8056_v35 }
 0x510   :  { %12242 = vst [vmem:[#allocation455_spill] sm:$0xff] %v8130_v13 }
 0x511   :  { %12243 = vst [vmem:[#allocation456_spill] sm:$0xff] %v8132_v37  ;;  %v2915_v37 = vmul.f32 %v2913_v50, %v8067_v5 }
 0x514   :  { %2896 = vrot.lane.b32.xlu1 %v2874_v8, %s6145_s12  ;;  %2894 = vrot.lane.b32.xlu0 %v2873_v51, %s6145_s12  ;;  %v2918_v8 = vmul.f32 %v2913_v50, %v8085_v10 }
 0x515   :  { %2898 = vrot.lane.b32.xlu2 %v2875_v1, %s6145_s12 }
 0x516   :  { %v8140_v0 = vpop.permute.xlu1 %2643  ;;  %v8142_v36 = vpop.permute.xlu0 %2641 }
 0x517   :  { %12244 = vst [vmem:[#allocation457_spill] sm:$0xff] %v8140_v0  ;;  %v8144_v13 = vpop.permute.xlu2 %2693  ;;  %v2919_v0 = vmul.f32 %v2913_v50, %v8083_v14 }
 0x518   :  { %12245 = vst [vmem:[#allocation458_spill] sm:$0xff] %v8142_v36 }
 0x519   :  { %12246 = vst [vmem:[#allocation459_spill] sm:$0xff] %v8144_v13  ;;  %v2917_v13 = vmul.f32 %v2913_v50, %v8074_v24 }
 0x51c   :  { %2932 = vrot.lane.b32.xlu1 %v2915_v37, %s6146_s14  ;;  %2930 = vrot.lane.b32.xlu0 %v2914_v9, %s6146_s14 }
 0x51d   :  { %2934 = vrot.lane.b32.xlu2 %v2916_v6, %s6146_s14 }
 0x51e   :  { %v8152_v2 = vpop.permute.xlu1 %2649  ;;  %v8154_v1 = vpop.permute.xlu0 %2647 }
 0x51f   :  { %12247 = vst [vmem:[#allocation460_spill] sm:$0xff] %v8152_v2  ;;  %v8156_v51 = vpop.permute.xlu2 %2729  ;;  %v2920_v2 = vmul.f32 %v2913_v50, %v8092_v28 }
 0x520   :  { %12248 = vst [vmem:[#allocation461_spill] sm:$0xff] %v8154_v1  ;;  %v2921_v1 = vmul.f32 %v2913_v50, %v8101_v43 }
 0x521   :  { %12249 = vst [vmem:[#allocation462_spill] sm:$0xff] %v8156_v51  ;;  %v2959_v51 = vstv %s5875_s7  ;;  %s5876_s7 = sld [smem:[#allocation8 + $0x105]] }
 0x522   :  { %v2960_v36 = vmul.f32 %v2959_v51, %v8056_v35  ;;  %v2963_v50 = vmul.f32 %v2959_v51, %v8074_v24 }
 0x524   :  { %2938 = vrot.lane.b32.xlu1 %v2918_v8, %s6146_s14  ;;  %2936 = vrot.lane.b32.xlu0 %v2917_v13, %s6146_s14 }
 0x525   :  { %2940 = vrot.lane.b32.xlu2 %v2919_v0, %s6146_s14 }
 0x526   :  { %v8164_v6 = vpop.permute.xlu1 %2685  ;;  %v8166_v9 = vpop.permute.xlu0 %2683 }
 0x527   :  { %12250 = vst [vmem:[#allocation463_spill] sm:$0xff] %v8164_v6  ;;  %v8168_v37 = vpop.permute.xlu2 %2735  ;;  %v2961_v6 = vmul.f32 %v2959_v51, %v8067_v5 }
 0x528   :  { %12251 = vst [vmem:[#allocation464_spill] sm:$0xff] %v8166_v9 }
 0x529   :  { %12252 = vst [vmem:[#allocation465_spill] sm:$0xff] %v8168_v37  ;;  %v2962_v37 = vmul.f32 %v2959_v51, %v8065_v7 }
 0x52c   :  { %2944 = vrot.lane.b32.xlu1 %v2921_v1, %s6146_s14  ;;  %2942 = vrot.lane.b32.xlu0 %v2920_v2, %s6146_s14 }
 0x52d   :  { %2976 = vrot.lane.b32.xlu2 %v2960_v36, %s6147_s16 }
 0x52e   :  { %v8176_v13 = vpop.permute.xlu1 %2691  ;;  %v8178_v0 = vpop.permute.xlu0 %2689 }
 0x52f   :  { %12253 = vst [vmem:[#allocation466_spill] sm:$0xff] %v8176_v13  ;;  %v8180_v8 = vpop.permute.xlu2 %2741  ;;  %v2966_v13 = vmul.f32 %v2959_v51, %v8092_v28 }
 0x530   :  { %12254 = vst [vmem:[#allocation467_spill] sm:$0xff] %v8178_v0  ;;  %v2964_v0 = vmul.f32 %v2959_v51, %v8085_v10 }
 0x531   :  { %12255 = vst [vmem:[#allocation468_spill] sm:$0xff] %v8180_v8  ;;  %v2965_v8 = vmul.f32 %v2959_v51, %v8083_v14 }
 0x534   :  { %2980 = vrot.lane.b32.xlu1 %v2962_v37, %s6147_s16  ;;  %2978 = vrot.lane.b32.xlu0 %v2961_v6, %s6147_s16  ;;  %v3005_v6 = vstv %s5876_s7  ;;  %s5877_s7 = sld [smem:[#allocation8 + $0x106]] }
 0x535   :  { %2982 = vrot.lane.b32.xlu2 %v2963_v50, %s6147_s16  ;;  %v3007_v9 = vmul.f32 %v3005_v6, %v8067_v5 }
 0x536   :  { %v8188_v36 = vpop.permute.xlu1 %2727  ;;  %v8190_v2 = vpop.permute.xlu0 %2695 }
 0x537   :  { %12256 = vst [vmem:[#allocation469_spill] sm:$0xff] %v8188_v36  ;;  %v8192_v1 = vpop.permute.xlu2 %2777  ;;  %v2967_v36 = vmul.f32 %v2959_v51, %v8101_v43  ;;  %v3010_v51 = vmul.f32 %v3005_v6, %v8085_v10 }
 0x538   :  { %12257 = vst [vmem:[#allocation470_spill] sm:$0xff] %v8190_v2 }
 0x539   :  { %12258 = vst [vmem:[#allocation471_spill] sm:$0xff] %v8192_v1  ;;  %v3006_v1 = vmul.f32 %v3005_v6, %v8056_v35 }
 0x53c   :  { %2986 = vrot.lane.b32.xlu1 %v2965_v8, %s6147_s16  ;;  %2984 = vrot.lane.b32.xlu0 %v2964_v0, %s6147_s16 }
 0x53d   :  { %2988 = vrot.lane.b32.xlu2 %v2966_v13, %s6147_s16 }
 0x53e   :  { %v8200_v37 = vpop.permute.xlu1 %2733  ;;  %v8202_v50 = vpop.permute.xlu0 %2731 }
 0x53f   :  { %12259 = vst [vmem:[#allocation472_spill] sm:$0xff] %v8200_v37  ;;  %v8204_v2 = vpop.permute.xlu2 %2783 }
 0x540   :  { %12260 = vst [vmem:[#allocation473_spill] sm:$0xff] %v8202_v50  ;;  %v3008_v50 = vmul.f32 %v3005_v6, %v8065_v7 }
 0x541   :  { %12261 = vst [vmem:[#allocation474_spill] sm:$0xff] %v8204_v2  ;;  %v3009_v2 = vmul.f32 %v3005_v6, %v8074_v24 }
 0x544   :  { %3022 = vrot.lane.b32.xlu1 %v3006_v1, %s6148_s18  ;;  %2990 = vrot.lane.b32.xlu0 %v2967_v36, %s6147_s16 }
 0x545   :  { %3024 = vrot.lane.b32.xlu2 %v3007_v9, %s6148_s18 }
 0x546   :  { %v8212_v0 = vpop.permute.xlu1 %2739  ;;  %v8214_v13 = vpop.permute.xlu0 %2737 }
 0x547   :  { %12262 = vst [vmem:[#allocation475_spill] sm:$0xff] %v8212_v0  ;;  %v8216_v8 = vpop.permute.xlu2 %2838  ;;  %v3012_v0 = vmul.f32 %v3005_v6, %v8092_v28 }
 0x548   :  { %12263 = vst [vmem:[#allocation476_spill] sm:$0xff] %v8214_v13  ;;  %v3011_v13 = vmul.f32 %v3005_v6, %v8083_v14 }
 0x549   :  { %12264 = vst [vmem:[#allocation477_spill] sm:$0xff] %v8216_v8  ;;  %v3013_v8 = vmul.f32 %v3005_v6, %v8101_v43 }
 0x54c   :  { %3028 = vrot.lane.b32.xlu1 %v3009_v2, %s6148_s18  ;;  %3026 = vrot.lane.b32.xlu0 %v3008_v50, %s6148_s18  ;;  %v3051_v2 = vstv %s5877_s7  ;;  %s5878_s7 = sld [smem:[#allocation8 + $0x107]] }
 0x54d   :  { %3030 = vrot.lane.b32.xlu2 %v3010_v51, %s6148_s18 }
 0x54e   :  { %v8224_v9 = vpop.permute.xlu1 %2775  ;;  %v8226_v36 = vpop.permute.xlu0 %2773 }
 0x54f   :  { %12265 = vst [vmem:[#allocation478_spill] sm:$0xff] %v8224_v9  ;;  %v8228_v1 = vpop.permute.xlu2 %2844  ;;  %v3054_v9 = vmul.f32 %v3051_v2, %v8065_v7 }
 0x550   :  { %12266 = vst [vmem:[#allocation479_spill] sm:$0xff] %v8226_v36  ;;  %v3052_v36 = vmul.f32 %v3051_v2, %v8056_v35 }
 0x551   :  { %12267 = vst [vmem:[#allocation480_spill] sm:$0xff] %v8228_v1  ;;  %v3053_v1 = vmul.f32 %v3051_v2, %v8067_v5 }
 0x554   :  { %3034 = vrot.lane.b32.xlu1 %v3012_v0, %s6148_s18  ;;  %3032 = vrot.lane.b32.xlu0 %v3011_v13, %s6148_s18 }
 0x555   :  { %3036 = vrot.lane.b32.xlu2 %v3013_v8, %s6148_s18  ;;  %v3056_v8 = vmul.f32 %v3051_v2, %v8085_v10 }
 0x556   :  { %v8236_v50 = vpop.permute.xlu1 %2781  ;;  %v8238_v51 = vpop.permute.xlu0 %2779 }
 0x557   :  { %12268 = vst [vmem:[#allocation481_spill] sm:$0xff] %v8236_v50  ;;  %v8240_v37 = vpop.permute.xlu2 %2850  ;;  %v3057_v50 = vmul.f32 %v3051_v2, %v8083_v14 }
 0x558   :  { %12269 = vst [vmem:[#allocation482_spill] sm:$0xff] %v8238_v51  ;;  %v3055_v51 = vmul.f32 %v3051_v2, %v8074_v24 }
 0x559   :  { %12270 = vst [vmem:[#allocation483_spill] sm:$0xff] %v8240_v37  ;;  %v3097_v37 = vstv %s5878_s7  ;;  %s5879_s7 = sld [smem:[#allocation8 + $0x108]] }
 0x55c   :  { %3070 = vrot.lane.b32.xlu1 %v3053_v1, %s6149_s20  ;;  %3068 = vrot.lane.b32.xlu0 %v3052_v36, %s6149_s20 }
 0x55d   :  { %3072 = vrot.lane.b32.xlu2 %v3054_v9, %s6149_s20 }
 0x55e   :  { %v8248_v6 = vpop.permute.xlu1 %2787  ;;  %v8250_v0 = vpop.permute.xlu0 %2785 }
 0x55f   :  { %12271 = vst [vmem:[#allocation484_spill] sm:$0xff] %v8248_v6  ;;  %v8252_v13 = vpop.permute.xlu2 %2886  ;;  %v3058_v6 = vmul.f32 %v3051_v2, %v8092_v28 }
 0x560   :  { %12272 = vst [vmem:[#allocation485_spill] sm:$0xff] %v8250_v0  ;;  %v3059_v0 = vmul.f32 %v3051_v2, %v8101_v43  ;;  %v3101_v2 = vmul.f32 %v3097_v37, %v8074_v24 }
 0x561   :  { %12273 = vst [vmem:[#allocation486_spill] sm:$0xff] %v8252_v13  ;;  %v3098_v13 = vmul.f32 %v3097_v37, %v8056_v35 }
 0x564   :  { %3076 = vrot.lane.b32.xlu1 %v3056_v8, %s6149_s20  ;;  %3074 = vrot.lane.b32.xlu0 %v3055_v51, %s6149_s20 }
 0x565   :  { %3078 = vrot.lane.b32.xlu2 %v3057_v50, %s6149_s20 }
 0x566   :  { %v8260_v9 = vpop.permute.xlu1 %2842  ;;  %v8262_v36 = vpop.permute.xlu0 %2840 }
 0x567   :  { %12274 = vst [vmem:[#allocation487_spill] sm:$0xff] %v8260_v9  ;;  %v8264_v1 = vpop.permute.xlu2 %2892 }
 0x568   :  { %12275 = vst [vmem:[#allocation488_spill] sm:$0xff] %v8262_v36  ;;  %v3099_v36 = vmul.f32 %v3097_v37, %v8067_v5 }
 0x569   :  { %12276 = vst [vmem:[#allocation489_spill] sm:$0xff] %v8264_v1  ;;  %v3100_v1 = vmul.f32 %v3097_v37, %v8065_v7 }
 0x56c   :  { %3082 = vrot.lane.b32.xlu1 %v3059_v0, %s6149_s20  ;;  %3080 = vrot.lane.b32.xlu0 %v3058_v6, %s6149_s20 }
 0x56d   :  { %3114 = vrot.lane.b32.xlu2 %v3098_v13, %s6150_s22 }
 0x56e   :  { %v8272_v50 = vpop.permute.xlu1 %2848  ;;  %v8274_v51 = vpop.permute.xlu0 %2846 }
 0x56f   :  { %12277 = vst [vmem:[#allocation490_spill] sm:$0xff] %v8272_v50  ;;  %v8276_v8 = vpop.permute.xlu2 %2898  ;;  %v3104_v50 = vmul.f32 %v3097_v37, %v8092_v28 }
 0x570   :  { %12278 = vst [vmem:[#allocation491_spill] sm:$0xff] %v8274_v51  ;;  %v3102_v51 = vmul.f32 %v3097_v37, %v8085_v10 }
 0x571   :  { %12279 = vst [vmem:[#allocation492_spill] sm:$0xff] %v8276_v8  ;;  %v3103_v8 = vmul.f32 %v3097_v37, %v8083_v14 }
 0x574   :  { %3118 = vrot.lane.b32.xlu1 %v3100_v1, %s6150_s22  ;;  %3116 = vrot.lane.b32.xlu0 %v3099_v36, %s6150_s22  ;;  %v3143_v36 = vstv %s5879_s7  ;;  %s5880_s7 = sld [smem:[#allocation8 + $0x109]] }
 0x575   :  { %3120 = vrot.lane.b32.xlu2 %v3101_v2, %s6150_s22  ;;  %v3145_v9 = vmul.f32 %v3143_v36, %v8067_v5 }
 0x576   :  { %v8284_v6 = vpop.permute.xlu1 %2884  ;;  %v8286_v0 = vpop.permute.xlu0 %2852 }
 0x577   :  { %12280 = vst [vmem:[#allocation493_spill] sm:$0xff] %v8284_v6  ;;  %v8288_v13 = vpop.permute.xlu2 %2934  ;;  %v3105_v6 = vmul.f32 %v3097_v37, %v8101_v43  ;;  %v3148_v37 = vmul.f32 %v3143_v36, %v8085_v10 }
 0x578   :  { %12281 = vst [vmem:[#allocation494_spill] sm:$0xff] %v8286_v0 }
 0x579   :  { %12282 = vst [vmem:[#allocation495_spill] sm:$0xff] %v8288_v13  ;;  %v3144_v13 = vmul.f32 %v3143_v36, %v8056_v35 }
 0x57c   :  { %3124 = vrot.lane.b32.xlu1 %v3103_v8, %s6150_s22  ;;  %3122 = vrot.lane.b32.xlu0 %v3102_v51, %s6150_s22 }
 0x57d   :  { %3126 = vrot.lane.b32.xlu2 %v3104_v50, %s6150_s22 }
 0x57e   :  { %v8296_v1 = vpop.permute.xlu1 %2890  ;;  %v8298_v2 = vpop.permute.xlu0 %2888 }
 0x57f   :  { %12283 = vst [vmem:[#allocation496_spill] sm:$0xff] %v8296_v1  ;;  %v8300_v0 = vpop.permute.xlu2 %2940 }
 0x580   :  { %12284 = vst [vmem:[#allocation497_spill] sm:$0xff] %v8298_v2  ;;  %v3146_v2 = vmul.f32 %v3143_v36, %v8065_v7 }
 0x581   :  { %12285 = vst [vmem:[#allocation498_spill] sm:$0xff] %v8300_v0  ;;  %v3147_v0 = vmul.f32 %v3143_v36, %v8074_v24 }
 0x584   :  { %3160 = vrot.lane.b32.xlu1 %v3144_v13, %s6151_s24  ;;  %3128 = vrot.lane.b32.xlu0 %v3105_v6, %s6150_s22 }
 0x585   :  { %3162 = vrot.lane.b32.xlu2 %v3145_v9, %s6151_s24 }
 0x586   :  { %v8308_v51 = vpop.permute.xlu1 %2896  ;;  %v8310_v50 = vpop.permute.xlu0 %2894 }
 0x587   :  { %12286 = vst [vmem:[#allocation499_spill] sm:$0xff] %v8308_v51  ;;  %v8312_v8 = vpop.permute.xlu2 %2976  ;;  %v3150_v51 = vmul.f32 %v3143_v36, %v8092_v28 }
 0x588   :  { %12287 = vst [vmem:[#allocation500_spill] sm:$0xff] %v8310_v50  ;;  %v3151_v50 = vmul.f32 %v3143_v36, %v8101_v43 }
 0x589   :  { %12288 = vst [vmem:[#allocation501_spill] sm:$0xff] %v8312_v8  ;;  %v3149_v8 = vmul.f32 %v3143_v36, %v8083_v14 }
 0x58c   :  { %3166 = vrot.lane.b32.xlu1 %v3147_v0, %s6151_s24  ;;  %3164 = vrot.lane.b32.xlu0 %v3146_v2, %s6151_s24  ;;  %v3189_v0 = vstv %s5880_s7  ;;  %s5881_s7 = sld [smem:[#allocation8 + $0x10a]] }
 0x58d   :  { %3168 = vrot.lane.b32.xlu2 %v3148_v37, %s6151_s24  ;;  %v3192_v1 = vmul.f32 %v3189_v0, %v8065_v7 }
 0x58e   :  { %v8320_v9 = vpop.permute.xlu1 %2932  ;;  %v8322_v6 = vpop.permute.xlu0 %2930 }
 0x58f   :  { %12289 = vst [vmem:[#allocation502_spill] sm:$0xff] %v8320_v9  ;;  %v8324_v13 = vpop.permute.xlu2 %2982  ;;  %v3190_v9 = vmul.f32 %v3189_v0, %v8056_v35 }
 0x590   :  { %12290 = vst [vmem:[#allocation503_spill] sm:$0xff] %v8322_v6 }
 0x591   :  { %12291 = vst [vmem:[#allocation504_spill] sm:$0xff] %v8324_v13  ;;  %v3191_v13 = vmul.f32 %v3189_v0, %v8067_v5 }
 0x594   :  { %3172 = vrot.lane.b32.xlu1 %v3150_v51, %s6151_s24  ;;  %3170 = vrot.lane.b32.xlu0 %v3149_v8, %s6151_s24  ;;  %v3194_v8 = vmul.f32 %v3189_v0, %v8085_v10 }
 0x595   :  { %3174 = vrot.lane.b32.xlu2 %v3151_v50, %s6151_s24 }
 0x596   :  { %v8332_v2 = vpop.permute.xlu1 %2938  ;;  %v8334_v37 = vpop.permute.xlu0 %2936 }
 0x597   :  { %12292 = vst [vmem:[#allocation505_spill] sm:$0xff] %v8332_v2  ;;  %v8336_v6 = vpop.permute.xlu2 %2988  ;;  %v3195_v2 = vmul.f32 %v3189_v0, %v8083_v14 }
 0x598   :  { %12293 = vst [vmem:[#allocation506_spill] sm:$0xff] %v8334_v37 }
 0x599   :  { %12294 = vst [vmem:[#allocation507_spill] sm:$0xff] %v8336_v6  ;;  %v3193_v6 = vmul.f32 %v3189_v0, %v8074_v24 }
 0x59c   :  { %3208 = vrot.lane.b32.xlu1 %v3191_v13, %s6152_s26  ;;  %3206 = vrot.lane.b32.xlu0 %v3190_v9, %s6152_s26 }
 0x59d   :  { %3210 = vrot.lane.b32.xlu2 %v3192_v1, %s6152_s26 }
 0x59e   :  { %v8344_v36 = vpop.permute.xlu1 %2944  ;;  %v8346_v51 = vpop.permute.xlu0 %2942 }
 0x59f   :  { %12295 = vst [vmem:[#allocation508_spill] sm:$0xff] %v8344_v36  ;;  %v8348_v50 = vpop.permute.xlu2 %3024  ;;  %v3196_v36 = vmul.f32 %v3189_v0, %v8092_v28 }
 0x5a0   :  { %12296 = vst [vmem:[#allocation509_spill] sm:$0xff] %v8346_v51  ;;  %v3197_v51 = vmul.f32 %v3189_v0, %v8101_v43 }
 0x5a1   :  { %12297 = vst [vmem:[#allocation510_spill] sm:$0xff] %v8348_v50  ;;  %v3235_v50 = vstv %s5881_s7  ;;  %s5882_s7 = sld [smem:[#allocation8 + $0x10b]] }
 0x5a2   :  { %v3236_v37 = vmul.f32 %v3235_v50, %v8056_v35  ;;  %v3239_v0 = vmul.f32 %v3235_v50, %v8074_v24 }
 0x5a4   :  { %3214 = vrot.lane.b32.xlu1 %v3194_v8, %s6152_s26  ;;  %3212 = vrot.lane.b32.xlu0 %v3193_v6, %s6152_s26 }
 0x5a5   :  { %3216 = vrot.lane.b32.xlu2 %v3195_v2, %s6152_s26 }
 0x5a6   :  { %v8356_v1 = vpop.permute.xlu1 %2980  ;;  %v8358_v9 = vpop.permute.xlu0 %2978 }
 0x5a7   :  { %12298 = vst [vmem:[#allocation511_spill] sm:$0xff] %v8356_v1  ;;  %v8360_v13 = vpop.permute.xlu2 %3030 }
 0x5a8   :  { %12299 = vst [vmem:[#allocation512_spill] sm:$0xff] %v8358_v9  ;;  %v3237_v9 = vmul.f32 %v3235_v50, %v8067_v5 }
 0x5a9   :  { %12300 = vst [vmem:[#allocation513_spill] sm:$0xff] %v8360_v13  ;;  %v3238_v13 = vmul.f32 %v3235_v50, %v8065_v7 }
 0x5ac   :  { %3220 = vrot.lane.b32.xlu1 %v3197_v51, %s6152_s26  ;;  %3218 = vrot.lane.b32.xlu0 %v3196_v36, %s6152_s26 }
 0x5ad   :  { %3252 = vrot.lane.b32.xlu2 %v3236_v37, %s6153_s28 }
 0x5ae   :  { %v8368_v6 = vpop.permute.xlu1 %2986  ;;  %v8370_v2 = vpop.permute.xlu0 %2984 }
 0x5af   :  { %12301 = vst [vmem:[#allocation514_spill] sm:$0xff] %v8368_v6  ;;  %v8372_v8 = vpop.permute.xlu2 %3036  ;;  %v3242_v6 = vmul.f32 %v3235_v50, %v8092_v28 }
 0x5b0   :  { %12302 = vst [vmem:[#allocation515_spill] sm:$0xff] %v8370_v2  ;;  %v3240_v2 = vmul.f32 %v3235_v50, %v8085_v10 }
 0x5b1   :  { %12303 = vst [vmem:[#allocation516_spill] sm:$0xff] %v8372_v8  ;;  %v3241_v8 = vmul.f32 %v3235_v50, %v8083_v14 }
 0x5b4   :  { %3256 = vrot.lane.b32.xlu1 %v3238_v13, %s6153_s28  ;;  %3254 = vrot.lane.b32.xlu0 %v3237_v9, %s6153_s28  ;;  %v3281_v9 = vstv %s5882_s7  ;;  %s5883_s7 = sld [smem:[#allocation8 + $0x10c]] }
 0x5b5   :  { %3258 = vrot.lane.b32.xlu2 %v3239_v0, %s6153_s28  ;;  %v3283_v1 = vmul.f32 %v3281_v9, %v8067_v5 }
 0x5b6   :  { %v8380_v37 = vpop.permute.xlu1 %3022  ;;  %v8382_v36 = vpop.permute.xlu0 %2990 }
 0x5b7   :  { %12304 = vst [vmem:[#allocation517_spill] sm:$0xff] %v8380_v37  ;;  %v8384_v51 = vpop.permute.xlu2 %3072  ;;  %v3243_v37 = vmul.f32 %v3235_v50, %v8101_v43  ;;  %v3286_v50 = vmul.f32 %v3281_v9, %v8085_v10 }
 0x5b8   :  { %12305 = vst [vmem:[#allocation518_spill] sm:$0xff] %v8382_v36 }
 0x5b9   :  { %12306 = vst [vmem:[#allocation519_spill] sm:$0xff] %v8384_v51  ;;  %v3282_v51 = vmul.f32 %v3281_v9, %v8056_v35 }
 0x5bc   :  { %3262 = vrot.lane.b32.xlu1 %v3241_v8, %s6153_s28  ;;  %3260 = vrot.lane.b32.xlu0 %v3240_v2, %s6153_s28 }
 0x5bd   :  { %3264 = vrot.lane.b32.xlu2 %v3242_v6, %s6153_s28 }
 0x5be   :  { %v8392_v13 = vpop.permute.xlu1 %3028  ;;  %v8394_v0 = vpop.permute.xlu0 %3026 }
 0x5bf   :  { %12307 = vst [vmem:[#allocation520_spill] sm:$0xff] %v8392_v13  ;;  %v8396_v36 = vpop.permute.xlu2 %3078 }
 0x5c0   :  { %12308 = vst [vmem:[#allocation521_spill] sm:$0xff] %v8394_v0  ;;  %v3284_v0 = vmul.f32 %v3281_v9, %v8065_v7 }
 0x5c1   :  { %12309 = vst [vmem:[#allocation522_spill] sm:$0xff] %v8396_v36  ;;  %v3285_v36 = vmul.f32 %v3281_v9, %v8074_v24 }
 0x5c4   :  { %3298 = vrot.lane.b32.xlu1 %v3282_v51, %s6154_s30  ;;  %3266 = vrot.lane.b32.xlu0 %v3243_v37, %s6153_s28 }
 0x5c5   :  { %3300 = vrot.lane.b32.xlu2 %v3283_v1, %s6154_s30 }
 0x5c6   :  { %v8404_v2 = vpop.permute.xlu1 %3034  ;;  %v8406_v6 = vpop.permute.xlu0 %3032 }
 0x5c7   :  { %12310 = vst [vmem:[#allocation523_spill] sm:$0xff] %v8404_v2  ;;  %v8408_v8 = vpop.permute.xlu2 %3114  ;;  %v3288_v2 = vmul.f32 %v3281_v9, %v8092_v28 }
 0x5c8   :  { %12311 = vst [vmem:[#allocation524_spill] sm:$0xff] %v8406_v6  ;;  %v3289_v6 = vmul.f32 %v3281_v9, %v8101_v43 }
 0x5c9   :  { %12312 = vst [vmem:[#allocation525_spill] sm:$0xff] %v8408_v8  ;;  %v3287_v8 = vmul.f32 %v3281_v9, %v8083_v14 }
 0x5cc   :  { %3304 = vrot.lane.b32.xlu1 %v3285_v36, %s6154_s30  ;;  %3302 = vrot.lane.b32.xlu0 %v3284_v0, %s6154_s30  ;;  %v3327_v36 = vstv %s5883_s7  ;;  %s5884_s7 = sld [smem:[#allocation8 + $0x10d]] }
 0x5cd   :  { %3306 = vrot.lane.b32.xlu2 %v3286_v50, %s6154_s30  ;;  %v3330_v13 = vmul.f32 %v3327_v36, %v8065_v7 }
 0x5ce   :  { %v8416_v1 = vpop.permute.xlu1 %3070  ;;  %v8418_v37 = vpop.permute.xlu0 %3068 }
 0x5cf   :  { %12313 = vst [vmem:[#allocation526_spill] sm:$0xff] %v8416_v1  ;;  %v8420_v51 = vpop.permute.xlu2 %3120  ;;  %v3328_v1 = vmul.f32 %v3327_v36, %v8056_v35 }
 0x5d0   :  { %12314 = vst [vmem:[#allocation527_spill] sm:$0xff] %v8418_v37 }
 0x5d1   :  { %12315 = vst [vmem:[#allocation528_spill] sm:$0xff] %v8420_v51  ;;  %v3329_v51 = vmul.f32 %v3327_v36, %v8067_v5 }
 0x5d4   :  { %3310 = vrot.lane.b32.xlu1 %v3288_v2, %s6154_s30  ;;  %3308 = vrot.lane.b32.xlu0 %v3287_v8, %s6154_s30  ;;  %v3332_v8 = vmul.f32 %v3327_v36, %v8085_v10 }
 0x5d5   :  { %3312 = vrot.lane.b32.xlu2 %v3289_v6, %s6154_s30 }
 0x5d6   :  { %v8428_v0 = vpop.permute.xlu1 %3076  ;;  %v8430_v50 = vpop.permute.xlu0 %3074 }
 0x5d7   :  { %12316 = vst [vmem:[#allocation529_spill] sm:$0xff] %v8428_v0  ;;  %v8432_v37 = vpop.permute.xlu2 %3126  ;;  %v3333_v0 = vmul.f32 %v3327_v36, %v8083_v14 }
 0x5d8   :  { %12317 = vst [vmem:[#allocation530_spill] sm:$0xff] %v8430_v50 }
 0x5d9   :  { %12318 = vst [vmem:[#allocation531_spill] sm:$0xff] %v8432_v37  ;;  %v3331_v37 = vmul.f32 %v3327_v36, %v8074_v24 }
 0x5dc   :  { %3346 = vrot.lane.b32.xlu1 %v3329_v51, %s6155_s8  ;;  %3344 = vrot.lane.b32.xlu0 %v3328_v1, %s6155_s8 }
 0x5dd   :  { %3348 = vrot.lane.b32.xlu2 %v3330_v13, %s6155_s8 }
 0x5de   :  { %v8440_v9 = vpop.permute.xlu1 %3082  ;;  %v8442_v2 = vpop.permute.xlu0 %3080 }
 0x5df   :  { %12319 = vst [vmem:[#allocation532_spill] sm:$0xff] %v8440_v9  ;;  %v8444_v6 = vpop.permute.xlu2 %3162  ;;  %v3334_v9 = vmul.f32 %v3327_v36, %v8092_v28 }
 0x5e0   :  { %12320 = vst [vmem:[#allocation533_spill] sm:$0xff] %v8442_v2  ;;  %v3335_v2 = vmul.f32 %v3327_v36, %v8101_v43 }
 0x5e1   :  { %12321 = vst [vmem:[#allocation534_spill] sm:$0xff] %v8444_v6  ;;  %v3373_v6 = vstv %s5884_s7  ;;  %s5885_s7 = sld [smem:[#allocation8 + $0x10e]] }
 0x5e2   :  { %v3374_v50 = vmul.f32 %v3373_v6, %v8056_v35  ;;  %v3377_v36 = vmul.f32 %v3373_v6, %v8074_v24 }
 0x5e4   :  { %3352 = vrot.lane.b32.xlu1 %v3332_v8, %s6155_s8  ;;  %3350 = vrot.lane.b32.xlu0 %v3331_v37, %s6155_s8 }
 0x5e5   :  { %3354 = vrot.lane.b32.xlu2 %v3333_v0, %s6155_s8 }
 0x5e6   :  { %v8452_v13 = vpop.permute.xlu1 %3118  ;;  %v8454_v1 = vpop.permute.xlu0 %3116 }
 0x5e7   :  { %12322 = vst [vmem:[#allocation535_spill] sm:$0xff] %v8452_v13  ;;  %v8456_v51 = vpop.permute.xlu2 %3168 }
 0x5e8   :  { %12323 = vst [vmem:[#allocation536_spill] sm:$0xff] %v8454_v1  ;;  %v3375_v1 = vmul.f32 %v3373_v6, %v8067_v5 }
 0x5e9   :  { %12324 = vst [vmem:[#allocation537_spill] sm:$0xff] %v8456_v51  ;;  %v3376_v51 = vmul.f32 %v3373_v6, %v8065_v7 }
 0x5ec   :  { %3358 = vrot.lane.b32.xlu1 %v3335_v2, %s6155_s8  ;;  %3356 = vrot.lane.b32.xlu0 %v3334_v9, %s6155_s8 }
 0x5ed   :  { %3390 = vrot.lane.b32.xlu2 %v3374_v50, %s6156_s10 }
 0x5ee   :  { %v8464_v37 = vpop.permute.xlu1 %3124  ;;  %v8466_v0 = vpop.permute.xlu0 %3122 }
 0x5ef   :  { %12325 = vst [vmem:[#allocation538_spill] sm:$0xff] %v8464_v37  ;;  %v8468_v8 = vpop.permute.xlu2 %3174  ;;  %v3380_v37 = vmul.f32 %v3373_v6, %v8092_v28 }
 0x5f0   :  { %12326 = vst [vmem:[#allocation539_spill] sm:$0xff] %v8466_v0  ;;  %v3378_v0 = vmul.f32 %v3373_v6, %v8085_v10 }
 0x5f1   :  { %12327 = vst [vmem:[#allocation540_spill] sm:$0xff] %v8468_v8  ;;  %v3379_v8 = vmul.f32 %v3373_v6, %v8083_v14 }
 0x5f4   :  { %3394 = vrot.lane.b32.xlu1 %v3376_v51, %s6156_s10  ;;  %3392 = vrot.lane.b32.xlu0 %v3375_v1, %s6156_s10  ;;  %v3419_v1 = vstv %s5885_s7  ;;  %s5886_s7 = sld [smem:[#allocation8 + $0x10f]] }
 0x5f5   :  { %3396 = vrot.lane.b32.xlu2 %v3377_v36, %s6156_s10  ;;  %v3421_v13 = vmul.f32 %v3419_v1, %v8067_v5 }
 0x5f6   :  { %v8476_v50 = vpop.permute.xlu1 %3160  ;;  %v8478_v9 = vpop.permute.xlu0 %3128 }
 0x5f7   :  { %12328 = vst [vmem:[#allocation541_spill] sm:$0xff] %v8476_v50  ;;  %v8480_v2 = vpop.permute.xlu2 %3210  ;;  %v3381_v50 = vmul.f32 %v3373_v6, %v8101_v43  ;;  %v3424_v6 = vmul.f32 %v3419_v1, %v8085_v10 }
 0x5f8   :  { %12329 = vst [vmem:[#allocation542_spill] sm:$0xff] %v8478_v9 }
 0x5f9   :  { %12330 = vst [vmem:[#allocation543_spill] sm:$0xff] %v8480_v2  ;;  %v3420_v2 = vmul.f32 %v3419_v1, %v8056_v35 }
 0x5fc   :  { %3400 = vrot.lane.b32.xlu1 %v3379_v8, %s6156_s10  ;;  %3398 = vrot.lane.b32.xlu0 %v3378_v0, %s6156_s10 }
 0x5fd   :  { %3402 = vrot.lane.b32.xlu2 %v3380_v37, %s6156_s10 }
 0x5fe   :  { %v8488_v51 = vpop.permute.xlu1 %3166  ;;  %v8490_v36 = vpop.permute.xlu0 %3164 }
 0x5ff   :  { %12331 = vst [vmem:[#allocation544_spill] sm:$0xff] %v8488_v51  ;;  %v8492_v9 = vpop.permute.xlu2 %3216 }
 0x600   :  { %12332 = vst [vmem:[#allocation545_spill] sm:$0xff] %v8490_v36  ;;  %v3422_v36 = vmul.f32 %v3419_v1, %v8065_v7 }
 0x601   :  { %12333 = vst [vmem:[#allocation546_spill] sm:$0xff] %v8492_v9  ;;  %v3423_v9 = vmul.f32 %v3419_v1, %v8074_v24 }
 0x604   :  { %3436 = vrot.lane.b32.xlu1 %v3420_v2, %s6157_s1  ;;  %3404 = vrot.lane.b32.xlu0 %v3381_v50, %s6156_s10 }
 0x605   :  { %3438 = vrot.lane.b32.xlu2 %v3421_v13, %s6157_s1 }
 0x606   :  { %v8500_v0 = vpop.permute.xlu1 %3172  ;;  %v8502_v37 = vpop.permute.xlu0 %3170 }
 0x607   :  { %12334 = vst [vmem:[#allocation547_spill] sm:$0xff] %v8500_v0  ;;  %v8504_v8 = vpop.permute.xlu2 %3252  ;;  %v3426_v0 = vmul.f32 %v3419_v1, %v8092_v28 }
 0x608   :  { %12335 = vst [vmem:[#allocation548_spill] sm:$0xff] %v8502_v37  ;;  %v3427_v37 = vmul.f32 %v3419_v1, %v8101_v43 }
 0x609   :  { %12336 = vst [vmem:[#allocation549_spill] sm:$0xff] %v8504_v8  ;;  %v3425_v8 = vmul.f32 %v3419_v1, %v8083_v14 }
 0x60c   :  { %3442 = vrot.lane.b32.xlu1 %v3423_v9, %s6157_s1  ;;  %3440 = vrot.lane.b32.xlu0 %v3422_v36, %s6157_s1  ;;  %v3465_v9 = vstv %s5886_s7  ;;  %s5887_s7 = sld [smem:[#allocation8 + $0x110]] }
 0x60d   :  { %3444 = vrot.lane.b32.xlu2 %v3424_v6, %s6157_s1  ;;  %v3468_v51 = vmul.f32 %v3465_v9, %v8065_v7 }
 0x60e   :  { %v8512_v13 = vpop.permute.xlu1 %3208  ;;  %v8514_v50 = vpop.permute.xlu0 %3206 }
 0x60f   :  { %12337 = vst [vmem:[#allocation550_spill] sm:$0xff] %v8512_v13  ;;  %v8516_v2 = vpop.permute.xlu2 %3258  ;;  %v3466_v13 = vmul.f32 %v3465_v9, %v8056_v35 }
 0x610   :  { %12338 = vst [vmem:[#allocation551_spill] sm:$0xff] %v8514_v50 }
 0x611   :  { %12339 = vst [vmem:[#allocation552_spill] sm:$0xff] %v8516_v2  ;;  %v3467_v2 = vmul.f32 %v3465_v9, %v8067_v5 }
 0x614   :  { %3448 = vrot.lane.b32.xlu1 %v3426_v0, %s6157_s1  ;;  %3446 = vrot.lane.b32.xlu0 %v3425_v8, %s6157_s1  ;;  %v3470_v8 = vmul.f32 %v3465_v9, %v8085_v10 }
 0x615   :  { %3450 = vrot.lane.b32.xlu2 %v3427_v37, %s6157_s1 }
 0x616   :  { %v8524_v36 = vpop.permute.xlu1 %3214  ;;  %v8526_v6 = vpop.permute.xlu0 %3212 }
 0x617   :  { %12340 = vst [vmem:[#allocation553_spill] sm:$0xff] %v8524_v36  ;;  %v8528_v50 = vpop.permute.xlu2 %3264  ;;  %v3471_v36 = vmul.f32 %v3465_v9, %v8083_v14 }
 0x618   :  { %12341 = vst [vmem:[#allocation554_spill] sm:$0xff] %v8526_v6 }
 0x619   :  { %12342 = vst [vmem:[#allocation555_spill] sm:$0xff] %v8528_v50  ;;  %v3469_v50 = vmul.f32 %v3465_v9, %v8074_v24 }
 0x61c   :  { %3484 = vrot.lane.b32.xlu1 %v3467_v2, %s6158_s13  ;;  %3482 = vrot.lane.b32.xlu0 %v3466_v13, %s6158_s13 }
 0x61d   :  { %3486 = vrot.lane.b32.xlu2 %v3468_v51, %s6158_s13 }
 0x61e   :  { %v8536_v1 = vpop.permute.xlu1 %3220  ;;  %v8538_v0 = vpop.permute.xlu0 %3218 }
 0x61f   :  { %12343 = vst [vmem:[#allocation556_spill] sm:$0xff] %v8536_v1  ;;  %v8540_v37 = vpop.permute.xlu2 %3300  ;;  %v3472_v1 = vmul.f32 %v3465_v9, %v8092_v28 }
 0x620   :  { %12344 = vst [vmem:[#allocation557_spill] sm:$0xff] %v8538_v0  ;;  %v3473_v0 = vmul.f32 %v3465_v9, %v8101_v43 }
 0x621   :  { %12345 = vst [vmem:[#allocation558_spill] sm:$0xff] %v8540_v37  ;;  %v3511_v37 = vstv %s5887_s7  ;;  %s5888_s7 = sld [smem:[#allocation8 + $0x111]] }
 0x622   :  { %v3512_v6 = vmul.f32 %v3511_v37, %v8056_v35  ;;  %v3515_v9 = vmul.f32 %v3511_v37, %v8074_v24 }
 0x624   :  { %3490 = vrot.lane.b32.xlu1 %v3470_v8, %s6158_s13  ;;  %3488 = vrot.lane.b32.xlu0 %v3469_v50, %s6158_s13 }
 0x625   :  { %3492 = vrot.lane.b32.xlu2 %v3471_v36, %s6158_s13 }
 0x626   :  { %v8548_v51 = vpop.permute.xlu1 %3256  ;;  %v8550_v13 = vpop.permute.xlu0 %3254 }
 0x627   :  { %12346 = vst [vmem:[#allocation559_spill] sm:$0xff] %v8548_v51  ;;  %v8552_v2 = vpop.permute.xlu2 %3306 }
 0x628   :  { %12347 = vst [vmem:[#allocation560_spill] sm:$0xff] %v8550_v13  ;;  %v3513_v13 = vmul.f32 %v3511_v37, %v8067_v5 }
 0x629   :  { %12348 = vst [vmem:[#allocation561_spill] sm:$0xff] %v8552_v2  ;;  %v3514_v2 = vmul.f32 %v3511_v37, %v8065_v7 }
 0x62c   :  { %3496 = vrot.lane.b32.xlu1 %v3473_v0, %s6158_s13  ;;  %3494 = vrot.lane.b32.xlu0 %v3472_v1, %s6158_s13 }
 0x62d   :  { %3528 = vrot.lane.b32.xlu2 %v3512_v6, %s6159_s17 }
 0x62e   :  { %v8560_v50 = vpop.permute.xlu1 %3262  ;;  %v8562_v36 = vpop.permute.xlu0 %3260 }
 0x62f   :  { %12349 = vst [vmem:[#allocation562_spill] sm:$0xff] %v8560_v50  ;;  %v8564_v8 = vpop.permute.xlu2 %3312  ;;  %v3518_v50 = vmul.f32 %v3511_v37, %v8092_v28 }
 0x630   :  { %12350 = vst [vmem:[#allocation563_spill] sm:$0xff] %v8562_v36  ;;  %v3516_v36 = vmul.f32 %v3511_v37, %v8085_v10 }
 0x631   :  { %12351 = vst [vmem:[#allocation564_spill] sm:$0xff] %v8564_v8  ;;  %v3517_v8 = vmul.f32 %v3511_v37, %v8083_v14 }
 0x634   :  { %3532 = vrot.lane.b32.xlu1 %v3514_v2, %s6159_s17  ;;  %3530 = vrot.lane.b32.xlu0 %v3513_v13, %s6159_s17  ;;  %v3557_v13 = vstv %s5888_s7  ;;  %s5889_s7 = sld [smem:[#allocation8 + $0x112]] }
 0x635   :  { %3534 = vrot.lane.b32.xlu2 %v3515_v9, %s6159_s17  ;;  %v3559_v51 = vmul.f32 %v3557_v13, %v8067_v5 }
 0x636   :  { %v8572_v6 = vpop.permute.xlu1 %3298  ;;  %v8574_v1 = vpop.permute.xlu0 %3266 }
 0x637   :  { %12352 = vst [vmem:[#allocation565_spill] sm:$0xff] %v8572_v6  ;;  %v8576_v0 = vpop.permute.xlu2 %3348  ;;  %v3519_v6 = vmul.f32 %v3511_v37, %v8101_v43  ;;  %v3562_v37 = vmul.f32 %v3557_v13, %v8085_v10 }
 0x638   :  { %12353 = vst [vmem:[#allocation566_spill] sm:$0xff] %v8574_v1 }
 0x639   :  { %12354 = vst [vmem:[#allocation567_spill] sm:$0xff] %v8576_v0  ;;  %v3558_v0 = vmul.f32 %v3557_v13, %v8056_v35 }
 0x63c   :  { %3538 = vrot.lane.b32.xlu1 %v3517_v8, %s6159_s17  ;;  %3536 = vrot.lane.b32.xlu0 %v3516_v36, %s6159_s17 }
 0x63d   :  { %3540 = vrot.lane.b32.xlu2 %v3518_v50, %s6159_s17 }
 0x63e   :  { %v8584_v2 = vpop.permute.xlu1 %3304  ;;  %v8586_v9 = vpop.permute.xlu0 %3302 }
 0x63f   :  { %12355 = vst [vmem:[#allocation568_spill] sm:$0xff] %v8584_v2  ;;  %v8588_v1 = vpop.permute.xlu2 %3354 }
 0x640   :  { %12356 = vst [vmem:[#allocation569_spill] sm:$0xff] %v8586_v9  ;;  %v3560_v9 = vmul.f32 %v3557_v13, %v8065_v7 }
 0x641   :  { %12357 = vst [vmem:[#allocation570_spill] sm:$0xff] %v8588_v1  ;;  %v3561_v1 = vmul.f32 %v3557_v13, %v8074_v24 }
 0x644   :  { %3574 = vrot.lane.b32.xlu1 %v3558_v0, %s6160_s21  ;;  %3542 = vrot.lane.b32.xlu0 %v3519_v6, %s6159_s17 }
 0x645   :  { %3576 = vrot.lane.b32.xlu2 %v3559_v51, %s6160_s21 }
 0x646   :  { %v8596_v36 = vpop.permute.xlu1 %3310  ;;  %v8598_v50 = vpop.permute.xlu0 %3308 }
 0x647   :  { %12358 = vst [vmem:[#allocation571_spill] sm:$0xff] %v8596_v36  ;;  %v8600_v8 = vpop.permute.xlu2 %3390  ;;  %v3564_v36 = vmul.f32 %v3557_v13, %v8092_v28 }
 0x648   :  { %12359 = vst [vmem:[#allocation572_spill] sm:$0xff] %v8598_v50  ;;  %v3565_v50 = vmul.f32 %v3557_v13, %v8101_v43 }
 0x649   :  { %12360 = vst [vmem:[#allocation573_spill] sm:$0xff] %v8600_v8  ;;  %v3563_v8 = vmul.f32 %v3557_v13, %v8083_v14 }
 0x64c   :  { %3580 = vrot.lane.b32.xlu1 %v3561_v1, %s6160_s21  ;;  %3578 = vrot.lane.b32.xlu0 %v3560_v9, %s6160_s21  ;;  %v3603_v1 = vstv %s5889_s7  ;;  %s5890_s7 = sld [smem:[#allocation8 + $0x113]] }
 0x64d   :  { %3582 = vrot.lane.b32.xlu2 %v3562_v37, %s6160_s21  ;;  %v3606_v2 = vmul.f32 %v3603_v1, %v8065_v7 }
 0x64e   :  { %v8608_v51 = vpop.permute.xlu1 %3346  ;;  %v8610_v6 = vpop.permute.xlu0 %3344 }
 0x64f   :  { %12361 = vst [vmem:[#allocation574_spill] sm:$0xff] %v8608_v51  ;;  %v8612_v0 = vpop.permute.xlu2 %3396  ;;  %v3604_v51 = vmul.f32 %v3603_v1, %v8056_v35 }
 0x650   :  { %12362 = vst [vmem:[#allocation575_spill] sm:$0xff] %v8610_v6 }
 0x651   :  { %12363 = vst [vmem:[#allocation576_spill] sm:$0xff] %v8612_v0  ;;  %v3605_v0 = vmul.f32 %v3603_v1, %v8067_v5 }
 0x654   :  { %3586 = vrot.lane.b32.xlu1 %v3564_v36, %s6160_s21  ;;  %3584 = vrot.lane.b32.xlu0 %v3563_v8, %s6160_s21  ;;  %v3608_v8 = vmul.f32 %v3603_v1, %v8085_v10 }
 0x655   :  { %3588 = vrot.lane.b32.xlu2 %v3565_v50, %s6160_s21 }
 0x656   :  { %v8620_v9 = vpop.permute.xlu1 %3352  ;;  %v8622_v37 = vpop.permute.xlu0 %3350 }
 0x657   :  { %12364 = vst [vmem:[#allocation577_spill] sm:$0xff] %v8620_v9  ;;  %v8624_v6 = vpop.permute.xlu2 %3402  ;;  %v3609_v9 = vmul.f32 %v3603_v1, %v8083_v14 }
 0x658   :  { %12365 = vst [vmem:[#allocation578_spill] sm:$0xff] %v8622_v37 }
 0x659   :  { %12366 = vst [vmem:[#allocation579_spill] sm:$0xff] %v8624_v6  ;;  %v3607_v6 = vmul.f32 %v3603_v1, %v8074_v24 }
 0x65c   :  { %3622 = vrot.lane.b32.xlu1 %v3605_v0, %s6161_s25  ;;  %3620 = vrot.lane.b32.xlu0 %v3604_v51, %s6161_s25 }
 0x65d   :  { %3624 = vrot.lane.b32.xlu2 %v3606_v2, %s6161_s25 }
 0x65e   :  { %v8632_v13 = vpop.permute.xlu1 %3358  ;;  %v8634_v36 = vpop.permute.xlu0 %3356 }
 0x65f   :  { %12367 = vst [vmem:[#allocation580_spill] sm:$0xff] %v8632_v13  ;;  %v8636_v50 = vpop.permute.xlu2 %3438  ;;  %v3610_v13 = vmul.f32 %v3603_v1, %v8092_v28 }
 0x660   :  { %12368 = vst [vmem:[#allocation581_spill] sm:$0xff] %v8634_v36  ;;  %v3611_v36 = vmul.f32 %v3603_v1, %v8101_v43 }
 0x661   :  { %12369 = vst [vmem:[#allocation582_spill] sm:$0xff] %v8636_v50  ;;  %v3649_v50 = vstv %s5890_s7  ;;  %s5891_s7 = sld [smem:[#allocation8 + $0x114]] }
 0x662   :  { %v3650_v37 = vmul.f32 %v3649_v50, %v8056_v35  ;;  %v3653_v1 = vmul.f32 %v3649_v50, %v8074_v24 }
 0x664   :  { %3628 = vrot.lane.b32.xlu1 %v3608_v8, %s6161_s25  ;;  %3626 = vrot.lane.b32.xlu0 %v3607_v6, %s6161_s25 }
 0x665   :  { %3630 = vrot.lane.b32.xlu2 %v3609_v9, %s6161_s25 }
 0x666   :  { %v8644_v2 = vpop.permute.xlu1 %3394  ;;  %v8646_v51 = vpop.permute.xlu0 %3392 }
 0x667   :  { %12370 = vst [vmem:[#allocation583_spill] sm:$0xff] %v8644_v2  ;;  %v8648_v0 = vpop.permute.xlu2 %3444 }
 0x668   :  { %12371 = vst [vmem:[#allocation584_spill] sm:$0xff] %v8646_v51  ;;  %v3651_v51 = vmul.f32 %v3649_v50, %v8067_v5 }
 0x669   :  { %12372 = vst [vmem:[#allocation585_spill] sm:$0xff] %v8648_v0  ;;  %v3652_v0 = vmul.f32 %v3649_v50, %v8065_v7 }
 0x66c   :  { %3634 = vrot.lane.b32.xlu1 %v3611_v36, %s6161_s25  ;;  %3632 = vrot.lane.b32.xlu0 %v3610_v13, %s6161_s25 }
 0x66d   :  { %3666 = vrot.lane.b32.xlu2 %v3650_v37, %s11780_s29 }
 0x66e   :  { %v8656_v6 = vpop.permute.xlu1 %3400  ;;  %v8658_v9 = vpop.permute.xlu0 %3398 }
 0x66f   :  { %12373 = vst [vmem:[#allocation586_spill] sm:$0xff] %v8656_v6  ;;  %v8660_v8 = vpop.permute.xlu2 %3450  ;;  %v3656_v6 = vmul.f32 %v3649_v50, %v8092_v28 }
 0x670   :  { %12374 = vst [vmem:[#allocation587_spill] sm:$0xff] %v8658_v9  ;;  %v3654_v9 = vmul.f32 %v3649_v50, %v8085_v10 }
 0x671   :  { %12375 = vst [vmem:[#allocation588_spill] sm:$0xff] %v8660_v8  ;;  %v3655_v8 = vmul.f32 %v3649_v50, %v8083_v14 }
 0x674   :  { %3670 = vrot.lane.b32.xlu1 %v3652_v0, %s11780_s29  ;;  %3668 = vrot.lane.b32.xlu0 %v3651_v51, %s11780_s29  ;;  %v3695_v51 = vstv %s5891_s7  ;;  %s5892_s7 = sld [smem:[#allocation8 + $0x115]] }
 0x675   :  { %3672 = vrot.lane.b32.xlu2 %v3653_v1, %s11780_s29  ;;  %v3697_v2 = vmul.f32 %v3695_v51, %v8067_v5 }
 0x676   :  { %v8668_v37 = vpop.permute.xlu1 %3436  ;;  %v8670_v13 = vpop.permute.xlu0 %3404 }
 0x677   :  { %12376 = vst [vmem:[#allocation589_spill] sm:$0xff] %v8668_v37  ;;  %v8672_v36 = vpop.permute.xlu2 %3486  ;;  %v3657_v37 = vmul.f32 %v3649_v50, %v8101_v43  ;;  %v3700_v50 = vmul.f32 %v3695_v51, %v8085_v10 }
 0x678   :  { %12377 = vst [vmem:[#allocation590_spill] sm:$0xff] %v8670_v13 }
 0x679   :  { %12378 = vst [vmem:[#allocation591_spill] sm:$0xff] %v8672_v36  ;;  %v3696_v36 = vmul.f32 %v3695_v51, %v8056_v35  ;;  %v3698_v35 = vmul.f32 %v3695_v51, %v8065_v7  ;;  %v3703_v7 = vmul.f32 %v3695_v51, %v8101_v43 }
 0x67a   :  { %v3741_v10 = vstv %s5892_s7  ;;  %s5893_s7 = sld [smem:[#allocation8 + $0x116]] }
 0x67c   :  { %3676 = vrot.lane.b32.xlu1 %v3655_v8, %s11780_s29  ;;  %3674 = vrot.lane.b32.xlu0 %v3654_v9, %s11780_s29 }
 0x67d   :  { %3678 = vrot.lane.b32.xlu2 %v3656_v6, %s11780_s29 }
 0x67e   :  { %v8680_v0 = vpop.permute.xlu1 %3442  ;;  %v8682_v1 = vpop.permute.xlu0 %3440 }
 0x67f   :  { %12379 = vst [vmem:[#allocation592_spill] sm:$0xff] %v8680_v0  ;;  %v8684_v13 = vpop.permute.xlu2 %3492 }
 0x680   :  { %12380 = vst [vmem:[#allocation593_spill] sm:$0xff] %v8682_v1  ;;  %v3787_v1 = vstv %s5893_s7  ;;  %s5894_s7 = sld [smem:[#allocation8 + $0x117]] }
 0x681   :  { %12381 = vst [vmem:[#allocation594_spill] sm:$0xff] %v8684_v13  ;;  %v3699_v13 = vmul.f32 %v3695_v51, %v8074_v24  ;;  %v3701_v24 = vmul.f32 %v3695_v51, %v8083_v14  ;;  %v8725_v14 = vld [vmem:[#allocation4 + $0x80] sm:$0xff] }
 0x682   :  { %v3742_v43 = vmul.f32 %v8725_v14, %v3741_v10 }
 0x684   :  { %3712 = vrot.lane.b32.xlu1 %v3696_v36, %s11776_s9  ;;  %3680 = vrot.lane.b32.xlu0 %v3657_v37, %s11780_s29  ;;  %v3702_v36 = vmul.f32 %v3695_v51, %v8092_v28  ;;  %v8728_v51 = vld [vmem:[#allocation4 + $0x90] sm:$0xff]  ;;  %s12417_s29 = smov 104  }
 0x685   :  { %3714 = vrot.lane.b32.xlu2 %v3697_v2, %s11776_s9 }
 0x686   :  { %v8692_v9 = vpop.permute.xlu1 %3448  ;;  %v8694_v6 = vpop.permute.xlu0 %3446 }
 0x687   :  { %12382 = vst [vmem:[#allocation595_spill] sm:$0xff] %v8692_v9  ;;  %v8696_v8 = vpop.permute.xlu2 %3528  ;;  %v8722_v9 = vld [vmem:[#allocation4 + $0x88] sm:$0xff] }
 0x688   :  { %12383 = vst [vmem:[#allocation596_spill] sm:$0xff] %v8694_v6  ;;  %v3743_v28 = vmul.f32 %v8722_v9, %v3741_v10 }
 0x689   :  { %12384 = vst [vmem:[#allocation597_spill] sm:$0xff] %v8696_v8 }
 0x68c   :  { %3718 = vrot.lane.b32.xlu1 %v3699_v13, %s11776_s9  ;;  %3716 = vrot.lane.b32.xlu0 %v3698_v35, %s11776_s9 }
 0x68d   :  { %3720 = vrot.lane.b32.xlu2 %v3700_v50, %s11776_s9 }
 0x68e   :  { %v8704_v5 = vpop.permute.xlu1 %3484  ;;  %v8706_v2 = vpop.permute.xlu0 %3482 }
 0x68f   :  { %12385 = vst [vmem:[#allocation598_spill] sm:$0xff] %v8704_v5  ;;  %v8708_v37 = vpop.permute.xlu2 %3534 }
 0x690   :  { %12386 = vst [vmem:[#allocation599_spill] sm:$0xff] %v8706_v2  ;;  %v8761_v2 = vld [vmem:[#allocation4 + $0xb0] sm:$0xff] }
 0x691   :  { %12387 = vst [vmem:[#allocation600_spill] sm:$0xff] %v8708_v37  ;;  %v8743_v37 = vld [vmem:[#allocation4 + $0x98] sm:$0xff]  ;;  %v3748_v5 = vmul.f32 %v8761_v2, %v3741_v10 }
 0x692   :  { %v3745_v6 = vmul.f32 %v8743_v37, %v3741_v10 }
 0x694   :  { %3724 = vrot.lane.b32.xlu1 %v3702_v36, %s11776_s9  ;;  %3722 = vrot.lane.b32.xlu0 %v3701_v24, %s11776_s9  ;;  %v3744_v36 = vmul.f32 %v8728_v51, %v3741_v10 }
 0x695   :  { %3726 = vrot.lane.b32.xlu2 %v3703_v7, %s11776_s9  ;;  %s12397_s9 = smov 106  }
 0x696   :  { %v8716_v13 = vpop.permute.xlu1 %3490  ;;  %v8718_v35 = vpop.permute.xlu0 %3488 }
 0x697   :  { %12388 = vst [vmem:[#allocation601_spill] sm:$0xff] %v8716_v13  ;;  %v8720_v50 = vpop.permute.xlu2 %3540  ;;  %v8740_v13 = vld [vmem:[#allocation4 + $0xa0] sm:$0xff] }
 0x698   :  { %12389 = vst [vmem:[#allocation602_spill] sm:$0xff] %v8718_v35  ;;  %v3746_v8 = vmul.f32 %v8740_v13, %v3741_v10 }
 0x699   :  { %12390 = vst [vmem:[#allocation603_spill] sm:$0xff] %v8720_v50 }
 0x69c   :  { %3760 = vrot.lane.b32.xlu1 %v3743_v28, %s11778_s11  ;;  %3758 = vrot.lane.b32.xlu0 %v3742_v43, %s11778_s11  ;;  %v8746_v28 = vld [vmem:[#allocation4 + $0xa8] sm:$0xff] }
 0x69d   :  { %3762 = vrot.lane.b32.xlu2 %v3744_v36, %s11778_s11  ;;  %v3747_v43 = vmul.f32 %v8746_v28, %v3741_v10 }
 0x69e   :  { %v8734_v24 = vpop.permute.xlu1 %3496  ;;  %v8736_v7 = vpop.permute.xlu0 %3494 }
 0x69f   :  { %12391 = vst [vmem:[#allocation604_spill] sm:$0xff] %v8734_v24  ;;  %v8738_v50 = vpop.permute.xlu2 %3576 }
 0x6a0   :  { %12392 = vst [vmem:[#allocation605_spill] sm:$0xff] %v8736_v7 }
 0x6a1   :  { %12393 = vst [vmem:[#allocation606_spill] sm:$0xff] %v8738_v50  ;;  %v8758_v50 = vld [vmem:[#allocation4 + $0xb8] sm:$0xff] }
 0x6a2   :  { %v3749_v35 = vmul.f32 %v8758_v50, %v3741_v10  ;;  %v3791_v10 = vmul.f32 %v8743_v37, %v3787_v1 }
 0x6a4   :  { %3766 = vrot.lane.b32.xlu1 %v3746_v8, %s11778_s11  ;;  %3764 = vrot.lane.b32.xlu0 %v3745_v6, %s11778_s11  ;;  %v3788_v8 = vmul.f32 %v8725_v14, %v3787_v1 }
 0x6a5   :  { %3768 = vrot.lane.b32.xlu2 %v3747_v43, %s11778_s11 }
 0x6a6   :  { %v8752_v36 = vpop.permute.xlu1 %3532  ;;  %v8754_v7 = vpop.permute.xlu0 %3530 }
 0x6a7   :  { %12394 = vst [vmem:[#allocation607_spill] sm:$0xff] %v8752_v36  ;;  %v8756_v24 = vpop.permute.xlu2 %3582  ;;  %v3789_v36 = vmul.f32 %v8722_v9, %v3787_v1 }
 0x6a8   :  { %12395 = vst [vmem:[#allocation608_spill] sm:$0xff] %v8754_v7  ;;  %v3790_v7 = vmul.f32 %v8728_v51, %v3787_v1 }
 0x6a9   :  { %12396 = vst [vmem:[#allocation609_spill] sm:$0xff] %v8756_v24 }
 0x6ac   :  { %3772 = vrot.lane.b32.xlu1 %v3749_v35, %s11778_s11  ;;  %3770 = vrot.lane.b32.xlu0 %v3748_v5, %s11778_s11  ;;  %s12407_s11 = smov 105  }
 0x6ad   :  { %3804 = vrot.lane.b32.xlu2 %v3788_v8, %s12397_s9 }
 0x6ae   :  { %v8768_v6 = vpop.permute.xlu1 %3538  ;;  %v8770_v43 = vpop.permute.xlu0 %3536 }
 0x6af   :  { %12398 = vst [vmem:[#allocation610_spill] sm:$0xff] %v8768_v6  ;;  %v8772_v24 = vpop.permute.xlu2 %3588  ;;  %v3794_v6 = vmul.f32 %v8761_v2, %v3787_v1 }
 0x6b0   :  { %12399 = vst [vmem:[#allocation611_spill] sm:$0xff] %v8770_v43  ;;  %v3792_v43 = vmul.f32 %v8740_v13, %v3787_v1 }
 0x6b1   :  { %12400 = vst [vmem:[#allocation612_spill] sm:$0xff] %v8772_v24  ;;  %v3793_v24 = vmul.f32 %v8746_v28, %v3787_v1 }
 0x6b4   :  { %3808 = vrot.lane.b32.xlu1 %v3790_v7, %s12397_s9  ;;  %3806 = vrot.lane.b32.xlu0 %v3789_v36, %s12397_s9  ;;  %v3833_v7 = vstv %s5894_s7  ;;  %s5895_s7 = sld [smem:[#allocation8 + $0x118]] }
 0x6b5   :  { %3810 = vrot.lane.b32.xlu2 %v3791_v10, %s12397_s9  ;;  %v3835_v0 = vmul.f32 %v8722_v9, %v3833_v7 }
 0x6b6   :  { %v8780_v5 = vpop.permute.xlu1 %3574  ;;  %v8782_v35 = vpop.permute.xlu0 %3542 }
 0x6b7   :  { %12401 = vst [vmem:[#allocation613_spill] sm:$0xff] %v8780_v5  ;;  %v8784_v8 = vpop.permute.xlu2 %3624  ;;  %v3795_v5 = vmul.f32 %v8758_v50, %v3787_v1  ;;  %v3838_v1 = vmul.f32 %v8740_v13, %v3833_v7 }
 0x6b8   :  { %12402 = vst [vmem:[#allocation614_spill] sm:$0xff] %v8782_v35 }
 0x6b9   :  { %12403 = vst [vmem:[#allocation615_spill] sm:$0xff] %v8784_v8  ;;  %v3834_v8 = vmul.f32 %v8725_v14, %v3833_v7 }
 0x6bc   :  { %3814 = vrot.lane.b32.xlu1 %v3793_v24, %s12397_s9  ;;  %3812 = vrot.lane.b32.xlu0 %v3792_v43, %s12397_s9 }
 0x6bd   :  { %3816 = vrot.lane.b32.xlu2 %v3794_v6, %s12397_s9 }
 0x6be   :  { %v8792_v36 = vpop.permute.xlu1 %3580  ;;  %v8794_v10 = vpop.permute.xlu0 %3578 }
 0x6bf   :  { %12404 = vst [vmem:[#allocation616_spill] sm:$0xff] %v8792_v36  ;;  %v8796_v35 = vpop.permute.xlu2 %3630 }
 0x6c0   :  { %12405 = vst [vmem:[#allocation617_spill] sm:$0xff] %v8794_v10  ;;  %v3836_v10 = vmul.f32 %v8728_v51, %v3833_v7 }
 0x6c1   :  { %12406 = vst [vmem:[#allocation618_spill] sm:$0xff] %v8796_v35  ;;  %v3837_v35 = vmul.f32 %v8743_v37, %v3833_v7 }
 0x6c4   :  { %3850 = vrot.lane.b32.xlu1 %v3834_v8, %s12407_s11  ;;  %3818 = vrot.lane.b32.xlu0 %v3795_v5, %s12397_s9 }
 0x6c5   :  { %3852 = vrot.lane.b32.xlu2 %v3835_v0, %s12407_s11 }
 0x6c6   :  { %v8804_v24 = vpop.permute.xlu1 %3586  ;;  %v8806_v6 = vpop.permute.xlu0 %3584 }
 0x6c7   :  { %12408 = vst [vmem:[#allocation619_spill] sm:$0xff] %v8804_v24  ;;  %v8808_v43 = vpop.permute.xlu2 %3666  ;;  %v3840_v24 = vmul.f32 %v8761_v2, %v3833_v7 }
 0x6c8   :  { %12409 = vst [vmem:[#allocation620_spill] sm:$0xff] %v8806_v6  ;;  %v3841_v6 = vmul.f32 %v8758_v50, %v3833_v7 }
 0x6c9   :  { %12410 = vst [vmem:[#allocation621_spill] sm:$0xff] %v8808_v43  ;;  %v3839_v43 = vmul.f32 %v8746_v28, %v3833_v7 }
 0x6cc   :  { %3856 = vrot.lane.b32.xlu1 %v3837_v35, %s12407_s11  ;;  %3854 = vrot.lane.b32.xlu0 %v3836_v10, %s12407_s11  ;;  %v3879_v35 = vstv %s5895_s7  ;;  %s5896_s7 = sld [smem:[#allocation8 + $0x119]] }
 0x6cd   :  { %3858 = vrot.lane.b32.xlu2 %v3838_v1, %s12407_s11  ;;  %v3882_v36 = vmul.f32 %v8728_v51, %v3879_v35 }
 0x6ce   :  { %v8816_v0 = vpop.permute.xlu1 %3622  ;;  %v8818_v5 = vpop.permute.xlu0 %3620 }
 0x6cf   :  { %12411 = vst [vmem:[#allocation622_spill] sm:$0xff] %v8816_v0  ;;  %v8820_v8 = vpop.permute.xlu2 %3672  ;;  %v3880_v0 = vmul.f32 %v8725_v14, %v3879_v35 }
 0x6d0   :  { %12412 = vst [vmem:[#allocation623_spill] sm:$0xff] %v8818_v5 }
 0x6d1   :  { %12413 = vst [vmem:[#allocation624_spill] sm:$0xff] %v8820_v8  ;;  %v3881_v8 = vmul.f32 %v8722_v9, %v3879_v35 }
 0x6d4   :  { %3862 = vrot.lane.b32.xlu1 %v3840_v24, %s12407_s11  ;;  %3860 = vrot.lane.b32.xlu0 %v3839_v43, %s12407_s11  ;;  %v3884_v43 = vmul.f32 %v8740_v13, %v3879_v35 }
 0x6d5   :  { %3864 = vrot.lane.b32.xlu2 %v3841_v6, %s12407_s11 }
 0x6d6   :  { %v8828_v10 = vpop.permute.xlu1 %3628  ;;  %v8830_v1 = vpop.permute.xlu0 %3626 }
 0x6d7   :  { %12414 = vst [vmem:[#allocation625_spill] sm:$0xff] %v8828_v10  ;;  %v8832_v5 = vpop.permute.xlu2 %3678  ;;  %v3885_v10 = vmul.f32 %v8746_v28, %v3879_v35 }
 0x6d8   :  { %12415 = vst [vmem:[#allocation626_spill] sm:$0xff] %v8830_v1 }
 0x6d9   :  { %12416 = vst [vmem:[#allocation627_spill] sm:$0xff] %v8832_v5  ;;  %v3883_v5 = vmul.f32 %v8743_v37, %v3879_v35 }
 0x6dc   :  { %3898 = vrot.lane.b32.xlu1 %v3881_v8, %s12417_s29  ;;  %3896 = vrot.lane.b32.xlu0 %v3880_v0, %s12417_s29 }
 0x6dd   :  { %3900 = vrot.lane.b32.xlu2 %v3882_v36, %s12417_s29 }
 0x6de   :  { %v8840_v7 = vpop.permute.xlu1 %3634  ;;  %v8842_v24 = vpop.permute.xlu0 %3632 }
 0x6df   :  { %12418 = vst [vmem:[#allocation628_spill] sm:$0xff] %v8840_v7  ;;  %v8844_v6 = vpop.permute.xlu2 %3714  ;;  %v3886_v7 = vmul.f32 %v8761_v2, %v3879_v35 }
 0x6e0   :  { %12419 = vst [vmem:[#allocation629_spill] sm:$0xff] %v8842_v24  ;;  %v3887_v24 = vmul.f32 %v8758_v50, %v3879_v35 }
 0x6e1   :  { %12420 = vst [vmem:[#allocation630_spill] sm:$0xff] %v8844_v6  ;;  %v3925_v6 = vstv %s5896_s7  ;;  %s5897_s7 = sld [smem:[#allocation8 + $0x11a]] }
 0x6e2   :  { %v3926_v1 = vmul.f32 %v8725_v14, %v3925_v6  ;;  %v3929_v35 = vmul.f32 %v8743_v37, %v3925_v6 }
 0x6e4   :  { %3904 = vrot.lane.b32.xlu1 %v3884_v43, %s12417_s29  ;;  %3902 = vrot.lane.b32.xlu0 %v3883_v5, %s12417_s29 }
 0x6e5   :  { %3906 = vrot.lane.b32.xlu2 %v3885_v10, %s12417_s29 }
 0x6e6   :  { %v8852_v36 = vpop.permute.xlu1 %3670  ;;  %v8854_v0 = vpop.permute.xlu0 %3668 }
 0x6e7   :  { %12421 = vst [vmem:[#allocation631_spill] sm:$0xff] %v8852_v36  ;;  %v8856_v8 = vpop.permute.xlu2 %3720 }
 0x6e8   :  { %12422 = vst [vmem:[#allocation632_spill] sm:$0xff] %v8854_v0  ;;  %v3927_v0 = vmul.f32 %v8722_v9, %v3925_v6 }
 0x6e9   :  { %12423 = vst [vmem:[#allocation633_spill] sm:$0xff] %v8856_v8  ;;  %v3928_v8 = vmul.f32 %v8728_v51, %v3925_v6 }
 0x6ec   :  { %3910 = vrot.lane.b32.xlu1 %v3887_v24, %s12417_s29  ;;  %3908 = vrot.lane.b32.xlu0 %v3886_v7, %s12417_s29 }
 0x6ed   :  { %3942 = vrot.lane.b32.xlu2 %v3926_v1, %s12187_s27 }
 0x6ee   :  { %v8864_v5 = vpop.permute.xlu1 %3676  ;;  %v8866_v10 = vpop.permute.xlu0 %3674 }
 0x6ef   :  { %12424 = vst [vmem:[#allocation634_spill] sm:$0xff] %v8864_v5  ;;  %v8868_v43 = vpop.permute.xlu2 %3726  ;;  %v3932_v5 = vmul.f32 %v8761_v2, %v3925_v6 }
 0x6f0   :  { %12425 = vst [vmem:[#allocation635_spill] sm:$0xff] %v8866_v10  ;;  %v3930_v10 = vmul.f32 %v8740_v13, %v3925_v6 }
 0x6f1   :  { %12426 = vst [vmem:[#allocation636_spill] sm:$0xff] %v8868_v43  ;;  %v3931_v43 = vmul.f32 %v8746_v28, %v3925_v6 }
 0x6f4   :  { %3946 = vrot.lane.b32.xlu1 %v3928_v8, %s12187_s27  ;;  %3944 = vrot.lane.b32.xlu0 %v3927_v0, %s12187_s27  ;;  %v3971_v0 = vstv %s5897_s7  ;;  %s5898_s7 = sld [smem:[#allocation8 + $0x11b]] }
 0x6f5   :  { %3948 = vrot.lane.b32.xlu2 %v3929_v35, %s12187_s27  ;;  %v3973_v36 = vmul.f32 %v8722_v9, %v3971_v0 }
 0x6f6   :  { %v8876_v1 = vpop.permute.xlu1 %3712  ;;  %v8878_v7 = vpop.permute.xlu0 %3680 }
 0x6f7   :  { %12427 = vst [vmem:[#allocation637_spill] sm:$0xff] %v8876_v1  ;;  %v8880_v24 = vpop.permute.xlu2 %3762  ;;  %v3933_v1 = vmul.f32 %v8758_v50, %v3925_v6  ;;  %v3976_v6 = vmul.f32 %v8740_v13, %v3971_v0 }
 0x6f8   :  { %12428 = vst [vmem:[#allocation638_spill] sm:$0xff] %v8878_v7 }
 0x6f9   :  { %12429 = vst [vmem:[#allocation639_spill] sm:$0xff] %v8880_v24  ;;  %v3972_v24 = vmul.f32 %v8725_v14, %v3971_v0 }
 0x6fc   :  { %3952 = vrot.lane.b32.xlu1 %v3931_v43, %s12187_s27  ;;  %3950 = vrot.lane.b32.xlu0 %v3930_v10, %s12187_s27 }
 0x6fd   :  { %3954 = vrot.lane.b32.xlu2 %v3932_v5, %s12187_s27 }
 0x6fe   :  { %v8888_v8 = vpop.permute.xlu1 %3718  ;;  %v8890_v35 = vpop.permute.xlu0 %3716 }
 0x6ff   :  { %12430 = vst [vmem:[#allocation640_spill] sm:$0xff] %v8888_v8  ;;  %v8892_v7 = vpop.permute.xlu2 %3768 }
 0x700   :  { %12431 = vst [vmem:[#allocation641_spill] sm:$0xff] %v8890_v35  ;;  %v3974_v35 = vmul.f32 %v8728_v51, %v3971_v0 }
 0x701   :  { %12432 = vst [vmem:[#allocation642_spill] sm:$0xff] %v8892_v7  ;;  %v3975_v7 = vmul.f32 %v8743_v37, %v3971_v0 }
 0x704   :  { %3988 = vrot.lane.b32.xlu1 %v3972_v24, %s12197_s0  ;;  %3956 = vrot.lane.b32.xlu0 %v3933_v1, %s12187_s27 }
 0x705   :  { %3990 = vrot.lane.b32.xlu2 %v3973_v36, %s12197_s0 }
 0x706   :  { %v8900_v10 = vpop.permute.xlu1 %3724  ;;  %v8902_v5 = vpop.permute.xlu0 %3722 }
 0x707   :  { %12433 = vst [vmem:[#allocation643_spill] sm:$0xff] %v8900_v10  ;;  %v8904_v43 = vpop.permute.xlu2 %3804  ;;  %v3978_v10 = vmul.f32 %v8761_v2, %v3971_v0 }
 0x708   :  { %12434 = vst [vmem:[#allocation644_spill] sm:$0xff] %v8902_v5  ;;  %v3979_v5 = vmul.f32 %v8758_v50, %v3971_v0 }
 0x709   :  { %12435 = vst [vmem:[#allocation645_spill] sm:$0xff] %v8904_v43  ;;  %v3977_v43 = vmul.f32 %v8746_v28, %v3971_v0 }
 0x70c   :  { %3994 = vrot.lane.b32.xlu1 %v3975_v7, %s12197_s0  ;;  %3992 = vrot.lane.b32.xlu0 %v3974_v35, %s12197_s0  ;;  %v4017_v7 = vstv %s5898_s7  ;;  %s5899_s7 = sld [smem:[#allocation8 + $0x11c]] }
 0x70d   :  { %3996 = vrot.lane.b32.xlu2 %v3976_v6, %s12197_s0  ;;  %v4020_v8 = vmul.f32 %v8728_v51, %v4017_v7 }
 0x70e   :  { %v8912_v36 = vpop.permute.xlu1 %3760  ;;  %v8914_v1 = vpop.permute.xlu0 %3758 }
 0x70f   :  { %12436 = vst [vmem:[#allocation646_spill] sm:$0xff] %v8912_v36  ;;  %v8916_v24 = vpop.permute.xlu2 %3810  ;;  %v4018_v36 = vmul.f32 %v8725_v14, %v4017_v7 }
 0x710   :  { %12437 = vst [vmem:[#allocation647_spill] sm:$0xff] %v8914_v1 }
 0x711   :  { %12438 = vst [vmem:[#allocation648_spill] sm:$0xff] %v8916_v24  ;;  %v4019_v24 = vmul.f32 %v8722_v9, %v4017_v7 }
 0x714   :  { %4000 = vrot.lane.b32.xlu1 %v3978_v10, %s12197_s0  ;;  %3998 = vrot.lane.b32.xlu0 %v3977_v43, %s12197_s0  ;;  %v4022_v43 = vmul.f32 %v8740_v13, %v4017_v7 }
 0x715   :  { %4002 = vrot.lane.b32.xlu2 %v3979_v5, %s12197_s0 }
 0x716   :  { %v8924_v35 = vpop.permute.xlu1 %3766  ;;  %v8926_v6 = vpop.permute.xlu0 %3764 }
 0x717   :  { %12439 = vst [vmem:[#allocation649_spill] sm:$0xff] %v8924_v35  ;;  %v8928_v1 = vpop.permute.xlu2 %3816  ;;  %v4023_v35 = vmul.f32 %v8746_v28, %v4017_v7 }
 0x718   :  { %12440 = vst [vmem:[#allocation650_spill] sm:$0xff] %v8926_v6 }
 0x719   :  { %12441 = vst [vmem:[#allocation651_spill] sm:$0xff] %v8928_v1  ;;  %v4021_v1 = vmul.f32 %v8743_v37, %v4017_v7 }
 0x71c   :  { %4036 = vrot.lane.b32.xlu1 %v4019_v24, %s12204_s19  ;;  %4034 = vrot.lane.b32.xlu0 %v4018_v36, %s12204_s19 }
 0x71d   :  { %4038 = vrot.lane.b32.xlu2 %v4020_v8, %s12204_s19 }
 0x71e   :  { %v8936_v0 = vpop.permute.xlu1 %3772  ;;  %v8938_v10 = vpop.permute.xlu0 %3770 }
 0x71f   :  { %12442 = vst [vmem:[#allocation652_spill] sm:$0xff] %v8936_v0  ;;  %v8940_v5 = vpop.permute.xlu2 %3852  ;;  %v4024_v0 = vmul.f32 %v8761_v2, %v4017_v7 }
 0x720   :  { %12443 = vst [vmem:[#allocation653_spill] sm:$0xff] %v8938_v10  ;;  %v4025_v10 = vmul.f32 %v8758_v50, %v4017_v7 }
 0x721   :  { %12444 = vst [vmem:[#allocation654_spill] sm:$0xff] %v8940_v5  ;;  %v4063_v5 = vstv %s5899_s7  ;;  %s5900_s7 = sld [smem:[#allocation8 + $0x11d]] }
 0x722   :  { %v4064_v6 = vmul.f32 %v8725_v14, %v4063_v5  ;;  %v4067_v7 = vmul.f32 %v8743_v37, %v4063_v5 }
 0x724   :  { %4042 = vrot.lane.b32.xlu1 %v4022_v43, %s12204_s19  ;;  %4040 = vrot.lane.b32.xlu0 %v4021_v1, %s12204_s19 }
 0x725   :  { %4044 = vrot.lane.b32.xlu2 %v4023_v35, %s12204_s19 }
 0x726   :  { %v8948_v8 = vpop.permute.xlu1 %3808  ;;  %v8950_v36 = vpop.permute.xlu0 %3806 }
 0x727   :  { %12445 = vst [vmem:[#allocation655_spill] sm:$0xff] %v8948_v8  ;;  %v8952_v24 = vpop.permute.xlu2 %3858 }
 0x728   :  { %12446 = vst [vmem:[#allocation656_spill] sm:$0xff] %v8950_v36  ;;  %v4065_v36 = vmul.f32 %v8722_v9, %v4063_v5 }
 0x729   :  { %12447 = vst [vmem:[#allocation657_spill] sm:$0xff] %v8952_v24  ;;  %v4066_v24 = vmul.f32 %v8728_v51, %v4063_v5 }
 0x72c   :  { %4048 = vrot.lane.b32.xlu1 %v4025_v10, %s12204_s19  ;;  %4046 = vrot.lane.b32.xlu0 %v4024_v0, %s12204_s19 }
 0x72d   :  { %4080 = vrot.lane.b32.xlu2 %v4064_v6, %s6171_s15 }
 0x72e   :  { %v8960_v1 = vpop.permute.xlu1 %3814  ;;  %v8962_v35 = vpop.permute.xlu0 %3812 }
 0x72f   :  { %12448 = vst [vmem:[#allocation658_spill] sm:$0xff] %v8960_v1  ;;  %v8964_v43 = vpop.permute.xlu2 %3864  ;;  %v4070_v1 = vmul.f32 %v8761_v2, %v4063_v5 }
 0x730   :  { %12449 = vst [vmem:[#allocation659_spill] sm:$0xff] %v8962_v35  ;;  %v4068_v35 = vmul.f32 %v8740_v13, %v4063_v5 }
 0x731   :  { %12450 = vst [vmem:[#allocation660_spill] sm:$0xff] %v8964_v43  ;;  %v4069_v43 = vmul.f32 %v8746_v28, %v4063_v5 }
 0x734   :  { %4084 = vrot.lane.b32.xlu1 %v4066_v24, %s6171_s15  ;;  %4082 = vrot.lane.b32.xlu0 %v4065_v36, %s6171_s15  ;;  %v4109_v36 = vstv %s5900_s7  ;;  %s5902_s7 = sld [smem:[#allocation8 + $0x181]] }
 0x735   :  { %4086 = vrot.lane.b32.xlu2 %v4067_v7, %s6171_s15  ;;  %v4111_v8 = vmul.f32 %v8722_v9, %v4109_v36 }
 0x736   :  { %v8972_v6 = vpop.permute.xlu1 %3850  ;;  %v8974_v0 = vpop.permute.xlu0 %3818 }
 0x737   :  { %12451 = vst [vmem:[#allocation661_spill] sm:$0xff] %v8972_v6  ;;  %v8976_v10 = vpop.permute.xlu2 %3900  ;;  %v4071_v6 = vmul.f32 %v8758_v50, %v4063_v5  ;;  %v4114_v5 = vmul.f32 %v8740_v13, %v4109_v36  ;;  %v9019_v13 = vld [vmem:[#allocation4 + $0xc8] sm:$0xff] }
 0x738   :  { %12452 = vst [vmem:[#allocation662_spill] sm:$0xff] %v8974_v0 }
 0x739   :  { %12453 = vst [vmem:[#allocation663_spill] sm:$0xff] %v8976_v10  ;;  %v4110_v10 = vmul.f32 %v8725_v14, %v4109_v36  ;;  %v4112_v14 = vmul.f32 %v8728_v51, %v4109_v36  ;;  %v4117_v51 = vmul.f32 %v8758_v50, %v4109_v36 }
 0x73c   :  { %4090 = vrot.lane.b32.xlu1 %v4069_v43, %s6171_s15  ;;  %4088 = vrot.lane.b32.xlu0 %v4068_v35, %s6171_s15 }
 0x73d   :  { %4092 = vrot.lane.b32.xlu2 %v4070_v1, %s6171_s15 }
 0x73e   :  { %v8984_v24 = vpop.permute.xlu1 %3856  ;;  %v8986_v7 = vpop.permute.xlu0 %3854 }
 0x73f   :  { %12454 = vst [vmem:[#allocation664_spill] sm:$0xff] %v8984_v24  ;;  %v8988_v0 = vpop.permute.xlu2 %3906 }
 0x740   :  { %12455 = vst [vmem:[#allocation665_spill] sm:$0xff] %v8986_v7 }
 0x741   :  { %12456 = vst [vmem:[#allocation666_spill] sm:$0xff] %v8988_v0  ;;  %v4113_v0 = vmul.f32 %v8743_v37, %v4109_v36  ;;  %v4115_v37 = vmul.f32 %v8746_v28, %v4109_v36 }
 0x744   :  { %4126 = vrot.lane.b32.xlu1 %v4110_v10, %s6172_s23  ;;  %4094 = vrot.lane.b32.xlu0 %v4071_v6, %s6171_s15  ;;  %v4116_v10 = vmul.f32 %v8761_v2, %v4109_v36  ;;  %v9028_v2 = vld [vmem:[#allocation4 + $0xd0] sm:$0xff] }
 0x745   :  { %4128 = vrot.lane.b32.xlu2 %v4111_v8, %s6172_s23 }
 0x746   :  { %v8996_v35 = vpop.permute.xlu1 %3862  ;;  %v8998_v1 = vpop.permute.xlu0 %3860 }
 0x747   :  { %12457 = vst [vmem:[#allocation667_spill] sm:$0xff] %v8996_v35  ;;  %v9000_v43 = vpop.permute.xlu2 %3942 }
 0x748   :  { %12458 = vst [vmem:[#allocation668_spill] sm:$0xff] %v8998_v1 }
 0x749   :  { %12459 = vst [vmem:[#allocation669_spill] sm:$0xff] %v9000_v43 }
 0x74c   :  { %4132 = vrot.lane.b32.xlu1 %v4113_v0, %s6172_s23  ;;  %4130 = vrot.lane.b32.xlu0 %v4112_v14, %s6172_s23  ;;  %v4174_v0 = vstv %s5902_s7  ;;  %v9021_v14 = vld [vmem:[#allocation4 + $0xc0] sm:$0xff]  ;;  %s5903_s7 = sld [smem:[#allocation8 + $0x182]] }
 0x74d   :  { %4134 = vrot.lane.b32.xlu2 %v4114_v5, %s6172_s23  ;;  %v4176_v50 = vmul.f32 %v4174_v0, %v9019_v13  ;;  %v4175_v36 = vmul.f32 %v4174_v0, %v9021_v14 }
 0x74e   :  { %v9008_v9 = vpop.permute.xlu1 %3898  ;;  %v9010_v8 = vpop.permute.xlu0 %3896 }
 0x74f   :  { %12460 = vst [vmem:[#allocation670_spill] sm:$0xff] %v9008_v9  ;;  %v9012_v6 = vpop.permute.xlu2 %3948 }
 0x750   :  { %12461 = vst [vmem:[#allocation671_spill] sm:$0xff] %v9010_v8 }
 0x751   :  { %12462 = vst [vmem:[#allocation672_spill] sm:$0xff] %v9012_v6 }
 0x752   :  { %v4220_v7 = vstv %s5903_s7  ;;  %s5904_s7 = sld [smem:[#allocation8 + $0x183]] }
 0x754   :  { %4138 = vrot.lane.b32.xlu1 %v4116_v10, %s6172_s23  ;;  %4136 = vrot.lane.b32.xlu0 %v4115_v37, %s6172_s23  ;;  %v4177_v10 = vmul.f32 %v4174_v0, %v9028_v2  ;;  %v9037_v37 = vld [vmem:[#allocation4 + $0xe0] sm:$0xff] }
 0x755   :  { %4140 = vrot.lane.b32.xlu2 %v4117_v51, %s6172_s23  ;;  %v9039_v51 = vld [vmem:[#allocation4 + $0xd8] sm:$0xff]  ;;  %v4179_v1 = vmul.f32 %v4174_v0, %v9037_v37 }
 0x756   :  { %v9024_v5 = vpop.permute.xlu1 %3904  ;;  %v9026_v35 = vpop.permute.xlu0 %3902 }
 0x757   :  { %12463 = vst [vmem:[#allocation673_spill] sm:$0xff] %v9024_v5  ;;  %v9030_v28 = vpop.permute.xlu2 %3954 }
 0x758   :  { %12464 = vst [vmem:[#allocation674_spill] sm:$0xff] %v9026_v35 }
 0x759   :  { %12465 = vst [vmem:[#allocation675_spill] sm:$0xff] %v9030_v28  ;;  %v9046_v28 = vld [vmem:[#allocation4 + $0xe8] sm:$0xff] }
 0x75c   :  { %4193 = vrot.lane.b32.xlu1 %v4176_v50, %s6144_s3  ;;  %4191 = vrot.lane.b32.xlu0 %v4175_v36, %s6144_s3  ;;  %v4178_v50 = vmul.f32 %v4174_v0, %v9039_v51  ;;  %v4180_v36 = vmul.f32 %v4174_v0, %v9046_v28 }
 0x75d   :  { %4195 = vrot.lane.b32.xlu2 %v4177_v10, %s6144_s3  ;;  %v9055_v10 = vld [vmem:[#allocation4 + $0xf8] sm:$0xff] }
 0x75e   :  { %v9042_v5 = vpop.permute.xlu1 %3910  ;;  %v9044_v43 = vpop.permute.xlu0 %3908  ;;  %v4182_v8 = vmul.f32 %v4174_v0, %v9055_v10 }
 0x75f   :  { %12466 = vst [vmem:[#allocation676_spill] sm:$0xff] %v9042_v5  ;;  %v9048_v6 = vpop.permute.xlu2 %3990  ;;  %v9057_v5 = vld [vmem:[#allocation4 + $0xf0] sm:$0xff] }
 0x760   :  { %12467 = vst [vmem:[#allocation677_spill] sm:$0xff] %v9044_v43  ;;  %v4181_v9 = vmul.f32 %v4174_v0, %v9057_v5  ;;  %v4224_v0 = vmul.f32 %v4220_v7, %v9039_v51 }
 0x761   :  { %12468 = vst [vmem:[#allocation678_spill] sm:$0xff] %v9048_v6 }
 0x764   :  { %4199 = vrot.lane.b32.xlu1 %v4179_v1, %s6144_s3  ;;  %4197 = vrot.lane.b32.xlu0 %v4178_v50, %s6144_s3  ;;  %v4221_v1 = vmul.f32 %v4220_v7, %v9021_v14 }
 0x765   :  { %4201 = vrot.lane.b32.xlu2 %v4180_v36, %s6144_s3 }
 0x766   :  { %v9060_v43 = vpop.permute.xlu1 %3946  ;;  %v9062_v6 = vpop.permute.xlu0 %3944 }
 0x767   :  { %12469 = vst [vmem:[#allocation679_spill] sm:$0xff] %v9060_v43  ;;  %v9064_v35 = vpop.permute.xlu2 %3996  ;;  %v4222_v43 = vmul.f32 %v4220_v7, %v9019_v13 }
 0x768   :  { %12470 = vst [vmem:[#allocation680_spill] sm:$0xff] %v9062_v6 }
 0x769   :  { %12471 = vst [vmem:[#allocation681_spill] sm:$0xff] %v9064_v35  ;;  %v4223_v35 = vmul.f32 %v4220_v7, %v9028_v2 }
 0x76c   :  { %4205 = vrot.lane.b32.xlu1 %v4182_v8, %s6144_s3  ;;  %4203 = vrot.lane.b32.xlu0 %v4181_v9, %s6144_s3 }
 0x76d   :  { %4237 = vrot.lane.b32.xlu2 %v4221_v1, %s6145_s12 }
 0x76e   :  { %v9072_v50 = vpop.permute.xlu1 %3952  ;;  %v9074_v36 = vpop.permute.xlu0 %3950 }
 0x76f   :  { %12472 = vst [vmem:[#allocation682_spill] sm:$0xff] %v9072_v50  ;;  %v9076_v6 = vpop.permute.xlu2 %4002  ;;  %v4227_v50 = vmul.f32 %v4220_v7, %v9057_v5 }
 0x770   :  { %12473 = vst [vmem:[#allocation683_spill] sm:$0xff] %v9074_v36  ;;  %v4225_v36 = vmul.f32 %v4220_v7, %v9037_v37 }
 0x771   :  { %12474 = vst [vmem:[#allocation684_spill] sm:$0xff] %v9076_v6  ;;  %v4226_v6 = vmul.f32 %v4220_v7, %v9046_v28 }
 0x774   :  { %4241 = vrot.lane.b32.xlu1 %v4223_v35, %s6145_s12  ;;  %4239 = vrot.lane.b32.xlu0 %v4222_v43, %s6145_s12  ;;  %v4266_v35 = vstv %s5904_s7  ;;  %s5905_s7 = sld [smem:[#allocation8 + $0x184]] }
 0x775   :  { %4243 = vrot.lane.b32.xlu2 %v4224_v0, %s6145_s12  ;;  %v4268_v24 = vmul.f32 %v4266_v35, %v9019_v13 }
 0x776   :  { %v9084_v9 = vpop.permute.xlu1 %3988  ;;  %v9086_v8 = vpop.permute.xlu0 %3956 }
 0x777   :  { %12475 = vst [vmem:[#allocation685_spill] sm:$0xff] %v9084_v9  ;;  %v9088_v1 = vpop.permute.xlu2 %4038  ;;  %v4228_v9 = vmul.f32 %v4220_v7, %v9055_v10  ;;  %v4271_v7 = vmul.f32 %v4266_v35, %v9037_v37 }
 0x778   :  { %12476 = vst [vmem:[#allocation686_spill] sm:$0xff] %v9086_v8 }
 0x779   :  { %12477 = vst [vmem:[#allocation687_spill] sm:$0xff] %v9088_v1  ;;  %v4267_v1 = vmul.f32 %v4266_v35, %v9021_v14 }
 0x77c   :  { %4247 = vrot.lane.b32.xlu1 %v4226_v6, %s6145_s12  ;;  %4245 = vrot.lane.b32.xlu0 %v4225_v36, %s6145_s12 }
 0x77d   :  { %4249 = vrot.lane.b32.xlu2 %v4227_v50, %s6145_s12 }
 0x77e   :  { %v9096_v43 = vpop.permute.xlu1 %3994  ;;  %v9098_v0 = vpop.permute.xlu0 %3992 }
 0x77f   :  { %12478 = vst [vmem:[#allocation688_spill] sm:$0xff] %v9096_v43  ;;  %v9100_v8 = vpop.permute.xlu2 %4044 }
 0x780   :  { %12479 = vst [vmem:[#allocation689_spill] sm:$0xff] %v9098_v0  ;;  %v4269_v0 = vmul.f32 %v4266_v35, %v9028_v2 }
 0x781   :  { %12480 = vst [vmem:[#allocation690_spill] sm:$0xff] %v9100_v8  ;;  %v4270_v8 = vmul.f32 %v4266_v35, %v9039_v51 }
 0x784   :  { %4283 = vrot.lane.b32.xlu1 %v4267_v1, %s6146_s14  ;;  %4251 = vrot.lane.b32.xlu0 %v4228_v9, %s6145_s12 }
 0x785   :  { %4285 = vrot.lane.b32.xlu2 %v4268_v24, %s6146_s14 }
 0x786   :  { %v9108_v6 = vpop.permute.xlu1 %4000  ;;  %v9110_v50 = vpop.permute.xlu0 %3998 }
 0x787   :  { %12481 = vst [vmem:[#allocation691_spill] sm:$0xff] %v9108_v6  ;;  %v9112_v36 = vpop.permute.xlu2 %4080  ;;  %v4273_v6 = vmul.f32 %v4266_v35, %v9057_v5 }
 0x788   :  { %12482 = vst [vmem:[#allocation692_spill] sm:$0xff] %v9110_v50  ;;  %v4272_v50 = vmul.f32 %v4266_v35, %v9046_v28 }
 0x789   :  { %12483 = vst [vmem:[#allocation693_spill] sm:$0xff] %v9112_v36  ;;  %v4274_v36 = vmul.f32 %v4266_v35, %v9055_v10 }
 0x78c   :  { %4289 = vrot.lane.b32.xlu1 %v4270_v8, %s6146_s14  ;;  %4287 = vrot.lane.b32.xlu0 %v4269_v0, %s6146_s14  ;;  %v4312_v8 = vstv %s5905_s7  ;;  %s5906_s7 = sld [smem:[#allocation8 + $0x185]] }
 0x78d   :  { %4291 = vrot.lane.b32.xlu2 %v4271_v7, %s6146_s14  ;;  %v4315_v43 = vmul.f32 %v4312_v8, %v9028_v2 }
 0x78e   :  { %v9120_v24 = vpop.permute.xlu1 %4036  ;;  %v9122_v9 = vpop.permute.xlu0 %4034 }
 0x78f   :  { %12484 = vst [vmem:[#allocation694_spill] sm:$0xff] %v9120_v24  ;;  %v9124_v1 = vpop.permute.xlu2 %4086  ;;  %v4313_v24 = vmul.f32 %v4312_v8, %v9021_v14 }
 0x790   :  { %12485 = vst [vmem:[#allocation695_spill] sm:$0xff] %v9122_v9 }
 0x791   :  { %12486 = vst [vmem:[#allocation696_spill] sm:$0xff] %v9124_v1  ;;  %v4314_v1 = vmul.f32 %v4312_v8, %v9019_v13 }
 0x794   :  { %4295 = vrot.lane.b32.xlu1 %v4273_v6, %s6146_s14  ;;  %4293 = vrot.lane.b32.xlu0 %v4272_v50, %s6146_s14 }
 0x795   :  { %4297 = vrot.lane.b32.xlu2 %v4274_v36, %s6146_s14  ;;  %v4317_v36 = vmul.f32 %v4312_v8, %v9037_v37 }
 0x796   :  { %v9132_v0 = vpop.permute.xlu1 %4042  ;;  %v9134_v7 = vpop.permute.xlu0 %4040 }
 0x797   :  { %12487 = vst [vmem:[#allocation697_spill] sm:$0xff] %v9132_v0  ;;  %v9136_v9 = vpop.permute.xlu2 %4092  ;;  %v4318_v0 = vmul.f32 %v4312_v8, %v9046_v28 }
 0x798   :  { %12488 = vst [vmem:[#allocation698_spill] sm:$0xff] %v9134_v7 }
 0x799   :  { %12489 = vst [vmem:[#allocation699_spill] sm:$0xff] %v9136_v9  ;;  %v4316_v9 = vmul.f32 %v4312_v8, %v9039_v51 }
 0x79c   :  { %4331 = vrot.lane.b32.xlu1 %v4314_v1, %s6147_s16  ;;  %4329 = vrot.lane.b32.xlu0 %v4313_v24, %s6147_s16 }
 0x79d   :  { %4333 = vrot.lane.b32.xlu2 %v4315_v43, %s6147_s16 }
 0x79e   :  { %v9144_v35 = vpop.permute.xlu1 %4048  ;;  %v9146_v6 = vpop.permute.xlu0 %4046 }
 0x79f   :  { %12490 = vst [vmem:[#allocation700_spill] sm:$0xff] %v9144_v35  ;;  %v9148_v50 = vpop.permute.xlu2 %4128  ;;  %v4319_v35 = vmul.f32 %v4312_v8, %v9057_v5 }
 0x7a0   :  { %12491 = vst [vmem:[#allocation701_spill] sm:$0xff] %v9146_v6  ;;  %v4320_v6 = vmul.f32 %v4312_v8, %v9055_v10 }
 0x7a1   :  { %12492 = vst [vmem:[#allocation702_spill] sm:$0xff] %v9148_v50  ;;  %v4358_v50 = vstv %s5906_s7  ;;  %s5907_s7 = sld [smem:[#allocation8 + $0x186]] }
 0x7a2   :  { %v4359_v7 = vmul.f32 %v4358_v50, %v9021_v14  ;;  %v4362_v8 = vmul.f32 %v4358_v50, %v9039_v51 }
 0x7a4   :  { %4337 = vrot.lane.b32.xlu1 %v4317_v36, %s6147_s16  ;;  %4335 = vrot.lane.b32.xlu0 %v4316_v9, %s6147_s16 }
 0x7a5   :  { %4339 = vrot.lane.b32.xlu2 %v4318_v0, %s6147_s16 }
 0x7a6   :  { %v9156_v43 = vpop.permute.xlu1 %4084  ;;  %v9158_v24 = vpop.permute.xlu0 %4082 }
 0x7a7   :  { %12493 = vst [vmem:[#allocation703_spill] sm:$0xff] %v9156_v43  ;;  %v9160_v1 = vpop.permute.xlu2 %4134  ;;  %v4366_v43 = vmul.f32 %v4358_v50, %v9055_v10 }
 0x7a8   :  { %12494 = vst [vmem:[#allocation704_spill] sm:$0xff] %v9158_v24  ;;  %v4360_v24 = vmul.f32 %v4358_v50, %v9019_v13 }
 0x7a9   :  { %12495 = vst [vmem:[#allocation705_spill] sm:$0xff] %v9160_v1  ;;  %v4361_v1 = vmul.f32 %v4358_v50, %v9028_v2 }
 0x7ac   :  { %4343 = vrot.lane.b32.xlu1 %v4320_v6, %s6147_s16  ;;  %4341 = vrot.lane.b32.xlu0 %v4319_v35, %s6147_s16 }
 0x7ad   :  { %4375 = vrot.lane.b32.xlu2 %v4359_v7, %s6148_s18 }
 0x7ae   :  { %v9168_v9 = vpop.permute.xlu1 %4090  ;;  %v9170_v0 = vpop.permute.xlu0 %4088 }
 0x7af   :  { %12496 = vst [vmem:[#allocation706_spill] sm:$0xff] %v9168_v9  ;;  %v9172_v36 = vpop.permute.xlu2 %4140  ;;  %v4365_v9 = vmul.f32 %v4358_v50, %v9057_v5 }
 0x7b0   :  { %12497 = vst [vmem:[#allocation707_spill] sm:$0xff] %v9170_v0  ;;  %v4363_v0 = vmul.f32 %v4358_v50, %v9037_v37 }
 0x7b1   :  { %12498 = vst [vmem:[#allocation708_spill] sm:$0xff] %v9172_v36  ;;  %v4364_v36 = vmul.f32 %v4358_v50, %v9046_v28 }
 0x7b4   :  { %4379 = vrot.lane.b32.xlu1 %v4361_v1, %s6148_s18  ;;  %4377 = vrot.lane.b32.xlu0 %v4360_v24, %s6148_s18  ;;  %v4404_v24 = vstv %s5907_s7  ;;  %s5908_s7 = sld [smem:[#allocation8 + $0x187]] }
 0x7b5   :  { %4381 = vrot.lane.b32.xlu2 %v4362_v8, %s6148_s18  ;;  %v4406_v59 = vmul.f32 %v4404_v24, %v9019_v13  ;;  %v4409_v50 = vmul.f32 %v4404_v24, %v9037_v37  ;;  %v4412_v48 = vmul.f32 %v4404_v24, %v9055_v10 }
 0x7b6   :  { %v9180_v7 = vpop.permute.xlu1 %4126  ;;  %v9182_v35 = vpop.permute.xlu0 %4094 }
 0x7b7   :  { %12499 = vst [vmem:[#allocation709_spill] sm:$0xff] %v9180_v7  ;;  %v9184_v6 = vpop.permute.xlu2 %4195  ;;  %v4405_v7 = vmul.f32 %v4404_v24, %v9021_v14 }
 0x7b8   :  { %12500 = vst [vmem:[#allocation710_spill] sm:$0xff] %v9182_v35 }
 0x7bc   :  { %4385 = vrot.lane.b32.xlu1 %v4364_v36, %s6148_s18  ;;  %4383 = vrot.lane.b32.xlu0 %v4363_v0, %s6148_s18 }
 0x7bd   :  { %4387 = vrot.lane.b32.xlu2 %v4365_v9, %s6148_s18 }
 0x7be   :  { %v9192_v1 = vpop.permute.xlu1 %4132  ;;  %v9194_v8 = vpop.permute.xlu0 %4130 }
 0x7bf   :  { %12501 = vst [vmem:[#allocation711_spill] sm:$0xff] %v9192_v1  ;;  %v9196_v35 = vpop.permute.xlu2 %4201  ;;  %v4407_v1 = vmul.f32 %v4404_v24, %v9028_v2 }
 0x7c0   :  { %12502 = vst [vmem:[#allocation712_spill] sm:$0xff] %v9194_v8  ;;  %v4408_v8 = vmul.f32 %v4404_v24, %v9039_v51 }
 0x7c4   :  { %4421 = vrot.lane.b32.xlu1 %v4405_v7, %s6149_s20  ;;  %4389 = vrot.lane.b32.xlu0 %v4366_v43, %s6148_s18  ;;  %s5909_s18 = sld [smem:[#allocation8 + $0x188]] }
 0x7c5   :  { %4423 = vrot.lane.b32.xlu2 %v4406_v59, %s6149_s20 }
 0x7c6   :  { %v9204_v0 = vpop.permute.xlu1 %4138  ;;  %v9206_v9 = vpop.permute.xlu0 %4136 }
 0x7c7   :  { %12503 = vst [vmem:[#allocation713_spill] sm:$0xff] %v9204_v0  ;;  %v9208_v36 = vpop.permute.xlu2 %4237  ;;  %v4411_v0 = vmul.f32 %v4404_v24, %v9057_v5 }
 0x7c8   :  { %12504 = vst [vmem:[#allocation714_spill] sm:$0xff] %v9206_v9  ;;  %v4410_v9 = vmul.f32 %v4404_v24, %v9046_v28 }
 0x7ca   :  { %v4496_v42 = vstv %s5909_s18  ;;  %s5916_s18 = sld [smem:[#allocation8 + $0x18f]] }
 0x7cb   :  { %v4497_v41 = vmul.f32 %v4496_v42, %v9021_v14  ;;  %v4499_v4 = vmul.f32 %v4496_v42, %v9028_v2  ;;  %v4498_v30 = vmul.f32 %v4496_v42, %v9019_v13  ;;  %v4502_v29 = vmul.f32 %v4496_v42, %v9046_v28 }
 0x7cc   :  { %4427 = vrot.lane.b32.xlu1 %v4408_v8, %s6149_s20  ;;  %4425 = vrot.lane.b32.xlu0 %v4407_v1, %s6149_s20  ;;  %v4450_v1 = vstv %s5908_s7  ;;  %v4501_v17 = vmul.f32 %v4496_v42, %v9037_v37  ;;  %v4503_v47 = vmul.f32 %v4496_v42, %v9057_v5  ;;  %v4504_v61 = vmul.f32 %v4496_v42, %v9055_v10  ;;  %s5913_s7 = sld [smem:[#allocation8 + $0x18c]] }
 0x7cd   :  { %4429 = vrot.lane.b32.xlu2 %v4409_v50, %s6149_s20  ;;  %v4452_v16 = vmul.f32 %v4450_v1, %v9019_v13  ;;  %v4451_v31 = vmul.f32 %v4450_v1, %v9021_v14  ;;  %v4453_v57 = vmul.f32 %v4450_v1, %v9028_v2  ;;  %v4454_v56 = vmul.f32 %v4450_v1, %v9039_v51 }
 0x7ce   :  { %v9216_v59 = vpop.permute.xlu1 %4193  ;;  %v9218_v43 = vpop.permute.xlu0 %4191  ;;  %v4456_v22 = vmul.f32 %v4450_v1, %v9046_v28  ;;  %v4458_v23 = vmul.f32 %v4450_v1, %v9055_v10  ;;  %v4457_v55 = vmul.f32 %v4450_v1, %v9057_v5 }
 0x7cf   :  { %v9220_v7 = vpop.permute.xlu2 %4243 }
 0x7d4   :  { %4433 = vrot.lane.b32.xlu1 %v4411_v0, %s6149_s20  ;;  %4431 = vrot.lane.b32.xlu0 %v4410_v9, %s6149_s20  ;;  %v4455_v9 = vmul.f32 %v4450_v1, %v9037_v37  ;;  %v4500_v1 = vmul.f32 %v4496_v42, %v9039_v51 }
 0x7d5   :  { %4435 = vrot.lane.b32.xlu2 %v4412_v48, %s6149_s20  ;;  %s5910_s20 = sld [smem:[#allocation8 + $0x189]] }
 0x7d6   :  { %v9228_v8 = vpop.permute.xlu1 %4199  ;;  %v9230_v50 = vpop.permute.xlu0 %4197 }
 0x7d7   :  { %v9232_v44 = vpop.permute.xlu2 %4249 }
 0x7dc   :  { %4469 = vrot.lane.b32.xlu1 %v4452_v16, %s6150_s22  ;;  %4467 = vrot.lane.b32.xlu0 %v4451_v31, %s6150_s22 }
 0x7dd   :  { %4471 = vrot.lane.b32.xlu2 %v4453_v57, %s6150_s22 }
 0x7de   :  { %v9240_v24 = vpop.permute.xlu1 %4205  ;;  %v9242_v48 = vpop.permute.xlu0 %4203 }
 0x7df   :  { %v9244_v0 = vpop.permute.xlu2 %4285 }
 0x7e4   :  { %4475 = vrot.lane.b32.xlu1 %v4455_v9, %s6150_s22  ;;  %4473 = vrot.lane.b32.xlu0 %v4454_v56, %s6150_s22 }
 0x7e5   :  { %4477 = vrot.lane.b32.xlu2 %v4456_v22, %s6150_s22 }
 0x7e6   :  { %v9252_v31 = vpop.permute.xlu1 %4241  ;;  %v9254_v57 = vpop.permute.xlu0 %4239 }
 0x7e7   :  { %v9256_v16 = vpop.permute.xlu2 %4291 }
 0x7ec   :  { %4481 = vrot.lane.b32.xlu1 %v4458_v23, %s6150_s22  ;;  %4479 = vrot.lane.b32.xlu0 %v4457_v55, %s6150_s22  ;;  %s5911_s22 = sld [smem:[#allocation8 + $0x18a]] }
 0x7ed   :  { %4513 = vrot.lane.b32.xlu2 %v4497_v41, %s6151_s24 }
 0x7ee   :  { %v9264_v22 = vpop.permute.xlu1 %4247  ;;  %v9266_v56 = vpop.permute.xlu0 %4245 }
 0x7ef   :  { %v9268_v9 = vpop.permute.xlu2 %4297 }
 0x7f4   :  { %4517 = vrot.lane.b32.xlu1 %v4499_v4, %s6151_s24  ;;  %4515 = vrot.lane.b32.xlu0 %v4498_v30, %s6151_s24  ;;  %v4542_v4 = vstv %s5910_s20  ;;  %s5920_s20 = sld [smem:[#allocation8 + $0x193]] }
 0x7f5   :  { %4519 = vrot.lane.b32.xlu2 %v4500_v1, %s6151_s24  ;;  %v4543_v18 = vmul.f32 %v4542_v4, %v9021_v14  ;;  %v4544_v60 = vmul.f32 %v4542_v4, %v9019_v13  ;;  %v4546_v27 = vmul.f32 %v4542_v4, %v9039_v51  ;;  %v4545_v53 = vmul.f32 %v4542_v4, %v9028_v2 }
 0x7f6   :  { %v9276_v55 = vpop.permute.xlu1 %4283  ;;  %v9278_v41 = vpop.permute.xlu0 %4251  ;;  %v4547_v42 = vmul.f32 %v4542_v4, %v9037_v37  ;;  %v4549_v52 = vmul.f32 %v4542_v4, %v9057_v5  ;;  %v4548_v34 = vmul.f32 %v4542_v4, %v9046_v28  ;;  %v4550_v46 = vmul.f32 %v4542_v4, %v9055_v10 }
 0x7f7   :  { %v9280_v23 = vpop.permute.xlu2 %4333 }
 0x7fc   :  { %4523 = vrot.lane.b32.xlu1 %v4502_v29, %s6151_s24  ;;  %4521 = vrot.lane.b32.xlu0 %v4501_v17, %s6151_s24 }
 0x7fd   :  { %4525 = vrot.lane.b32.xlu2 %v4503_v47, %s6151_s24 }
 0x7fe   :  { %v9288_v30 = vpop.permute.xlu1 %4289  ;;  %v9290_v1 = vpop.permute.xlu0 %4287 }
 0x7ff   :  { %v9292_v40 = vpop.permute.xlu2 %4339 }
 0x804   :  { %4559 = vrot.lane.b32.xlu1 %v4543_v18, %s6152_s26  ;;  %4527 = vrot.lane.b32.xlu0 %v4504_v61, %s6151_s24 }
 0x805   :  { %4561 = vrot.lane.b32.xlu2 %v4544_v60, %s6152_s26 }
 0x806   :  { %v9300_v17 = vpop.permute.xlu1 %4295  ;;  %v9302_v47 = vpop.permute.xlu0 %4293 }
 0x807   :  { %v9304_v29 = vpop.permute.xlu2 %4375 }
 0x80c   :  { %4565 = vrot.lane.b32.xlu1 %v4546_v27, %s6152_s26  ;;  %4563 = vrot.lane.b32.xlu0 %v4545_v53, %s6152_s26  ;;  %v4588_v27 = vstv %s5911_s22  ;;  %s12572_s22 = smov 108  }
 0x80d   :  { %4567 = vrot.lane.b32.xlu2 %v4547_v42, %s6152_s26  ;;  %v4590_v38 = vmul.f32 %v4588_v27, %v9019_v13  ;;  %v4589_v21 = vmul.f32 %v4588_v27, %v9021_v14  ;;  %v4591_v33 = vmul.f32 %v4588_v27, %v9028_v2  ;;  %v4593_v4 = vmul.f32 %v4588_v27, %v9037_v37 }
 0x80e   :  { %v9312_v60 = vpop.permute.xlu1 %4331  ;;  %v9314_v61 = vpop.permute.xlu0 %4329  ;;  %v4592_v32 = vmul.f32 %v4588_v27, %v9039_v51  ;;  %v4594_v15 = vmul.f32 %v4588_v27, %v9046_v28  ;;  %v4596_v39 = vmul.f32 %v4588_v27, %v9055_v10  ;;  %v4595_v58 = vmul.f32 %v4588_v27, %v9057_v5 }
 0x80f   :  { %v9316_v18 = vpop.permute.xlu2 %4381 }
 0x814   :  { %4571 = vrot.lane.b32.xlu1 %v4549_v52, %s6152_s26  ;;  %4569 = vrot.lane.b32.xlu0 %v4548_v34, %s6152_s26 }
 0x815   :  { %4573 = vrot.lane.b32.xlu2 %v4550_v46, %s6152_s26  ;;  %s5912_s26 = sld [smem:[#allocation8 + $0x18b]] }
 0x816   :  { %v9324_v53 = vpop.permute.xlu1 %4337  ;;  %v9326_v42 = vpop.permute.xlu0 %4335 }
 0x817   :  { %v9328_v45 = vpop.permute.xlu2 %4387 }
 0x81b   :  { %v4634_v26 = vstv %s5912_s26  ;;  %s5922_s26 = sld [smem:[#allocation8 + $0x195]] }
 0x81c   :  { %4607 = vrot.lane.b32.xlu1 %v4590_v38, %s6153_s28  ;;  %4605 = vrot.lane.b32.xlu0 %v4589_v21, %s6153_s28  ;;  %v4635_v25 = vmul.f32 %v4634_v26, %v9021_v14  ;;  %v4637_v3 = vmul.f32 %v4634_v26, %v9028_v2  ;;  %v4636_v20 = vmul.f32 %v4634_v26, %v9019_v13 }
 0x81d   :  { %4609 = vrot.lane.b32.xlu2 %v4591_v33, %s6153_s28  ;;  %v4638_v27 = vmul.f32 %v4634_v26, %v9039_v51  ;;  %v4640_v19 = vmul.f32 %v4634_v26, %v9046_v28  ;;  %v4639_v49 = vmul.f32 %v4634_v26, %v9037_v37  ;;  %v4641_v54 = vmul.f32 %v4634_v26, %v9057_v5 }
 0x81e   :  { %v9336_v34 = vpop.permute.xlu1 %4343  ;;  %v9338_v46 = vpop.permute.xlu0 %4341  ;;  %v4642_v62 = vmul.f32 %v4634_v26, %v9055_v10 }
 0x81f   :  { %v9340_v52 = vpop.permute.xlu2 %4423 }
 0x824   :  { %4613 = vrot.lane.b32.xlu1 %v4593_v4, %s6153_s28  ;;  %4611 = vrot.lane.b32.xlu0 %v4592_v32, %s6153_s28 }
 0x825   :  { %4615 = vrot.lane.b32.xlu2 %v4594_v15, %s6153_s28 }
 0x826   :  { %v9348_v21 = vpop.permute.xlu1 %4379  ;;  %v9350_v33 = vpop.permute.xlu0 %4377 }
 0x827   :  { %v9352_v38 = vpop.permute.xlu2 %4429 }
 0x828   :  { %12505 = vst [vmem:[#allocation715_spill] sm:$0xff] %v9352_v38 }
 0x82c   :  { %4619 = vrot.lane.b32.xlu1 %v4596_v39, %s6153_s28  ;;  %4617 = vrot.lane.b32.xlu0 %v4595_v58, %s6153_s28  ;;  %s5914_s28 = sld [smem:[#allocation8 + $0x18d]] }
 0x82d   :  { %4651 = vrot.lane.b32.xlu2 %v4635_v25, %s6154_s30 }
 0x82e   :  { %v9360_v15 = vpop.permute.xlu1 %4385  ;;  %v9362_v32 = vpop.permute.xlu0 %4383 }
 0x82f   :  { %v9364_v4 = vpop.permute.xlu2 %4435 }
 0x834   :  { %4655 = vrot.lane.b32.xlu1 %v4637_v3, %s6154_s30  ;;  %4653 = vrot.lane.b32.xlu0 %v4636_v20, %s6154_s30  ;;  %v4680_v3 = vstv %s5913_s7  ;;  %s12582_s7 = smov 107  }
 0x835   :  { %4657 = vrot.lane.b32.xlu2 %v4638_v27, %s6154_s30  ;;  %v4681_v12 = vmul.f32 %v4680_v3, %v9021_v14  ;;  %v4682_v11 = vmul.f32 %v4680_v3, %v9019_v13  ;;  %v4685_v26 = vmul.f32 %v4680_v3, %v9037_v37 }
 0x836   :  { %v9372_v58 = vpop.permute.xlu1 %4421  ;;  %v9374_v25 = vpop.permute.xlu0 %4389 }
 0x837   :  { %v9376_v39 = vpop.permute.xlu2 %4471 }
 0x838   :  { %12506 = vst [vmem:[#allocation716_spill] sm:$0xff] %v9376_v39  ;;  %v4684_v39 = vmul.f32 %v4680_v3, %v9039_v51 }
 0x83c   :  { %4661 = vrot.lane.b32.xlu1 %v4640_v19, %s6154_s30  ;;  %4659 = vrot.lane.b32.xlu0 %v4639_v49, %s6154_s30 }
 0x83d   :  { %4663 = vrot.lane.b32.xlu2 %v4641_v54, %s6154_s30 }
 0x83e   :  { %v9384_v20 = vpop.permute.xlu1 %4427  ;;  %v9386_v27 = vpop.permute.xlu0 %4425 }
 0x83f   :  { %12507 = vst [vmem:[#allocation717_spill] sm:$0xff] %v9384_v20  ;;  %v9388_v63 = vpop.permute.xlu2 %4477  ;;  %v4688_v20 = vmul.f32 %v4680_v3, %v9055_v10 }
 0x840   :  { %12508 = vst [vmem:[#allocation718_spill] sm:$0xff] %v9386_v27  ;;  %v4686_v27 = vmul.f32 %v4680_v3, %v9046_v28 }
 0x841   :  { %12509 = vst [vmem:[#allocation719_spill] sm:$0xff] %v9388_v63  ;;  %v4683_v63 = vmul.f32 %v4680_v3, %v9028_v2 }
 0x844   :  { %4697 = vrot.lane.b32.xlu1 %v4681_v12, %s6155_s8  ;;  %4665 = vrot.lane.b32.xlu0 %v4642_v62, %s6154_s30  ;;  %s5915_s30 = sld [smem:[#allocation8 + $0x18e]] }
 0x845   :  { %4699 = vrot.lane.b32.xlu2 %v4682_v11, %s6155_s8 }
 0x846   :  { %v9396_v49 = vpop.permute.xlu1 %4433  ;;  %v9398_v54 = vpop.permute.xlu0 %4431 }
 0x847   :  { %v9400_v19 = vpop.permute.xlu2 %4513 }
 0x848   :  { %12510 = vst [vmem:[#allocation720_spill] sm:$0xff] %v9400_v19  ;;  %v4687_v19 = vmul.f32 %v4680_v3, %v9057_v5 }
 0x84c   :  { %4703 = vrot.lane.b32.xlu1 %v4684_v39, %s6155_s8  ;;  %4701 = vrot.lane.b32.xlu0 %v4683_v63, %s6155_s8  ;;  %v4726_v63 = vstv %s5914_s28  ;;  %s5923_s28 = sld [smem:[#allocation8 + $0x196]] }
 0x84d   :  { %4705 = vrot.lane.b32.xlu2 %v4685_v26, %s6155_s8  ;;  %v4729_v38 = vmul.f32 %v4726_v63, %v9028_v2 }
 0x84e   :  { %v9408_v62 = vpop.permute.xlu1 %4469  ;;  %v9410_v11 = vpop.permute.xlu0 %4467 }
 0x84f   :  { %12511 = vst [vmem:[#allocation721_spill] sm:$0xff] %v9408_v62  ;;  %v9412_v12 = vpop.permute.xlu2 %4519  ;;  %v4727_v62 = vmul.f32 %v4726_v63, %v9021_v14 }
 0x850   :  { %12512 = vst [vmem:[#allocation722_spill] sm:$0xff] %v9410_v11 }
 0x851   :  { %12513 = vst [vmem:[#allocation723_spill] sm:$0xff] %v9412_v12  ;;  %v4728_v12 = vmul.f32 %v4726_v63, %v9019_v13 }
 0x854   :  { %4709 = vrot.lane.b32.xlu1 %v4687_v19, %s6155_s8  ;;  %4707 = vrot.lane.b32.xlu0 %v4686_v27, %s6155_s8  ;;  %v4731_v19 = vmul.f32 %v4726_v63, %v9037_v37 }
 0x855   :  { %4711 = vrot.lane.b32.xlu2 %v4688_v20, %s6155_s8 }
 0x856   :  { %v9420_v39 = vpop.permute.xlu1 %4475  ;;  %v9422_v26 = vpop.permute.xlu0 %4473 }
 0x857   :  { %12514 = vst [vmem:[#allocation724_spill] sm:$0xff] %v9420_v39  ;;  %v9424_v11 = vpop.permute.xlu2 %4525 }
 0x858   :  { %12515 = vst [vmem:[#allocation725_spill] sm:$0xff] %v9422_v26  ;;  %v4732_v26 = vmul.f32 %v4726_v63, %v9046_v28 }
 0x859   :  { %12516 = vst [vmem:[#allocation726_spill] sm:$0xff] %v9424_v11  ;;  %v4730_v11 = vmul.f32 %v4726_v63, %v9039_v51 }
 0x85c   :  { %4745 = vrot.lane.b32.xlu1 %v4728_v12, %s6156_s10  ;;  %4743 = vrot.lane.b32.xlu0 %v4727_v62, %s6156_s10 }
 0x85d   :  { %4747 = vrot.lane.b32.xlu2 %v4729_v38, %s6156_s10 }
 0x85e   :  { %v9432_v3 = vpop.permute.xlu1 %4481  ;;  %v9434_v20 = vpop.permute.xlu0 %4479 }
 0x85f   :  { %12517 = vst [vmem:[#allocation727_spill] sm:$0xff] %v9432_v3  ;;  %v9436_v27 = vpop.permute.xlu2 %4561  ;;  %v4772_v3 = vstv %s5915_s30  ;;  %s5901_s30 = sld [smem:[#allocation8 + $0x180]] }
 0x860   :  { %12518 = vst [vmem:[#allocation728_spill] sm:$0xff] %v9434_v20  ;;  %v4733_v20 = vmul.f32 %v4726_v63, %v9057_v5  ;;  %v4773_v39 = vmul.f32 %v4772_v3, %v9021_v14 }
 0x861   :  { %12519 = vst [vmem:[#allocation729_spill] sm:$0xff] %v9436_v27  ;;  %v4734_v27 = vmul.f32 %v4726_v63, %v9055_v10  ;;  %v4776_v63 = vmul.f32 %v4772_v3, %v9039_v51 }
 0x864   :  { %4751 = vrot.lane.b32.xlu1 %v4731_v19, %s6156_s10  ;;  %4749 = vrot.lane.b32.xlu0 %v4730_v11, %s6156_s10 }
 0x865   :  { %4753 = vrot.lane.b32.xlu2 %v4732_v26, %s6156_s10 }
 0x866   :  { %v9444_v38 = vpop.permute.xlu1 %4517  ;;  %v9446_v62 = vpop.permute.xlu0 %4515 }
 0x867   :  { %12520 = vst [vmem:[#allocation730_spill] sm:$0xff] %v9444_v38  ;;  %v9448_v12 = vpop.permute.xlu2 %4567  ;;  %v4777_v38 = vmul.f32 %v4772_v3, %v9037_v37 }
 0x868   :  { %12521 = vst [vmem:[#allocation731_spill] sm:$0xff] %v9446_v62  ;;  %v4774_v62 = vmul.f32 %v4772_v3, %v9019_v13 }
 0x869   :  { %12522 = vst [vmem:[#allocation732_spill] sm:$0xff] %v9448_v12  ;;  %v4775_v12 = vmul.f32 %v4772_v3, %v9028_v2 }
 0x86c   :  { %4757 = vrot.lane.b32.xlu1 %v4734_v27, %s6156_s10  ;;  %4755 = vrot.lane.b32.xlu0 %v4733_v20, %s6156_s10  ;;  %s5917_s10 = sld [smem:[#allocation8 + $0x190]] }
 0x86d   :  { %4789 = vrot.lane.b32.xlu2 %v4773_v39, %s6157_s1 }
 0x86e   :  { %v9456_v11 = vpop.permute.xlu1 %4523  ;;  %v9458_v26 = vpop.permute.xlu0 %4521 }
 0x86f   :  { %12523 = vst [vmem:[#allocation733_spill] sm:$0xff] %v9456_v11  ;;  %v9460_v19 = vpop.permute.xlu2 %4573 }
 0x870   :  { %12524 = vst [vmem:[#allocation734_spill] sm:$0xff] %v9458_v26  ;;  %v4779_v26 = vmul.f32 %v4772_v3, %v9057_v5 }
 0x871   :  { %12525 = vst [vmem:[#allocation735_spill] sm:$0xff] %v9460_v19  ;;  %v4778_v19 = vmul.f32 %v4772_v3, %v9046_v28 }
 0x874   :  { %4793 = vrot.lane.b32.xlu1 %v4775_v12, %s6157_s1  ;;  %4791 = vrot.lane.b32.xlu0 %v4774_v62, %s6157_s1  ;;  %v4818_v62 = vstv %s5916_s18  ;;  %s9764_s18 = sld [smem:[#allocation8 + $0x197]] }
 0x875   :  { %4795 = vrot.lane.b32.xlu2 %v4776_v63, %s6157_s1  ;;  %v4820_v11 = vmul.f32 %v4818_v62, %v9019_v13 }
 0x876   :  { %v9468_v39 = vpop.permute.xlu1 %4559  ;;  %v9470_v20 = vpop.permute.xlu0 %4527 }
 0x877   :  { %12526 = vst [vmem:[#allocation736_spill] sm:$0xff] %v9468_v39  ;;  %v9472_v27 = vpop.permute.xlu2 %4609 }
 0x878   :  { %12527 = vst [vmem:[#allocation737_spill] sm:$0xff] %v9470_v20  ;;  %v4780_v20 = vmul.f32 %v4772_v3, %v9055_v10  ;;  %v4823_v3 = vmul.f32 %v4818_v62, %v9037_v37 }
 0x879   :  { %12528 = vst [vmem:[#allocation738_spill] sm:$0xff] %v9472_v27  ;;  %v4819_v27 = vmul.f32 %v4818_v62, %v9021_v14 }
 0x87c   :  { %4799 = vrot.lane.b32.xlu1 %v4778_v19, %s6157_s1  ;;  %4797 = vrot.lane.b32.xlu0 %v4777_v38, %s6157_s1 }
 0x87d   :  { %4801 = vrot.lane.b32.xlu2 %v4779_v26, %s6157_s1 }
 0x87e   :  { %v9480_v12 = vpop.permute.xlu1 %4565  ;;  %v9482_v63 = vpop.permute.xlu0 %4563 }
 0x87f   :  { %12529 = vst [vmem:[#allocation739_spill] sm:$0xff] %v9480_v12  ;;  %v9484_v39 = vpop.permute.xlu2 %4615  ;;  %v4821_v12 = vmul.f32 %v4818_v62, %v9028_v2 }
 0x880   :  { %12530 = vst [vmem:[#allocation740_spill] sm:$0xff] %v9482_v63  ;;  %v4822_v63 = vmul.f32 %v4818_v62, %v9039_v51 }
 0x881   :  { %12531 = vst [vmem:[#allocation741_spill] sm:$0xff] %v9484_v39  ;;  %v4824_v39 = vmul.f32 %v4818_v62, %v9046_v28 }
 0x884   :  { %4835 = vrot.lane.b32.xlu1 %v4819_v27, %s6158_s13  ;;  %4803 = vrot.lane.b32.xlu0 %v4780_v20, %s6157_s1  ;;  %s5918_s1 = sld [smem:[#allocation8 + $0x191]] }
 0x885   :  { %4837 = vrot.lane.b32.xlu2 %v4820_v11, %s6158_s13 }
 0x886   :  { %v9492_v38 = vpop.permute.xlu1 %4571  ;;  %v9494_v26 = vpop.permute.xlu0 %4569 }
 0x887   :  { %12532 = vst [vmem:[#allocation742_spill] sm:$0xff] %v9492_v38  ;;  %v9496_v19 = vpop.permute.xlu2 %4651 }
 0x888   :  { %12533 = vst [vmem:[#allocation743_spill] sm:$0xff] %v9494_v26  ;;  %v4826_v26 = vmul.f32 %v4818_v62, %v9055_v10 }
 0x889   :  { %12534 = vst [vmem:[#allocation744_spill] sm:$0xff] %v9496_v19  ;;  %v4825_v19 = vmul.f32 %v4818_v62, %v9057_v5 }
 0x88c   :  { %4841 = vrot.lane.b32.xlu1 %v4822_v63, %s6158_s13  ;;  %4839 = vrot.lane.b32.xlu0 %v4821_v12, %s6158_s13  ;;  %v4864_v12 = vstv %s5917_s10  ;;  %s71_s10 = sld [smem:[#allocation8]] }
 0x88d   :  { %4843 = vrot.lane.b32.xlu2 %v4823_v3, %s6158_s13  ;;  %v4867_v38 = vmul.f32 %v4864_v12, %v9028_v2 }
 0x88e   :  { %v9504_v11 = vpop.permute.xlu1 %4607  ;;  %v9506_v20 = vpop.permute.xlu0 %4605 }
 0x88f   :  { %12535 = vst [vmem:[#allocation745_spill] sm:$0xff] %v9504_v11  ;;  %v9508_v27 = vpop.permute.xlu2 %4657  ;;  %v4865_v11 = vmul.f32 %v4864_v12, %v9021_v14 }
 0x890   :  { %12536 = vst [vmem:[#allocation746_spill] sm:$0xff] %v9506_v20 }
 0x891   :  { %12537 = vst [vmem:[#allocation747_spill] sm:$0xff] %v9508_v27  ;;  %v4866_v27 = vmul.f32 %v4864_v12, %v9019_v13 }
 0x894   :  { %4847 = vrot.lane.b32.xlu1 %v4825_v19, %s6158_s13  ;;  %4845 = vrot.lane.b32.xlu0 %v4824_v39, %s6158_s13  ;;  %v4869_v19 = vmul.f32 %v4864_v12, %v9037_v37 }
 0x895   :  { %4849 = vrot.lane.b32.xlu2 %v4826_v26, %s6158_s13  ;;  %s5919_s13 = sld [smem:[#allocation8 + $0x192]] }
 0x896   :  { %v9516_v63 = vpop.permute.xlu1 %4613  ;;  %v9518_v3 = vpop.permute.xlu0 %4611 }
 0x897   :  { %12538 = vst [vmem:[#allocation748_spill] sm:$0xff] %v9516_v63  ;;  %v9520_v20 = vpop.permute.xlu2 %4663 }
 0x898   :  { %12539 = vst [vmem:[#allocation749_spill] sm:$0xff] %v9518_v3  ;;  %v4868_v3 = vmul.f32 %v4864_v12, %v9039_v51 }
 0x899   :  { %12540 = vst [vmem:[#allocation750_spill] sm:$0xff] %v9520_v20  ;;  %v4870_v20 = vmul.f32 %v4864_v12, %v9046_v28 }
 0x89c   :  { %4883 = vrot.lane.b32.xlu1 %v4866_v27, %s6159_s17  ;;  %4881 = vrot.lane.b32.xlu0 %v4865_v11, %s6159_s17 }
 0x89d   :  { %4885 = vrot.lane.b32.xlu2 %v4867_v38, %s6159_s17 }
 0x89e   :  { %v9528_v39 = vpop.permute.xlu1 %4619  ;;  %v9530_v62 = vpop.permute.xlu0 %4617 }
 0x89f   :  { %12541 = vst [vmem:[#allocation751_spill] sm:$0xff] %v9528_v39  ;;  %v9532_v26 = vpop.permute.xlu2 %4699  ;;  %v4910_v39 = vstv %s5918_s1  ;;  %s10159_s1 = sld [smem:[#allocation8 + $0x19a]] }
 0x8a0   :  { %12542 = vst [vmem:[#allocation752_spill] sm:$0xff] %v9530_v62  ;;  %v4871_v62 = vmul.f32 %v4864_v12, %v9057_v5  ;;  %v4911_v63 = vmul.f32 %v4910_v39, %v9021_v14 }
 0x8a1   :  { %12543 = vst [vmem:[#allocation753_spill] sm:$0xff] %v9532_v26  ;;  %v4872_v26 = vmul.f32 %v4864_v12, %v9055_v10  ;;  %v4914_v12 = vmul.f32 %v4910_v39, %v9039_v51 }
 0x8a4   :  { %4889 = vrot.lane.b32.xlu1 %v4869_v19, %s6159_s17  ;;  %4887 = vrot.lane.b32.xlu0 %v4868_v3, %s6159_s17 }
 0x8a5   :  { %4891 = vrot.lane.b32.xlu2 %v4870_v20, %s6159_s17 }
 0x8a6   :  { %v9540_v38 = vpop.permute.xlu1 %4655  ;;  %v9542_v11 = vpop.permute.xlu0 %4653 }
 0x8a7   :  { %12544 = vst [vmem:[#allocation754_spill] sm:$0xff] %v9540_v38  ;;  %v9544_v27 = vpop.permute.xlu2 %4705  ;;  %v4913_v38 = vmul.f32 %v4910_v39, %v9028_v2 }
 0x8a8   :  { %12545 = vst [vmem:[#allocation755_spill] sm:$0xff] %v9542_v11  ;;  %v4912_v11 = vmul.f32 %v4910_v39, %v9019_v13 }
 0x8a9   :  { %12546 = vst [vmem:[#allocation756_spill] sm:$0xff] %v9544_v27  ;;  %v4916_v27 = vmul.f32 %v4910_v39, %v9046_v28 }
 0x8ac   :  { %4895 = vrot.lane.b32.xlu1 %v4872_v26, %s6159_s17  ;;  %4893 = vrot.lane.b32.xlu0 %v4871_v62, %s6159_s17 }
 0x8ad   :  { %4927 = vrot.lane.b32.xlu2 %v4911_v63, %s6160_s21 }
 0x8ae   :  { %v9552_v20 = vpop.permute.xlu1 %4661  ;;  %v9554_v3 = vpop.permute.xlu0 %4659 }
 0x8af   :  { %12547 = vst [vmem:[#allocation757_spill] sm:$0xff] %v9552_v20  ;;  %v9556_v19 = vpop.permute.xlu2 %4711 }
 0x8b0   :  { %12548 = vst [vmem:[#allocation758_spill] sm:$0xff] %v9554_v3  ;;  %v4917_v3 = vmul.f32 %v4910_v39, %v9057_v5 }
 0x8b1   :  { %12549 = vst [vmem:[#allocation759_spill] sm:$0xff] %v9556_v19  ;;  %v4915_v19 = vmul.f32 %v4910_v39, %v9037_v37 }
 0x8b4   :  { %4931 = vrot.lane.b32.xlu1 %v4913_v38, %s6160_s21  ;;  %4929 = vrot.lane.b32.xlu0 %v4912_v11, %s6160_s21  ;;  %v4956_v38 = vstv %s5919_s13  ;;  %s10496_s13 = sld [smem:[#allocation8 + $0x80]] }
 0x8b5   :  { %4933 = vrot.lane.b32.xlu2 %v4914_v12, %s6160_s21  ;;  %v4958_v20 = vmul.f32 %v4956_v38, %v9019_v13 }
 0x8b6   :  { %v9564_v63 = vpop.permute.xlu1 %4697  ;;  %v9566_v62 = vpop.permute.xlu0 %4665 }
 0x8b7   :  { %12550 = vst [vmem:[#allocation760_spill] sm:$0xff] %v9564_v63  ;;  %v9568_v26 = vpop.permute.xlu2 %4747 }
 0x8b8   :  { %12551 = vst [vmem:[#allocation761_spill] sm:$0xff] %v9566_v62  ;;  %v4918_v62 = vmul.f32 %v4910_v39, %v9055_v10  ;;  %v4961_v39 = vmul.f32 %v4956_v38, %v9037_v37 }
 0x8b9   :  { %12552 = vst [vmem:[#allocation762_spill] sm:$0xff] %v9568_v26  ;;  %v4957_v26 = vmul.f32 %v4956_v38, %v9021_v14 }
 0x8bc   :  { %4937 = vrot.lane.b32.xlu1 %v4916_v27, %s6160_s21  ;;  %4935 = vrot.lane.b32.xlu0 %v4915_v19, %s6160_s21 }
 0x8bd   :  { %4939 = vrot.lane.b32.xlu2 %v4917_v3, %s6160_s21 }
 0x8be   :  { %v9576_v11 = vpop.permute.xlu1 %4703  ;;  %v9578_v12 = vpop.permute.xlu0 %4701 }
 0x8bf   :  { %12553 = vst [vmem:[#allocation763_spill] sm:$0xff] %v9576_v11  ;;  %v9580_v63 = vpop.permute.xlu2 %4753  ;;  %v4959_v11 = vmul.f32 %v4956_v38, %v9028_v2 }
 0x8c0   :  { %12554 = vst [vmem:[#allocation764_spill] sm:$0xff] %v9578_v12  ;;  %v4960_v12 = vmul.f32 %v4956_v38, %v9039_v51 }
 0x8c1   :  { %12555 = vst [vmem:[#allocation765_spill] sm:$0xff] %v9580_v63  ;;  %v4962_v63 = vmul.f32 %v4956_v38, %v9046_v28 }
 0x8c4   :  { %4973 = vrot.lane.b32.xlu1 %v4957_v26, %s6161_s25  ;;  %4941 = vrot.lane.b32.xlu0 %v4918_v62, %s6160_s21  ;;  %s12565_s21 = smov 109  }
 0x8c5   :  { %4975 = vrot.lane.b32.xlu2 %v4958_v20, %s6161_s25 }
 0x8c6   :  { %v9588_v27 = vpop.permute.xlu1 %4709  ;;  %v9590_v3 = vpop.permute.xlu0 %4707 }
 0x8c7   :  { %12556 = vst [vmem:[#allocation766_spill] sm:$0xff] %v9588_v27  ;;  %v9592_v19 = vpop.permute.xlu2 %4789 }
 0x8c8   :  { %12557 = vst [vmem:[#allocation767_spill] sm:$0xff] %v9590_v3  ;;  %v4964_v3 = vmul.f32 %v4956_v38, %v9055_v10 }
 0x8c9   :  { %12558 = vst [vmem:[#allocation768_spill] sm:$0xff] %v9592_v19  ;;  %v4963_v19 = vmul.f32 %v4956_v38, %v9057_v5 }
 0x8cc   :  { %4979 = vrot.lane.b32.xlu1 %v4960_v12, %s6161_s25  ;;  %4977 = vrot.lane.b32.xlu0 %v4959_v11, %s6161_s25  ;;  %v5002_v11 = vstv %s5920_s20 }
 0x8cd   :  { %4981 = vrot.lane.b32.xlu2 %v4961_v39, %s6161_s25  ;;  %v5005_v27 = vmul.f32 %v5002_v11, %v9028_v2 }
 0x8ce   :  { %v9600_v20 = vpop.permute.xlu1 %4745  ;;  %v9602_v62 = vpop.permute.xlu0 %4743 }
 0x8cf   :  { %12559 = vst [vmem:[#allocation769_spill] sm:$0xff] %v9600_v20  ;;  %v9604_v26 = vpop.permute.xlu2 %4795  ;;  %v5003_v20 = vmul.f32 %v5002_v11, %v9021_v14 }
 0x8d0   :  { %12560 = vst [vmem:[#allocation770_spill] sm:$0xff] %v9602_v62 }
 0x8d1   :  { %12561 = vst [vmem:[#allocation771_spill] sm:$0xff] %v9604_v26  ;;  %v5004_v26 = vmul.f32 %v5002_v11, %v9019_v13 }
 0x8d4   :  { %4985 = vrot.lane.b32.xlu1 %v4963_v19, %s6161_s25  ;;  %4983 = vrot.lane.b32.xlu0 %v4962_v63, %s6161_s25  ;;  %v5007_v19 = vmul.f32 %v5002_v11, %v9037_v37 }
 0x8d5   :  { %4987 = vrot.lane.b32.xlu2 %v4964_v3, %s6161_s25  ;;  %s5921_s25 = sld [smem:[#allocation8 + $0x194]] }
 0x8d6   :  { %v9612_v12 = vpop.permute.xlu1 %4751  ;;  %v9614_v39 = vpop.permute.xlu0 %4749 }
 0x8d7   :  { %12562 = vst [vmem:[#allocation772_spill] sm:$0xff] %v9612_v12  ;;  %v9616_v62 = vpop.permute.xlu2 %4801 }
 0x8d8   :  { %12563 = vst [vmem:[#allocation773_spill] sm:$0xff] %v9614_v39  ;;  %v5006_v39 = vmul.f32 %v5002_v11, %v9039_v51 }
 0x8d9   :  { %12564 = vst [vmem:[#allocation774_spill] sm:$0xff] %v9616_v62  ;;  %v5008_v62 = vmul.f32 %v5002_v11, %v9046_v28 }
 0x8dc   :  { %5021 = vrot.lane.b32.xlu1 %v5004_v26, %s12565_s21  ;;  %5019 = vrot.lane.b32.xlu0 %v5003_v20, %s12565_s21 }
 0x8dd   :  { %5023 = vrot.lane.b32.xlu2 %v5005_v27, %s12565_s21 }
 0x8de   :  { %v9624_v63 = vpop.permute.xlu1 %4757  ;;  %v9626_v38 = vpop.permute.xlu0 %4755 }
 0x8df   :  { %12566 = vst [vmem:[#allocation775_spill] sm:$0xff] %v9624_v63  ;;  %v9628_v3 = vpop.permute.xlu2 %4837  ;;  %v5048_v63 = vstv %s5921_s25  ;;  %s5931_s25 = sld [smem:[#allocation9 + $0x1]] }
 0x8e0   :  { %12567 = vst [vmem:[#allocation776_spill] sm:$0xff] %v9626_v38  ;;  %v5009_v38 = vmul.f32 %v5002_v11, %v9057_v5  ;;  %v5049_v12 = vmul.f32 %v5048_v63, %v9021_v14 }
 0x8e1   :  { %12568 = vst [vmem:[#allocation777_spill] sm:$0xff] %v9628_v3  ;;  %v5010_v3 = vmul.f32 %v5002_v11, %v9055_v10  ;;  %v5052_v11 = vmul.f32 %v5048_v63, %v9039_v51  ;;  %v5094_v51 = vstv %s5922_s26  ;;  %s5934_s26 = sld [smem:[#allocation9 + $0x4]] }
 0x8e4   :  { %5027 = vrot.lane.b32.xlu1 %v5007_v19, %s12565_s21  ;;  %5025 = vrot.lane.b32.xlu0 %v5006_v39, %s12565_s21 }
 0x8e5   :  { %5029 = vrot.lane.b32.xlu2 %v5008_v62, %s12565_s21 }
 0x8e6   :  { %v9636_v27 = vpop.permute.xlu1 %4793  ;;  %v9638_v20 = vpop.permute.xlu0 %4791 }
 0x8e7   :  { %12569 = vst [vmem:[#allocation778_spill] sm:$0xff] %v9636_v27  ;;  %v9640_v26 = vpop.permute.xlu2 %4843  ;;  %v5051_v27 = vmul.f32 %v5048_v63, %v9028_v2  ;;  %v5053_v2 = vmul.f32 %v5048_v63, %v9037_v37  ;;  %v5056_v37 = vmul.f32 %v5048_v63, %v9055_v10 }
 0x8e8   :  { %12570 = vst [vmem:[#allocation779_spill] sm:$0xff] %v9638_v20  ;;  %v5050_v20 = vmul.f32 %v5048_v63, %v9019_v13  ;;  %v5055_v13 = vmul.f32 %v5048_v63, %v9057_v5  ;;  %v9682_v5 = vld [vmem:[#allocation4 + $0xc8] sm:$0xff] }
 0x8e9   :  { %12571 = vst [vmem:[#allocation780_spill] sm:$0xff] %v9640_v26  ;;  %v9712_v26 = vld [vmem:[#allocation4 + $0xf0] sm:$0xff] }
 0x8ec   :  { %5033 = vrot.lane.b32.xlu1 %v5010_v3, %s12565_s21  ;;  %5031 = vrot.lane.b32.xlu0 %v5009_v38, %s12565_s21  ;;  %v5054_v3 = vmul.f32 %v5048_v63, %v9046_v28  ;;  %v9697_v63 = vld [vmem:[#allocation4 + $0xd0] sm:$0xff] }
 0x8ed   :  { %5065 = vrot.lane.b32.xlu2 %v5049_v12, %s12572_s22 }
 0x8ee   :  { %v9648_v62 = vpop.permute.xlu1 %4799  ;;  %v9650_v39 = vpop.permute.xlu0 %4797 }
 0x8ef   :  { %12573 = vst [vmem:[#allocation781_spill] sm:$0xff] %v9648_v62  ;;  %v9652_v19 = vpop.permute.xlu2 %4849 }
 0x8f0   :  { %12574 = vst [vmem:[#allocation782_spill] sm:$0xff] %v9650_v39  ;;  %v4207_v39 = vsel %vm11795_vm0, %v9218_v43, %v9216_v59  ;;  %v4210_v43 = vsel %vm11795_vm0, %v9242_v48, %v9240_v24  ;;  %v4299_v24 = vsel %vm11791_vm2, %v9276_v55, %v9244_v0 }
 0x8f1   :  { %12575 = vst [vmem:[#allocation783_spill] sm:$0xff] %v9652_v19 }
 0x8f4   :  { %5069 = vrot.lane.b32.xlu1 %v5051_v27, %s12572_s22  ;;  %5067 = vrot.lane.b32.xlu0 %v5050_v20, %s12572_s22 }
 0x8f5   :  { %5071 = vrot.lane.b32.xlu2 %v5052_v11, %s12572_s22 }
 0x8f6   :  { %v9660_v14 = vpop.permute.xlu1 %4835  ;;  %v9662_v12 = vpop.permute.xlu0 %4803 }
 0x8f7   :  { %12576 = vst [vmem:[#allocation784_spill] sm:$0xff] %v9660_v14  ;;  %v9664_v38 = vpop.permute.xlu2 %4885  ;;  %v5097_v14 = vmul.f32 %v9697_v63, %v5094_v51 }
 0x8f8   :  { %12577 = vst [vmem:[#allocation785_spill] sm:$0xff] %v9662_v12 }
 0x8f9   :  { %12578 = vst [vmem:[#allocation786_spill] sm:$0xff] %v9664_v38  ;;  %v9678_v38 = vld [vmem:[#allocation4 + $0xc0] sm:$0xff] }
 0x8fa   :  { %v5095_v28 = vmul.f32 %v9678_v38, %v5094_v51 }
 0x8fc   :  { %5075 = vrot.lane.b32.xlu1 %v5054_v3, %s12572_s22  ;;  %5073 = vrot.lane.b32.xlu0 %v5053_v2, %s12572_s22  ;;  %v5096_v3 = vmul.f32 %v9682_v5, %v5094_v51 }
 0x8fd   :  { %5077 = vrot.lane.b32.xlu2 %v5055_v13, %s12572_s22 }
 0x8fe   :  { %v9672_v27 = vpop.permute.xlu1 %4841  ;;  %v9674_v20 = vpop.permute.xlu0 %4839 }
 0x8ff   :  { %12579 = vst [vmem:[#allocation787_spill] sm:$0xff] %v9672_v27  ;;  %v9676_v11 = vpop.permute.xlu2 %4891  ;;  %v9694_v27 = vld [vmem:[#allocation4 + $0xd8] sm:$0xff] }
 0x900   :  { %12580 = vst [vmem:[#allocation788_spill] sm:$0xff] %v9674_v20  ;;  %v5098_v10 = vmul.f32 %v9694_v27, %v5094_v51 }
 0x901   :  { %12581 = vst [vmem:[#allocation789_spill] sm:$0xff] %v9676_v11  ;;  %v9700_v11 = vld [vmem:[#allocation4 + $0xe0] sm:$0xff] }
 0x902   :  { %12586 = vst [vmem:[#allocation793_spill] sm:$0xff] %v9700_v11 }
 0x904   :  { %5111 = vrot.lane.b32.xlu1 %v5095_v28, %s12582_s7  ;;  %5079 = vrot.lane.b32.xlu0 %v5056_v37, %s12572_s22  ;;  %v5099_v28 = vmul.f32 %v9700_v11, %v5094_v51 }
 0x905   :  { %5113 = vrot.lane.b32.xlu2 %v5096_v3, %s12582_s7 }
 0x906   :  { %v9688_v2 = vpop.permute.xlu1 %4847  ;;  %v9690_v13 = vpop.permute.xlu0 %4845 }
 0x907   :  { %12583 = vst [vmem:[#allocation790_spill] sm:$0xff] %v9688_v2  ;;  %v9692_v20 = vpop.permute.xlu2 %4927  ;;  %v9715_v2 = vld [vmem:[#allocation4 + $0xe8] sm:$0xff] }
 0x908   :  { %12584 = vst [vmem:[#allocation791_spill] sm:$0xff] %v9690_v13  ;;  %v5101_v13 = vmul.f32 %v9712_v26, %v5094_v51  ;;  %v5100_v19 = vmul.f32 %v9715_v2, %v5094_v51 }
 0x909   :  { %12585 = vst [vmem:[#allocation792_spill] sm:$0xff] %v9692_v20 }
 0x90c   :  { %5117 = vrot.lane.b32.xlu1 %v5098_v10, %s12582_s7  ;;  %5115 = vrot.lane.b32.xlu0 %v5097_v14, %s12582_s7  ;;  %v9718_v10 = vld [vmem:[#allocation4 + $0xf8] sm:$0xff] }
 0x90d   :  { %5119 = vrot.lane.b32.xlu2 %v5099_v28, %s12582_s7  ;;  %v5102_v14 = vmul.f32 %v9718_v10, %v5094_v51  ;;  %v9723_v28 = vstv %s5923_s28  ;;  %s5936_s28 = sld [smem:[#allocation9 + $0x6]] }
 0x90e   :  { %v9706_v37 = vpop.permute.xlu1 %4883  ;;  %v9708_v3 = vpop.permute.xlu0 %4881  ;;  %v5142_v12 = vmul.f32 %v9682_v5, %v9723_v28  ;;  %v5141_v51 = vmul.f32 %v9678_v38, %v9723_v28  ;;  %v5144_v59 = vmul.f32 %v9694_v27, %v9723_v28 }
 0x90f   :  { %12587 = vst [vmem:[#allocation794_spill] sm:$0xff] %v9706_v37  ;;  %v9710_v20 = vpop.permute.xlu2 %4933 }
 0x910   :  { %12588 = vst [vmem:[#allocation795_spill] sm:$0xff] %v9708_v3 }
 0x911   :  { %12589 = vst [vmem:[#allocation796_spill] sm:$0xff] %v9710_v20 }
 0x914   :  { %5123 = vrot.lane.b32.xlu1 %v5101_v13, %s12582_s7  ;;  %5121 = vrot.lane.b32.xlu0 %v5100_v19, %s12582_s7  ;;  %v5143_v13 = vmul.f32 %v9697_v63, %v9723_v28  ;;  %v4160_v19 = vstv %s5901_s30  ;;  %s5937_s30 = sld [smem:[#allocation9 + $0x7]] }
 0x915   :  { %5125 = vrot.lane.b32.xlu2 %v5102_v14, %s12582_s7  ;;  %v4161_v14 = vmul.f32 %v9678_v38, %v4160_v19  ;;  %v4163_v62 = vmul.f32 %v9700_v11, %v4160_v19  ;;  %s5935_s7 = sld [smem:[#allocation9 + $0x5]] }
 0x916   :  { %v9726_v20 = vpop.permute.xlu1 %4889  ;;  %v9728_v3 = vpop.permute.xlu0 %4887 }
 0x917   :  { %12590 = vst [vmem:[#allocation797_spill] sm:$0xff] %v9726_v20  ;;  %v9730_v37 = vpop.permute.xlu2 %4939 }
 0x918   :  { %12591 = vst [vmem:[#allocation798_spill] sm:$0xff] %v9728_v3 }
 0x919   :  { %12592 = vst [vmem:[#allocation799_spill] sm:$0xff] %v9730_v37 }
 0x91c   :  { %5159 = vrot.lane.b32.xlu1 %v5142_v12, %s12397_s9  ;;  %5157 = vrot.lane.b32.xlu0 %v5141_v51, %s12397_s9  ;;  %v4162_v12 = vmul.f32 %v9697_v63, %v4160_v19  ;;  %v4164_v51 = vmul.f32 %v9712_v26, %v4160_v19  ;;  %v4255_v19 = vsel %vm11796_vm1, %v9266_v56, %v9264_v22 }
 0x91d   :  { %5161 = vrot.lane.b32.xlu2 %v5143_v13, %s12397_s9  ;;  %v4209_v13 = vsel %vm11795_vm0, %v9228_v8, %v9196_v35  ;;  %v4253_v35 = vsel %vm11796_vm1, %v9208_v36, %v9254_v57  ;;  %v5146_v8 = vmul.f32 %v9715_v2, %v9723_v28  ;;  %v4256_v36 = vsel %vm11796_vm1, %v9232_v44, %v9278_v41 }
 0x91e   :  { %v9742_v3 = vpop.permute.xlu1 %4895  ;;  %v9744_v20 = vpop.permute.xlu0 %4893  ;;  %v4218_v48 = vadd.f32 %v4210_v43, %v4164_v51  ;;  %v4300_v56 = vsel %vm11791_vm2, %v9290_v1, %v9288_v30  ;;  %v4346_v30 = vsel %vm11790_vm3, %v9280_v23, %v9326_v42  ;;  %v4391_v23 = vsel %vm11788_vm4, %v9304_v29, %v9350_v33 }
 0x91f   :  { %12593 = vst [vmem:[#allocation800_spill] sm:$0xff] %v9742_v3  ;;  %v9752_v37 = vpop.permute.xlu2 %4975  ;;  %v5145_v3 = vmul.f32 %v9700_v11, %v9723_v28  ;;  %v4217_v11 = vadd.f32 %v4209_v13, %v4163_v62  ;;  %v4345_v62 = vsel %vm11790_vm3, %v9314_v61, %v9312_v60  ;;  %v5147_v60 = vmul.f32 %v9712_v26, %v9723_v28  ;;  %v12599_v13 = vld [vmem:[#allocation719_spill] sm:$0xff] }
 0x920   :  { %12594 = vst [vmem:[#allocation801_spill] sm:$0xff] %v9744_v20  ;;  %v4208_v20 = vsel %vm11795_vm0, %v9184_v6, %v9230_v50  ;;  %v4215_v6 = vadd.f32 %v4207_v39, %v4161_v14  ;;  %v4254_v50 = vsel %vm11796_vm1, %v9252_v31, %v9220_v7  ;;  %v4301_v7 = vsel %vm11791_vm2, %v9256_v16, %v9302_v47  ;;  %v12598_v14 = vld [vmem:[#allocation718_spill] sm:$0xff] }
 0x921   :  { %12595 = vst [vmem:[#allocation802_spill] sm:$0xff] %v9752_v37  ;;  %v4216_v37 = vadd.f32 %v4208_v20, %v4162_v12  ;;  %v4263_v22 = vadd.f32 %v4255_v19, %v4217_v11  ;;  %v4264_v0 = vadd.f32 %v4256_v36, %v4218_v48  ;;  %v4302_v16 = vsel %vm11791_vm2, %v9300_v17, %v9268_v9  ;;  %v12603_v19 = vld [vmem:[#allocation721_spill] sm:$0xff] }
 0x922   :  { %v4261_v57 = vadd.f32 %v4253_v35, %v4215_v6  ;;  %v4347_v39 = vsel %vm11790_vm3, %v9324_v53, %v9292_v40  ;;  %v4348_v9 = vsel %vm11790_vm3, %v9338_v46, %v9336_v34  ;;  %v5148_v17 = vmul.f32 %v9718_v10, %v9723_v28  ;;  %v12601_v35 = vld [vmem:[#allocation727_spill] sm:$0xff]  ;;  %v12605_v48 = vld [vmem:[#allocation725_spill] sm:$0xff] }
 0x923   :  { %v4262_v31 = vadd.f32 %v4254_v50, %v4216_v37  ;;  %v4309_v47 = vadd.f32 %v4301_v7, %v4263_v22  ;;  %v9821_v61 = vstv %s9764_s18  ;;  %v4310_v40 = vadd.f32 %v4302_v16, %v4264_v0  ;;  %v12607_v0 = vld [vmem:[#allocation733_spill] sm:$0xff]  ;;  %s5939_s18 = sld [smem:[#allocation9 + $0x9]] }
 0x924   :  { %5165 = vrot.lane.b32.xlu1 %v5145_v3, %s12397_s9  ;;  %5163 = vrot.lane.b32.xlu0 %v5144_v59, %s12397_s9  ;;  %v4307_v44 = vadd.f32 %v4299_v24, %v4261_v57  ;;  %v5187_v53 = vmul.f32 %v9678_v38, %v9821_v61  ;;  %v4393_v34 = vsel %vm11788_vm4, %v9362_v32, %v9360_v15  ;;  %v12596_v32 = vld [vmem:[#allocation715_spill] sm:$0xff]  ;;  %v12600_v59 = vld [vmem:[#allocation724_spill] sm:$0xff]  ;;  %v12604_v24 = vld [vmem:[#allocation722_spill] sm:$0xff] }
 0x925   :  { %5167 = vrot.lane.b32.xlu2 %v5146_v8, %s12397_s9  ;;  %v4308_v20 = vadd.f32 %v4300_v56, %v4262_v31  ;;  %v4355_v11 = vadd.f32 %v4347_v39, %v4309_v47  ;;  %v4394_v46 = vsel %vm11788_vm4, %v9328_v45, %v9374_v25  ;;  %v4356_v3 = vadd.f32 %v4348_v9, %v4310_v40  ;;  %v12597_v25 = vld [vmem:[#allocation717_spill] sm:$0xff]  ;;  %v12602_v8 = vld [vmem:[#allocation728_spill] sm:$0xff]  ;;  %v12608_v56 = vld [vmem:[#allocation734_spill] sm:$0xff] }
 0x926   :  { %v9798_v55 = vpop.permute.xlu1 %4931  ;;  %v9800_v41 = vpop.permute.xlu0 %4929  ;;  %v4353_v42 = vadd.f32 %v4345_v62, %v4307_v44  ;;  %v4392_v28 = vsel %vm11788_vm4, %v9348_v21, %v9316_v18  ;;  %v4437_v29 = vsel %vm11787_vm5, %v9372_v58, %v9340_v52  ;;  %v4440_v15 = vsel %vm11787_vm5, %v9396_v49, %v9364_v4  ;;  %v12606_v57 = vld [vmem:[#allocation716_spill] sm:$0xff]  ;;  %v12609_v47 = vld [vmem:[#allocation737_spill] sm:$0xff]  ;;  %v12610_v62 = vld [vmem:[#allocation726_spill] sm:$0xff] }
 0x927   :  { %v9811_v1 = vpop.permute.xlu2 %4981  ;;  %v4354_v37 = vadd.f32 %v4346_v30, %v4308_v20  ;;  %v4439_v45 = vsel %vm11787_vm5, %v12596_v32, %v9398_v54  ;;  %v4401_v18 = vadd.f32 %v4393_v34, %v4355_v11  ;;  %v4402_v21 = vadd.f32 %v4394_v46, %v4356_v3  ;;  %v12612_v20 = vld [vmem:[#allocation730_spill] sm:$0xff]  ;;  %v12615_v46 = vld [vmem:[#allocation735_spill] sm:$0xff] }
 0x928   :  { %v4399_v33 = vadd.f32 %v4391_v23, %v4353_v42  ;;  %v4438_v4 = vsel %vm11787_vm5, %v12598_v14, %v12597_v25  ;;  %v4485_v43 = vsel %vm11789_vm6, %v12600_v59, %v12599_v13  ;;  %v4486_v6 = vsel %vm11789_vm6, %v12602_v8, %v12601_v35  ;;  %v12613_v23 = vld [vmem:[#allocation731_spill] sm:$0xff]  ;;  %v12622_v14 = vld [vmem:[#allocation752_spill] sm:$0xff] }
 0x929   :  { %v4400_v52 = vadd.f32 %v4392_v28, %v4354_v37  ;;  %v4448_v12 = vadd.f32 %v4440_v15, %v4402_v21  ;;  %v4447_v51 = vadd.f32 %v4439_v45, %v4401_v18  ;;  %v4483_v36 = vsel %vm11789_vm6, %v12604_v24, %v12603_v19  ;;  %v12616_v37 = vld [vmem:[#allocation742_spill] sm:$0xff]  ;;  %v12617_v28 = vld [vmem:[#allocation743_spill] sm:$0xff]  ;;  %v12619_v21 = vld [vmem:[#allocation741_spill] sm:$0xff] }
 0x92a   :  { %v4445_v58 = vadd.f32 %v4437_v29, %v4399_v33  ;;  %v4484_v7 = vsel %vm11789_vm6, %v12606_v57, %v12605_v48  ;;  %v5189_v31 = vmul.f32 %v9697_v63, %v9821_v61  ;;  %v5188_v22 = vmul.f32 %v9682_v5, %v9821_v61  ;;  %v12618_v29 = vld [vmem:[#allocation732_spill] sm:$0xff]  ;;  %v12621_v25 = vld [vmem:[#allocation751_spill] sm:$0xff]  ;;  %v12628_v48 = vld [vmem:[#allocation758_spill] sm:$0xff] }
 0x92b   :  { %v4446_v44 = vadd.f32 %v4438_v4, %v4400_v52  ;;  %v4531_v16 = vsel %vm11785_vm7, %v12608_v56, %v12607_v0  ;;  %v4532_v39 = vsel %vm11785_vm7, %v12610_v62, %v12609_v47  ;;  %v5190_v30 = vmul.f32 %v9694_v27, %v9821_v61  ;;  %v12620_v52 = vld [vmem:[#allocation748_spill] sm:$0xff]  ;;  %v12625_v59 = vld [vmem:[#allocation739_spill] sm:$0xff] }
 0x92c   :  { %5171 = vrot.lane.b32.xlu1 %v5148_v17, %s12397_s9  ;;  %5169 = vrot.lane.b32.xlu0 %v5147_v60, %s12397_s9  ;;  %v4493_v9 = vadd.f32 %v4485_v43, %v4447_v51  ;;  %v4494_v17 = vadd.f32 %v4486_v6, %v4448_v12  ;;  %v12611_v60 = vld [vmem:[#allocation723_spill] sm:$0xff]  ;;  %v4491_v11 = vadd.f32 %v4483_v36, %v4445_v58  ;;  %s9902_s9 = sld [smem:[#allocation8 + $0x198]]  ;;  %v12623_v12 = vld [vmem:[#allocation729_spill] sm:$0xff]  ;;  %v12624_v51 = vld [vmem:[#allocation736_spill] sm:$0xff] }
 0x92d   :  { %5203 = vrot.lane.b32.xlu2 %v5187_v53, %s12407_s11  ;;  %v4530_v40 = vsel %vm11785_vm7, %v12612_v20, %v12611_v60  ;;  %v12614_v53 = vld [vmem:[#allocation720_spill] sm:$0xff]  ;;  %v4492_v34 = vadd.f32 %v4484_v7, %v4446_v44  ;;  %v4578_v3 = vsel %vm11784_vm8, %v12616_v37, %v12615_v46  ;;  %v4577_v33 = vsel %vm11784_vm8, %v12618_v29, %v12617_v28  ;;  %v12627_v36 = vld [vmem:[#allocation757_spill] sm:$0xff]  ;;  %v12631_v44 = vld [vmem:[#allocation802_spill] sm:$0xff] }
 0x92e   :  { %v9852_v49 = vpop.permute.xlu1 %4937  ;;  %v9854_v54 = vpop.permute.xlu0 %4935  ;;  %v4529_v42 = vsel %vm11785_vm7, %v12614_v53, %v12613_v23  ;;  %v4539_v15 = vadd.f32 %v4531_v16, %v4493_v9  ;;  %v4540_v32 = vadd.f32 %v4532_v39, %v4494_v17  ;;  %v4623_v58 = vsel %vm542_vm9, %v12620_v52, %v12619_v21  ;;  %v12626_v43 = vld [vmem:[#allocation740_spill] sm:$0xff]  ;;  %v12629_v7 = vld [vmem:[#allocation761_spill] sm:$0xff]  ;;  %v12632_v56 = vld [vmem:[#allocation799_spill] sm:$0xff] }
 0x92f   :  { %v9862_v50 = vpop.permute.xlu2 %4987  ;;  %v4538_v45 = vadd.f32 %v4530_v40, %v4492_v34  ;;  %v4537_v18 = vadd.f32 %v4529_v42, %v4491_v11  ;;  %v4624_v4 = vsel %vm542_vm9, %v12622_v14, %v12621_v25  ;;  %v4575_v13 = vsel %vm11784_vm8, %v12624_v51, %v12623_v12  ;;  %v12633_v9 = vld [vmem:[#allocation793_spill] sm:$0xff]  ;;  %v12635_v20 = vld [vmem:[#allocation746_spill] sm:$0xff]  ;;  %v12636_v23 = vld [vmem:[#allocation759_spill] sm:$0xff] }
 0x930   :  { %v4576_v35 = vsel %vm11784_vm8, %v12626_v43, %v12625_v59  ;;  %v4586_v8 = vadd.f32 %v4578_v3, %v4540_v32  ;;  %v4585_v6 = vadd.f32 %v4577_v33, %v4539_v15  ;;  %v4669_v57 = vsel %vm589_vm10, %v12628_v48, %v12627_v36  ;;  %v12634_v60 = vld [vmem:[#allocation745_spill] sm:$0xff]  ;;  %v12637_v53 = vld [vmem:[#allocation766_spill] sm:$0xff]  ;;  %v12638_v11 = vld [vmem:[#allocation767_spill] sm:$0xff] }
 0x931   :  { %v5191_v17 = vmul.f32 %v12633_v9, %v9821_v61  ;;  %v4621_v40 = vsel %vm542_vm9, %v12635_v20, %v12634_v60  ;;  %v4716_v42 = vsel %vm636_vm11, %v12637_v53, %v12636_v23  ;;  %v12639_v34 = vld [vmem:[#allocation756_spill] sm:$0xff]  ;;  %v5193_v37 = vmul.f32 %v9712_v26, %v9821_v61  ;;  %v12640_v15 = vld [vmem:[#allocation755_spill] sm:$0xff]  ;;  %v12642_v52 = vld [vmem:[#allocation765_spill] sm:$0xff] }
 0x932   :  { %v4631_v62 = vadd.f32 %v4623_v58, %v4585_v6  ;;  %v4632_v39 = vadd.f32 %v4624_v4, %v4586_v8  ;;  %v4715_v46 = vsel %vm636_vm11, %v12639_v34, %v12638_v11  ;;  %vm11802_vm8 = vcmask 924672   ;;  %v12641_v32 = vld [vmem:[#allocation744_spill] sm:$0xff]  ;;  %v12644_v14 = vld [vmem:[#allocation775_spill] sm:$0xff]  ;;  %v12649_v8 = vld [vmem:[#allocation782_spill] sm:$0xff] }
 0x933   :  { %v4583_v3 = vadd.f32 %v4575_v13, %v4537_v18  ;;  %v4584_v33 = vadd.f32 %v4576_v35, %v4538_v45  ;;  %v4667_v21 = vsel %vm589_vm10, %v12641_v32, %v12640_v15  ;;  %v12643_v58 = vld [vmem:[#allocation772_spill] sm:$0xff]  ;;  %vm11792_vm7 = vcmask 916480   ;;  %v12646_v45 = vld [vmem:[#allocation749_spill] sm:$0xff]  ;;  %v12647_v13 = vld [vmem:[#allocation738_spill] sm:$0xff] }
 0x934   :  { %5207 = vrot.lane.b32.xlu1 %v5189_v31, %s12407_s11  ;;  %5205 = vrot.lane.b32.xlu0 %v5188_v22, %s12407_s11  ;;  %v12630_v31 = vld [vmem:[#allocation750_spill] sm:$0xff]  ;;  %v4677_v28 = vadd.f32 %v4669_v57, %v4631_v62  ;;  %v4761_v25 = vsel %vm683_vm12, %v12643_v58, %v12642_v52  ;;  %v12645_v4 = vld [vmem:[#allocation776_spill] sm:$0xff]  ;;  %v4622_v43 = vsel %vm542_vm9, %v12647_v13, %v12646_v45  ;;  %v12648_v35 = vld [vmem:[#allocation781_spill] sm:$0xff]  ;;  %v9963_v48 = vstv %s9902_s9  ;;  %s11720_s9 = sld [smem:[#allocation9 + $0x8]] }
 0x935   :  { %5209 = vrot.lane.b32.xlu2 %v5190_v30, %s12407_s11  ;;  %v4670_v22 = vsel %vm589_vm10, %v12630_v31, %v12629_v7  ;;  %v5192_v30 = vmul.f32 %v9715_v2, %v9821_v61  ;;  %v4762_v12 = vsel %vm683_vm12, %v12645_v4, %v12644_v14  ;;  %v4629_v51 = vadd.f32 %v4621_v40, %v4583_v3  ;;  %v12652_v7 = vld [vmem:[#allocation753_spill] sm:$0xff]  ;;  %v12653_v31 = vld [vmem:[#allocation760_spill] sm:$0xff]  ;;  %v12656_v20 = vld [vmem:[#allocation783_spill] sm:$0xff] }
 0x936   :  { %v4974_v19 = vpop.permute.xlu1 %4973  ;;  %v4942_v24 = vpop.permute.xlu0 %4941  ;;  %v4678_v29 = vadd.f32 %v4670_v22, %v4632_v39  ;;  %v4723_v18 = vadd.f32 %v4715_v46, %v4677_v28  ;;  %v4807_v6 = vsel %vm730_vm13, %v12649_v8, %v12648_v35  ;;  %v4713_v22 = vsel %vm636_vm11, %v12653_v31, %v12652_v7  ;;  %v12657_v40 = vld [vmem:[#allocation790_spill] sm:$0xff]  ;;  %v12658_v53 = vld [vmem:[#allocation791_spill] sm:$0xff]  ;;  %v12660_v32 = vld [vmem:[#allocation789_spill] sm:$0xff] }
 0x937   :  { %v9919_v0 = vsel %vm11786_vm15, %v4974_v19, %v12631_v44  ;;  %v9923_v16 = vsel %vm11801_vm14, %v12632_v56, %v4942_v24  ;;  %v9925_v47 = vpop.permute.xlu2 %5023  ;;  %v12650_v19 = vld [vmem:[#allocation785_spill] sm:$0xff]  ;;  %v12651_v24 = vld [vmem:[#allocation774_spill] sm:$0xff]  ;;  %v4675_v57 = vadd.f32 %v4667_v21, %v4629_v51  ;;  %v4854_v23 = vsel %vm11802_vm8, %v12657_v40, %v12656_v20  ;;  %v12662_v58 = vld [vmem:[#allocation800_spill] sm:$0xff] }
 0x938   :  { %v4724_v59 = vadd.f32 %v4716_v42, %v4678_v29  ;;  %v4808_v36 = vsel %vm730_vm13, %v12651_v24, %v12650_v19  ;;  %v4769_v44 = vadd.f32 %v4761_v25, %v4723_v18  ;;  %v12659_v42 = vld [vmem:[#allocation780_spill] sm:$0xff]  ;;  %v5233_v28 = vmul.f32 %v9678_v38, %v9963_v48  ;;  %v12661_v21 = vld [vmem:[#allocation797_spill] sm:$0xff]  ;;  %v12667_v35 = vld [vmem:[#allocation754_spill] sm:$0xff] }
 0x939   :  { %v4853_v11 = vsel %vm11802_vm8, %v12659_v42, %v12658_v53  ;;  %v5194_v29 = vmul.f32 %v9718_v10, %v9821_v61  ;;  %v4721_v15 = vadd.f32 %v4713_v22, %v4675_v57  ;;  %v4899_v52 = vsel %vm11792_vm7, %v12661_v21, %v12660_v32  ;;  %v12663_v25 = vld [vmem:[#allocation801_spill] sm:$0xff]  ;;  %v12665_v51 = vld [vmem:[#allocation768_spill] sm:$0xff]  ;;  %v12666_v61 = vld [vmem:[#allocation747_spill] sm:$0xff] }
 0x93a   :  { %v4770_v56 = vadd.f32 %v4762_v12, %v4724_v59  ;;  %v4900_v14 = vsel %vm11792_vm7, %v12663_v25, %v12662_v58  ;;  %v5234_v4 = vmul.f32 %v9682_v5, %v9963_v48  ;;  %v12664_v12 = vld [vmem:[#allocation779_spill] sm:$0xff]  ;;  %v4630_v13 = vadd.f32 %v4622_v43, %v4584_v33  ;;  %v12668_v24 = vld [vmem:[#allocation777_spill] sm:$0xff]  ;;  %v12678_v58 = vld [vmem:[#allocation778_spill] sm:$0xff] }
 0x93b   :  { %v4805_v59 = vsel %vm730_vm13, %v12665_v51, %v12664_v12  ;;  %v4668_v8 = vsel %vm589_vm10, %v12667_v35, %v12666_v61  ;;  %v4945_v19 = vsel %vm11801_vm14, %v9854_v54, %v9852_v49  ;;  %v12670_v22 = vld [vmem:[#allocation763_spill] sm:$0xff]  ;;  %v12680_v51 = vld [vmem:[#allocation788_spill] sm:$0xff]  ;;  %v12681_v35 = vld [vmem:[#allocation798_spill] sm:$0xff] }
 0x93c   :  { %5213 = vrot.lane.b32.xlu1 %v5192_v30, %s12407_s11  ;;  %5211 = vrot.lane.b32.xlu0 %v5191_v17, %s12407_s11  ;;  %v12654_v30 = vld [vmem:[#allocation769_spill] sm:$0xff]  ;;  %v12655_v17 = vld [vmem:[#allocation770_spill] sm:$0xff]  ;;  %v4816_v3 = vadd.f32 %v4808_v36, %v4770_v56  ;;  %v12669_v36 = vld [vmem:[#allocation784_spill] sm:$0xff]  ;;  %v4676_v43 = vadd.f32 %v4668_v8, %v4630_v13 }
 0x93d   :  { %5215 = vrot.lane.b32.xlu2 %v5193_v37, %s12407_s11  ;;  %v4759_v60 = vsel %vm683_vm12, %v12655_v17, %v12654_v30  ;;  %v4815_v37 = vadd.f32 %v4807_v6, %v4769_v44  ;;  %v4851_v57 = vsel %vm11802_vm8, %v12669_v36, %v12668_v24  ;;  %v12671_v44 = vld [vmem:[#allocation764_spill] sm:$0xff]  ;;  %v12672_v17 = vld [vmem:[#allocation794_spill] sm:$0xff]  ;;  %v12679_v12 = vld [vmem:[#allocation787_spill] sm:$0xff] }
 0x93e   :  { %v4980_v62 = vpop.permute.xlu1 %4979  ;;  %v4978_v39 = vpop.permute.xlu0 %4977  ;;  %v4862_v18 = vadd.f32 %v4854_v23, %v4816_v3  ;;  %v4767_v6 = vadd.f32 %v4759_v60, %v4721_v15  ;;  %v4714_v56 = vsel %vm636_vm11, %v12671_v44, %v12670_v22  ;;  %v12673_v60 = vld [vmem:[#allocation795_spill] sm:$0xff]  ;;  %v12674_v3 = vld [vmem:[#allocation773_spill] sm:$0xff]  ;;  %v12682_v8 = vld [vmem:[#allocation786_spill] sm:$0xff]  ;;  %v5240_v44 = vmul.f32 %v9718_v10, %v9963_v48 }
 0x93f   :  { %v9979_v34 = vsel %vm11786_vm15, %v4978_v39, %v4980_v62  ;;  %v9981_v46 = vpop.permute.xlu2 %5029  ;;  %v4861_v45 = vadd.f32 %v4853_v11, %v4815_v37  ;;  %v4897_v20 = vsel %vm11792_vm7, %v12673_v60, %v12672_v17  ;;  %v5235_v37 = vmul.f32 %v9697_v63, %v9963_v48  ;;  %v12686_v17 = vld [vmem:[#allocation26_spill] sm:$0xff]  ;;  %v12687_v60 = vld [vmem:[#allocation23_spill] sm:$0xff] }
 0x940   :  { %v4908_v31 = vadd.f32 %v4900_v14, %v4862_v18  ;;  %v4813_v33 = vadd.f32 %v4805_v59, %v4767_v6  ;;  %v4722_v32 = vadd.f32 %v4714_v56, %v4676_v43  ;;  %v4852_v59 = vsel %vm11802_vm8, %v12680_v51, %v12679_v12  ;;  %v12683_v43 = vld [vmem:[#allocation796_spill] sm:$0xff]  ;;  %v12684_v56 = vld [vmem:[#allocation25_spill] sm:$0xff] }
 0x941   :  { %v4907_v7 = vadd.f32 %v4899_v52, %v4861_v45  ;;  %v12677_v52 = vld [vmem:[#allocation771_spill] sm:$0xff]  ;;  %v4898_v6 = vsel %vm11792_vm7, %v12682_v8, %v12681_v35  ;;  %v4944_v22 = vsel %vm11801_vm14, %v9798_v55, %v12683_v43  ;;  %v12688_v55 = vld [vmem:[#allocation20_spill] sm:$0xff]  ;;  %v12701_v43 = vld [vmem:[#allocation37_spill] sm:$0xff] }
 0x942   :  { %v4954_v54 = vadd.f32 %v9923_v16, %v4908_v31  ;;  %v4859_v30 = vadd.f32 %v4851_v57, %v4813_v33  ;;  %v5236_v16 = vmul.f32 %v9694_v27, %v9963_v48  ;;  %v4806_v25 = vsel %vm730_vm13, %v12678_v58, %v12677_v52  ;;  %v12692_v52 = vld [vmem:[#allocation24_spill] sm:$0xff]  ;;  %v12693_v58 = vld [vmem:[#allocation31_spill] sm:$0xff] }
 0x943   :  { %v4953_v49 = vadd.f32 %v4945_v19, %v4907_v7  ;;  %v5239_v7 = vmul.f32 %v9712_v26, %v9963_v48  ;;  %v5238_v31 = vmul.f32 %v9715_v2, %v9963_v48  ;;  %v12694_v51 = vld [vmem:[#allocation32_spill] sm:$0xff] }
 0x944   :  { %5249 = vrot.lane.b32.xlu1 %v5233_v28, %s12417_s29  ;;  %5217 = vrot.lane.b32.xlu0 %v5194_v29, %s12407_s11  ;;  %v12675_v28 = vld [vmem:[#allocation762_spill] sm:$0xff]  ;;  %v4905_v21 = vadd.f32 %v4897_v20, %v4859_v30  ;;  %s10045_s11 = sld [smem:[#allocation8 + $0x199]]  ;;  %v120_v20 = vsel %vm11795_vm0, %v12687_v60, %v12686_v17 }
 0x945   :  { %5251 = vrot.lane.b32.xlu2 %v5234_v4, %s12417_s29  ;;  %v4760_v29 = vsel %vm683_vm12, %v12675_v28, %v12674_v3  ;;  %v6016_v28 = vld [vmem:[#allocation4 + $0x30] sm:$0xff] }
 0x946   :  { %v4986_v62 = vpop.permute.xlu1 %4985  ;;  %v4984_v39 = vpop.permute.xlu0 %4983  ;;  %v4768_v14 = vadd.f32 %v4760_v29, %v4722_v32  ;;  %v12691_v32 = vld [vmem:[#allocation29_spill] sm:$0xff] }
 0x947   :  { %v4992_v40 = vsel %vm11786_vm15, %v4986_v62, %v9862_v50  ;;  %v4991_v23 = vsel %vm11786_vm15, %v9811_v1, %v4984_v39  ;;  %v10021_v53 = vpop.permute.xlu2 %5065  ;;  %v12676_v50 = vld [vmem:[#allocation792_spill] sm:$0xff]  ;;  %v5237_v1 = vmul.f32 %v12633_v9, %v9963_v48  ;;  %vm11798_vm15 = vcmask 891904   ;;  %v6014_v62 = vld [vmem:[#allocation4] sm:$0xff] }
 0x948   :  { %v10023_v42 = vadd.f32 %v4992_v40, %v4954_v54  ;;  %v4999_v11 = vadd.f32 %v4991_v23, %v4953_v49  ;;  %v4943_v15 = vsel %vm11801_vm14, %v12676_v50, %v9800_v41  ;;  %v72_v41 = vstv %s71_s10  ;;  %v12685_v49 = vld [vmem:[#allocation22_spill] sm:$0xff]  ;;  %v6015_v40 = vld [vmem:[#allocation4 + $0x20] sm:$0xff] }
 0x949   :  { %v4951_v4 = vadd.f32 %v4943_v15, %v4905_v21  ;;  %v4814_v18 = vadd.f32 %v4806_v25, %v4768_v14  ;;  %v121_v54 = vsel %vm11795_vm0, %v12685_v49, %v12684_v56  ;;  %v73_v39 = vmul.f32 %v6014_v62, %v72_v41  ;;  %v12689_v48 = vld [vmem:[#allocation19_spill] sm:$0xff]  ;;  %v12702_v56 = vld [vmem:[#allocation40_spill] sm:$0xff]  ;;  %v12703_v49 = vld [vmem:[#allocation41_spill] sm:$0xff] }
 0x94a   :  { %v75_v23 = vmul.f32 %v6015_v40, %v72_v41  ;;  %v76_v29 = vmul.f32 %v6016_v28, %v72_v41  ;;  %v10078_v50 = vstv %s10045_s11  ;;  %v168_v25 = vsel %vm11796_vm1, %v12693_v58, %v12692_v52  ;;  %v12704_v62 = vld [vmem:[#allocation36_spill] sm:$0xff]  ;;  %v12707_v40 = vld [vmem:[#allocation33_spill] sm:$0xff]  ;;  %v12712_v58 = vld [vmem:[#allocation42_spill] sm:$0xff] }
 0x94b   :  { %v4997_v45 = vadd.f32 %v9919_v0, %v4951_v4  ;;  %v4860_v36 = vadd.f32 %v4852_v59, %v4814_v18  ;;  %v6013_v0 = vld [vmem:[#allocation4 + $0x10] sm:$0xff]  ;;  %v128_v15 = vadd.f32 %v120_v20, %v73_v39  ;;  %v12696_v18 = vld [vmem:[#allocation38_spill] sm:$0xff]  ;;  %v12705_v39 = vld [vmem:[#allocation43_spill] sm:$0xff] }
 0x94c   :  { %5255 = vrot.lane.b32.xlu1 %v5236_v16, %s12417_s29  ;;  %5253 = vrot.lane.b32.xlu0 %v5235_v37, %s12417_s29  ;;  %v74_v33 = vmul.f32 %v6013_v0, %v72_v41  ;;  %v122_v37 = vsel %vm11795_vm0, %v12689_v48, %v12688_v55  ;;  %v12695_v59 = vld [vmem:[#allocation21_spill] sm:$0xff]  ;;  %v12699_v0 = vld [vmem:[#allocation35_spill] sm:$0xff]  ;;  %v12706_v20 = vld [vmem:[#allocation44_spill] sm:$0xff] }
 0x94d   :  { %5257 = vrot.lane.b32.xlu2 %v5237_v1, %s12417_s29  ;;  %v4906_v30 = vadd.f32 %v4898_v6, %v4860_v36  ;;  %v12690_v1 = vld [vmem:[#allocation28_spill] sm:$0xff]  ;;  %v167_v41 = vsel %vm11796_vm1, %v12695_v59, %v12694_v51  ;;  %v5279_v36 = vmul.f32 %v9678_v38, %v10078_v50  ;;  %v12708_v55 = vld [vmem:[#allocation46_spill] sm:$0xff]  ;;  %v12709_v48 = vld [vmem:[#allocation47_spill] sm:$0xff] }
 0x94e   :  { %v5022_v13 = vpop.permute.xlu1 %5021  ;;  %v5020_v61 = vpop.permute.xlu0 %5019  ;;  %v129_v3 = vadd.f32 %v121_v54, %v74_v33  ;;  %v123_v21 = vsel %vm11795_vm0, %v12691_v32, %v12690_v1  ;;  %v12700_v33 = vld [vmem:[#allocation30_spill] sm:$0xff]  ;;  %v215_v54 = vsel %vm11791_vm2, %v12703_v49, %v12702_v56  ;;  %v261_v28 = vsel %vm11790_vm3, %v12709_v48, %v12708_v55  ;;  %v12723_v56 = vld [vmem:[#allocation59_spill] sm:$0xff] }
 0x94f   :  { %v5035_v19 = vsel %vm11798_vm15, %v5020_v61, %v5022_v13  ;;  %v10053_v24 = vpop.permute.xlu2 %5071  ;;  %v4952_v16 = vadd.f32 %v4944_v22, %v4906_v30  ;;  %v130_v22 = vadd.f32 %v122_v37, %v75_v23  ;;  %v217_v30 = vsel %vm11791_vm2, %v12705_v39, %v12704_v62  ;;  %v12725_v62 = vld [vmem:[#allocation61_spill] sm:$0xff]  ;;  %v12729_v55 = vld [vmem:[#allocation67_spill] sm:$0xff] }
 0x950   :  { %v10055_v57 = vadd.f32 %v5035_v19, %v4997_v45  ;;  %v12697_v45 = vld [vmem:[#allocation27_spill] sm:$0xff]  ;;  %v5280_v19 = vmul.f32 %v9682_v5, %v10078_v50  ;;  %v176_v17 = vadd.f32 %v168_v25, %v129_v3  ;;  %v12713_v25 = vld [vmem:[#allocation49_spill] sm:$0xff] }
 0x951   :  { %v4998_v14 = vadd.f32 %v9979_v34, %v4952_v16  ;;  %v170_v13 = vsel %vm11796_vm1, %v12697_v45, %v12696_v18  ;;  %v216_v16 = vsel %vm11791_vm2, %v12707_v40, %v12706_v20  ;;  %v12716_v45 = vld [vmem:[#allocation48_spill] sm:$0xff]  ;;  %v12727_v20 = vld [vmem:[#allocation65_spill] sm:$0xff] }
 0x952   :  { %v223_v3 = vadd.f32 %v215_v54, %v176_v17  ;;  %v12724_v54 = vld [vmem:[#allocation54_spill] sm:$0xff] }
 0x953   :  { %v355_v39 = vsel %vm11787_vm5, %v12725_v62, %v12724_v54  ;;  %v12743_v54 = vld [vmem:[#allocation72_spill] sm:$0xff] }
 0x954   :  { %5261 = vrot.lane.b32.xlu1 %v5239_v7, %s12417_s29  ;;  %5259 = vrot.lane.b32.xlu0 %v5238_v31, %s12417_s29  ;;  %v131_v7 = vadd.f32 %v123_v21, %v76_v29  ;;  %v12698_v31 = vld [vmem:[#allocation34_spill] sm:$0xff] }
 0x955   :  { %5263 = vrot.lane.b32.xlu2 %v5240_v44, %s12417_s29  ;;  %v175_v44 = vadd.f32 %v167_v41, %v128_v15  ;;  %v12710_v29 = vld [vmem:[#allocation50_spill] sm:$0xff]  ;;  %v12711_v15 = vld [vmem:[#allocation39_spill] sm:$0xff] }
 0x956   :  { %v5028_v4 = vpop.permute.xlu1 %5027  ;;  %v5026_v12 = vpop.permute.xlu0 %5025  ;;  %v178_v60 = vadd.f32 %v170_v13, %v131_v7  ;;  %v262_v1 = vsel %vm11790_vm3, %v12711_v15, %v12710_v29  ;;  %v12717_v13 = vld [vmem:[#allocation55_spill] sm:$0xff] }
 0x957   :  { %v5037_v61 = vsel %vm11798_vm15, %v5028_v4, %v9981_v46  ;;  %v5036_v35 = vsel %vm11798_vm15, %v9925_v47, %v5026_v12  ;;  %v10098_v8 = vpop.permute.xlu2 %5077  ;;  %v169_v46 = vsel %vm11796_vm1, %v12699_v0, %v12698_v31  ;;  %v214_v47 = vsel %vm11791_vm2, %v12701_v43, %v12700_v33  ;;  %v12714_v4 = vld [vmem:[#allocation52_spill] sm:$0xff]  ;;  %v12715_v12 = vld [vmem:[#allocation53_spill] sm:$0xff]  ;;  %v12720_v0 = vld [vmem:[#allocation62_spill] sm:$0xff] }
 0x958   :  { %v10100_v6 = vadd.f32 %v5037_v61, %v4999_v11  ;;  %v10102_v34 = vadd.f32 %v5036_v35, %v4998_v14  ;;  %v5281_v11 = vmul.f32 %v9697_v63, %v10078_v50  ;;  %v177_v23 = vadd.f32 %v169_v46, %v130_v22  ;;  %v12718_v35 = vld [vmem:[#allocation56_spill] sm:$0xff]  ;;  %v12721_v46 = vld [vmem:[#allocation51_spill] sm:$0xff] }
 0x959   :  { %v222_v37 = vadd.f32 %v214_v47, %v175_v44  ;;  %v225_v32 = vadd.f32 %v217_v30, %v178_v60  ;;  %v263_v14 = vsel %vm11790_vm3, %v12713_v25, %v12712_v58  ;;  %v264_v51 = vsel %vm11790_vm3, %v12715_v12, %v12714_v4  ;;  %v12722_v44 = vld [vmem:[#allocation58_spill] sm:$0xff]  ;;  %v12726_v60 = vld [vmem:[#allocation64_spill] sm:$0xff]  ;;  %v12733_v58 = vld [vmem:[#allocation71_spill] sm:$0xff] }
 0x95a   :  { %v224_v21 = vadd.f32 %v216_v16, %v177_v23  ;;  %v270_v18 = vadd.f32 %v262_v1, %v223_v3  ;;  %v309_v61 = vsel %vm11788_vm4, %v12717_v13, %v12716_v45  ;;  %v311_v33 = vsel %vm11788_vm4, %v12721_v46, %v12720_v0  ;;  %v12728_v16 = vld [vmem:[#allocation60_spill] sm:$0xff]  ;;  %v12735_v4 = vld [vmem:[#allocation73_spill] sm:$0xff] }
 0x95b   :  { %v269_v52 = vadd.f32 %v261_v28, %v222_v37  ;;  %v5283_v47 = vmul.f32 %v12633_v9, %v10078_v50  ;;  %v272_v22 = vadd.f32 %v264_v51, %v225_v32  ;;  %v310_v49 = vsel %vm11788_vm4, %v12723_v56, %v12722_v44  ;;  %v12730_v3 = vld [vmem:[#allocation68_spill] sm:$0xff]  ;;  %v12731_v32 = vld [vmem:[#allocation57_spill] sm:$0xff]  ;;  %v12736_v51 = vld [vmem:[#allocation74_spill] sm:$0xff] }
 0x95c   :  { %5297 = vrot.lane.b32.xlu1 %v5280_v19, %s12187_s27  ;;  %5295 = vrot.lane.b32.xlu0 %v5279_v36, %s12187_s27  ;;  %v12719_v19 = vld [vmem:[#allocation45_spill] sm:$0xff]  ;;  %v271_v30 = vadd.f32 %v263_v14, %v224_v21  ;;  %v356_v40 = vsel %vm11787_vm5, %v12727_v20, %v12726_v60  ;;  %v358_v48 = vsel %vm11787_vm5, %v12729_v55, %v12728_v16  ;;  %v12734_v14 = vld [vmem:[#allocation66_spill] sm:$0xff]  ;;  %v10213_v56 = vstv %s10159_s1 }
 0x95d   :  { %5299 = vrot.lane.b32.xlu2 %v5281_v11, %s12187_s27  ;;  %v308_v36 = vsel %vm11788_vm4, %v12719_v19, %v12718_v35  ;;  %v5282_v11 = vmul.f32 %v9694_v27, %v10078_v50  ;;  %v317_v28 = vadd.f32 %v309_v61, %v270_v18  ;;  %v319_v23 = vadd.f32 %v311_v33, %v272_v22  ;;  %v12738_v18 = vld [vmem:[#allocation76_spill] sm:$0xff]  ;;  %v12739_v45 = vld [vmem:[#allocation77_spill] sm:$0xff]  ;;  %v12751_v20 = vld [vmem:[#allocation86_spill] sm:$0xff] }
 0x95e   :  { %v5034_v59 = vpop.permute.xlu1 %5033  ;;  %v5032_v41 = vpop.permute.xlu0 %5031  ;;  %v316_v17 = vadd.f32 %v308_v36, %v269_v52  ;;  %v318_v37 = vadd.f32 %v310_v49, %v271_v30  ;;  %v357_v21 = vsel %vm11787_vm5, %v12731_v32, %v12730_v3  ;;  %v12732_v52 = vld [vmem:[#allocation70_spill] sm:$0xff]  ;;  %v404_v12 = vsel %vm11789_vm6, %v12735_v4, %v12734_v14  ;;  %v12740_v19 = vld [vmem:[#allocation80_spill] sm:$0xff]  ;;  %v12741_v36 = vld [vmem:[#allocation69_spill] sm:$0xff] }
 0x95f   :  { %v5038_v7 = vsel %vm11798_vm15, %v5032_v41, %v5034_v59  ;;  %v10147_v31 = vpop.permute.xlu2 %5113  ;;  %v364_v15 = vadd.f32 %v356_v40, %v317_v28  ;;  %v366_v1 = vadd.f32 %v358_v48, %v319_v23  ;;  %v402_v25 = vsel %vm11789_vm6, %v12733_v58, %v12732_v52  ;;  %v12737_v59 = vld [vmem:[#allocation63_spill] sm:$0xff]  ;;  %v12749_v60 = vld [vmem:[#allocation85_spill] sm:$0xff]  ;;  %v12754_v23 = vld [vmem:[#allocation88_spill] sm:$0xff] }
 0x960   :  { %v10153_v43 = vadd.f32 %v5038_v7, %v10023_v42  ;;  %v5284_v42 = vmul.f32 %v9715_v2, %v10078_v50  ;;  %v363_v29 = vadd.f32 %v355_v39, %v316_v17  ;;  %v403_v41 = vsel %vm11789_vm6, %v12737_v59, %v12736_v51  ;;  %v12746_v30 = vld [vmem:[#allocation83_spill] sm:$0xff]  ;;  %v12748_v17 = vld [vmem:[#allocation78_spill] sm:$0xff]  ;;  %v12757_v58 = vld [vmem:[#allocation84_spill] sm:$0xff] }
 0x961   :  { %v405_v13 = vsel %vm11789_vm6, %v12739_v45, %v12738_v18  ;;  %vm11797_vm5 = vcmask 883712   ;;  %vm12742_vm4 = vcmask 982016   ;;  %v5286_v33 = vmul.f32 %v9718_v10, %v10078_v50  ;;  %v12752_v40 = vld [vmem:[#allocation75_spill] sm:$0xff]  ;;  %v12760_v14 = vld [vmem:[#allocation92_spill] sm:$0xff]  ;;  %v12761_v4 = vld [vmem:[#allocation81_spill] sm:$0xff] }
 0x962   :  { %v449_v7 = vsel %vm12742_vm4, %v12741_v36, %v12740_v19  ;;  %v5285_v44 = vmul.f32 %v9712_v26, %v10078_v50  ;;  %v410_v49 = vadd.f32 %v402_v25, %v363_v29  ;;  %v5325_v39 = vmul.f32 %v9678_v38, %v10213_v56  ;;  %vm12747_vm6 = vmmov %vm12742_vm4  ;;  %v12758_v25 = vld [vmem:[#allocation91_spill] sm:$0xff]  ;;  %v12763_v51 = vld [vmem:[#allocation94_spill] sm:$0xff] }
 0x963   :  { %vm12750_vm3 = vcmask 973824   ;;  %vm12753_vm2 = vmmov %vm12742_vm4  ;;  %v413_v48 = vadd.f32 %v405_v13, %v366_v1  ;;  %v12764_v59 = vld [vmem:[#allocation95_spill] sm:$0xff]  ;;  %v12765_v13 = vld [vmem:[#allocation90_spill] sm:$0xff] }
 0x964   :  { %5303 = vrot.lane.b32.xlu1 %v5283_v47, %s12187_s27  ;;  %5301 = vrot.lane.b32.xlu0 %v5282_v11, %s12187_s27  ;;  %v496_v50 = vsel %vm12750_vm3, %v12749_v60, %v12748_v17  ;;  %v452_v16 = vsel %vm12753_vm2, %v12752_v40, %v12751_v20  ;;  %v457_v28 = vadd.f32 %v449_v7, %v410_v49  ;;  %vm12759_vm2 = vmmov %vm12750_vm3  ;;  %v12767_v19 = vld [vmem:[#allocation98_spill] sm:$0xff]  ;;  %v12768_v36 = vld [vmem:[#allocation87_spill] sm:$0xff] }
 0x965   :  { %5305 = vrot.lane.b32.xlu2 %v5284_v42, %s12187_s27  ;;  %v411_v42 = vadd.f32 %v403_v41, %v364_v15  ;;  %v499_v1 = vsel %vm12759_vm2, %v12758_v25, %v12757_v58  ;;  %v543_v41 = vsel %vm542_vm9, %v12764_v59, %v12763_v51  ;;  %v544_v7 = vsel %vm542_vm9, %v12768_v36, %v12767_v19  ;;  %v12771_v49 = vld [vmem:[#allocation104_spill] sm:$0xff]  ;;  %v12775_v40 = vld [vmem:[#allocation106_spill] sm:$0xff]  ;;  %v12788_v36 = vld [vmem:[#allocation119_spill] sm:$0xff] }
 0x966   :  { %v5070_v61 = vpop.permute.xlu1 %5069  ;;  %v5068_v35 = vpop.permute.xlu0 %5067  ;;  %v504_v32 = vadd.f32 %v496_v50, %v457_v28  ;;  %v5328_v17 = vmul.f32 %v9694_v27, %v10213_v56  ;;  %v12773_v60 = vld [vmem:[#allocation96_spill] sm:$0xff]  ;;  %v12774_v50 = vld [vmem:[#allocation103_spill] sm:$0xff]  ;;  %v12787_v19 = vld [vmem:[#allocation118_spill] sm:$0xff] }
 0x967   :  { %v5082_v0 = vsel %vm11797_vm5, %v5070_v61, %v10053_v24  ;;  %v5081_v46 = vsel %vm11797_vm5, %v10021_v53, %v5068_v35  ;;  %v10202_v47 = vpop.permute.xlu2 %5119  ;;  %v365_v24 = vadd.f32 %v357_v21, %v318_v37  ;;  %v12744_v53 = vld [vmem:[#allocation79_spill] sm:$0xff]  ;;  %v12755_v37 = vld [vmem:[#allocation89_spill] sm:$0xff]  ;;  %v460_v21 = vadd.f32 %v452_v16, %v413_v48  ;;  %v12783_v59 = vld [vmem:[#allocation108_spill] sm:$0xff] }
 0x968   :  { %v10205_v11 = vadd.f32 %v5082_v0, %v10102_v34  ;;  %v10208_v22 = vadd.f32 %v5081_v46, %v10055_v57  ;;  %v450_v62 = vsel %vm12742_vm4, %v12744_v53, %v12743_v54  ;;  %v12745_v34 = vld [vmem:[#allocation82_spill] sm:$0xff]  ;;  %vm12756_vm4 = vmmov %vm12750_vm3  ;;  %v12766_v61 = vld [vmem:[#allocation97_spill] sm:$0xff]  ;;  %v591_v20 = vsel %vm589_vm10, %v12774_v50, %v12773_v60 }
 0x969   :  { %v451_v57 = vsel %vm12747_vm6, %v12746_v30, %v12745_v34  ;;  %v412_v55 = vadd.f32 %v404_v12, %v365_v24  ;;  %v497_v29 = vsel %vm12756_vm4, %v12755_v37, %v12754_v23  ;;  %v458_v15 = vadd.f32 %v450_v62, %v411_v42  ;;  %vm12762_vm3 = vmmov %vm12759_vm2  ;;  %v12769_v0 = vld [vmem:[#allocation100_spill] sm:$0xff]  ;;  %v12770_v46 = vld [vmem:[#allocation101_spill] sm:$0xff] }
 0x96a   :  { %v498_v12 = vsel %vm12762_vm3, %v12761_v4, %v12760_v14  ;;  %v545_v35 = vsel %vm542_vm9, %v12766_v61, %v12765_v13  ;;  %v12772_v54 = vld [vmem:[#allocation93_spill] sm:$0xff]  ;;  %v5326_v42 = vmul.f32 %v9682_v5, %v10213_v56  ;;  %v507_v34 = vadd.f32 %v499_v1, %v460_v21  ;;  %v12776_v16 = vld [vmem:[#allocation107_spill] sm:$0xff]  ;;  %v12779_v23 = vld [vmem:[#allocation110_spill] sm:$0xff] }
 0x96b   :  { %v459_v3 = vadd.f32 %v451_v57, %v412_v55  ;;  %v505_v52 = vadd.f32 %v497_v29, %v458_v15  ;;  %v590_v53 = vsel %vm589_vm10, %v12772_v54, %v12771_v49  ;;  %v551_v57 = vadd.f32 %v543_v41, %v504_v32  ;;  %v12777_v55 = vld [vmem:[#allocation102_spill] sm:$0xff]  ;;  %v12778_v48 = vld [vmem:[#allocation109_spill] sm:$0xff]  ;;  %v12780_v37 = vld [vmem:[#allocation99_spill] sm:$0xff] }
 0x96c   :  { %5309 = vrot.lane.b32.xlu1 %v5286_v33, %s12187_s27  ;;  %5307 = vrot.lane.b32.xlu0 %v5285_v44, %s12187_s27  ;;  %v546_v33 = vsel %vm542_vm9, %v12770_v46, %v12769_v0  ;;  %v637_v28 = vsel %vm636_vm11, %v12778_v48, %v12777_v55  ;;  %v593_v29 = vsel %vm589_vm10, %v12780_v37, %v12779_v23  ;;  %s10282_s27 = sld [smem:[#allocation8 + $0x19b]]  ;;  %v12781_v4 = vld [vmem:[#allocation112_spill] sm:$0xff]  ;;  %vm11793_vm6 = vcmask 875520   ;;  %v12789_v0 = vld [vmem:[#allocation122_spill] sm:$0xff]  ;;  %v12790_v46 = vld [vmem:[#allocation111_spill] sm:$0xff] }
 0x96d   :  { %5341 = vrot.lane.b32.xlu2 %v5325_v39, %s12197_s0  ;;  %v5327_v39 = vmul.f32 %v9697_v63, %v10213_v56  ;;  %v506_v30 = vadd.f32 %v498_v12, %v459_v3  ;;  %v552_v3 = vadd.f32 %v544_v7, %v505_v52  ;;  %v554_v32 = vadd.f32 %v546_v33, %v507_v34  ;;  %v12782_v12 = vld [vmem:[#allocation113_spill] sm:$0xff]  ;;  %v12784_v52 = vld [vmem:[#allocation115_spill] sm:$0xff]  ;;  %v12799_v37 = vld [vmem:[#allocation130_spill] sm:$0xff] }
 0x96e   :  { %v5076_v18 = vpop.permute.xlu1 %5075  ;;  %v5074_v45 = vpop.permute.xlu0 %5073  ;;  %v598_v21 = vadd.f32 %v590_v53, %v551_v57  ;;  %v638_v51 = vsel %vm636_vm11, %v12782_v12, %v12781_v4  ;;  %v640_v41 = vsel %vm636_vm11, %v12784_v52, %v12783_v59  ;;  %v684_v7 = vsel %vm683_vm12, %v12788_v36, %v12787_v19  ;;  %v12791_v57 = vld [vmem:[#allocation114_spill] sm:$0xff]  ;;  %v12794_v60 = vld [vmem:[#allocation117_spill] sm:$0xff]  ;;  %v12798_v55 = vld [vmem:[#allocation127_spill] sm:$0xff] }
 0x96f   :  { %v5083_v44 = vsel %vm11797_vm5, %v5074_v45, %v5076_v18  ;;  %v10254_v24 = vpop.permute.xlu2 %5125  ;;  %v553_v15 = vadd.f32 %v545_v35, %v506_v30  ;;  %v599_v58 = vadd.f32 %v591_v20, %v552_v3  ;;  %v601_v14 = vadd.f32 %v593_v29, %v554_v32  ;;  %v12785_v18 = vld [vmem:[#allocation116_spill] sm:$0xff]  ;;  %v12786_v45 = vld [vmem:[#allocation105_spill] sm:$0xff]  ;;  %v12800_v29 = vld [vmem:[#allocation131_spill] sm:$0xff] }
 0x970   :  { %v10260_v62 = vadd.f32 %v5083_v44, %v10100_v6  ;;  %v592_v6 = vsel %vm589_vm10, %v12776_v16, %v12775_v40  ;;  %v645_v1 = vadd.f32 %v637_v28, %v598_v21  ;;  %v639_v13 = vsel %vm636_vm11, %v12786_v45, %v12785_v18  ;;  %v12795_v40 = vld [vmem:[#allocation124_spill] sm:$0xff]  ;;  %v12801_v3 = vld [vmem:[#allocation126_spill] sm:$0xff]  ;;  %v12802_v32 = vld [vmem:[#allocation133_spill] sm:$0xff] }
 0x971   :  { %v600_v25 = vadd.f32 %v592_v6, %v553_v15  ;;  %v685_v33 = vsel %vm683_vm12, %v12790_v46, %v12789_v0  ;;  %v5329_v34 = vmul.f32 %v12633_v9, %v10213_v56  ;;  %v646_v30 = vadd.f32 %v638_v51, %v599_v58  ;;  %v12797_v6 = vld [vmem:[#allocation120_spill] sm:$0xff]  ;;  %v12803_v51 = vld [vmem:[#allocation134_spill] sm:$0xff]  ;;  %v12804_v59 = vld [vmem:[#allocation123_spill] sm:$0xff] }
 0x972   :  { %v692_v20 = vadd.f32 %v684_v7, %v645_v1  ;;  %v732_v48 = vsel %vm730_vm13, %v12798_v55, %v12797_v6  ;;  %v648_v28 = vadd.f32 %v640_v41, %v601_v14  ;;  %v733_v15 = vsel %vm730_vm13, %v12800_v29, %v12799_v37  ;;  %v12805_v41 = vld [vmem:[#allocation136_spill] sm:$0xff]  ;;  %v12806_v18 = vld [vmem:[#allocation137_spill] sm:$0xff]  ;;  %v12808_v19 = vld [vmem:[#allocation139_spill] sm:$0xff] }
 0x973   :  { %v693_v23 = vadd.f32 %v685_v33, %v646_v30  ;;  %v10339_v4 = vstv %s10282_s27  ;;  %v734_v52 = vsel %vm730_vm13, %v12804_v59, %v12803_v51  ;;  %v779_v45 = vsel %vm11802_vm8, %v12806_v18, %v12805_v41  ;;  %v12809_v7 = vld [vmem:[#allocation140_spill] sm:$0xff]  ;;  %v12810_v0 = vld [vmem:[#allocation129_spill] sm:$0xff]  ;;  %v12811_v33 = vld [vmem:[#allocation142_spill] sm:$0xff] }
 0x974   :  { %5345 = vrot.lane.b32.xlu1 %v5327_v39, %s12197_s0  ;;  %5343 = vrot.lane.b32.xlu0 %v5326_v42, %s12197_s0  ;;  %v5330_v42 = vmul.f32 %v9715_v2, %v10213_v56  ;;  %v12796_v2 = vld [vmem:[#allocation125_spill] sm:$0xff]  ;;  %v780_v46 = vsel %vm11802_vm8, %v12810_v0, %v12809_v7  ;;  %v12813_v30 = vld [vmem:[#allocation146_spill] sm:$0xff]  ;;  %v12817_v6 = vld [vmem:[#allocation148_spill] sm:$0xff]  ;;  %vm12827_vm4 = vcmask 900096  }
 0x975   :  { %5347 = vrot.lane.b32.xlu2 %v5328_v17, %s12197_s0  ;;  %v687_v16 = vsel %vm683_vm12, %v12796_v2, %v12795_v40  ;;  %v740_v1 = vadd.f32 %v732_v48, %v693_v23  ;;  %v5372_v2 = vmul.f32 %v9682_v5, %v10339_v4  ;;  %v12818_v55 = vld [vmem:[#allocation149_spill] sm:$0xff]  ;;  %v12819_v48 = vld [vmem:[#allocation144_spill] sm:$0xff]  ;;  %v12828_v59 = vld [vmem:[#allocation158_spill] sm:$0xff] }
 0x976   :  { %v5112_v61 = vpop.permute.xlu1 %5111  ;;  %v5080_v35 = vpop.permute.xlu0 %5079  ;;  %v12821_v23 = vld [vmem:[#allocation152_spill] sm:$0xff]  ;;  %v12826_v51 = vld [vmem:[#allocation157_spill] sm:$0xff]  ;;  %vm12832_vm2 = vmmov %vm12827_vm4 }
 0x977   :  { %v5127_v44 = vsel %vm11793_vm6, %v5112_v61, %v10147_v31  ;;  %v5084_v49 = vsel %vm11797_vm5, %v10098_v8, %v5080_v35  ;;  %v10304_v54 = vpop.permute.xlu2 %5161  ;;  %v12792_v31 = vld [vmem:[#allocation121_spill] sm:$0xff]  ;;  %v12793_v8 = vld [vmem:[#allocation128_spill] sm:$0xff]  ;;  %vm12835_vm3 = vmmov %vm12832_vm2 }
 0x978   :  { %v10307_v53 = vadd.f32 %v5127_v44, %v10208_v22  ;;  %v10310_v39 = vadd.f32 %v5084_v49, %v10153_v43  ;;  %v686_v17 = vsel %vm683_vm12, %v12792_v31, %v12791_v57  ;;  %v731_v50 = vsel %vm730_vm13, %v12794_v60, %v12793_v8  ;;  %v12807_v35 = vld [vmem:[#allocation132_spill] sm:$0xff]  ;;  %v12812_v44 = vld [vmem:[#allocation143_spill] sm:$0xff] }
 0x979   :  { %v5331_v43 = vmul.f32 %v9712_v26, %v10213_v56  ;;  %v647_v22 = vadd.f32 %v639_v13, %v600_v25  ;;  %v778_v26 = vsel %vm11802_vm8, %v12802_v32, %v12801_v3  ;;  %v739_v58 = vadd.f32 %v731_v50, %v692_v20  ;;  %v12814_v57 = vld [vmem:[#allocation135_spill] sm:$0xff]  ;;  %v12816_v20 = vld [vmem:[#allocation145_spill] sm:$0xff]  ;;  %v12823_v3 = vld [vmem:[#allocation154_spill] sm:$0xff] }
 0x97a   :  { %v695_v25 = vadd.f32 %v687_v16, %v648_v28  ;;  %v781_v36 = vsel %vm11802_vm8, %v12808_v19, %v12807_v35  ;;  %v825_v49 = vsel %vm11792_vm7, %v12812_v44, %v12811_v33  ;;  %v826_v31 = vsel %vm11792_vm7, %v12814_v57, %v12813_v30  ;;  %v12820_v28 = vld [vmem:[#allocation151_spill] sm:$0xff]  ;;  %v12830_v18 = vld [vmem:[#allocation160_spill] sm:$0xff] }
 0x97b   :  { %v694_v21 = vadd.f32 %v686_v17, %v647_v22  ;;  %v786_v12 = vadd.f32 %v778_v26, %v739_v58  ;;  %v5371_v8 = vmul.f32 %v9678_v38, %v10339_v4  ;;  %v5332_v60 = vmul.f32 %v9718_v10, %v10213_v56  ;;  %v12815_v22 = vld [vmem:[#allocation138_spill] sm:$0xff]  ;;  %v12822_v10 = vld [vmem:[#allocation141_spill] sm:$0xff]  ;;  %v12824_v32 = vld [vmem:[#allocation155_spill] sm:$0xff] }
 0x97c   :  { %5351 = vrot.lane.b32.xlu1 %v5330_v42, %s12197_s0  ;;  %5349 = vrot.lane.b32.xlu0 %v5329_v34, %s12197_s0  ;;  %v742_v50 = vadd.f32 %v734_v52, %v695_v25  ;;  %v827_v40 = vsel %vm11792_vm7, %v12816_v20, %v12815_v22  ;;  %v873_v38 = vsel %vm11801_vm14, %v12820_v28, %v12819_v48  ;;  %v12829_v52 = vld [vmem:[#allocation147_spill] sm:$0xff]  ;;  %v12833_v19 = vld [vmem:[#allocation156_spill] sm:$0xff] }
 0x97d   :  { %5353 = vrot.lane.b32.xlu2 %v5331_v43, %s12197_s0  ;;  %v741_v14 = vadd.f32 %v733_v15, %v694_v21  ;;  %v787_v43 = vadd.f32 %v779_v45, %v740_v1  ;;  %v872_v56 = vsel %vm11801_vm14, %v12822_v10, %v12821_v23  ;;  %v833_v29 = vadd.f32 %v825_v49, %v786_v12  ;;  %v12831_v45 = vld [vmem:[#allocation161_spill] sm:$0xff]  ;;  %v12836_v0 = vld [vmem:[#allocation164_spill] sm:$0xff]  ;;  %v12842_v22 = vld [vmem:[#allocation159_spill] sm:$0xff] }
 0x97e   :  { %v5118_v13 = vpop.permute.xlu1 %5117  ;;  %v5116_v61 = vpop.permute.xlu0 %5115  ;;  %v789_v37 = vadd.f32 %v781_v36, %v742_v50  ;;  %v874_v5 = vsel %vm11801_vm14, %v12824_v32, %v12823_v3  ;;  %v875_v41 = vsel %vm11801_vm14, %v12829_v52, %v12828_v59  ;;  %v12834_v36 = vld [vmem:[#allocation163_spill] sm:$0xff]  ;;  %v12839_v50 = vld [vmem:[#allocation166_spill] sm:$0xff]  ;;  %v12847_v28 = vld [vmem:[#allocation168_spill] sm:$0xff] }
 0x97f   :  { %v5128_v42 = vsel %vm11793_vm6, %v5116_v61, %v5118_v13  ;;  %v10358_v34 = vpop.permute.xlu2 %5167  ;;  %v788_v16 = vadd.f32 %v780_v46, %v741_v14  ;;  %v834_v15 = vadd.f32 %v826_v31, %v787_v43  ;;  %v880_v25 = vadd.f32 %v872_v56, %v833_v29  ;;  %v12825_v14 = vld [vmem:[#allocation150_spill] sm:$0xff]  ;;  %v12837_v46 = vld [vmem:[#allocation153_spill] sm:$0xff]  ;;  %v12849_v10 = vld [vmem:[#allocation176_spill] sm:$0xff] }
 0x980   :  { %v10364_v17 = vadd.f32 %v5128_v42, %v10205_v11  ;;  %v828_v11 = vsel %vm11792_vm7, %v12818_v55, %v12817_v6  ;;  %v919_v12 = vsel %vm12827_vm4, %v12826_v51, %v12825_v14  ;;  %v920_v13 = vsel %vm12832_vm2, %v12831_v45, %v12830_v18  ;;  %vm12838_vm7 = vmmov %vm12832_vm2  ;;  %v12845_v6 = vld [vmem:[#allocation172_spill] sm:$0xff]  ;;  %v12850_v56 = vld [vmem:[#allocation165_spill] sm:$0xff] }
 0x981   :  { %v835_v26 = vadd.f32 %v827_v40, %v788_v16  ;;  %v836_v21 = vadd.f32 %v828_v11, %v789_v37  ;;  %v881_v58 = vadd.f32 %v873_v38, %v834_v15  ;;  %v922_v7 = vsel %vm12835_vm3, %v12834_v36, %v12833_v19  ;;  %v12844_v16 = vld [vmem:[#allocation169_spill] sm:$0xff]  ;;  %v12848_v38 = vld [vmem:[#allocation175_spill] sm:$0xff]  ;;  %v12853_v14 = vld [vmem:[#allocation174_spill] sm:$0xff] }
 0x982   :  { %v921_v33 = vsel %vm12838_vm7, %v12837_v46, %v12836_v0  ;;  %v5374_v31 = vmul.f32 %v9694_v27, %v10339_v4  ;;  %v1014_v23 = vsel %vm11797_vm5, %v12848_v38, %v12847_v28  ;;  %vm11794_vm7 = vcmask 867328   ;;  %v12854_v51 = vld [vmem:[#allocation181_spill] sm:$0xff]  ;;  %v12855_v59 = vld [vmem:[#allocation182_spill] sm:$0xff]  ;;  %v12856_v52 = vld [vmem:[#allocation171_spill] sm:$0xff] }
 0x983   :  { %v882_v1 = vadd.f32 %v874_v5, %v835_v26  ;;  %v928_v40 = vadd.f32 %v920_v13, %v881_v58  ;;  %v12851_v26 = vld [vmem:[#allocation178_spill] sm:$0xff]  ;;  %v12857_v18 = vld [vmem:[#allocation184_spill] sm:$0xff]  ;;  %v12858_v45 = vld [vmem:[#allocation185_spill] sm:$0xff]  ;;  %vm1153_vm4 = vcmask 859136   ;;  %vm1200_vm2 = vcmask 850944  }
 0x984   :  { %5387 = vrot.lane.b32.xlu1 %v5371_v8, %s12204_s19  ;;  %5355 = vrot.lane.b32.xlu0 %v5332_v60, %s12197_s0  ;;  %v5373_v8 = vmul.f32 %v9697_v63, %v10339_v4  ;;  %v883_v60 = vadd.f32 %v875_v41, %v836_v21  ;;  %v12846_v63 = vld [vmem:[#allocation173_spill] sm:$0xff]  ;;  %s10443_s0 = sld [smem:[#allocation8 + $0x19c]]  ;;  %v12852_v21 = vld [vmem:[#allocation179_spill] sm:$0xff]  ;;  %v1016_v41 = vsel %vm11797_vm5, %v12856_v52, %v12855_v59  ;;  %v12859_v19 = vld [vmem:[#allocation188_spill] sm:$0xff]  ;;  %vm11800_vm3 = vcmask 842752  }
 0x985   :  { %5389 = vrot.lane.b32.xlu2 %v5372_v2, %s12204_s19  ;;  %v12843_v2 = vld [vmem:[#allocation162_spill] sm:$0xff]  ;;  %v969_v55 = vsel %vm11798_vm15, %v12846_v63, %v12845_v6  ;;  %v929_v48 = vadd.f32 %v921_v33, %v882_v1  ;;  %v1015_v58 = vsel %vm11797_vm5, %v12852_v21, %v12851_v26  ;;  %v1061_v13 = vsel %vm11793_vm6, %v12858_v45, %v12857_v18  ;;  %v12860_v36 = vld [vmem:[#allocation177_spill] sm:$0xff] }
 0x986   :  { %v5124_v61 = vpop.permute.xlu1 %5123  ;;  %v5122_v35 = vpop.permute.xlu0 %5121  ;;  %v968_v27 = vsel %vm11798_vm15, %v12844_v16, %v12843_v2  ;;  %v930_v11 = vadd.f32 %v922_v7, %v883_v60  ;;  %v1062_v7 = vsel %vm11793_vm6, %v12860_v36, %v12859_v19  ;;  %v10467_v46 = vld [vmem:[#allocation4 + $0xf0] sm:$0xff]  ;;  %v12862_v60 = vld [vmem:[#allocation187_spill] sm:$0xff]  ;;  %v12867_v16 = vld [vmem:[#allocation194_spill] sm:$0xff] }
 0x987   :  { %v5130_v44 = vsel %vm11793_vm6, %v5124_v61, %v10254_v24  ;;  %v5129_v49 = vsel %vm11793_vm6, %v10202_v47, %v5122_v35  ;;  %v10409_v42 = vpop.permute.xlu2 %5203  ;;  %v12840_v24 = vld [vmem:[#allocation167_spill] sm:$0xff]  ;;  %v12841_v47 = vld [vmem:[#allocation170_spill] sm:$0xff]  ;;  %v976_v15 = vadd.f32 %v968_v27, %v929_v48  ;;  %v5377_v33 = vmul.f32 %v10467_v46, %v10339_v4  ;;  %v12870_v48 = vld [vmem:[#allocation197_spill] sm:$0xff] }
 0x988   :  { %v10412_v30 = vadd.f32 %v5130_v44, %v10310_v39  ;;  %v10415_v57 = vadd.f32 %v5129_v49, %v10260_v62  ;;  %v966_v43 = vsel %vm11798_vm15, %v12840_v24, %v12839_v50  ;;  %v967_v20 = vsel %vm11798_vm15, %v12842_v22, %v12841_v47  ;;  %v10471_v44 = vld [vmem:[#allocation4 + $0xe8] sm:$0xff]  ;;  %v12863_v24 = vld [vmem:[#allocation190_spill] sm:$0xff]  ;;  %v12868_v27 = vld [vmem:[#allocation183_spill] sm:$0xff] }
 0x989   :  { %v5375_v39 = vmul.f32 %v12633_v9, %v10339_v4  ;;  %v927_v62 = vadd.f32 %v919_v12, %v880_v25  ;;  %v1013_v9 = vsel %vm11797_vm5, %v12850_v56, %v12849_v10  ;;  %v975_v29 = vadd.f32 %v967_v20, %v928_v40  ;;  %v10481_v47 = vld [vmem:[#allocation4 + $0xf8] sm:$0xff]  ;;  %v12866_v40 = vld [vmem:[#allocation193_spill] sm:$0xff]  ;;  %v10530_v19 = vld [vmem:[#allocation4 + $0xc0] sm:$0xff] }
 0x98a   :  { %v977_v3 = vadd.f32 %v969_v55, %v930_v11  ;;  %v1060_v12 = vsel %vm11793_vm6, %v12854_v51, %v12853_v14  ;;  %v5376_v49 = vmul.f32 %v10471_v44, %v10339_v4  ;;  %v5378_v22 = vmul.f32 %v10481_v47, %v10339_v4  ;;  %v12869_v11 = vld [vmem:[#allocation196_spill] sm:$0xff]  ;;  %v12877_v14 = vld [vmem:[#allocation206_spill] sm:$0xff]  ;;  %v12878_v51 = vld [vmem:[#allocation195_spill] sm:$0xff] }
 0x98b   :  { %v974_v37 = vadd.f32 %v966_v43, %v927_v62  ;;  %v1022_v32 = vadd.f32 %v1014_v23, %v975_v29  ;;  %v12864_v43 = vld [vmem:[#allocation191_spill] sm:$0xff]  ;;  %v12865_v62 = vld [vmem:[#allocation186_spill] sm:$0xff]  ;;  %v1108_v6 = vsel %vm11794_vm7, %v12868_v27, %v12867_v16  ;;  %v1110_v28 = vsel %vm11794_vm7, %v12870_v48, %v12869_v11 }
 0x98c   :  { %5393 = vrot.lane.b32.xlu1 %v5374_v31, %s12204_s19  ;;  %5391 = vrot.lane.b32.xlu0 %v5373_v8, %s12204_s19  ;;  %v1023_v31 = vadd.f32 %v1015_v58, %v976_v15  ;;  %v12861_v8 = vld [vmem:[#allocation180_spill] sm:$0xff]  ;;  %v1109_v2 = vsel %vm11794_vm7, %v12866_v40, %v12865_v62  ;;  %v10499_v56 = vstv %s10443_s0  ;;  %v12872_v29 = vld [vmem:[#allocation199_spill] sm:$0xff]  ;;  %v12875_v58 = vld [vmem:[#allocation202_spill] sm:$0xff]  ;;  %vm12930_vm15 = vcmask 1014784  }
 0x98d   :  { %5395 = vrot.lane.b32.xlu2 %v5375_v39, %s12204_s19  ;;  %v1021_v5 = vadd.f32 %v1013_v9, %v974_v37  ;;  %v1063_v50 = vsel %vm11793_vm6, %v12862_v60, %v12861_v8  ;;  %v1024_v39 = vadd.f32 %v1016_v41, %v977_v3  ;;  %v1069_v63 = vadd.f32 %v1061_v13, %v1022_v32  ;;  %v12871_v37 = vld [vmem:[#allocation192_spill] sm:$0xff]  ;;  %v12874_v32 = vld [vmem:[#allocation189_spill] sm:$0xff]  ;;  %v12879_v36 = vld [vmem:[#allocation198_spill] sm:$0xff] }
 0x98e   :  { %v5160_v25 = vpop.permute.xlu1 %5159  ;;  %v5158_v1 = vpop.permute.xlu0 %5157  ;;  %v1070_v55 = vadd.f32 %v1062_v7, %v1023_v31  ;;  %v1155_v15 = vsel %vm1153_vm4, %v12872_v29, %v12871_v37  ;;  %v12873_v3 = vld [vmem:[#allocation200_spill] sm:$0xff]  ;;  %v12884_v31 = vld [vmem:[#allocation201_spill] sm:$0xff]  ;;  %v12887_v40 = vld [vmem:[#allocation214_spill] sm:$0xff]  ;;  %vm11799_vm6 = vcmask 834560  }
 0x98f   :  { %v5173_v61 = vsel %vm11794_vm7, %v5158_v1, %v5160_v25  ;;  %v10459_v35 = vpop.permute.xlu2 %5209  ;;  %v1068_v20 = vadd.f32 %v1060_v12, %v1021_v5  ;;  %v1071_v38 = vadd.f32 %v1063_v50, %v1024_v39  ;;  %v1116_v10 = vadd.f32 %v1108_v6, %v1069_v63  ;;  %v12876_v25 = vld [vmem:[#allocation203_spill] sm:$0xff]  ;;  %v10526_v13 = vld [vmem:[#allocation4 + $0xc8] sm:$0xff]  ;;  %v10543_v60 = vld [vmem:[#allocation4 + $0xd0] sm:$0xff] }
 0x990   :  { %v10465_v0 = vadd.f32 %v5173_v61, %v10307_v53  ;;  %v1107_v53 = vsel %vm11794_vm7, %v12864_v43, %v12863_v24  ;;  %v1117_v23 = vadd.f32 %v1109_v2, %v1070_v55  ;;  %v1154_v5 = vsel %vm1153_vm4, %v12874_v32, %v12873_v3  ;;  %v12888_v2 = vld [vmem:[#allocation215_spill] sm:$0xff]  ;;  %v12889_v27 = vld [vmem:[#allocation210_spill] sm:$0xff]  ;;  %v12890_v6 = vld [vmem:[#allocation217_spill] sm:$0xff] }
 0x991   :  { %v1115_v4 = vadd.f32 %v1107_v53, %v1068_v20  ;;  %v1118_v9 = vadd.f32 %v1110_v28, %v1071_v38  ;;  %v1156_v1 = vsel %vm1153_vm4, %v12876_v25, %v12875_v58  ;;  %v1157_v12 = vsel %vm1153_vm4, %v12878_v51, %v12877_v14  ;;  %v12886_v20 = vld [vmem:[#allocation211_spill] sm:$0xff]  ;;  %v12891_v55 = vld [vmem:[#allocation218_spill] sm:$0xff]  ;;  %v12894_v3 = vld [vmem:[#allocation221_spill] sm:$0xff] }
 0x992   :  { %v5418_v61 = vmul.f32 %v10526_v13, %v10499_v56  ;;  %v5419_v50 = vmul.f32 %v10543_v60, %v10499_v56  ;;  %v1163_v24 = vadd.f32 %v1155_v15, %v1116_v10  ;;  %v1164_v53 = vadd.f32 %v1156_v1, %v1117_v23  ;;  %v12892_v11 = vld [vmem:[#allocation207_spill] sm:$0xff]  ;;  %v12893_v15 = vld [vmem:[#allocation220_spill] sm:$0xff]  ;;  %v12898_v14 = vld [vmem:[#allocation213_spill] sm:$0xff] }
 0x993   :  { %v1162_v43 = vadd.f32 %v1154_v5, %v1115_v4  ;;  %v1165_v62 = vadd.f32 %v1157_v12, %v1118_v9  ;;  %v1248_v16 = vsel %vm11800_vm3, %v12888_v2, %v12887_v40  ;;  %v1250_v63 = vsel %vm11800_vm3, %v12890_v6, %v12889_v27  ;;  %v12896_v58 = vld [vmem:[#allocation223_spill] sm:$0xff]  ;;  %v12897_v1 = vld [vmem:[#allocation224_spill] sm:$0xff]  ;;  %v12899_v12 = vld [vmem:[#allocation226_spill] sm:$0xff] }
 0x994   :  { %5399 = vrot.lane.b32.xlu1 %v5377_v33, %s12204_s19  ;;  %5397 = vrot.lane.b32.xlu0 %v5376_v49, %s12204_s19  ;;  %v12881_v33 = vld [vmem:[#allocation208_spill] sm:$0xff]  ;;  %v1249_v48 = vsel %vm11800_vm3, %v12892_v11, %v12891_v55  ;;  %v1454_v10 = vstv %s10496_s13  ;;  %v1251_v32 = vsel %vm11800_vm3, %v12894_v3, %v12893_v15  ;;  %v1295_v51 = vsel %vm11799_vm6, %v12898_v14, %v12897_v1  ;;  %v12904_v40 = vld [vmem:[#allocation257_spill] sm:$0xff]  ;;  %v12906_v27 = vld [vmem:[#allocation259_spill] sm:$0xff]  ;;  %s5779_s13 = sshll.u32 %s11762_s5, 4  ;;  %s5780_s13 = int_to_ptr.hbm [resolvable:$true] %s5779_s13 }
 0x995   :  { %5401 = vrot.lane.b32.xlu2 %v5378_v22, %s12204_s19  ;;  %v12885_v22 = vld [vmem:[#allocation204_spill] sm:$0xff]  ;;  %s10589_s19 = sld [smem:[#allocation8 + $0x19d]]  ;;  %v12908_v55 = vld [vmem:[#allocation249_spill] sm:$0xff] }
 0x996   :  { %v5166_v26 = vpop.permute.xlu1 %5165  ;;  %v5164_v21 = vpop.permute.xlu0 %5163  ;;  %v1204_v39 = vsel %vm1200_vm2, %v12886_v20, %v12885_v22  ;;  %v12901_v22 = vld [vmem:[#allocation246_spill] sm:$0xff]  ;;  %v12902_v20 = vld [vmem:[#allocation253_spill] sm:$0xff]  ;;  %v12915_v1 = vld [vmem:[#allocation268_spill] sm:$0xff] }
 0x997   :  { %v5175_v59 = vsel %vm11794_vm7, %v5166_v26, %v10358_v34  ;;  %v5174_v52 = vsel %vm11794_vm7, %v10304_v54, %v5164_v21  ;;  %v10518_v41 = vpop.permute.xlu2 %5215  ;;  %v5417_v34 = vmul.f32 %v10530_v19, %v10499_v56  ;;  %v12880_v54 = vld [vmem:[#allocation205_spill] sm:$0xff]  ;;  %v1212_v23 = vadd.f32 %v1204_v39, %v1165_v62  ;;  %v12895_v21 = vld [vmem:[#allocation216_spill] sm:$0xff] }
 0x998   :  { %v10521_v18 = vadd.f32 %v5175_v59, %v10415_v57  ;;  %v10524_v45 = vadd.f32 %v5174_v52, %v10364_v17  ;;  %v1201_v7 = vsel %vm1200_vm2, %v12880_v54, %v12879_v36  ;;  %v12882_v57 = vld [vmem:[#allocation209_spill] sm:$0xff]  ;;  %v12883_v17 = vld [vmem:[#allocation212_spill] sm:$0xff]  ;;  %v1296_v25 = vsel %vm11799_vm6, %v12896_v58, %v12895_v21  ;;  %v12900_v59 = vld [vmem:[#allocation227_spill] sm:$0xff] }
 0x999   :  { %v1202_v49 = vsel %vm1200_vm2, %v12882_v57, %v12881_v33  ;;  %v1203_v8 = vsel %vm1200_vm2, %v12884_v31, %v12883_v17  ;;  %v1209_v28 = vadd.f32 %v1201_v7, %v1162_v43  ;;  %v1297_v52 = vsel %vm11799_vm6, %v12900_v59, %v12899_v12  ;;  %v6023_v36 = vld [vmem:[#allocation4 + $0x40] sm:$0xff]  ;;  %v6026_v31 = vld [vmem:[#allocation4 + $0x50] sm:$0xff]  ;;  %v12903_v62 = vld [vmem:[#allocation256_spill] sm:$0xff] }
 0x99a   :  { %v1210_v38 = vadd.f32 %v1202_v49, %v1163_v24  ;;  %v1211_v4 = vadd.f32 %v1203_v8, %v1164_v53  ;;  %v1455_v54 = vmul.f32 %v6023_v36, %v1454_v10  ;;  %v10581_v33 = vld [vmem:[#allocation4 + $0xe0] sm:$0xff]  ;;  %v10585_v49 = vld [vmem:[#allocation4 + $0xd8] sm:$0xff]  ;;  %v1456_v8 = vmul.f32 %v6026_v31, %v1454_v10  ;;  %v12916_v14 = vld [vmem:[#allocation269_spill] sm:$0xff] }
 0x99b   :  { %v1256_v9 = vadd.f32 %v1248_v16, %v1209_v28  ;;  %v5421_v57 = vmul.f32 %v10581_v33, %v10499_v56  ;;  %v5420_v17 = vmul.f32 %v10585_v49, %v10499_v56  ;;  %v6028_v43 = vld [vmem:[#allocation4 + $0x60] sm:$0xff]  ;;  %v1501_v39 = vsel %vm11795_vm0, %v12902_v20, %v12901_v22  ;;  %v12905_v16 = vld [vmem:[#allocation252_spill] sm:$0xff]  ;;  %v12913_v21 = vld [vmem:[#allocation266_spill] sm:$0xff] }
 0x99c   :  { %5435 = vrot.lane.b32.xlu1 %v5418_v61, %s6171_s15  ;;  %5433 = vrot.lane.b32.xlu0 %v5417_v34, %s6171_s15  ;;  %v1258_v37 = vadd.f32 %v1250_v63, %v1211_v4  ;;  %v1257_v29 = vadd.f32 %v1249_v48, %v1210_v38  ;;  %v1457_v53 = vmul.f32 %v6028_v43, %v1454_v10  ;;  %v12907_v63 = vld [vmem:[#allocation260_spill] sm:$0xff]  ;;  %v12914_v58 = vld [vmem:[#allocation255_spill] sm:$0xff]  ;;  %v10648_v43 = vstv %s10589_s19  ;;  %v12922_v22 = vld [vmem:[#allocation278_spill] sm:$0xff] }
 0x99d   :  { %5437 = vrot.lane.b32.xlu2 %v5419_v50, %s6171_s15  ;;  %v6027_v50 = vld [vmem:[#allocation4 + $0x70] sm:$0xff]  ;;  %v1502_v2 = vsel %vm11795_vm0, %v12904_v40, %v12903_v62  ;;  %v1504_v6 = vsel %vm11795_vm0, %v12906_v27, %v12905_v16  ;;  %v1503_v11 = vsel %vm11795_vm0, %v12908_v55, %v12907_v63  ;;  %v10605_v48 = vadd.f32 %v1251_v32, %v1212_v23  ;;  %v12909_v23 = vld [vmem:[#allocation262_spill] sm:$0xff]  ;;  %v12910_v32 = vld [vmem:[#allocation263_spill] sm:$0xff] }
 0x99e   :  { %v5172_v5 = vpop.permute.xlu1 %5171  ;;  %v5170_v26 = vpop.permute.xlu0 %5169  ;;  %v1458_v24 = vmul.f32 %v6027_v50, %v1454_v10  ;;  %v10607_v28 = vadd.f32 %v1296_v25, %v1257_v29  ;;  %v10609_v38 = vadd.f32 %v1295_v51, %v1256_v9  ;;  %v10611_v4 = vadd.f32 %v1297_v52, %v1258_v37  ;;  %v12911_v9 = vld [vmem:[#allocation258_spill] sm:$0xff]  ;;  %v12917_v52 = vld [vmem:[#allocation272_spill] sm:$0xff]  ;;  %v12923_v20 = vld [vmem:[#allocation267_spill] sm:$0xff] }
 0x99f   :  { %v5176_v61 = vsel %vm11794_vm7, %v5170_v26, %v5172_v5  ;;  %v10576_v34 = vpop.permute.xlu2 %5251  ;;  %vm1341_vm7 = vcmask 826368   ;;  %v1509_v10 = vadd.f32 %v1501_v39, %v1455_v54  ;;  %v1510_v15 = vadd.f32 %v1502_v2, %v1456_v8  ;;  %v12912_v26 = vld [vmem:[#allocation265_spill] sm:$0xff]  ;;  %v12925_v40 = vld [vmem:[#allocation274_spill] sm:$0xff]  ;;  %v12926_v2 = vld [vmem:[#allocation275_spill] sm:$0xff] }
 0x9a0   :  { %v10579_v7 = vadd.f32 %v5176_v61, %v10412_v30  ;;  %v5422_v30 = vmul.f32 %v10471_v44, %v10499_v56  ;;  %v1512_v3 = vadd.f32 %v1504_v6, %v1458_v24  ;;  %v1511_v5 = vadd.f32 %v1503_v11, %v1457_v53  ;;  %v12918_v61 = vld [vmem:[#allocation261_spill] sm:$0xff]  ;;  %v12920_v53 = vld [vmem:[#allocation264_spill] sm:$0xff]  ;;  %v12928_v16 = vld [vmem:[#allocation270_spill] sm:$0xff] }
 0x9a1   :  { %v1547_v29 = vsel %vm11796_vm1, %v12910_v32, %v12909_v23  ;;  %v1549_v37 = vsel %vm11796_vm1, %v12912_v26, %v12911_v9  ;;  %v1548_v25 = vsel %vm11796_vm1, %v12914_v58, %v12913_v21  ;;  %v1550_v51 = vsel %vm11796_vm1, %v12916_v14, %v12915_v1  ;;  %v12929_v27 = vld [vmem:[#allocation277_spill] sm:$0xff]  ;;  %v12931_v11 = vld [vmem:[#allocation280_spill] sm:$0xff] }
 0x9a2   :  { %vm12919_vm0 = vcmask 1022976   ;;  %v5423_v24 = vmul.f32 %v10467_v46, %v10499_v56  ;;  %v1556_v62 = vadd.f32 %v1548_v25, %v1510_v15  ;;  %v1639_v6 = vsel %vm12930_vm15, %v12929_v27, %v12928_v16  ;;  %v12934_v32 = vld [vmem:[#allocation276_spill] sm:$0xff]  ;;  %v12937_v15 = vld [vmem:[#allocation222_spill] sm:$0xff]  ;;  %v12942_v1 = vld [vmem:[#allocation233_spill] sm:$0xff] }
 0x9a3   :  { %v1593_v36 = vsel %vm12919_vm0, %v12918_v61, %v12917_v52  ;;  %vm12924_vm1 = vmmov %vm12919_vm0  ;;  %v1557_v63 = vadd.f32 %v1549_v37, %v1511_v5  ;;  %v12939_v5 = vld [vmem:[#allocation230_spill] sm:$0xff]  ;;  %v12940_v37 = vld [vmem:[#allocation219_spill] sm:$0xff] }
 0x9a4   :  { %5441 = vrot.lane.b32.xlu1 %v5421_v57, %s6171_s15  ;;  %5439 = vrot.lane.b32.xlu0 %v5420_v17, %s6171_s15  ;;  %v5424_v17 = vmul.f32 %v10481_v47, %v10499_v56  ;;  %v1596_v39 = vsel %vm12924_vm1, %v12923_v20, %v12922_v22  ;;  %vm12927_vm5 = vmmov %vm12919_vm0  ;;  %v1298_v58 = vsel %vm11799_vm6, %v12940_v37, %v12939_v5  ;;  %v12941_v25 = vld [vmem:[#allocation232_spill] sm:$0xff]  ;;  %v12952_v20 = vld [vmem:[#allocation290_spill] sm:$0xff] }
 0x9a5   :  { %5443 = vrot.lane.b32.xlu2 %v5422_v30, %s6171_s15  ;;  %v12921_v30 = vld [vmem:[#allocation271_spill] sm:$0xff]  ;;  %v1595_v56 = vsel %vm12927_vm5, %v12926_v2, %v12925_v40  ;;  %v1343_v14 = vsel %vm1341_vm7, %v12942_v1, %v12941_v25  ;;  %v12943_v61 = vld [vmem:[#allocation284_spill] sm:$0xff]  ;;  %v12959_v27 = vld [vmem:[#allocation285_spill] sm:$0xff] }
 0x9a6   :  { %v5208_v12 = vpop.permute.xlu1 %5207  ;;  %v5206_v59 = vpop.permute.xlu0 %5205  ;;  %v12958_v16 = vld [vmem:[#allocation296_spill] sm:$0xff]  ;;  %v12967_v5 = vld [vmem:[#allocation294_spill] sm:$0xff]  ;;  %v12968_v37 = vld [vmem:[#allocation301_spill] sm:$0xff] }
 0x9a7   :  { %v5220_v54 = vsel %vm1153_vm4, %v5208_v12, %v10459_v35  ;;  %v5219_v57 = vsel %vm1153_vm4, %v10409_v42, %v5206_v59  ;;  %v10637_v31 = vpop.permute.xlu2 %5257  ;;  %v1555_v35 = vadd.f32 %v1547_v29, %v1509_v10  ;;  %v1594_v42 = vsel %vm12919_vm0, %v12921_v30, %v12920_v53  ;;  %v12932_v10 = vld [vmem:[#allocation281_spill] sm:$0xff]  ;;  %vm12933_vm0 = vmmov %vm12930_vm15  ;;  %v12935_v29 = vld [vmem:[#allocation283_spill] sm:$0xff] }
 0x9a8   :  { %v10640_v8 = vadd.f32 %v5220_v54, %v10524_v45  ;;  %v10643_v50 = vadd.f32 %v5219_v57, %v10465_v0  ;;  %v5463_v45 = vmul.f32 %v10530_v19, %v10648_v43  ;;  %v1558_v0 = vadd.f32 %v1550_v51, %v1512_v3  ;;  %vm12936_vm1 = vmmov %vm12933_vm0  ;;  %v12938_v3 = vld [vmem:[#allocation229_spill] sm:$0xff]  ;;  %v12946_v57 = vld [vmem:[#allocation286_spill] sm:$0xff] }
 0x9a9   :  { %v1601_v55 = vadd.f32 %v1593_v36, %v1555_v35  ;;  %v1640_v23 = vsel %vm12933_vm0, %v12932_v10, %v12931_v11  ;;  %v1642_v19 = vsel %vm12936_vm1, %v12935_v29, %v12934_v32  ;;  %v1342_v9 = vsel %vm1341_vm7, %v12938_v3, %v12937_v15  ;;  %v12944_v36 = vld [vmem:[#allocation273_spill] sm:$0xff]  ;;  %vm12945_vm5 = vmmov %vm12933_vm0  ;;  %v12949_v30 = vld [vmem:[#allocation282_spill] sm:$0xff] }
 0x9aa   :  { %v1602_v26 = vadd.f32 %v1594_v42, %v1556_v62  ;;  %v1604_v21 = vadd.f32 %v1596_v39, %v1558_v0  ;;  %v1603_v51 = vadd.f32 %v1595_v56, %v1557_v63  ;;  %v1641_v54 = vsel %vm12945_vm5, %v12944_v36, %v12943_v61  ;;  %v12950_v42 = vld [vmem:[#allocation289_spill] sm:$0xff]  ;;  %v12953_v39 = vld [vmem:[#allocation279_spill] sm:$0xff]  ;;  %v12955_v62 = vld [vmem:[#allocation292_spill] sm:$0xff] }
 0x9ab   :  { %v1647_v12 = vadd.f32 %v1639_v6, %v1601_v55  ;;  %vm12948_vm15 = vcmask 1006592   ;;  %v12956_v0 = vld [vmem:[#allocation293_spill] sm:$0xff]  ;;  %vm12960_vm5 = vcmask 998400   ;;  %v5465_v55 = vmul.f32 %v10543_v60, %v10648_v43  ;;  %v12961_v32 = vld [vmem:[#allocation288_spill] sm:$0xff]  ;;  %v12962_v29 = vld [vmem:[#allocation295_spill] sm:$0xff] }
 0x9ac   :  { %5447 = vrot.lane.b32.xlu1 %v5424_v17, %s6171_s15  ;;  %5445 = vrot.lane.b32.xlu0 %v5423_v24, %s6171_s15  ;;  %v1648_v59 = vadd.f32 %v1640_v23, %v1602_v26  ;;  %v1650_v52 = vadd.f32 %v1642_v19, %v1604_v21  ;;  %v12947_v17 = vld [vmem:[#allocation287_spill] sm:$0xff]  ;;  %vm12951_vm0 = vmmov %vm12948_vm15  ;;  %v1731_v6 = vsel %vm12960_vm5, %v12959_v27, %v12958_v16  ;;  %v12964_v26 = vld [vmem:[#allocation298_spill] sm:$0xff] }
 0x9ad   :  { %5479 = vrot.lane.b32.xlu2 %v5463_v45, %s6172_s23  ;;  %v1685_v24 = vsel %vm12948_vm15, %v12947_v17, %v12946_v57  ;;  %v1687_v22 = vsel %vm12951_vm0, %v12950_v42, %v12949_v30  ;;  %vm12954_vm1 = vmmov %vm12951_vm0  ;;  %v5464_v11 = vmul.f32 %v10526_v13, %v10648_v43  ;;  %v1649_v10 = vadd.f32 %v1641_v54, %v1603_v51  ;;  %v12965_v21 = vld [vmem:[#allocation299_spill] sm:$0xff]  ;;  %v12970_v25 = vld [vmem:[#allocation302_spill] sm:$0xff] }
 0x9ae   :  { %v5214_v35 = vpop.permute.xlu1 %5213  ;;  %v5212_v53 = vpop.permute.xlu0 %5211  ;;  %v1686_v45 = vsel %vm12954_vm1, %v12953_v39, %v12952_v20  ;;  %vm12957_vm6 = vmmov %vm12951_vm0  ;;  %v1693_v23 = vadd.f32 %v1685_v24, %v1647_v12  ;;  %v5466_v15 = vmul.f32 %v10585_v49, %v10648_v43  ;;  %vm12969_vm0 = vcmask 990208   ;;  %v12971_v13 = vld [vmem:[#allocation291_spill] sm:$0xff]  ;;  %v12973_v36 = vld [vmem:[#allocation304_spill] sm:$0xff] }
 0x9af   :  { %v1688_v40 = vsel %vm12957_vm6, %v12956_v0, %v12955_v62  ;;  %v5221_v2 = vsel %vm1153_vm4, %v5212_v53, %v5214_v35  ;;  %v10698_v56 = vpop.permute.xlu2 %5263  ;;  %vm12963_vm6 = vmmov %vm12960_vm5  ;;  %v1694_v3 = vadd.f32 %v1686_v45, %v1648_v59  ;;  %v1777_v60 = vsel %vm12969_vm0, %v12968_v37, %v12967_v5  ;;  %v12974_v54 = vld [vmem:[#allocation305_spill] sm:$0xff]  ;;  %v12981_v20 = vld [vmem:[#allocation310_spill] sm:$0xff] }
 0x9b0   :  { %v10704_v63 = vadd.f32 %v5221_v2, %v10521_v18  ;;  %v1732_v19 = vsel %vm12963_vm6, %v12962_v29, %v12961_v32  ;;  %vm12966_vm15 = vmmov %vm12960_vm5  ;;  %v1695_v51 = vadd.f32 %v1687_v22, %v1649_v10  ;;  %v1696_v12 = vadd.f32 %v1688_v40, %v1650_v52  ;;  %v12980_v42 = vld [vmem:[#allocation297_spill] sm:$0xff]  ;;  %v12982_v39 = vld [vmem:[#allocation311_spill] sm:$0xff] }
 0x9b1   :  { %v1733_v18 = vsel %vm12966_vm15, %v12965_v21, %v12964_v26  ;;  %vm12972_vm1 = vmmov %vm12960_vm5  ;;  %v1739_v61 = vadd.f32 %v1731_v6, %v1693_v23  ;;  %v10728_v59 = vadd.f32 %v1342_v9, %v10609_v38  ;;  %v10731_v57 = vadd.f32 %v1298_v58, %v10605_v48  ;;  %v12976_v38 = vld [vmem:[#allocation300_spill] sm:$0xff]  ;;  %v12977_v9 = vld [vmem:[#allocation307_spill] sm:$0xff] }
 0x9b2   :  { %v1734_v1 = vsel %vm12972_vm1, %v12971_v13, %v12970_v25  ;;  %vm12975_vm5 = vmmov %vm12969_vm0  ;;  %vm1388_vm6 = vcmask 818176   ;;  %v1740_v17 = vadd.f32 %v1732_v19, %v1694_v3  ;;  %v10736_v24 = vadd.f32 %v1343_v14, %v10607_v28  ;;  %v12979_v58 = vld [vmem:[#allocation308_spill] sm:$0xff]  ;;  %v12984_v62 = vld [vmem:[#allocation306_spill] sm:$0xff] }
 0x9b3   :  { %v1778_v49 = vsel %vm12975_vm5, %v12974_v54, %v12973_v36  ;;  %v1741_v52 = vadd.f32 %v1733_v18, %v1695_v51  ;;  %v1785_v35 = vadd.f32 %v1777_v60, %v1739_v61  ;;  %v1742_v53 = vadd.f32 %v1734_v1, %v1696_v12  ;;  %vm12978_vm15 = vmmov %vm12969_vm0  ;;  %v12985_v0 = vld [vmem:[#allocation313_spill] sm:$0xff]  ;;  %v12987_v2 = vld [vmem:[#allocation314_spill] sm:$0xff] }
 0x9b4   :  { %5483 = vrot.lane.b32.xlu1 %v5465_v55, %s6172_s23  ;;  %5481 = vrot.lane.b32.xlu0 %v5464_v11, %s6172_s23  ;;  %v1786_v30 = vadd.f32 %v1778_v49, %v1740_v17  ;;  %v1780_v48 = vsel %vm12978_vm15, %v12977_v9, %v12976_v38  ;;  %v1779_v22 = vsel %vm12969_vm0, %v12980_v42, %v12979_v58  ;;  %vm12983_vm1 = vcmask 982016   ;;  %v12988_v16 = vld [vmem:[#allocation303_spill] sm:$0xff]  ;;  %v12994_v26 = vld [vmem:[#allocation309_spill] sm:$0xff]  ;;  %v12996_v5 = vld [vmem:[#allocation312_spill] sm:$0xff] }
 0x9b5   :  { %5485 = vrot.lane.b32.xlu2 %v5466_v15, %s6172_s23  ;;  %v1823_v45 = vsel %vm12983_vm1, %v12982_v39, %v12981_v20  ;;  %vm12986_vm5 = vmmov %vm12983_vm1  ;;  %v5468_v32 = vmul.f32 %v10471_v44, %v10648_v43  ;;  %v5467_v29 = vmul.f32 %v10581_v33, %v10648_v43  ;;  %v1787_v19 = vadd.f32 %v1779_v22, %v1741_v52  ;;  %v12990_v15 = vld [vmem:[#allocation316_spill] sm:$0xff]  ;;  %v12997_v37 = vld [vmem:[#allocation319_spill] sm:$0xff] }
 0x9b6   :  { %v5250_v28 = vpop.permute.xlu1 %5249  ;;  %v5218_v14 = vpop.permute.xlu0 %5217  ;;  %v1825_v40 = vsel %vm12986_vm5, %v12985_v0, %v12984_v62  ;;  %vm12989_vm3 = vmmov %vm12983_vm1  ;;  %vm12995_vm15 = vcmask 973824   ;;  %v1831_v18 = vadd.f32 %v1823_v45, %v1785_v35  ;;  %v12999_v60 = vld [vmem:[#allocation322_spill] sm:$0xff]  ;;  %v13000_v33 = vld [vmem:[#allocation323_spill] sm:$0xff] }
 0x9b7   :  { %v1824_v27 = vsel %vm12989_vm3, %v12988_v16, %v12987_v2  ;;  %v5265_v6 = vsel %vm1200_vm2, %v5250_v28, %v10576_v34  ;;  %v5222_v55 = vsel %vm1153_vm4, %v10518_v41, %v5218_v14  ;;  %v10758_v11 = vpop.permute.xlu2 %5299  ;;  %v12991_v34 = vld [vmem:[#allocation317_spill] sm:$0xff]  ;;  %vm12992_vm3 = vmmov %vm12983_vm1  ;;  %v12993_v41 = vld [vmem:[#allocation320_spill] sm:$0xff]  ;;  %v1833_v13 = vadd.f32 %v1825_v40, %v1787_v19 }
 0x9b8   :  { %v10761_v10 = vadd.f32 %v5265_v6, %v10643_v50  ;;  %v10764_v23 = vadd.f32 %v5222_v55, %v10579_v7  ;;  %v1826_v3 = vsel %vm12992_vm3, %v12991_v34, %v12990_v15  ;;  %v1869_v21 = vsel %vm12995_vm15, %v12994_v26, %v12993_v41  ;;  %vm12998_vm0 = vmmov %vm12995_vm15  ;;  %v13002_v51 = vld [vmem:[#allocation318_spill] sm:$0xff]  ;;  %v13003_v12 = vld [vmem:[#allocation325_spill] sm:$0xff] }
 0x9b9   :  { %v5469_v50 = vmul.f32 %v10467_v46, %v10648_v43  ;;  %v1788_v7 = vadd.f32 %v1780_v48, %v1742_v53  ;;  %v1870_v44 = vsel %vm12998_vm0, %v12997_v37, %v12996_v5  ;;  %vm13001_vm1 = vmmov %vm12998_vm0  ;;  %v1832_v1 = vadd.f32 %v1824_v27, %v1786_v30  ;;  %v13004_v36 = vld [vmem:[#allocation326_spill] sm:$0xff]  ;;  %v13005_v54 = vld [vmem:[#allocation315_spill] sm:$0xff] }
 0x9ba   :  { %v1871_v25 = vsel %vm13001_vm1, %v13000_v33, %v12999_v60  ;;  %v1915_v61 = vsel %vm542_vm9, %v13003_v12, %v13002_v51  ;;  %vm13006_vm5 = vmmov %vm12998_vm0  ;;  %v1877_v17 = vadd.f32 %v1869_v21, %v1831_v18  ;;  %v13007_v52 = vld [vmem:[#allocation328_spill] sm:$0xff]  ;;  %v13008_v35 = vld [vmem:[#allocation329_spill] sm:$0xff]  ;;  %vm1435_vm3 = vcmask 809984  }
 0x9bb   :  { %v1872_v46 = vsel %vm13006_vm5, %v13005_v54, %v13004_v36  ;;  %v1834_v49 = vadd.f32 %v1826_v3, %v1788_v7  ;;  %v1916_v53 = vsel %vm542_vm9, %v13008_v35, %v13007_v52  ;;  %v13009_v38 = vld [vmem:[#allocation236_spill] sm:$0xff]  ;;  %v13010_v30 = vld [vmem:[#allocation225_spill] sm:$0xff]  ;;  %v13011_v48 = vld [vmem:[#allocation238_spill] sm:$0xff]  ;;  %v1878_v22 = vadd.f32 %v1870_v44, %v1832_v1 }
 0x9bc   :  { %5489 = vrot.lane.b32.xlu1 %v5468_v32, %s6172_s23  ;;  %5487 = vrot.lane.b32.xlu0 %v5467_v29, %s6172_s23  ;;  %v1344_v9 = vsel %vm1341_vm7, %v13010_v30, %v13009_v38  ;;  %v13012_v58 = vld [vmem:[#allocation239_spill] sm:$0xff]  ;;  %v1879_v20 = vadd.f32 %v1871_v25, %v1833_v13  ;;  %v1923_v39 = vadd.f32 %v1915_v61, %v1877_v17  ;;  %v13013_v28 = vld [vmem:[#allocation332_spill] sm:$0xff]  ;;  %v13014_v14 = vld [vmem:[#allocation321_spill] sm:$0xff]  ;;  %vm13063_vm15 = vcmask 916480  }
 0x9bd   :  { %v1389_v42 = vsel %vm1388_vm6, %v13012_v58, %v13011_v48  ;;  %5491 = vrot.lane.b32.xlu2 %v5469_v50, %s6172_s23  ;;  %v1880_v45 = vadd.f32 %v1872_v46, %v1834_v49  ;;  %v1917_v62 = vsel %vm542_vm9, %v13014_v14, %v13013_v28  ;;  %v13015_v0 = vld [vmem:[#allocation334_spill] sm:$0xff]  ;;  %v13016_v40 = vld [vmem:[#allocation335_spill] sm:$0xff]  ;;  %v1924_v6 = vadd.f32 %v1916_v53, %v1878_v22  ;;  %v13017_v55 = vld [vmem:[#allocation324_spill] sm:$0xff] }
 0x9be   :  { %v1961_v2 = vsel %vm589_vm10, %v13016_v40, %v13015_v0  ;;  %v5256_v16 = vpop.permute.xlu1 %5255  ;;  %v5254_v27 = vpop.permute.xlu0 %5253  ;;  %v13018_v32 = vld [vmem:[#allocation331_spill] sm:$0xff]  ;;  %v13019_v19 = vld [vmem:[#allocation338_spill] sm:$0xff]  ;;  %v13022_v21 = vld [vmem:[#allocation337_spill] sm:$0xff]  ;;  %v5470_v44 = vmul.f32 %v10481_v47, %v10648_v43  ;;  %v1925_v60 = vadd.f32 %v1917_v62, %v1879_v20  ;;  %v1352_v28 = vadd.f32 %v1344_v9, %v10611_v4 }
 0x9bf   :  { %v1918_v29 = vsel %vm542_vm9, %v13018_v32, %v13017_v55  ;;  %v13020_v15 = vld [vmem:[#allocation327_spill] sm:$0xff]  ;;  %v5266_v3 = vsel %vm1200_vm2, %v5254_v27, %v5256_v16  ;;  %v10815_v41 = vpop.permute.xlu2 %5305  ;;  %v13021_v26 = vld [vmem:[#allocation330_spill] sm:$0xff]  ;;  %v13023_v7 = vld [vmem:[#allocation344_spill] sm:$0xff]  ;;  %v1969_v33 = vadd.f32 %v1961_v2, %v1923_v39  ;;  %v10854_v0 = vadd.f32 %v1389_v42, %v10728_v59 }
 0x9c0   :  { %v1962_v34 = vsel %vm589_vm10, %v13020_v15, %v13019_v19  ;;  %v1963_v50 = vsel %vm589_vm10, %v13022_v21, %v13021_v26  ;;  %v13024_v18 = vld [vmem:[#allocation333_spill] sm:$0xff]  ;;  %v10824_v37 = vadd.f32 %v5266_v3, %v10640_v8  ;;  %v13025_v25 = vld [vmem:[#allocation340_spill] sm:$0xff]  ;;  %v13028_v12 = vld [vmem:[#allocation343_spill] sm:$0xff]  ;;  %v1926_v36 = vadd.f32 %v1918_v29, %v1880_v45 }
 0x9c1   :  { %v2007_v5 = vsel %vm636_vm11, %v13024_v18, %v13023_v7  ;;  %v13026_v13 = vld [vmem:[#allocation341_spill] sm:$0xff]  ;;  %v13027_v51 = vld [vmem:[#allocation336_spill] sm:$0xff]  ;;  %v1970_v54 = vadd.f32 %v1962_v34, %v1924_v6  ;;  %v13029_v46 = vld [vmem:[#allocation346_spill] sm:$0xff]  ;;  %v1971_v43 = vadd.f32 %v1963_v50, %v1925_v60 }
 0x9c2   :  { %v1964_v1 = vsel %vm589_vm10, %v13026_v13, %v13025_v25  ;;  %v2008_v61 = vsel %vm636_vm11, %v13028_v12, %v13027_v51  ;;  %v13030_v49 = vld [vmem:[#allocation347_spill] sm:$0xff]  ;;  %v13031_v17 = vld [vmem:[#allocation342_spill] sm:$0xff]  ;;  %v13032_v52 = vld [vmem:[#allocation349_spill] sm:$0xff]  ;;  %v2015_v35 = vadd.f32 %v2007_v5, %v1969_v33 }
 0x9c3   :  { %v2009_v8 = vsel %vm636_vm11, %v13030_v49, %v13029_v46  ;;  %v2053_v47 = vsel %vm683_vm12, %v13032_v52, %v13031_v17  ;;  %v13033_v53 = vld [vmem:[#allocation350_spill] sm:$0xff]  ;;  %v13034_v38 = vld [vmem:[#allocation339_spill] sm:$0xff]  ;;  %v13035_v48 = vld [vmem:[#allocation352_spill] sm:$0xff]  ;;  %v1972_v14 = vadd.f32 %v1964_v1, %v1926_v36  ;;  %v2016_v62 = vadd.f32 %v2008_v61, %v1970_v54 }
 0x9c4   :  { %v2010_v30 = vsel %vm636_vm11, %v13034_v38, %v13033_v53  ;;  %v13036_v58 = vld [vmem:[#allocation353_spill] sm:$0xff]  ;;  %v13037_v20 = vld [vmem:[#allocation228_spill] sm:$0xff]  ;;  %v13038_v39 = vld [vmem:[#allocation235_spill] sm:$0xff]  ;;  %5493 = vrot.lane.b32.xlu0 %v5470_v44, %s6172_s23  ;;  %v2017_v27 = vadd.f32 %v2009_v8, %v1971_v43  ;;  %v2061_v6 = vadd.f32 %v2053_v47, %v2015_v35  ;;  %s11029_s23 = sld [smem:[#allocation8 + $0x100]] }
 0x9c5   :  { %v2054_v22 = vsel %vm683_vm12, %v13036_v58, %v13035_v48  ;;  %v10849_v45 = vsel %vm1341_vm7, %v13038_v39, %v13037_v20  ;;  %v13039_v40 = vld [vmem:[#allocation234_spill] sm:$0xff]  ;;  %v13040_v2 = vld [vmem:[#allocation241_spill] sm:$0xff]  ;;  %v2018_v55 = vadd.f32 %v2010_v30, %v1972_v14  ;;  %v13041_v29 = vld [vmem:[#allocation348_spill] sm:$0xff] }
 0x9c6   :  { %v1391_v16 = vsel %vm1388_vm6, %v13040_v2, %v13039_v40  ;;  %v2062_v32 = vadd.f32 %v2054_v22, %v2016_v62  ;;  %v13042_v19 = vld [vmem:[#allocation355_spill] sm:$0xff]  ;;  %v13043_v4 = vld [vmem:[#allocation356_spill] sm:$0xff]  ;;  %v13044_v9 = vld [vmem:[#allocation345_spill] sm:$0xff]  ;;  %v5262_v3 = vpop.permute.xlu1 %5261  ;;  %v5260_v26 = vpop.permute.xlu0 %5259 }
 0x9c7   :  { %v2056_v15 = vsel %vm683_vm12, %v13042_v19, %v13041_v29  ;;  %v2055_v34 = vsel %vm683_vm12, %v13044_v9, %v13043_v4  ;;  %v13045_v59 = vld [vmem:[#allocation358_spill] sm:$0xff]  ;;  %v13046_v42 = vld [vmem:[#allocation359_spill] sm:$0xff]  ;;  %v5268_v5 = vsel %vm1200_vm2, %v5262_v3, %v10698_v56  ;;  %v5267_v44 = vsel %vm1200_vm2, %v10637_v31, %v5260_v26  ;;  %v13050_v33 = vld [vmem:[#allocation361_spill] sm:$0xff]  ;;  %v10893_v52 = vpop.permute.xlu2 %5341 }
 0x9c8   :  { %v2099_v21 = vsel %vm730_vm13, %v13046_v42, %v13045_v59  ;;  %v13047_v50 = vld [vmem:[#allocation362_spill] sm:$0xff]  ;;  %v13048_v7 = vld [vmem:[#allocation351_spill] sm:$0xff]  ;;  %v13051_v13 = vld [vmem:[#allocation364_spill] sm:$0xff]  ;;  %v10882_v12 = vadd.f32 %v5268_v5, %v10764_v23  ;;  %v10885_v61 = vadd.f32 %v5267_v44, %v10704_v63  ;;  %v2064_v36 = vadd.f32 %v2056_v15, %v2018_v55 }
 0x9c9   :  { %v2100_v18 = vsel %vm730_vm13, %v13048_v7, %v13047_v50  ;;  %v13049_v60 = vld [vmem:[#allocation354_spill] sm:$0xff]  ;;  %v13052_v1 = vld [vmem:[#allocation365_spill] sm:$0xff]  ;;  %v2063_v56 = vadd.f32 %v2055_v34, %v2017_v27  ;;  %v13053_v54 = vld [vmem:[#allocation360_spill] sm:$0xff]  ;;  %v2107_v47 = vadd.f32 %v2099_v21, %v2061_v6  ;;  %v10913_v4 = vadd.f32 %v1391_v16, %v1352_v28 }
 0x9ca   :  { %v2101_v25 = vsel %vm730_vm13, %v13050_v33, %v13049_v60  ;;  %v2102_v51 = vsel %vm730_vm13, %v13052_v1, %v13051_v13  ;;  %v13054_v46 = vld [vmem:[#allocation367_spill] sm:$0xff]  ;;  %v13055_v49 = vld [vmem:[#allocation368_spill] sm:$0xff]  ;;  %v13056_v8 = vld [vmem:[#allocation357_spill] sm:$0xff]  ;;  %v2108_v43 = vadd.f32 %v2100_v18, %v2062_v32 }
 0x9cb   :  { %v2146_v31 = vsel %vm11802_vm8, %v13054_v46, %v13053_v54  ;;  %v2145_v17 = vsel %vm11802_vm8, %v13056_v8, %v13055_v49  ;;  %v13057_v23 = vld [vmem:[#allocation370_spill] sm:$0xff]  ;;  %v13058_v35 = vld [vmem:[#allocation371_spill] sm:$0xff]  ;;  %v2109_v48 = vadd.f32 %v2101_v25, %v2063_v56  ;;  %v2110_v58 = vadd.f32 %v2102_v51, %v2064_v36  ;;  %v13062_v20 = vld [vmem:[#allocation373_spill] sm:$0xff] }
 0x9cc   :  { %v2147_v63 = vsel %vm11802_vm8, %v13058_v35, %v13057_v23  ;;  %v13059_v53 = vld [vmem:[#allocation374_spill] sm:$0xff]  ;;  %v13060_v38 = vld [vmem:[#allocation363_spill] sm:$0xff]  ;;  %v13064_v14 = vld [vmem:[#allocation376_spill] sm:$0xff]  ;;  %v2154_v55 = vadd.f32 %v2146_v31, %v2108_v43  ;;  %v2153_v32 = vadd.f32 %v2145_v17, %v2107_v47 }
 0x9cd   :  { %v2148_v30 = vsel %vm11802_vm8, %v13060_v38, %v13059_v53  ;;  %v13061_v22 = vld [vmem:[#allocation366_spill] sm:$0xff]  ;;  %v13065_v62 = vld [vmem:[#allocation377_spill] sm:$0xff]  ;;  %vm13066_vm0 = vmmov %vm13063_vm15  ;;  %v2155_v9 = vadd.f32 %v2147_v63, %v2109_v48 }
 0x9ce   :  { %v2191_v39 = vsel %vm13063_vm15, %v13062_v20, %v13061_v22  ;;  %v2192_v40 = vsel %vm13066_vm0, %v13065_v62, %v13064_v14  ;;  %v13067_v2 = vld [vmem:[#allocation242_spill] sm:$0xff]  ;;  %v13068_v27 = vld [vmem:[#allocation231_spill] sm:$0xff]  ;;  %v13069_v29 = vld [vmem:[#allocation372_spill] sm:$0xff]  ;;  %v2156_v34 = vadd.f32 %v2148_v30, %v2110_v58  ;;  %v5298_v33 = vpop.permute.xlu1 %5297  ;;  %v5296_v25 = vpop.permute.xlu0 %5295  ;;  %vm13083_vm15 = vcmask 842752  }
 0x9cf   :  { %v1390_v6 = vsel %vm1388_vm6, %v13068_v27, %v13067_v2  ;;  %v13070_v19 = vld [vmem:[#allocation379_spill] sm:$0xff]  ;;  %vm13071_vm1 = vmmov %vm13066_vm0  ;;  %v13072_v3 = vld [vmem:[#allocation380_spill] sm:$0xff]  ;;  %v2199_v42 = vadd.f32 %v2191_v39, %v2153_v32  ;;  %v2200_v21 = vadd.f32 %v2192_v40, %v2154_v55  ;;  %v5311_v54 = vsel %vm13083_vm15, %v5296_v25, %v5298_v33 }
 0x9d0   :  { %v2194_v15 = vsel %vm13071_vm1, %v13070_v19, %v13069_v29  ;;  %v13073_v26 = vld [vmem:[#allocation369_spill] sm:$0xff]  ;;  %vm13074_vm5 = vmmov %vm13066_vm0  ;;  %v13075_v50 = vld [vmem:[#allocation382_spill] sm:$0xff]  ;;  %vm13086_vm0 = vcmask 900096   ;;  %v10938_v23 = vadd.f32 %v5311_v54, %v10761_v10 }
 0x9d1   :  { %v2193_v59 = vsel %vm13074_vm5, %v13073_v26, %v13072_v3  ;;  %v13076_v7 = vld [vmem:[#allocation383_spill] sm:$0xff]  ;;  %v13077_v5 = vld [vmem:[#allocation386_spill] sm:$0xff]  ;;  %v2202_v28 = vadd.f32 %v2194_v15, %v2156_v34  ;;  %v13080_v13 = vld [vmem:[#allocation385_spill] sm:$0xff]  ;;  %v10958_v26 = vpop.permute.xlu2 %5347 }
 0x9d2   :  { %v2237_v18 = vsel %vm11801_vm14, %v13076_v7, %v13075_v50  ;;  %v13078_v44 = vld [vmem:[#allocation375_spill] sm:$0xff]  ;;  %v13079_v16 = vld [vmem:[#allocation378_spill] sm:$0xff]  ;;  %v13081_v51 = vld [vmem:[#allocation388_spill] sm:$0xff]  ;;  %v2201_v46 = vadd.f32 %v2193_v59, %v2155_v9  ;;  %v1398_v59 = vadd.f32 %v1390_v6, %v10736_v24 }
 0x9d3   :  { %v2238_v60 = vsel %vm11801_vm14, %v13078_v44, %v13077_v5  ;;  %v2239_v1 = vsel %vm11801_vm14, %v13080_v13, %v13079_v16  ;;  %v13082_v36 = vld [vmem:[#allocation389_spill] sm:$0xff]  ;;  %v13084_v31 = vld [vmem:[#allocation384_spill] sm:$0xff]  ;;  %v13085_v49 = vld [vmem:[#allocation391_spill] sm:$0xff]  ;;  %v2245_v35 = vadd.f32 %v2237_v18, %v2199_v42 }
 0x9d4   :  { %v2240_v56 = vsel %vm11801_vm14, %v13082_v36, %v13081_v51  ;;  %v2284_v8 = vsel %vm13086_vm0, %v13085_v49, %v13084_v31  ;;  %v13087_v17 = vld [vmem:[#allocation392_spill] sm:$0xff]  ;;  %v13088_v47 = vld [vmem:[#allocation381_spill] sm:$0xff]  ;;  %vm13089_vm1 = vmmov %vm13086_vm0  ;;  %v2246_v63 = vadd.f32 %v2238_v60, %v2200_v21  ;;  %v2247_v20 = vadd.f32 %v2239_v1, %v2201_v46 }
 0x9d5   :  { %v2283_v43 = vsel %vm13089_vm1, %v13088_v47, %v13087_v17  ;;  %v13090_v53 = vld [vmem:[#allocation394_spill] sm:$0xff]  ;;  %v13091_v38 = vld [vmem:[#allocation395_spill] sm:$0xff]  ;;  %vm13092_vm5 = vmmov %vm13086_vm0  ;;  %v2248_v39 = vadd.f32 %v2240_v56, %v2202_v28 }
 0x9d6   :  { %v2285_v30 = vsel %vm13092_vm5, %v13091_v38, %v13090_v53  ;;  %v13093_v48 = vld [vmem:[#allocation398_spill] sm:$0xff]  ;;  %v13094_v58 = vld [vmem:[#allocation387_spill] sm:$0xff]  ;;  %vm13095_vm15 = vmmov %vm13086_vm0  ;;  %vm13098_vm0 = vcmask 891904   ;;  %v2292_v55 = vadd.f32 %v2284_v8, %v2246_v63  ;;  %v2291_v32 = vadd.f32 %v2283_v43, %v2245_v35  ;;  %v5304_v31 = vpop.permute.xlu1 %5303  ;;  %v5302_v49 = vpop.permute.xlu0 %5301 }
 0x9d7   :  { %v2286_v22 = vsel %vm13095_vm15, %v13094_v58, %v13093_v48  ;;  %v13096_v14 = vld [vmem:[#allocation390_spill] sm:$0xff]  ;;  %v13097_v62 = vld [vmem:[#allocation397_spill] sm:$0xff]  ;;  %v13099_v2 = vld [vmem:[#allocation400_spill] sm:$0xff]  ;;  %v2293_v7 = vadd.f32 %v2285_v30, %v2247_v20 }
 0x9d8   :  { %v2329_v40 = vsel %vm13098_vm0, %v13097_v62, %v13096_v14  ;;  %v13100_v27 = vld [vmem:[#allocation401_spill] sm:$0xff]  ;;  %vm13101_vm1 = vmmov %vm13098_vm0  ;;  %v13102_v29 = vld [vmem:[#allocation396_spill] sm:$0xff]  ;;  %v2294_v18 = vadd.f32 %v2286_v22, %v2248_v39 }
 0x9d9   :  { %v2330_v10 = vsel %vm13101_vm1, %v13100_v27, %v13099_v2  ;;  %v13103_v19 = vld [vmem:[#allocation403_spill] sm:$0xff]  ;;  %vm13104_vm14 = vmmov %vm13098_vm0  ;;  %v13105_v9 = vld [vmem:[#allocation404_spill] sm:$0xff]  ;;  %v2337_v33 = vadd.f32 %v2329_v40, %v2291_v32 }
 0x9da   :  { %v2332_v15 = vsel %vm13104_vm14, %v13103_v19, %v13102_v29  ;;  %v13106_v34 = vld [vmem:[#allocation393_spill] sm:$0xff]  ;;  %vm13107_vm5 = vmmov %vm13098_vm0  ;;  %v13108_v42 = vld [vmem:[#allocation240_spill] sm:$0xff]  ;;  %v2338_v25 = vadd.f32 %v2330_v10, %v2292_v55  ;;  %vm13114_vm14 = vcmask 883712  }
 0x9db   :  { %v2331_v3 = vsel %vm13107_vm5, %v13106_v34, %v13105_v9  ;;  %v13109_v21 = vld [vmem:[#allocation247_spill] sm:$0xff]  ;;  %v13110_v5 = vld [vmem:[#allocation248_spill] sm:$0xff]  ;;  %v13111_v44 = vld [vmem:[#allocation237_spill] sm:$0xff]  ;;  %v2340_v1 = vadd.f32 %v2332_v15, %v2294_v18  ;;  %vm13126_vm5 = vcmask 875520  }
 0x9dc   :  { %v1437_v50 = vsel %vm1435_vm3, %v13109_v21, %v13108_v42  ;;  %v10967_v60 = vsel %vm1435_vm3, %v13111_v44, %v13110_v5  ;;  %v13112_v28 = vld [vmem:[#allocation406_spill] sm:$0xff]  ;;  %v13113_v16 = vld [vmem:[#allocation407_spill] sm:$0xff]  ;;  %v2339_v51 = vadd.f32 %v2331_v3, %v2293_v7  ;;  %v13116_v6 = vld [vmem:[#allocation409_spill] sm:$0xff] }
 0x9dd   :  { %v2375_v13 = vsel %vm13114_vm14, %v13113_v16, %v13112_v28  ;;  %v13115_v24 = vld [vmem:[#allocation402_spill] sm:$0xff]  ;;  %vm13117_vm15 = vmmov %vm13114_vm14  ;;  %v13119_v54 = vld [vmem:[#allocation399_spill] sm:$0xff]  ;;  %v11018_v28 = vadd.f32 %v1437_v50, %v1398_v59  ;;  %v11031_v59 = vpop.permute.xlu2 %5353 }
 0x9de   :  { %v2377_v36 = vsel %vm13117_vm15, %v13116_v6, %v13115_v24  ;;  %v13118_v56 = vld [vmem:[#allocation410_spill] sm:$0xff]  ;;  %vm13120_vm0 = vmmov %vm13114_vm14  ;;  %v13121_v8 = vld [vmem:[#allocation412_spill] sm:$0xff]  ;;  %vm13127_vm14 = vcmask 842752   ;;  %v2383_v30 = vadd.f32 %v2375_v13, %v2337_v33 }
 0x9df   :  { %v2376_v46 = vsel %vm13120_vm0, %v13119_v54, %v13118_v56  ;;  %v13122_v17 = vld [vmem:[#allocation413_spill] sm:$0xff]  ;;  %vm13123_vm1 = vmmov %vm13120_vm0  ;;  %v13124_v43 = vld [vmem:[#allocation416_spill] sm:$0xff]  ;;  %v5313_v53 = vsel %vm13127_vm14, %v5304_v31, %v10815_v41  ;;  %v2385_v29 = vadd.f32 %v2377_v36, %v2339_v51 }
 0x9e0   :  { %v2378_v47 = vsel %vm13123_vm1, %v13122_v17, %v13121_v8  ;;  %v13125_v35 = vld [vmem:[#allocation405_spill] sm:$0xff]  ;;  %vm13128_vm8 = vmmov %vm13127_vm14  ;;  %v13129_v48 = vld [vmem:[#allocation408_spill] sm:$0xff]  ;;  %v10992_v20 = vadd.f32 %v5313_v53, %v10885_v61  ;;  %v2384_v14 = vadd.f32 %v2376_v46, %v2338_v25  ;;  %vm13137_vm1 = vcmask 867328   ;;  %v5310_v53 = vpop.permute.xlu1 %5309 }
 0x9e1   :  { %v2421_v63 = vsel %vm13126_vm5, %v13125_v35, %v13124_v43  ;;  %v5312_v38 = vsel %vm13128_vm8, %v10758_v11, %v5302_v49  ;;  %v13130_v58 = vld [vmem:[#allocation415_spill] sm:$0xff]  ;;  %vm13131_vm15 = vmmov %vm13126_vm5  ;;  %v13132_v62 = vld [vmem:[#allocation418_spill] sm:$0xff]  ;;  %v2386_v19 = vadd.f32 %v2378_v47, %v2340_v1 }
 0x9e2   :  { %v2422_v22 = vsel %vm13131_vm15, %v13130_v58, %v13129_v48  ;;  %v10995_v39 = vadd.f32 %v5312_v38, %v10824_v37  ;;  %v13133_v40 = vld [vmem:[#allocation419_spill] sm:$0xff]  ;;  %vm13134_vm0 = vmmov %vm13126_vm5  ;;  %v13135_v41 = vld [vmem:[#allocation414_spill] sm:$0xff]  ;;  %v2429_v61 = vadd.f32 %v2421_v63, %v2383_v30  ;;  %v5308_v38 = vpop.permute.xlu0 %5307 }
 0x9e3   :  { %v2423_v2 = vsel %vm13134_vm0, %v13133_v40, %v13132_v62  ;;  %v13136_v27 = vld [vmem:[#allocation421_spill] sm:$0xff]  ;;  %v13138_v10 = vld [vmem:[#allocation422_spill] sm:$0xff]  ;;  %v13139_v55 = vld [vmem:[#allocation411_spill] sm:$0xff]  ;;  %v2430_v34 = vadd.f32 %v2422_v22, %v2384_v14 }
 0x9e4   :  { %v2467_v11 = vsel %vm13137_vm1, %v13136_v27, %v13135_v41  ;;  %vm13140_vm8 = vmmov %vm13134_vm0  ;;  %v13141_v15 = vld [vmem:[#allocation424_spill] sm:$0xff]  ;;  %v13142_v9 = vld [vmem:[#allocation425_spill] sm:$0xff]  ;;  %v2431_v16 = vadd.f32 %v2423_v2, %v2385_v29  ;;  %vm13166_vm0 = vcmask 842752  }
 0x9e5   :  { %v2424_v32 = vsel %vm13140_vm8, %v13139_v55, %v13138_v10  ;;  %vm13143_vm5 = vmmov %vm13137_vm1  ;;  %v13144_v3 = vld [vmem:[#allocation420_spill] sm:$0xff]  ;;  %v13145_v42 = vld [vmem:[#allocation427_spill] sm:$0xff]  ;;  %v2475_v13 = vadd.f32 %v2467_v11, %v2429_v61 }
 0x9e6   :  { %v2468_v37 = vsel %vm13143_vm5, %v13142_v9, %v13141_v15  ;;  %vm13146_vm14 = vmmov %vm13137_vm1  ;;  %v13147_v7 = vld [vmem:[#allocation428_spill] sm:$0xff]  ;;  %v13148_v18 = vld [vmem:[#allocation417_spill] sm:$0xff]  ;;  %v2432_v1 = vadd.f32 %v2424_v32, %v2386_v19  ;;  %vm13177_vm5 = vcmask 834560  }
 0x9e7   :  { %v2470_v21 = vsel %vm13146_vm14, %v13145_v42, %v13144_v3  ;;  %vm13149_vm15 = vmmov %vm13137_vm1  ;;  %v13150_v44 = vld [vmem:[#allocation430_spill] sm:$0xff]  ;;  %v13151_v33 = vld [vmem:[#allocation431_spill] sm:$0xff]  ;;  %v2476_v36 = vadd.f32 %v2468_v37, %v2430_v34 }
 0x9e8   :  { %v2469_v5 = vsel %vm13149_vm15, %v13148_v18, %v13147_v7  ;;  %v2513_v25 = vsel %vm1153_vm4, %v13151_v33, %v13150_v44  ;;  %v13152_v51 = vld [vmem:[#allocation250_spill] sm:$0xff]  ;;  %v13153_v24 = vld [vmem:[#allocation251_spill] sm:$0xff]  ;;  %v13156_v31 = vld [vmem:[#allocation440_spill] sm:$0xff]  ;;  %v2478_v50 = vadd.f32 %v2470_v21, %v2432_v1 }
 0x9e9   :  { %v1438_v6 = vsel %vm1435_vm3, %v13153_v24, %v13152_v51  ;;  %v13154_v56 = vld [vmem:[#allocation434_spill] sm:$0xff]  ;;  %v13155_v54 = vld [vmem:[#allocation423_spill] sm:$0xff]  ;;  %v13157_v49 = vld [vmem:[#allocation429_spill] sm:$0xff]  ;;  %v2477_v17 = vadd.f32 %v2469_v5, %v2431_v16  ;;  %v2521_v47 = vadd.f32 %v2513_v25, %v2475_v13 }
 0x9ea   :  { %v2514_v46 = vsel %vm1153_vm4, %v13155_v54, %v13154_v56  ;;  %v2559_v8 = vsel %vm1200_vm2, %v13157_v49, %v13156_v31  ;;  %v13158_v43 = vld [vmem:[#allocation436_spill] sm:$0xff]  ;;  %v13159_v35 = vld [vmem:[#allocation437_spill] sm:$0xff]  ;;  %v13160_v30 = vld [vmem:[#allocation426_spill] sm:$0xff] }
 0x9eb   :  { %v2516_v63 = vsel %vm1153_vm4, %v13159_v35, %v13158_v43  ;;  %v13161_v48 = vld [vmem:[#allocation433_spill] sm:$0xff]  ;;  %v13162_v22 = vld [vmem:[#allocation432_spill] sm:$0xff]  ;;  %v13163_v14 = vld [vmem:[#allocation439_spill] sm:$0xff]  ;;  %v2522_v11 = vadd.f32 %v2514_v46, %v2476_v36  ;;  %v2567_v10 = vadd.f32 %v2559_v8, %v2521_v47  ;;  %v1444_v8 = vadd.f32 %v10967_v60, %v10854_v0  ;;  %v11087_v60 = vpop.permute.xlu1 %5345 }
 0x9ec   :  { %v2515_v58 = vsel %vm1153_vm4, %v13161_v48, %v13160_v30  ;;  %v2560_v62 = vsel %vm1200_vm2, %v13163_v14, %v13162_v22  ;;  %v13164_v40 = vld [vmem:[#allocation438_spill] sm:$0xff]  ;;  %v13165_v2 = vld [vmem:[#allocation445_spill] sm:$0xff]  ;;  %vm13167_vm1 = vmmov %vm13166_vm0  ;;  %v2524_v61 = vadd.f32 %v2516_v63, %v2478_v50  ;;  %v11076_v43 = vadd.f32 %v1438_v6, %v10913_v4 }
 0x9ed   :  { %v2605_v41 = vsel %vm13166_vm0, %v13165_v2, %v13164_v40  ;;  %v5314_v27 = vsel %vm13167_vm1, %v5308_v38, %v5310_v53  ;;  %v13168_v55 = vld [vmem:[#allocation446_spill] sm:$0xff]  ;;  %v13169_v32 = vld [vmem:[#allocation435_spill] sm:$0xff]  ;;  %v13172_v34 = vld [vmem:[#allocation448_spill] sm:$0xff]  ;;  %v2523_v5 = vadd.f32 %v2515_v58, %v2477_v17  ;;  %v2568_v44 = vadd.f32 %v2560_v62, %v2522_v11  ;;  %v5344_v40 = vpop.permute.xlu0 %5343 }
 0x9ee   :  { %v2562_v29 = vsel %vm1200_vm2, %v13169_v32, %v13168_v55  ;;  %v11050_v19 = vadd.f32 %v5314_v27, %v10882_v12  ;;  %v13170_v15 = vld [vmem:[#allocation442_spill] sm:$0xff]  ;;  %v13171_v9 = vld [vmem:[#allocation443_spill] sm:$0xff]  ;;  %v13173_v3 = vld [vmem:[#allocation449_spill] sm:$0xff]  ;;  %v2613_v33 = vadd.f32 %v2605_v41, %v2567_v10  ;;  %v2807_v30 = vstv %s11029_s23 }
 0x9ef   :  { %v2561_v37 = vsel %vm1200_vm2, %v13171_v9, %v13170_v15  ;;  %vm13174_vm8 = vmmov %vm13166_vm0  ;;  %v13175_v21 = vld [vmem:[#allocation454_spill] sm:$0xff]  ;;  %v13176_v7 = vld [vmem:[#allocation455_spill] sm:$0xff]  ;;  %v2570_v13 = vadd.f32 %v2562_v29, %v2524_v61  ;;  %v11100_v61 = vpop.permute.xlu2 %5389 }
 0x9f0   :  { %v2606_v42 = vsel %vm13174_vm8, %v13173_v3, %v13172_v34  ;;  %v2651_v18 = vsel %vm13177_vm5, %v13176_v7, %v13175_v21  ;;  %v13178_v25 = vld [vmem:[#allocation444_spill] sm:$0xff]  ;;  %v13179_v12 = vld [vmem:[#allocation451_spill] sm:$0xff]  ;;  %vm13180_vm14 = vmmov %vm13166_vm0  ;;  %v2569_v50 = vadd.f32 %v2561_v37, %v2523_v5 }
 0x9f1   :  { %v2608_v16 = vsel %vm13180_vm14, %v13179_v12, %v13178_v25  ;;  %v13181_v1 = vld [vmem:[#allocation452_spill] sm:$0xff]  ;;  %v13182_v51 = vld [vmem:[#allocation441_spill] sm:$0xff]  ;;  %vm13183_vm15 = vmmov %vm13166_vm0  ;;  %v2614_v17 = vadd.f32 %v2606_v42, %v2568_v44  ;;  %v2659_v47 = vadd.f32 %v2651_v18, %v2613_v33 }
 0x9f2   :  { %v2607_v24 = vsel %vm13183_vm15, %v13182_v51, %v13181_v1  ;;  %v13184_v36 = vld [vmem:[#allocation458_spill] sm:$0xff]  ;;  %v13185_v56 = vld [vmem:[#allocation447_spill] sm:$0xff]  ;;  %vm13186_vm0 = vmmov %vm13177_vm5  ;;  %v11078_v35 = vadd.f32 %v2608_v16, %v2570_v13  ;;  %vm13205_vm5 = vcmask 1039360  }
 0x9f3   :  { %v2652_v54 = vsel %vm13186_vm0, %v13185_v56, %v13184_v36  ;;  %v13187_v46 = vld [vmem:[#allocation464_spill] sm:$0xff]  ;;  %v13188_v31 = vld [vmem:[#allocation453_spill] sm:$0xff]  ;;  %v13189_v63 = vld [vmem:[#allocation462_spill] sm:$0xff]  ;;  %v2615_v48 = vadd.f32 %v2607_v24, %v2569_v50 }
 0x9f4   :  { %v2697_v49 = vsel %vm1341_vm7, %v13188_v31, %v13187_v46  ;;  %v13190_v53 = vld [vmem:[#allocation469_spill] sm:$0xff]  ;;  %v13191_v58 = vld [vmem:[#allocation450_spill] sm:$0xff]  ;;  %vm13193_vm1 = vmmov %vm13186_vm0  ;;  %v2660_v62 = vadd.f32 %v2652_v54, %v2614_v17 }
 0x9f5   :  { %v2743_v38 = vsel %vm1388_vm6, %v13190_v53, %v13189_v63  ;;  %v13192_v22 = vld [vmem:[#allocation457_spill] sm:$0xff]  ;;  %v2705_v0 = vadd.f32 %v2697_v49, %v2659_v47  ;;  %v13194_v2 = vld [vmem:[#allocation456_spill] sm:$0xff]  ;;  %v13195_v4 = vld [vmem:[#allocation463_spill] sm:$0xff] }
 0x9f6   :  { %v2653_v14 = vsel %vm13193_vm1, %v13192_v22, %v13191_v58  ;;  %v2698_v6 = vsel %vm1341_vm7, %v13195_v4, %v13194_v2  ;;  %v13196_v41 = vld [vmem:[#allocation466_spill] sm:$0xff]  ;;  %v13197_v27 = vld [vmem:[#allocation467_spill] sm:$0xff]  ;;  %vm13200_vm8 = vmmov %vm13186_vm0 }
 0x9f7   :  { %v2699_v11 = vsel %vm1341_vm7, %v13197_v27, %v13196_v41  ;;  %v13198_v10 = vld [vmem:[#allocation478_spill] sm:$0xff]  ;;  %v13199_v55 = vld [vmem:[#allocation479_spill] sm:$0xff]  ;;  %v5357_v29 = vsel %vm13200_vm8, %v10893_v52, %v5344_v40  ;;  %v2751_v15 = vadd.f32 %v2743_v38, %v2705_v0  ;;  %v6029_v9 = vld [vmem:[#allocation4 + $0x90] sm:$0xff]  ;;  %v2661_v21 = vadd.f32 %v2653_v14, %v2615_v48 }
 0x9f8   :  { %v2789_v32 = vsel %vm1435_vm3, %v13199_v55, %v13198_v10  ;;  %v2809_v37 = vmul.f32 %v6029_v9, %v2807_v30  ;;  %v6030_v34 = vld [vmem:[#allocation4 + $0x80] sm:$0xff]  ;;  %v11103_v42 = vadd.f32 %v5357_v29, %v10938_v23  ;;  %v13201_v7 = vld [vmem:[#allocation472_spill] sm:$0xff]  ;;  %v13202_v18 = vld [vmem:[#allocation473_spill] sm:$0xff]  ;;  %v2706_v23 = vadd.f32 %v2698_v6, %v2660_v62 }
 0x9f9   :  { %v2808_v3 = vmul.f32 %v6030_v34, %v2807_v30  ;;  %v2744_v5 = vsel %vm1388_vm6, %v13202_v18, %v13201_v7  ;;  %v13203_v44 = vld [vmem:[#allocation480_spill] sm:$0xff]  ;;  %v13204_v33 = vld [vmem:[#allocation487_spill] sm:$0xff]  ;;  %v13207_v12 = vld [vmem:[#allocation477_spill] sm:$0xff]  ;;  %v2797_v54 = vadd.f32 %v2789_v32, %v2751_v15  ;;  %v2707_v46 = vadd.f32 %v2699_v11, %v2661_v21  ;;  %v11150_v21 = vpop.permute.xlu0 %5349 }
 0x9fa   :  { %v2855_v25 = vsel %vm13205_vm5, %v13204_v33, %v13203_v44  ;;  %v13206_v52 = vld [vmem:[#allocation488_spill] sm:$0xff]  ;;  %vm13208_vm14 = vmmov %vm13205_vm5  ;;  %v13210_v1 = vld [vmem:[#allocation461_spill] sm:$0xff]  ;;  %v11133_v58 = vadd.f32 %v2744_v5, %v2706_v23 }
 0x9fb   :  { %v2854_v16 = vsel %vm13208_vm14, %v13207_v12, %v13206_v52  ;;  %v13209_v13 = vld [vmem:[#allocation460_spill] sm:$0xff]  ;;  %vm13211_vm15 = vmmov %vm13186_vm0  ;;  %v13213_v36 = vld [vmem:[#allocation465_spill] sm:$0xff]  ;;  %vm13218_vm0 = vcmask 1031168   ;;  %v2863_v22 = vadd.f32 %v2855_v25, %v2809_v37  ;;  %v11146_v29 = vadd.f32 %v2797_v54, %v1444_v8 }
 0x9fc   :  { %v11117_v51 = vsel %vm13211_vm15, %v13210_v1, %v13209_v13  ;;  %v13212_v24 = vld [vmem:[#allocation476_spill] sm:$0xff]  ;;  %v13214_v31 = vld [vmem:[#allocation470_spill] sm:$0xff]  ;;  %v13215_v49 = vld [vmem:[#allocation459_spill] sm:$0xff]  ;;  %v2862_v14 = vadd.f32 %v2854_v16, %v2808_v3  ;;  %v11148_v3 = vpop.permute.xlu1 %5351 }
 0x9fd   :  { %v2745_v56 = vsel %vm1388_vm6, %v13213_v36, %v13212_v24  ;;  %v11125_v50 = vsel %vm1341_vm7, %v13215_v49, %v13214_v31  ;;  %v13216_v17 = vld [vmem:[#allocation486_spill] sm:$0xff]  ;;  %v13217_v47 = vld [vmem:[#allocation493_spill] sm:$0xff]  ;;  %v13219_v53 = vld [vmem:[#allocation496_spill] sm:$0xff] }
 0x9fe   :  { %v2900_v63 = vsel %vm13218_vm0, %v13217_v47, %v13216_v17  ;;  %v13220_v38 = vld [vmem:[#allocation497_spill] sm:$0xff]  ;;  %vm13221_vm1 = vmmov %vm13218_vm0  ;;  %v6031_v62 = vld [vmem:[#allocation4 + $0xa0] sm:$0xff]  ;;  %v11135_v40 = vadd.f32 %v2745_v56, %v2707_v46 }
 0x9ff   :  { %v2901_v48 = vsel %vm13221_vm1, %v13220_v38, %v13219_v53  ;;  %v2810_v0 = vmul.f32 %v6031_v62, %v2807_v30  ;;  %v13222_v2 = vld [vmem:[#allocation490_spill] sm:$0xff]  ;;  %v13223_v4 = vld [vmem:[#allocation491_spill] sm:$0xff]  ;;  %vm13224_vm8 = vmmov %vm13205_vm5  ;;  %vm13227_vm5 = vcmask 1022976   ;;  %v2908_v15 = vadd.f32 %v2900_v63, %v2862_v14 }
 0xa00   :  { %v2856_v6 = vsel %vm13224_vm8, %v13223_v4, %v13222_v2  ;;  %v13225_v41 = vld [vmem:[#allocation502_spill] sm:$0xff]  ;;  %v13226_v27 = vld [vmem:[#allocation503_spill] sm:$0xff]  ;;  %vm13230_vm14 = vmmov %vm13227_vm5  ;;  %v2909_v34 = vadd.f32 %v2901_v48, %v2863_v22  ;;  %vm13238_vm1 = vcmask 1014784   ;;  %v11181_v2 = vpop.permute.xlu2 %5395 }
 0xa01   :  { %v2946_v11 = vsel %vm13227_vm5, %v13226_v27, %v13225_v41  ;;  %v13228_v10 = vld [vmem:[#allocation506_spill] sm:$0xff]  ;;  %v13229_v55 = vld [vmem:[#allocation495_spill] sm:$0xff]  ;;  %v6032_v9 = vld [vmem:[#allocation4 + $0xb0] sm:$0xff]  ;;  %v2864_v36 = vadd.f32 %v2856_v6, %v2810_v0 }
 0xa02   :  { %v2947_v32 = vsel %vm13230_vm14, %v13229_v55, %v13228_v10  ;;  %v2811_v37 = vmul.f32 %v6032_v9, %v2807_v30  ;;  %v13231_v7 = vld [vmem:[#allocation494_spill] sm:$0xff]  ;;  %v13232_v18 = vld [vmem:[#allocation483_spill] sm:$0xff]  ;;  %vm13233_vm15 = vmmov %vm13224_vm8  ;;  %v2954_v56 = vadd.f32 %v2946_v11, %v2908_v15 }
 0xa03   :  { %v2857_v5 = vsel %vm13233_vm15, %v13232_v18, %v13231_v7  ;;  %v13234_v44 = vld [vmem:[#allocation500_spill] sm:$0xff]  ;;  %v13235_v33 = vld [vmem:[#allocation489_spill] sm:$0xff]  ;;  %v13237_v12 = vld [vmem:[#allocation511_spill] sm:$0xff]  ;;  %v2955_v54 = vadd.f32 %v2947_v32, %v2909_v34  ;;  %vm13251_vm15 = vcmask 1006592  }
 0xa04   :  { %v2902_v25 = vsel %vm13218_vm0, %v13235_v33, %v13234_v44  ;;  %v13236_v52 = vld [vmem:[#allocation504_spill] sm:$0xff]  ;;  %v13240_v13 = vld [vmem:[#allocation501_spill] sm:$0xff]  ;;  %vm13241_vm8 = vmmov %vm13238_vm1  ;;  %v2865_v0 = vadd.f32 %v2857_v5, %v2811_v37 }
 0xa05   :  { %v2993_v8 = vsel %vm13238_vm1, %v13237_v12, %v13236_v52  ;;  %v13239_v16 = vld [vmem:[#allocation512_spill] sm:$0xff]  ;;  %v13242_v1 = vld [vmem:[#allocation474_spill] sm:$0xff]  ;;  %v13243_v23 = vld [vmem:[#allocation481_spill] sm:$0xff]  ;;  %v2910_v4 = vadd.f32 %v2902_v25, %v2864_v36 }
 0xa06   :  { %v2992_v30 = vsel %vm13241_vm8, %v13240_v13, %v13239_v16  ;;  %v11167_v24 = vsel %vm1435_vm3, %v13243_v23, %v13242_v1  ;;  %v13244_v46 = vld [vmem:[#allocation492_spill] sm:$0xff]  ;;  %v13245_v31 = vld [vmem:[#allocation499_spill] sm:$0xff]  ;;  %vm13246_vm5 = vmmov %vm13218_vm0  ;;  %v3001_v6 = vadd.f32 %v2993_v8, %v2955_v54  ;;  %vm13261_vm8 = vcmask 998400  }
 0xa07   :  { %v2903_v49 = vsel %vm13246_vm5, %v13245_v31, %v13244_v46  ;;  %v13247_v17 = vld [vmem:[#allocation498_spill] sm:$0xff]  ;;  %v13248_v47 = vld [vmem:[#allocation505_spill] sm:$0xff]  ;;  %v13252_v22 = vld [vmem:[#allocation520_spill] sm:$0xff]  ;;  %v3000_v41 = vadd.f32 %v2992_v30, %v2954_v56 }
 0xa08   :  { %v2948_v63 = vsel %vm13230_vm14, %v13248_v47, %v13247_v17  ;;  %v13249_v53 = vld [vmem:[#allocation510_spill] sm:$0xff]  ;;  %v13250_v38 = vld [vmem:[#allocation517_spill] sm:$0xff]  ;;  %vm13254_vm0 = vmmov %vm13251_vm15  ;;  %v2911_v5 = vadd.f32 %v2903_v49, %v2865_v0 }
 0xa09   :  { %v3038_v48 = vsel %vm13251_vm15, %v13250_v38, %v13249_v53  ;;  %v13253_v14 = vld [vmem:[#allocation521_spill] sm:$0xff]  ;;  %v13255_v27 = vld [vmem:[#allocation482_spill] sm:$0xff]  ;;  %v13256_v11 = vld [vmem:[#allocation471_spill] sm:$0xff]  ;;  %v2956_v33 = vadd.f32 %v2948_v63, %v2910_v4 }
 0xa0a   :  { %v3039_v62 = vsel %vm13254_vm0, %v13253_v14, %v13252_v22  ;;  %v11186_v10 = vsel %vm1435_vm3, %v13256_v11, %v13255_v27  ;;  %v13257_v55 = vld [vmem:[#allocation514_spill] sm:$0xff]  ;;  %v13258_v32 = vld [vmem:[#allocation515_spill] sm:$0xff]  ;;  %vm13264_vm5 = vmmov %vm13261_vm8  ;;  %v3046_v25 = vadd.f32 %v3038_v48, %v3000_v41  ;;  %v11212_v48 = vpop.permute.xlu1 %5387  ;;  %v5356_v22 = vpop.permute.xlu0 %5355 }
 0xa0b   :  { %v2994_v15 = vsel %vm13238_vm1, %v13258_v32, %v13257_v55  ;;  %v13259_v9 = vld [vmem:[#allocation526_spill] sm:$0xff]  ;;  %v13260_v34 = vld [vmem:[#allocation527_spill] sm:$0xff]  ;;  %v3047_v52 = vadd.f32 %v3039_v62, %v3001_v6  ;;  %v13265_v12 = vld [vmem:[#allocation508_spill] sm:$0xff] }
 0xa0c   :  { %v3084_v7 = vsel %vm13261_vm8, %v13260_v34, %v13259_v9  ;;  %v13262_v18 = vld [vmem:[#allocation530_spill] sm:$0xff]  ;;  %v13263_v44 = vld [vmem:[#allocation519_spill] sm:$0xff]  ;;  %v13266_v8 = vld [vmem:[#allocation509_spill] sm:$0xff]  ;;  %v3002_v49 = vadd.f32 %v2994_v15, %v2956_v33  ;;  %vm13278_vm8 = vcmask 1014784  }
 0xa0d   :  { %v3085_v37 = vsel %vm13264_vm5, %v13263_v44, %v13262_v18  ;;  %v2949_v16 = vsel %vm13230_vm14, %v13266_v8, %v13265_v12  ;;  %v13267_v13 = vld [vmem:[#allocation524_spill] sm:$0xff]  ;;  %v13268_v30 = vld [vmem:[#allocation513_spill] sm:$0xff]  ;;  %vm13269_vm15 = vmmov %vm13254_vm0  ;;  %vm13272_vm0 = vcmask 990208   ;;  %v3092_v53 = vadd.f32 %v3084_v7, %v3046_v25 }
 0xa0e   :  { %v3040_v1 = vsel %vm13269_vm15, %v13268_v30, %v13267_v13  ;;  %v13270_v23 = vld [vmem:[#allocation528_spill] sm:$0xff]  ;;  %v13271_v36 = vld [vmem:[#allocation535_spill] sm:$0xff]  ;;  %v13274_v46 = vld [vmem:[#allocation525_spill] sm:$0xff]  ;;  %v3093_v38 = vadd.f32 %v3085_v37, %v3047_v52  ;;  %vm13283_vm14 = vcmask 982016   ;;  %v2957_v18 = vadd.f32 %v2949_v16, %v2911_v5 }
 0xa0f   :  { %v3131_v56 = vsel %vm13272_vm0, %v13271_v36, %v13270_v23  ;;  %v13273_v54 = vld [vmem:[#allocation536_spill] sm:$0xff]  ;;  %vm13275_vm1 = vmmov %vm13272_vm0  ;;  %v13276_v17 = vld [vmem:[#allocation518_spill] sm:$0xff]  ;;  %vm13287_vm0 = vcmask 834560   ;;  %v3048_v15 = vadd.f32 %v3040_v1, %v3002_v49 }
 0xa10   :  { %v3130_v31 = vsel %vm13275_vm1, %v13274_v46, %v13273_v54  ;;  %v13277_v47 = vld [vmem:[#allocation507_spill] sm:$0xff]  ;;  %v13279_v14 = vld [vmem:[#allocation522_spill] sm:$0xff]  ;;  %v13280_v62 = vld [vmem:[#allocation529_spill] sm:$0xff]  ;;  %v5360_v32 = vsel %vm13287_vm0, %v11031_v59, %v5356_v22  ;;  %v3139_v9 = vadd.f32 %v3131_v56, %v3093_v38  ;;  %v11249_v22 = vpop.permute.xlu2 %5401  ;;  %vm13307_vm0 = vcmask 998400  }
 0xa11   :  { %v2995_v63 = vsel %vm13278_vm8, %v13277_v47, %v13276_v17  ;;  %v3086_v0 = vsel %vm13264_vm5, %v13280_v62, %v13279_v14  ;;  %v13281_v4 = vld [vmem:[#allocation534_spill] sm:$0xff]  ;;  %v13282_v6 = vld [vmem:[#allocation541_spill] sm:$0xff]  ;;  %v13284_v27 = vld [vmem:[#allocation544_spill] sm:$0xff]  ;;  %v3138_v34 = vadd.f32 %v3130_v31, %v3092_v53  ;;  %v11226_v7 = vadd.f32 %v5360_v32, %v11050_v19 }
 0xa12   :  { %v3176_v41 = vsel %vm13283_vm14, %v13282_v6, %v13281_v4  ;;  %v13285_v11 = vld [vmem:[#allocation545_spill] sm:$0xff]  ;;  %vm13286_vm15 = vmmov %vm13283_vm14  ;;  %v13288_v44 = vld [vmem:[#allocation538_spill] sm:$0xff]  ;;  %vm13292_vm8 = vcmask 973824   ;;  %vm13298_vm14 = vcmask 1006592   ;;  %v3094_v36 = vadd.f32 %v3086_v0, %v3048_v15 }
 0xa13   :  { %v3177_v55 = vsel %vm13286_vm15, %v13285_v11, %v13284_v27  ;;  %v13289_v37 = vld [vmem:[#allocation539_spill] sm:$0xff]  ;;  %v13290_v25 = vld [vmem:[#allocation550_spill] sm:$0xff]  ;;  %vm13295_vm5 = vmmov %vm13292_vm8  ;;  %v3184_v19 = vadd.f32 %v3176_v41, %v3138_v34  ;;  %v3003_v5 = vadd.f32 %v2995_v63, %v2957_v18 }
 0xa14   :  { %v3132_v33 = vsel %vm13275_vm1, %v13289_v37, %v13288_v44  ;;  %v13291_v52 = vld [vmem:[#allocation551_spill] sm:$0xff]  ;;  %v13293_v8 = vld [vmem:[#allocation554_spill] sm:$0xff]  ;;  %v13296_v59 = vld [vmem:[#allocation516_spill] sm:$0xff]  ;;  %v3185_v56 = vadd.f32 %v3177_v55, %v3139_v9 }
 0xa15   :  { %v3222_v12 = vsel %vm13292_vm8, %v13291_v52, %v13290_v25  ;;  %v13294_v13 = vld [vmem:[#allocation543_spill] sm:$0xff]  ;;  %v13299_v16 = vld [vmem:[#allocation548_spill] sm:$0xff]  ;;  %v13300_v54 = vld [vmem:[#allocation537_spill] sm:$0xff]  ;;  %v3140_v4 = vadd.f32 %v3132_v33, %v3094_v36  ;;  %vm13317_vm8 = vcmask 990208  }
 0xa16   :  { %v3223_v30 = vsel %vm13295_vm5, %v13294_v13, %v13293_v8  ;;  %v13297_v1 = vld [vmem:[#allocation523_spill] sm:$0xff]  ;;  %v3178_v46 = vsel %vm13286_vm15, %v13300_v54, %v13299_v16  ;;  %v13301_v31 = vld [vmem:[#allocation552_spill] sm:$0xff]  ;;  %v13304_v53 = vld [vmem:[#allocation549_spill] sm:$0xff]  ;;  %v3230_v63 = vadd.f32 %v3222_v12, %v3184_v19  ;;  %v11266_v13 = vpop.permute.xlu1 %5393 }
 0xa17   :  { %v3041_v23 = vsel %vm13298_vm14, %v13297_v1, %v13296_v59  ;;  %v13302_v49 = vld [vmem:[#allocation559_spill] sm:$0xff]  ;;  %v13303_v47 = vld [vmem:[#allocation560_spill] sm:$0xff]  ;;  %v13306_v62 = vld [vmem:[#allocation533_spill] sm:$0xff]  ;;  %v3231_v6 = vadd.f32 %v3223_v30, %v3185_v56  ;;  %v3186_v33 = vadd.f32 %v3178_v46, %v3140_v4  ;;  %v11268_v30 = vpop.permute.xlu0 %5391 }
 0xa18   :  { %v3269_v17 = vsel %vm542_vm9, %v13302_v49, %v13301_v31  ;;  %v3268_v38 = vsel %vm542_vm9, %v13304_v53, %v13303_v47  ;;  %v13305_v14 = vld [vmem:[#allocation532_spill] sm:$0xff]  ;;  %v3049_v41 = vadd.f32 %v3041_v23, %v3003_v5  ;;  %v13308_v27 = vld [vmem:[#allocation546_spill] sm:$0xff]  ;;  %v13309_v11 = vld [vmem:[#allocation553_spill] sm:$0xff] }
 0xa19   :  { %v3087_v0 = vsel %vm13307_vm0, %v13306_v62, %v13305_v14  ;;  %vm13310_vm1 = vmmov %vm13295_vm5  ;;  %v13311_v32 = vld [vmem:[#allocation558_spill] sm:$0xff]  ;;  %v13312_v15 = vld [vmem:[#allocation565_spill] sm:$0xff]  ;;  %v3277_v12 = vadd.f32 %v3269_v17, %v3231_v6  ;;  %v3276_v8 = vadd.f32 %v3268_v38, %v3230_v63 }
 0xa1a   :  { %v3224_v55 = vsel %vm13310_vm1, %v13309_v11, %v13308_v27  ;;  %v3314_v9 = vsel %vm589_vm10, %v13312_v15, %v13311_v32  ;;  %v13313_v34 = vld [vmem:[#allocation568_spill] sm:$0xff]  ;;  %v13314_v18 = vld [vmem:[#allocation569_spill] sm:$0xff]  ;;  %v13315_v37 = vld [vmem:[#allocation542_spill] sm:$0xff]  ;;  %v3095_v59 = vadd.f32 %v3087_v0, %v3049_v41 }
 0xa1b   :  { %v3315_v44 = vsel %vm589_vm10, %v13314_v18, %v13313_v34  ;;  %v13316_v25 = vld [vmem:[#allocation531_spill] sm:$0xff]  ;;  %v13318_v1 = vld [vmem:[#allocation562_spill] sm:$0xff]  ;;  %v13324_v46 = vld [vmem:[#allocation540_spill] sm:$0xff]  ;;  %v3232_v47 = vadd.f32 %v3224_v55, %v3186_v33  ;;  %v3322_v53 = vadd.f32 %v3314_v9, %v3276_v8 }
 0xa1c   :  { %v3133_v52 = vsel %vm13317_vm8, %v13316_v25, %v13315_v37  ;;  %v13319_v23 = vld [vmem:[#allocation563_spill] sm:$0xff]  ;;  %v13320_v19 = vld [vmem:[#allocation574_spill] sm:$0xff]  ;;  %vm13326_vm5 = vmmov %vm13286_vm15  ;;  %v3323_v38 = vadd.f32 %v3315_v44, %v3277_v12  ;;  %vm13348_vm15 = vcmask 924672   ;;  %vm13369_vm8 = vcmask 908288  }
 0xa1d   :  { %v3270_v36 = vsel %vm542_vm9, %v13319_v23, %v13318_v1  ;;  %v13321_v56 = vld [vmem:[#allocation575_spill] sm:$0xff]  ;;  %v13322_v16 = vld [vmem:[#allocation578_spill] sm:$0xff]  ;;  %v3141_v14 = vadd.f32 %v3133_v52, %v3095_v59  ;;  %v13327_v62 = vld [vmem:[#allocation572_spill] sm:$0xff] }
 0xa1e   :  { %v3360_v5 = vsel %vm636_vm11, %v13321_v56, %v13320_v19  ;;  %v13323_v54 = vld [vmem:[#allocation567_spill] sm:$0xff]  ;;  %v13328_v0 = vld [vmem:[#allocation561_spill] sm:$0xff]  ;;  %v13329_v63 = vld [vmem:[#allocation576_spill] sm:$0xff]  ;;  %v3278_v55 = vadd.f32 %v3270_v36, %v3232_v47 }
 0xa1f   :  { %v3361_v31 = vsel %vm636_vm11, %v13323_v54, %v13322_v16  ;;  %v13325_v49 = vld [vmem:[#allocation547_spill] sm:$0xff]  ;;  %v3316_v4 = vsel %vm589_vm10, %v13328_v0, %v13327_v62  ;;  %v13331_v27 = vld [vmem:[#allocation584_spill] sm:$0xff]  ;;  %v13332_v11 = vld [vmem:[#allocation573_spill] sm:$0xff]  ;;  %v3368_v9 = vadd.f32 %v3360_v5, %v3322_v53 }
 0xa20   :  { %v3179_v17 = vsel %vm13326_vm5, %v13325_v49, %v13324_v46  ;;  %v13330_v6 = vld [vmem:[#allocation583_spill] sm:$0xff]  ;;  %v3406_v32 = vsel %vm683_vm12, %v13332_v11, %v13331_v27  ;;  %v13333_v15 = vld [vmem:[#allocation556_spill] sm:$0xff]  ;;  %v13334_v34 = vld [vmem:[#allocation557_spill] sm:$0xff]  ;;  %v3369_v44 = vadd.f32 %v3361_v31, %v3323_v38  ;;  %v3324_v36 = vadd.f32 %v3316_v4, %v3278_v55 }
 0xa21   :  { %v3407_v41 = vsel %vm683_vm12, %v13330_v6, %v13329_v63  ;;  %vm13335_vm14 = vmmov %vm13310_vm1  ;;  %v3187_v37 = vadd.f32 %v3179_v17, %v3141_v14  ;;  %v13336_v25 = vld [vmem:[#allocation570_spill] sm:$0xff]  ;;  %v13337_v52 = vld [vmem:[#allocation577_spill] sm:$0xff]  ;;  %v3414_v31 = vadd.f32 %v3406_v32, %v3368_v9  ;;  %v11315_v6 = vpop.permute.xlu2 %5437 }
 0xa22   :  { %v3225_v18 = vsel %vm13335_vm14, %v13334_v34, %v13333_v15  ;;  %v3362_v33 = vsel %vm636_vm11, %v13337_v52, %v13336_v25  ;;  %v13338_v12 = vld [vmem:[#allocation582_spill] sm:$0xff]  ;;  %v13339_v8 = vld [vmem:[#allocation589_spill] sm:$0xff]  ;;  %v13340_v1 = vld [vmem:[#allocation592_spill] sm:$0xff]  ;;  %v3415_v5 = vadd.f32 %v3407_v41, %v3369_v44  ;;  %v11320_v34 = vpop.permute.xlu1 %5399  ;;  %vm13380_vm14 = vcmask 900096  }
 0xa23   :  { %v3452_v59 = vsel %vm730_vm13, %v13339_v8, %v13338_v12  ;;  %v13341_v23 = vld [vmem:[#allocation593_spill] sm:$0xff]  ;;  %v13342_v56 = vld [vmem:[#allocation566_spill] sm:$0xff]  ;;  %v13343_v16 = vld [vmem:[#allocation555_spill] sm:$0xff]  ;;  %v3233_v46 = vadd.f32 %v3225_v18, %v3187_v37  ;;  %v3370_v41 = vadd.f32 %v3362_v33, %v3324_v36  ;;  %v11322_v18 = vpop.permute.xlu0 %5397 }
 0xa24   :  { %v3453_v19 = vsel %vm730_vm13, %v13341_v23, %v13340_v1  ;;  %v3271_v54 = vsel %vm542_vm9, %v13343_v16, %v13342_v56  ;;  %v13344_v49 = vld [vmem:[#allocation586_spill] sm:$0xff]  ;;  %v13345_v17 = vld [vmem:[#allocation587_spill] sm:$0xff]  ;;  %vm13351_vm0 = vmmov %vm13348_vm15  ;;  %v3460_v32 = vadd.f32 %v3452_v59, %v3414_v31  ;;  %vm13358_vm9 = vcmask 916480  }
 0xa25   :  { %v3408_v47 = vsel %vm683_vm12, %v13345_v17, %v13344_v49  ;;  %v13346_v53 = vld [vmem:[#allocation598_spill] sm:$0xff]  ;;  %v13347_v38 = vld [vmem:[#allocation599_spill] sm:$0xff]  ;;  %v13352_v27 = vld [vmem:[#allocation564_spill] sm:$0xff]  ;;  %v3461_v15 = vadd.f32 %v3453_v19, %v3415_v5  ;;  %v3279_v55 = vadd.f32 %v3271_v54, %v3233_v46 }
 0xa26   :  { %v3498_v14 = vsel %vm13348_vm15, %v13347_v38, %v13346_v53  ;;  %v13349_v62 = vld [vmem:[#allocation602_spill] sm:$0xff]  ;;  %v13350_v0 = vld [vmem:[#allocation591_spill] sm:$0xff]  ;;  %v13354_v9 = vld [vmem:[#allocation596_spill] sm:$0xff]  ;;  %v3416_v56 = vadd.f32 %v3408_v47, %v3370_v41 }
 0xa27   :  { %v3499_v63 = vsel %vm13351_vm0, %v13350_v0, %v13349_v62  ;;  %v13353_v11 = vld [vmem:[#allocation571_spill] sm:$0xff]  ;;  %v13355_v44 = vld [vmem:[#allocation585_spill] sm:$0xff]  ;;  %v13356_v25 = vld [vmem:[#allocation600_spill] sm:$0xff]  ;;  %v3506_v16 = vadd.f32 %v3498_v14, %v3460_v32 }
 0xa28   :  { %v3317_v4 = vsel %vm589_vm10, %v13353_v11, %v13352_v27  ;;  %v3454_v37 = vsel %vm730_vm13, %v13355_v44, %v13354_v9  ;;  %v13357_v52 = vld [vmem:[#allocation607_spill] sm:$0xff]  ;;  %v13359_v8 = vld [vmem:[#allocation608_spill] sm:$0xff]  ;;  %v13360_v1 = vld [vmem:[#allocation597_spill] sm:$0xff]  ;;  %v3507_v36 = vadd.f32 %v3499_v63, %v3461_v15 }
 0xa29   :  { %v3545_v12 = vsel %vm13358_vm9, %v13357_v52, %v13356_v25  ;;  %vm13361_vm1 = vmmov %vm13358_vm9  ;;  %v13362_v33 = vld [vmem:[#allocation580_spill] sm:$0xff]  ;;  %v13363_v59 = vld [vmem:[#allocation581_spill] sm:$0xff]  ;;  %v3325_v54 = vadd.f32 %v3317_v4, %v3279_v55  ;;  %v3462_v47 = vadd.f32 %v3454_v37, %v3416_v56 }
 0xa2a   :  { %v3544_v23 = vsel %vm13361_vm1, %v13360_v1, %v13359_v8  ;;  %v3363_v19 = vsel %vm636_vm11, %v13363_v59, %v13362_v33  ;;  %v13364_v5 = vld [vmem:[#allocation594_spill] sm:$0xff]  ;;  %v13365_v31 = vld [vmem:[#allocation601_spill] sm:$0xff]  ;;  %vm13366_vm10 = vmmov %vm13351_vm0  ;;  %v3553_v14 = vadd.f32 %v3545_v12, %v3507_v36  ;;  %vm13391_vm0 = vcmask 891904  }
 0xa2b   :  { %v3500_v46 = vsel %vm13366_vm10, %v13365_v31, %v13364_v5  ;;  %v13367_v49 = vld [vmem:[#allocation606_spill] sm:$0xff]  ;;  %v13368_v17 = vld [vmem:[#allocation613_spill] sm:$0xff]  ;;  %v13370_v38 = vld [vmem:[#allocation616_spill] sm:$0xff]  ;;  %v3552_v63 = vadd.f32 %v3544_v23, %v3506_v16  ;;  %v3371_v4 = vadd.f32 %v3363_v19, %v3325_v54 }
 0xa2c   :  { %v3590_v53 = vsel %vm13369_vm8, %v13368_v17, %v13367_v49  ;;  %v13371_v62 = vld [vmem:[#allocation617_spill] sm:$0xff]  ;;  %vm13372_vm5 = vmmov %vm13369_vm8  ;;  %v13373_v27 = vld [vmem:[#allocation590_spill] sm:$0xff]  ;;  %v3508_v37 = vadd.f32 %v3500_v46, %v3462_v47  ;;  %v11374_v47 = vpop.permute.xlu0 %5433 }
 0xa2d   :  { %v3591_v0 = vsel %vm13372_vm5, %v13371_v62, %v13370_v38  ;;  %v13374_v11 = vld [vmem:[#allocation579_spill] sm:$0xff]  ;;  %v13375_v41 = vld [vmem:[#allocation610_spill] sm:$0xff]  ;;  %vm13377_vm11 = vmmov %vm13361_vm1  ;;  %v3598_v12 = vadd.f32 %v3590_v53, %v3552_v63 }
 0xa2e   :  { %v3409_v9 = vsel %vm683_vm12, %v13374_v11, %v13373_v27  ;;  %v13376_v32 = vld [vmem:[#allocation611_spill] sm:$0xff]  ;;  %v13378_v55 = vld [vmem:[#allocation622_spill] sm:$0xff]  ;;  %vm13383_vm15 = vmmov %vm13380_vm14  ;;  %v3599_v23 = vadd.f32 %v3591_v0, %v3553_v14 }
 0xa2f   :  { %v3546_v15 = vsel %vm13377_vm11, %v13376_v32, %v13375_v41  ;;  %v13379_v44 = vld [vmem:[#allocation623_spill] sm:$0xff]  ;;  %v13381_v52 = vld [vmem:[#allocation626_spill] sm:$0xff]  ;;  %v13384_v33 = vld [vmem:[#allocation588_spill] sm:$0xff]  ;;  %v3417_v19 = vadd.f32 %v3409_v9, %v3371_v4  ;;  %v11372_v9 = vpop.permute.xlu1 %5435 }
 0xa30   :  { %v3636_v25 = vsel %vm13380_vm14, %v13379_v44, %v13378_v55  ;;  %v13382_v8 = vld [vmem:[#allocation615_spill] sm:$0xff]  ;;  %v13386_v56 = vld [vmem:[#allocation620_spill] sm:$0xff]  ;;  %v13387_v16 = vld [vmem:[#allocation609_spill] sm:$0xff]  ;;  %v3554_v46 = vadd.f32 %v3546_v15, %v3508_v37 }
 0xa31   :  { %v3637_v1 = vsel %vm13383_vm15, %v13382_v8, %v13381_v52  ;;  %v13385_v59 = vld [vmem:[#allocation595_spill] sm:$0xff]  ;;  %vm13388_vm12 = vmmov %vm13372_vm5  ;;  %v13389_v54 = vld [vmem:[#allocation624_spill] sm:$0xff]  ;;  %v3644_v53 = vadd.f32 %v3636_v25, %v3598_v12 }
 0xa32   :  { %v3455_v5 = vsel %vm730_vm13, %v13385_v59, %v13384_v33  ;;  %v3592_v36 = vsel %vm13388_vm12, %v13387_v16, %v13386_v56  ;;  %v13390_v31 = vld [vmem:[#allocation631_spill] sm:$0xff]  ;;  %v13392_v17 = vld [vmem:[#allocation632_spill] sm:$0xff]  ;;  %v13393_v38 = vld [vmem:[#allocation621_spill] sm:$0xff]  ;;  %v3645_v0 = vadd.f32 %v3637_v1, %v3599_v23 }
 0xa33   :  { %v3683_v49 = vsel %vm13391_vm0, %v13390_v31, %v13389_v54  ;;  %vm13394_vm9 = vmmov %vm13391_vm0  ;;  %v13395_v27 = vld [vmem:[#allocation604_spill] sm:$0xff]  ;;  %v13396_v11 = vld [vmem:[#allocation605_spill] sm:$0xff]  ;;  %v3463_v14 = vadd.f32 %v3455_v5, %v3417_v19  ;;  %v3600_v37 = vadd.f32 %v3592_v36, %v3554_v46  ;;  %v11388_v5 = vpop.permute.xlu2 %5443 }
 0xa34   :  { %v3682_v62 = vsel %vm13394_vm9, %v13393_v38, %v13392_v17  ;;  %vm13397_vm1 = vmmov %vm13366_vm10  ;;  %v13398_v63 = vld [vmem:[#allocation618_spill] sm:$0xff]  ;;  %v13399_v4 = vld [vmem:[#allocation625_spill] sm:$0xff]  ;;  %vm13403_vm10 = vcmask 883712   ;;  %v3691_v12 = vadd.f32 %v3683_v49, %v3645_v0  ;;  %vm13426_vm9 = vcmask 867328  }
 0xa35   :  { %v3501_v41 = vsel %vm13397_vm1, %v13396_v11, %v13395_v27  ;;  %vm13400_vm13 = vmmov %vm13380_vm14  ;;  %v13401_v55 = vld [vmem:[#allocation630_spill] sm:$0xff]  ;;  %v13402_v44 = vld [vmem:[#allocation637_spill] sm:$0xff]  ;;  %v3690_v23 = vadd.f32 %v3682_v62, %v3644_v53  ;;  %vm13415_vm14 = vcmask 875520  }
 0xa36   :  { %v3638_v32 = vsel %vm13400_vm13, %v13399_v4, %v13398_v63  ;;  %v3728_v52 = vsel %vm13403_vm10, %v13402_v44, %v13401_v55  ;;  %v13404_v8 = vld [vmem:[#allocation640_spill] sm:$0xff]  ;;  %v13405_v33 = vld [vmem:[#allocation641_spill] sm:$0xff]  ;;  %vm13406_vm8 = vmmov %vm13403_vm10  ;;  %v3509_v19 = vadd.f32 %v3501_v41, %v3463_v14 }
 0xa37   :  { %v3729_v59 = vsel %vm13406_vm8, %v13405_v33, %v13404_v8  ;;  %v13407_v15 = vld [vmem:[#allocation614_spill] sm:$0xff]  ;;  %v13408_v25 = vld [vmem:[#allocation603_spill] sm:$0xff]  ;;  %vm13409_vm5 = vmmov %vm13377_vm11  ;;  %v3646_v49 = vadd.f32 %v3638_v32, %v3600_v37  ;;  %v3736_v62 = vadd.f32 %v3728_v52, %v3690_v23 }
 0xa38   :  { %v3547_v1 = vsel %vm13409_vm5, %v13408_v25, %v13407_v15  ;;  %v13410_v56 = vld [vmem:[#allocation634_spill] sm:$0xff]  ;;  %v13411_v16 = vld [vmem:[#allocation635_spill] sm:$0xff]  ;;  %vm13412_vm11 = vmmov %vm13391_vm0  ;;  %v3737_v46 = vadd.f32 %v3729_v59, %v3691_v12 }
 0xa39   :  { %v3684_v54 = vsel %vm13412_vm11, %v13411_v16, %v13410_v56  ;;  %v13413_v31 = vld [vmem:[#allocation646_spill] sm:$0xff]  ;;  %v13414_v17 = vld [vmem:[#allocation647_spill] sm:$0xff]  ;;  %vm13418_vm15 = vmmov %vm13415_vm14  ;;  %v3555_v41 = vadd.f32 %v3547_v1, %v3509_v19 }
 0xa3a   :  { %v3774_v38 = vsel %vm13415_vm14, %v13414_v17, %v13413_v31  ;;  %v13416_v27 = vld [vmem:[#allocation650_spill] sm:$0xff]  ;;  %v13417_v11 = vld [vmem:[#allocation639_spill] sm:$0xff]  ;;  %v13419_v4 = vld [vmem:[#allocation612_spill] sm:$0xff]  ;;  %v3692_v32 = vadd.f32 %v3684_v54, %v3646_v49  ;;  %v5440_v49 = vpop.permute.xlu0 %5439 }
 0xa3b   :  { %v3775_v63 = vsel %vm13418_vm15, %v13417_v11, %v13416_v27  ;;  %v13420_v55 = vld [vmem:[#allocation619_spill] sm:$0xff]  ;;  %v13421_v53 = vld [vmem:[#allocation644_spill] sm:$0xff]  ;;  %v13422_v0 = vld [vmem:[#allocation633_spill] sm:$0xff]  ;;  %v3782_v52 = vadd.f32 %v3774_v38, %v3736_v62 }
 0xa3c   :  { %v3593_v36 = vsel %vm13388_vm12, %v13420_v55, %v13419_v4  ;;  %vm13423_vm0 = vmmov %vm13406_vm8  ;;  %v13424_v44 = vld [vmem:[#allocation648_spill] sm:$0xff]  ;;  %v13425_v8 = vld [vmem:[#allocation655_spill] sm:$0xff]  ;;  %v3783_v59 = vadd.f32 %v3775_v63, %v3737_v46 }
 0xa3d   :  { %v3730_v14 = vsel %vm13423_vm0, %v13422_v0, %v13421_v53  ;;  %v3821_v33 = vsel %vm13426_vm9, %v13425_v8, %v13424_v44  ;;  %v13427_v15 = vld [vmem:[#allocation656_spill] sm:$0xff]  ;;  %v13428_v25 = vld [vmem:[#allocation645_spill] sm:$0xff]  ;;  %vm13429_vm1 = vmmov %vm13426_vm9  ;;  %v3601_v1 = vadd.f32 %v3593_v36, %v3555_v41  ;;  %v11426_v36 = vpop.permute.xlu1 %5441 }
 0xa3e   :  { %v3820_v56 = vsel %vm13429_vm1, %v13428_v25, %v13427_v15  ;;  %v13430_v16 = vld [vmem:[#allocation628_spill] sm:$0xff]  ;;  %v13431_v31 = vld [vmem:[#allocation629_spill] sm:$0xff]  ;;  %v13432_v37 = vld [vmem:[#allocation642_spill] sm:$0xff]  ;;  %v3738_v54 = vadd.f32 %v3730_v14, %v3692_v32  ;;  %v3829_v38 = vadd.f32 %v3821_v33, %v3783_v59 }
 0xa3f   :  { %v3639_v17 = vsel %vm13400_vm13, %v13431_v31, %v13430_v16  ;;  %v13433_v12 = vld [vmem:[#allocation649_spill] sm:$0xff]  ;;  %vm13434_vm10 = vmmov %vm13415_vm14  ;;  %v13435_v19 = vld [vmem:[#allocation654_spill] sm:$0xff]  ;;  %v3828_v63 = vadd.f32 %v3820_v56, %v3782_v52  ;;  %vm13456_vm14 = vcmask 842752  }
 0xa40   :  { %v3776_v23 = vsel %vm13434_vm10, %v13433_v12, %v13432_v37  ;;  %v13436_v27 = vld [vmem:[#allocation661_spill] sm:$0xff]  ;;  %v13437_v4 = vld [vmem:[#allocation664_spill] sm:$0xff]  ;;  %v13439_v0 = vld [vmem:[#allocation638_spill] sm:$0xff]  ;;  %v3647_v62 = vadd.f32 %v3639_v17, %v3601_v1 }
 0xa41   :  { %v3866_v11 = vsel %vm1153_vm4, %v13436_v27, %v13435_v19  ;;  %v13438_v55 = vld [vmem:[#allocation665_spill] sm:$0xff]  ;;  %v13440_v44 = vld [vmem:[#allocation627_spill] sm:$0xff]  ;;  %vm13441_vm8 = vmmov %vm13412_vm11  ;;  %v3784_v56 = vadd.f32 %v3776_v23, %v3738_v54 }
 0xa42   :  { %v3867_v53 = vsel %vm1153_vm4, %v13438_v55, %v13437_v4  ;;  %v3685_v8 = vsel %vm13441_vm8, %v13440_v44, %v13439_v0  ;;  %v13442_v46 = vld [vmem:[#allocation658_spill] sm:$0xff]  ;;  %v13443_v41 = vld [vmem:[#allocation659_spill] sm:$0xff]  ;;  %vm13444_vm5 = vmmov %vm13429_vm1  ;;  %v3874_v32 = vadd.f32 %v3866_v11, %v3828_v63 }
 0xa43   :  { %v3822_v15 = vsel %vm13444_vm5, %v13443_v41, %v13442_v46  ;;  %v13445_v25 = vld [vmem:[#allocation670_spill] sm:$0xff]  ;;  %v13446_v16 = vld [vmem:[#allocation671_spill] sm:$0xff]  ;;  %v13449_v27 = vld [vmem:[#allocation636_spill] sm:$0xff]  ;;  %v3875_v52 = vadd.f32 %v3867_v53, %v3829_v38  ;;  %v3693_v17 = vadd.f32 %v3685_v8, %v3647_v62  ;;  %v5480_v8 = vpop.permute.xlu2 %5479 }
 0xa44   :  { %v3912_v31 = vsel %vm1200_vm2, %v13446_v16, %v13445_v25  ;;  %v13447_v37 = vld [vmem:[#allocation674_spill] sm:$0xff]  ;;  %v13448_v12 = vld [vmem:[#allocation663_spill] sm:$0xff]  ;;  %vm13451_vm11 = vmmov %vm13423_vm0  ;;  %v3830_v23 = vadd.f32 %v3822_v15, %v3784_v56  ;;  %vm13467_vm0 = vcmask 834560  }
 0xa45   :  { %v3913_v19 = vsel %vm1200_vm2, %v13448_v12, %v13447_v37  ;;  %v13450_v14 = vld [vmem:[#allocation643_spill] sm:$0xff]  ;;  %v13452_v59 = vld [vmem:[#allocation668_spill] sm:$0xff]  ;;  %v13453_v1 = vld [vmem:[#allocation657_spill] sm:$0xff]  ;;  %v3920_v11 = vadd.f32 %v3912_v31, %v3874_v32 }
 0xa46   :  { %v3731_v33 = vsel %vm13451_vm11, %v13450_v14, %v13449_v27  ;;  %v3868_v4 = vsel %vm1153_vm4, %v13453_v1, %v13452_v59  ;;  %v13454_v55 = vld [vmem:[#allocation672_spill] sm:$0xff]  ;;  %v13455_v0 = vld [vmem:[#allocation679_spill] sm:$0xff]  ;;  %v13458_v41 = vld [vmem:[#allocation669_spill] sm:$0xff]  ;;  %v3921_v53 = vadd.f32 %v3913_v19, %v3875_v52 }
 0xa47   :  { %v3959_v44 = vsel %vm13456_vm14, %v13455_v0, %v13454_v55  ;;  %v13457_v46 = vld [vmem:[#allocation680_spill] sm:$0xff]  ;;  %vm13459_vm15 = vmmov %vm13456_vm14  ;;  %v13461_v37 = vld [vmem:[#allocation653_spill] sm:$0xff]  ;;  %v3739_v54 = vadd.f32 %v3731_v33, %v3693_v17  ;;  %v3876_v31 = vadd.f32 %v3868_v4, %v3830_v23 }
 0xa48   :  { %v3958_v25 = vsel %vm13459_vm15, %v13458_v41, %v13457_v46  ;;  %v13460_v16 = vld [vmem:[#allocation652_spill] sm:$0xff]  ;;  %vm13462_vm12 = vmmov %vm13434_vm10  ;;  %v13463_v38 = vld [vmem:[#allocation666_spill] sm:$0xff]  ;;  %v3967_v19 = vadd.f32 %v3959_v44, %v3921_v53 }
 0xa49   :  { %v3777_v12 = vsel %vm13462_vm12, %v13461_v37, %v13460_v16  ;;  %v13464_v63 = vld [vmem:[#allocation673_spill] sm:$0xff]  ;;  %v13465_v27 = vld [vmem:[#allocation678_spill] sm:$0xff]  ;;  %v13468_v1 = vld [vmem:[#allocation688_spill] sm:$0xff]  ;;  %v3966_v56 = vadd.f32 %v3958_v25, %v3920_v11  ;;  %v11475_v25 = vpop.permute.xlu1 %5447 }
 0xa4a   :  { %v3914_v62 = vsel %vm1200_vm2, %v13464_v63, %v13463_v38  ;;  %v13466_v14 = vld [vmem:[#allocation685_spill] sm:$0xff]  ;;  %vm13470_vm9 = vmmov %vm13467_vm0  ;;  %v13471_v46 = vld [vmem:[#allocation662_spill] sm:$0xff]  ;;  %v3785_v33 = vadd.f32 %v3777_v12, %v3739_v54  ;;  %v11477_v12 = vpop.permute.xlu0 %5445 }
 0xa4b   :  { %v4004_v59 = vsel %vm13467_vm0, %v13466_v14, %v13465_v27  ;;  %v13469_v55 = vld [vmem:[#allocation689_spill] sm:$0xff]  ;;  %v13472_v41 = vld [vmem:[#allocation651_spill] sm:$0xff]  ;;  %v13473_v32 = vld [vmem:[#allocation682_spill] sm:$0xff] }
 0xa4c   :  { %v4005_v0 = vsel %vm13470_vm9, %v13469_v55, %v13468_v1  ;;  %v3823_v15 = vsel %vm13429_vm1, %v13472_v41, %v13471_v46  ;;  %v13474_v52 = vld [vmem:[#allocation683_spill] sm:$0xff]  ;;  %vm13475_vm13 = vmmov %vm13456_vm14  ;;  %v13476_v16 = vld [vmem:[#allocation694_spill] sm:$0xff]  ;;  %v2798_v1 = vadd.f32 %v11186_v10, %v11133_v58  ;;  %v3922_v55 = vadd.f32 %v3914_v62, %v3876_v31 }
 0xa4d   :  { %v3960_v17 = vsel %vm13475_vm13, %v13474_v52, %v13473_v32  ;;  %v13477_v37 = vld [vmem:[#allocation695_spill] sm:$0xff]  ;;  %v13478_v63 = vld [vmem:[#allocation698_spill] sm:$0xff]  ;;  %v4012_v4 = vadd.f32 %v4004_v59, %v3966_v56  ;;  %v4013_v44 = vadd.f32 %v4005_v0, %v3967_v19  ;;  %v3831_v23 = vadd.f32 %v3823_v15, %v3785_v33  ;;  %v13480_v11 = vld [vmem:[#allocation696_spill] sm:$0xff] }
 0xa4e   :  { %v4050_v38 = vsel %vm1341_vm7, %v13477_v37, %v13476_v16  ;;  %v13479_v27 = vld [vmem:[#allocation687_spill] sm:$0xff]  ;;  %v13482_v46 = vld [vmem:[#allocation704_spill] sm:$0xff]  ;;  %v13483_v41 = vld [vmem:[#allocation693_spill] sm:$0xff]  ;;  %v3968_v10 = vadd.f32 %v3960_v17, %v3922_v55 }
 0xa4f   :  { %v4051_v14 = vsel %vm1341_vm7, %v13479_v27, %v13478_v63  ;;  %v13481_v53 = vld [vmem:[#allocation703_spill] sm:$0xff]  ;;  %v4096_v32 = vsel %vm1388_vm6, %v13483_v41, %v13482_v46  ;;  %vm13484_vm10 = vmmov %vm13467_vm0  ;;  %v13485_v62 = vld [vmem:[#allocation692_spill] sm:$0xff]  ;;  %v4058_v31 = vadd.f32 %v4050_v38, %v4012_v4  ;;  %v5403_v63 = vsel %vm1341_vm7, %v11212_v48, %v11100_v61  ;;  %v5486_v41 = vpop.permute.xlu2 %5485 }
 0xa50   :  { %v4097_v54 = vsel %vm1388_vm6, %v13481_v53, %v13480_v11  ;;  %v5358_v58 = vsel %vm13484_vm10, %v11087_v60, %v10958_v26  ;;  %v13486_v59 = vld [vmem:[#allocation681_spill] sm:$0xff]  ;;  %vm13487_vm8 = vmmov %vm13467_vm0  ;;  %v4059_v19 = vadd.f32 %v4051_v14, %v4013_v44  ;;  %v13488_v15 = vld [vmem:[#allocation702_spill] sm:$0xff]  ;;  %v5404_v26 = vsel %vm1341_vm7, %v11268_v30, %v11266_v13 }
 0xa51   :  { %v4006_v0 = vsel %vm13487_vm8, %v13486_v59, %v13485_v62  ;;  %v13489_v56 = vld [vmem:[#allocation709_spill] sm:$0xff]  ;;  %v13490_v52 = vld [vmem:[#allocation711_spill] sm:$0xff]  ;;  %v13491_v16 = vld [vmem:[#allocation712_spill] sm:$0xff]  ;;  %v4104_v14 = vadd.f32 %v4096_v32, %v4058_v31  ;;  %v5366_v55 = vadd.f32 %v5358_v58, %v10995_v39  ;;  %v5449_v61 = vsel %vm1388_vm6, %v11374_v47, %v11372_v9 }
 0xa52   :  { %v4142_v33 = vsel %vm1435_vm3, %v13489_v56, %v13488_v15  ;;  %v4143_v37 = vsel %vm1435_vm3, %v13491_v16, %v13490_v52  ;;  %v13492_v60 = vld [vmem:[#allocation660_spill] sm:$0xff]  ;;  %v13493_v17 = vld [vmem:[#allocation667_spill] sm:$0xff]  ;;  %v4105_v27 = vadd.f32 %v4097_v54, %v4059_v19  ;;  %v4014_v4 = vadd.f32 %v4006_v0, %v3968_v10  ;;  %v13494_v44 = vld [vmem:[#allocation690_spill] sm:$0xff]  ;;  %v5482_v19 = vpop.permute.xlu0 %5481 }
 0xa53   :  { %v3869_v38 = vsel %vm1153_vm4, %v13493_v17, %v13492_v60  ;;  %v13495_v11 = vld [vmem:[#allocation697_spill] sm:$0xff]  ;;  %v5450_v48 = vsel %vm1388_vm6, %v11315_v6, %v5440_v49  ;;  %v4150_v13 = vadd.f32 %v4142_v33, %v4104_v14  ;;  %v5411_v46 = vadd.f32 %v5403_v63, %v11103_v42  ;;  %v13496_v10 = vld [vmem:[#allocation676_spill] sm:$0xff]  ;;  %v13498_v9 = vld [vmem:[#allocation686_spill] sm:$0xff]  ;;  %v5484_v42 = vpop.permute.xlu1 %5483 }
 0xa54   :  { %v4052_v53 = vsel %vm1341_vm7, %v13495_v11, %v13494_v44  ;;  %v4151_v30 = vadd.f32 %v4143_v37, %v4105_v27  ;;  %v5412_v54 = vadd.f32 %v5404_v26, %v5366_v55  ;;  %v2799_v39 = vadd.f32 %v11167_v24, %v11135_v40  ;;  %v13497_v62 = vld [vmem:[#allocation677_spill] sm:$0xff]  ;;  %v13499_v47 = vld [vmem:[#allocation675_spill] sm:$0xff]  ;;  %vm13500_vm4 = vmmov %vm13475_vm13 }
 0xa55   :  { %v5508_v32 = vadd.f32 %v2798_v1, %v11018_v28  ;;  %v3877_v58 = vadd.f32 %v3869_v38, %v3831_v23  ;;  %v3915_v59 = vsel %vm1200_vm2, %v13497_v62, %v13496_v10  ;;  %v3961_v6 = vsel %vm13500_vm4, %v13499_v47, %v13498_v9  ;;  %v13501_v15 = vld [vmem:[#allocation706_spill] sm:$0xff]  ;;  %v13502_v56 = vld [vmem:[#allocation707_spill] sm:$0xff]  ;;  %vm13503_vm5 = vmmov %vm13467_vm0 }
 0xa56   :  { %v4060_v49 = vadd.f32 %v4052_v53, %v4014_v4  ;;  %v5457_v0 = vadd.f32 %v5449_v61, %v5411_v46  ;;  %v5458_v31 = vadd.f32 %v5450_v48, %v5412_v54  ;;  %v4098_v40 = vsel %vm1388_vm6, %v13502_v56, %v13501_v15  ;;  %v13504_v63 = vld [vmem:[#allocation714_spill] sm:$0xff]  ;;  %v13505_v26 = vld [vmem:[#allocation705_spill] sm:$0xff]  ;;  %v13506_v55 = vld [vmem:[#allocation684_spill] sm:$0xff] }
 0xa57   :  { %v5359_v28 = vsel %vm13503_vm5, %v11150_v21, %v11148_v3  ;;  %v5496_v24 = vsel %vm1435_vm3, %v5484_v42, %v5486_v41  ;;  %v5495_v1 = vsel %vm1435_vm3, %v5480_v8, %v5482_v19  ;;  %v5511_v23 = vadd.f32 %v11146_v29, %v4150_v13  ;;  %v13507_v4 = vld [vmem:[#allocation691_spill] sm:$0xff]  ;;  %vm13508_vm2 = vmmov %vm13467_vm0  ;;  %v13512_v46 = vld [vmem:[#allocation701_spill] sm:$0xff] }
 0xa58   :  { %v5512_v33 = vadd.f32 %v5508_v32, %v4151_v30  ;;  %v5504_v52 = vadd.f32 %v5496_v24, %v5458_v31  ;;  %v5503_v16 = vadd.f32 %v5495_v1, %v5457_v0  ;;  %v3923_v37 = vadd.f32 %v3915_v59, %v3877_v58  ;;  %v13510_v48 = vld [vmem:[#allocation475_spill] sm:$0xff]  ;;  %v13511_v30 = vld [vmem:[#allocation700_spill] sm:$0xff]  ;;  %v13516_v62 = vld [vmem:[#allocation485_spill] sm:$0xff] }
 0xa59   :  { %v4144_v60 = vsel %vm1435_vm3, %v13505_v26, %v13504_v63  ;;  %v5405_v17 = vsel %vm1341_vm7, %v11181_v2, %v11322_v18  ;;  %v5520_v3 = vstv %s11759_s2  ;;  %v4106_v21 = vadd.f32 %v4098_v40, %v4060_v49  ;;  %v13515_v10 = vld [vmem:[#allocation484_spill] sm:$0xff]  ;;  %v13517_v9 = vld [vmem:[#allocation710_spill] sm:$0xff]  ;;  %v13520_v19 = vld [vmem:[#allocation243_spill] sm:$0xff]  ;;  %s6174_s2 = smov 96  }
 0xa5a   :  { %v5367_v8 = vadd.f32 %v5359_v28, %v10992_v20  ;;  %v5516_v29 = vadd.f32 %v5512_v33, %v5504_v52  ;;  %v5515_v38 = vadd.f32 %v5511_v23, %v5503_v16  ;;  %v2662_v27 = vadd.f32 %v11117_v51, %v11078_v35  ;;  %v13509_v51 = vld [vmem:[#allocation468_spill] sm:$0xff]  ;;  %v5488_v58 = vpop.permute.xlu0 %5487  ;;  %v13519_v42 = vld [vmem:[#allocation254_spill] sm:$0xff]  ;;  %v13522_v40 = vld [vmem:[#allocation713_spill] sm:$0xff] }
 0xa5b   :  { %v3969_v14 = vadd.f32 %v3961_v6, %v3923_v37  ;;  %v4007_v44 = vsel %vm13508_vm2, %v13507_v4, %v13506_v55  ;;  %v5451_v2 = vsel %vm1388_vm6, %v11426_v36, %v11388_v5  ;;  %v4152_v18 = vadd.f32 %v4144_v60, %v4106_v21  ;;  %v5490_v32 = vpop.permute.xlu1 %5489  ;;  %v13521_v56 = vld [vmem:[#allocation708_spill] sm:$0xff] }
 0xa5c   :  { %v5413_v11 = vadd.f32 %v5405_v17, %v5367_v8  ;;  %v11552_v53 = vadd.f32 %v5520_v3, %v5516_v29  ;;  %v11554_v61 = vadd.f32 %v5520_v3, %v5515_v38  ;;  %v1353_v20 = vadd.f32 %v10849_v45, %v10731_v57  ;;  %v13513_v57 = vld [vmem:[#allocation244_spill] sm:$0xff]  ;;  %v13514_v45 = vld [vmem:[#allocation245_spill] sm:$0xff]  ;;  %v5492_v17 = vpop.permute.xlu2 %5491 }
 0xa5d   :  { %v2708_v35 = vadd.f32 %v11125_v50, %v2662_v27  ;;  %v2746_v13 = vsel %vm1388_vm6, %v13510_v48, %v13509_v51  ;;  %v4053_v54 = vsel %vm1341_vm7, %v13512_v46, %v13511_v30  ;;  %v5509_v5 = vadd.f32 %v2799_v39, %v11076_v43  ;;  %v13518_v43 = vld [vmem:[#allocation699_spill] sm:$0xff] }
 0xa5e   :  { %v4015_v36 = vadd.f32 %v4007_v44, %v3969_v14  ;;  %v5459_v41 = vadd.f32 %v5451_v2, %v5413_v11  ;;  %5527 = vrot.lane.b32.xlu2 %v11552_v53, %s6144_s3  ;;  %5525 = vrot.lane.b32.xlu1 %v11554_v61, %s6144_s3  ;;  %v1392_v50 = vsel %vm1388_vm6, %v13514_v45, %v13513_v57  ;;  %v6173_v11 = vmov 0  }
 0xa5f   :  { %v2792_v59 = vsel %vm1435_vm3, %v13516_v62, %v13515_v10  ;;  %v4099_v39 = vsel %vm1388_vm6, %v13518_v43, %v13517_v9  ;;  %v5497_v47 = vsel %vm1435_vm3, %v5488_v58, %v5490_v32  ;;  %v2754_v6 = vadd.f32 %v2746_v13, %v2708_v35 }
 0xa60   :  { %v4061_v49 = vadd.f32 %v4053_v54, %v4015_v36  ;;  %v5513_v0 = vadd.f32 %v5509_v5, %v4152_v18  ;;  %v5505_v31 = vadd.f32 %v5497_v47, %v5459_v41  ;;  %v1439_v15 = vsel %vm1435_vm3, %v13520_v19, %v13519_v42 }
 0xa61   :  { %v4145_v28 = vsel %vm1435_vm3, %v13522_v40, %v13521_v56  ;;  %v5406_v24 = vsel %vm1341_vm7, %v11320_v34, %v11249_v22  ;;  %v1400_v1 = vadd.f32 %v1392_v50, %v1353_v20  ;;  %v2800_v23 = vadd.f32 %v2792_v59, %v2754_v6 }
 0xa62   :  { %v4107_v33 = vadd.f32 %v4099_v39, %v4061_v49  ;;  %v5517_v52 = vadd.f32 %v5513_v0, %v5505_v31  ;;  %v5452_v16 = vsel %vm1388_vm6, %v11477_v12, %v11475_v25  ;;  %v5414_v26 = vadd.f32 %v5406_v24, %v11226_v7  ;;  %v5494_v29 = vpop.permute.xlu0 %5493 }
 0xa63   :  { %v1447_v37 = vadd.f32 %v1439_v15, %v1400_v1  ;;  %v5498_v22 = vsel %vm1435_vm3, %v5492_v17, %v5494_v29  ;;  %v5585_v18 = vlaneseq }
 0xa64   :  { %v4153_v63 = vadd.f32 %v4145_v28, %v4107_v33  ;;  %v5523_v60 = vadd.f32 %v5520_v3, %v5517_v52  ;;  %v5460_v8 = vadd.f32 %v5452_v16, %v5414_v26 }
 0xa65   :  { %v5510_v21 = vadd.f32 %v2800_v23, %v1447_v37  ;;  %v5586_v35 = vand.u32 127, %v5585_v18 }
 0xa66   :  { %5529 = vrot.lane.b32.xlu0 %v5523_v60, %s6144_s3  ;;  %5545 = vrot.lane.b32.xlu2 %v11554_v61, %s6145_s12  ;;  %v5506_v38 = vadd.f32 %v5498_v22, %v5460_v8 }
 0xa67   :  { %v5514_v34 = vadd.f32 %v5510_v21, %v4153_v63 }
 0xa69   :  { %v5518_v27 = vadd.f32 %v5514_v34, %v5506_v38 }
 0xa6b   :  { %v5524_v25 = vadd.f32 %v5520_v3, %v5518_v27 }
 0xa6d   :  { %5531 = vrot.lane.b32.xlu1 %v5524_v25, %s6144_s3  ;;  %s6175_s3 = smov 92  }
 0xa6e   :  { %5547 = vrot.lane.b32.xlu0 %v11552_v53, %s6145_s12  ;;  %5551 = vrot.lane.b32.xlu2 %v5524_v25, %s6145_s12 }
 0xa75   :  { %5549 = vrot.lane.b32.xlu1 %v5523_v60, %s6145_s12  ;;  %s6176_s12 = smov [#allocation12]  }
 0xa76   :  { %5565 = vrot.lane.b32.xlu0 %v11554_v61, %s6146_s14  ;;  %5569 = vrot.lane.b32.xlu2 %v5523_v60, %s6146_s14 }
 0xa7d   :  { %5567 = vrot.lane.b32.xlu1 %v11552_v53, %s6146_s14 }
 0xa7e   :  { %5571 = vrot.lane.b32.xlu0 %v5524_v25, %s6146_s14  ;;  %s5790_s14 = sshll.u32 %s6176_s12, 4  ;;  %s5791_s14 = int_to_ptr.vmem [resolvable:$true] %s5790_s14 }
 0xab8   :  { %v5528_v7 = vpop.permute.xlu2 %5527 }
 0xab9   :  { %vm5534_vm14 = vcmp.gt.f32.partialorder %v5528_v7, %v11552_v53 }
 0xaba   :  { %v5538_v45 = vsel %vm5534_vm14, %v5528_v7, %v11552_v53  ;;  %v5542_v39 = vsel %vm5534_vm14, 1, %v6173_v11 }
 0xac0   :  { %v5546_v12 = vpop.permute.xlu2 %5545 }
 0xac8   :  { %v5552_v4 = vpop.permute.xlu2 %5551 }
 0xad0   :  { %v5526_v14 = vpop.permute.xlu1 %5525  ;;  %v5570_v41 = vpop.permute.xlu2 %5569 }
 0xad1   :  { %vm5533_vm7 = vcmp.gt.f32.partialorder %v5526_v14, %v11554_v61 }
 0xad2   :  { %v5537_v2 = vsel %vm5533_vm7, %v5526_v14, %v11554_v61  ;;  %v5541_v20 = vsel %vm5533_vm7, 1, %v6173_v11 }
 0xad3   :  { %vm5553_vm6 = vcmp.gt.f32.partialorder %v5546_v12, %v5537_v2 }
 0xad4   :  { %v5557_v48 = vsel %vm5553_vm6, %v5546_v12, %v5537_v2  ;;  %v5561_v46 = vsel %vm5553_vm6, 2, %v5541_v20  ;;  %v5610_v20 = vstv %s5931_s25 }
 0xad8   :  { %v5530_v3 = vpop.permute.xlu0 %5529 }
 0xad9   :  { %vm5535_vm3 = vcmp.gt.f32.partialorder %v5530_v3, %v5523_v60 }
 0xada   :  { %v5539_v13 = vsel %vm5535_vm3, %v5530_v3, %v5523_v60  ;;  %v5543_v30 = vsel %vm5535_vm3, 1, %v6173_v11 }
 0xadf   :  { %v5532_v44 = vpop.permute.xlu1 %5531 }
 0xae0   :  { %v5548_v55 = vpop.permute.xlu0 %5547  ;;  %vm5536_vm11 = vcmp.gt.f32.partialorder %v5532_v44, %v5524_v25 }
 0xae1   :  { %v5540_v5 = vsel %vm5536_vm11, %v5532_v44, %v5524_v25  ;;  %vm5554_vm1 = vcmp.gt.f32.partialorder %v5548_v55, %v5538_v45  ;;  %v5544_v62 = vsel %vm5536_vm11, 1, %v6173_v11 }
 0xae2   :  { %vm5556_vm9 = vcmp.gt.f32.partialorder %v5552_v4, %v5540_v5  ;;  %v5558_v47 = vsel %vm5554_vm1, %v5548_v55, %v5538_v45  ;;  %v5562_v0 = vsel %vm5554_vm1, 2, %v5542_v39  ;;  %v5678_v45 = vstv %s5935_s7 }
 0xae3   :  { %v5560_v43 = vsel %vm5556_vm9, %v5552_v4, %v5540_v5  ;;  %v5564_v6 = vsel %vm5556_vm9, 2, %v5544_v62 }
 0xae7   :  { %v5550_v54 = vpop.permute.xlu1 %5549 }
 0xae8   :  { %v5566_v51 = vpop.permute.xlu0 %5565  ;;  %vm5555_vm12 = vcmp.gt.f32.partialorder %v5550_v54, %v5539_v13 }
 0xae9   :  { %vm5573_vm15 = vcmp.gt.f32.partialorder %v5566_v51, %v5557_v48  ;;  %v5559_v58 = vsel %vm5555_vm12, %v5550_v54, %v5539_v13  ;;  %v5563_v57 = vsel %vm5555_vm12, 2, %v5543_v30 }
 0xaea   :  { %v11612_v36 = vsel %vm5573_vm15, %v5566_v51, %v5557_v48  ;;  %v5581_v61 = vsel %vm5573_vm15, 3, %v5561_v46  ;;  %vm5575_vm0 = vcmp.gt.f32.partialorder %v5570_v41, %v5559_v58 }
 0xaeb   :  { %v5587_v32 = vadd.s32 %v5586_v35, %v5581_v61  ;;  %5601 = vrot.lane.b32.xlu1 %v11612_v36, %s6147_s16  ;;  %v11619_v50 = vsel %vm5575_vm0, %v5570_v41, %v5559_v58  ;;  %v5583_v10 = vsel %vm5575_vm0, 3, %v5563_v57  ;;  %v5660_v41 = vstv %s5934_s26 }
 0xaec   :  { %v5589_v59 = vadd.s32 %v5586_v35, %v5583_v10  ;;  %5605 = vrot.lane.b32.xlu0 %v11619_v50, %s6147_s16  ;;  %v5696_v10 = vstv %s5936_s28 }
 0xaed   :  { %5591 = vst [vmem:[#allocation12] sm:$0xff] %v5587_v32 }
 0xaee   :  { %5593 = vst [vmem:[#allocation12 + $0x10] sm:$0xff] %v5589_v59 }
 0xaef   :  { %v5568_v49 = vpop.permute.xlu1 %5567 }
 0xaf0   :  { %v5572_v9 = vpop.permute.xlu0 %5571  ;;  %vm5574_vm10 = vcmp.gt.f32.partialorder %v5568_v49, %v5558_v47 }
 0xaf1   :  { %vm5576_vm13 = vcmp.gt.f32.partialorder %v5572_v9, %v5560_v43  ;;  %v11628_v15 = vsel %vm5574_vm10, %v5568_v49, %v5558_v47  ;;  %v5582_v56 = vsel %vm5574_vm10, 3, %v5562_v0 }
 0xaf2   :  { %v11626_v31 = vsel %vm5576_vm13, %v5572_v9, %v5560_v43  ;;  %v5584_v42 = vsel %vm5576_vm13, 3, %v5564_v6  ;;  %v5588_v40 = vadd.s32 %v5586_v35, %v5582_v56  ;;  %5603 = vrot.lane.b32.xlu2 %v11628_v15, %s6147_s16  ;;  %v5714_v6 = vstv %s5937_s30 }
 0xaf3   :  { %v5590_v19 = vadd.s32 %v5586_v35, %v5584_v42  ;;  %5607 = vrot.lane.b32.xlu1 %v11626_v31, %s6147_s16 }
 0xaf4   :  { %5592 = vst [vmem:[#allocation12 + $0x8] sm:$0xff] %v5588_v40  ;;  %5617 = vrot.lane.b32.xlu0 %v11628_v15, %s6151_s24 }
 0xaf5   :  { %5594 = vst [vmem:[#allocation12 + $0x18] sm:$0xff] %v5590_v19 }
 0xafa   :  { %5615 = vrot.lane.b32.xlu2 %v11612_v36, %s6151_s24 }
 0xafb   :  { %5619 = vrot.lane.b32.xlu1 %v11619_v50, %s6151_s24 }
 0xafc   :  { %5633 = vrot.lane.b32.xlu0 %v11612_v36, %s6155_s8 }
 0xb02   :  { %5621 = vrot.lane.b32.xlu2 %v11626_v31, %s6151_s24 }
 0xb03   :  { %5635 = vrot.lane.b32.xlu1 %v11628_v15, %s6155_s8 }
 0xb04   :  { %5639 = vrot.lane.b32.xlu0 %v11626_v31, %s6155_s8 }
 0xb0a   :  { %5637 = vrot.lane.b32.xlu2 %v11619_v50, %s6155_s8  ;;  %s5792_s8 = sshll.u32 %s11763_s6, 4  ;;  %s5932_s6 = sld [smem:[#allocation9 + $0x2]]  ;;  %s5793_s8 = int_to_ptr.hbm [resolvable:$true] %s5792_s8 }
 0xb0b   :  { %5651 = vrot.lane.b32.xlu1 %v11612_v36, %s6159_s17 }
 0xb0c   :  { %5655 = vrot.lane.b32.xlu0 %v11619_v50, %s6159_s17 }
 0xb10   :  { %v5624_v2 = vstv %s5932_s6 }
 0xb12   :  { %5653 = vrot.lane.b32.xlu2 %v11628_v15, %s6159_s17 }
 0xb13   :  { %5657 = vrot.lane.b32.xlu1 %v11626_v31, %s6159_s17  ;;  %s6177_s17 = smov 128  }
 0xb14   :  { %5671 = vrot.lane.b32.xlu0 %v11628_v15, %s12572_s22 }
 0xb1a   :  { %5669 = vrot.lane.b32.xlu2 %v11612_v36, %s12572_s22 }
 0xb1b   :  { %5673 = vrot.lane.b32.xlu1 %v11619_v50, %s12572_s22 }
 0xb1c   :  { %5687 = vrot.lane.b32.xlu0 %v11612_v36, %s12417_s29 }
 0xb22   :  { %5675 = vrot.lane.b32.xlu2 %v11626_v31, %s12572_s22  ;;  %s5933_s22 = sld [smem:[#allocation9 + $0x3]] }
 0xb23   :  { %5689 = vrot.lane.b32.xlu1 %v11628_v15, %s12417_s29 }
 0xb24   :  { %5693 = vrot.lane.b32.xlu0 %v11626_v31, %s12417_s29 }
 0xb28   :  { %v5642_v51 = vstv %s5933_s22 }
 0xb2a   :  { %5691 = vrot.lane.b32.xlu2 %v11619_v50, %s12417_s29  ;;  %s6178_s29 = smov 8  }
 0xb2b   :  { %5705 = vrot.lane.b32.xlu1 %v11612_v36, %s6171_s15 }
 0xb2c   :  { %5709 = vrot.lane.b32.xlu0 %v11619_v50, %s6171_s15 }
 0xb2d   :  { %5798 = dma.vmem_to_hbm [thread:$0]  %s5791_s14, 512, %s5793_s8, [#allocation13], %s6177_s17, %s6177_s17, %s6178_s29  }
 0xb32   :  { %5707 = vrot.lane.b32.xlu2 %v11628_v15, %s6171_s15 }
 0xb33   :  { %5711 = vrot.lane.b32.xlu1 %v11626_v31, %s6171_s15  ;;  %s5595_s15 = sld [smem:[#allocation9]] }
 0xb34   :  { %5725 = vrot.lane.b32.xlu0 %v11628_v15, %s6174_s2 }
 0xb39   :  { %v5596_v11 = vstv %s5595_s15 }
 0xb3a   :  { %5723 = vrot.lane.b32.xlu2 %v11612_v36, %s6174_s2  ;;  %v5597_v48 = vmul.f32 %v5596_v11, %v11612_v36  ;;  %v5600_v13 = vmul.f32 %v5596_v11, %v11626_v31  ;;  %v5598_v30 = vmul.f32 %v5596_v11, %v11628_v15  ;;  %v5599_v46 = vmul.f32 %v5596_v11, %v11619_v50 }
 0xb3b   :  { %5727 = vrot.lane.b32.xlu1 %v11619_v50, %s6174_s2 }
 0xb3c   :  { %5741 = vrot.lane.b32.xlu0 %v11612_v36, %s6175_s3 }
 0xb42   :  { %5729 = vrot.lane.b32.xlu2 %v11626_v31, %s6174_s2 }
 0xb43   :  { %5743 = vrot.lane.b32.xlu1 %v11628_v15, %s6175_s3 }
 0xb44   :  { %5747 = vrot.lane.b32.xlu0 %v11626_v31, %s6175_s3 }
 0xb4a   :  { %5745 = vrot.lane.b32.xlu2 %v11619_v50, %s6175_s3  ;;  %v11728_v50 = vstv %s5939_s18 }
 0xb4c   :  { %v5604_v53 = vpop.permute.xlu2 %5603 }
 0xb4d   :  { %v5612_v5 = vmul.f32 %v5610_v20, %v5604_v53 }
 0xb54   :  { %v5616_v28 = vpop.permute.xlu2 %5615 }
 0xb55   :  { %v5625_v35 = vmul.f32 %v5624_v2, %v5616_v28 }
 0xb57   :  { %v5629_v58 = vadd.f32 %v5625_v35, %v5597_v48 }
 0xb5c   :  { %v5622_v1 = vpop.permute.xlu2 %5621 }
 0xb5d   :  { %v5602_v24 = vpop.permute.xlu1 %5601  ;;  %v5628_v57 = vmul.f32 %v5624_v2, %v5622_v1  ;;  %v5732_v1 = vstv %s11720_s9 }
 0xb5e   :  { %v5606_v23 = vpop.permute.xlu0 %5605  ;;  %v5611_v62 = vmul.f32 %v5610_v20, %v5602_v24 }
 0xb5f   :  { %v5613_v59 = vmul.f32 %v5610_v20, %v5606_v23  ;;  %v5632_v15 = vadd.f32 %v5628_v57, %v5600_v13 }
 0xb64   :  { %v5638_v52 = vpop.permute.xlu2 %5637 }
 0xb65   :  { %v11696_v33 = vpop.permute.xlu1 %5607  ;;  %v5645_v61 = vmul.f32 %v5642_v51, %v5638_v52 }
 0xb66   :  { %v5618_v16 = vpop.permute.xlu0 %5617  ;;  %v5614_v56 = vmul.f32 %v5610_v20, %v11696_v33 }
 0xb67   :  { %v5626_v39 = vmul.f32 %v5624_v2, %v5618_v16  ;;  %v5649_v0 = vadd.f32 %v5645_v61, %v5613_v59 }
 0xb69   :  { %v5630_v52 = vadd.f32 %v5626_v39, %v5598_v30 }
 0xb6c   :  { %v11698_v63 = vpop.permute.xlu2 %5653 }
 0xb6d   :  { %v5620_v37 = vpop.permute.xlu1 %5619  ;;  %v5662_v11 = vmul.f32 %v5660_v41, %v11698_v63 }
 0xb6e   :  { %v5634_v26 = vpop.permute.xlu0 %5633  ;;  %v5627_v32 = vmul.f32 %v5624_v2, %v5620_v37 }
 0xb6f   :  { %v5643_v47 = vmul.f32 %v5642_v51, %v5634_v26  ;;  %v5666_v57 = vadd.f32 %v5662_v11, %v5630_v52 }
 0xb70   :  { %v5631_v31 = vadd.f32 %v5627_v32, %v5599_v46 }
 0xb71   :  { %v5647_v16 = vadd.f32 %v5643_v47, %v5611_v62 }
 0xb74   :  { %v5670_v17 = vpop.permute.xlu2 %5669 }
 0xb75   :  { %v11700_v60 = vpop.permute.xlu1 %5635  ;;  %v5679_v40 = vmul.f32 %v5678_v45, %v5670_v17 }
 0xb76   :  { %v11702_v21 = vpop.permute.xlu0 %5639 }
 0xb77   :  { %v5683_v33 = vadd.f32 %v5679_v40, %v5647_v16  ;;  %v5646_v20 = vmul.f32 %v5642_v51, %v11702_v21 }
 0xb7c   :  { %v11704_v29 = vpop.permute.xlu2 %5675 }
 0xb7d   :  { %v5652_v8 = vpop.permute.xlu1 %5651  ;;  %v5682_v21 = vmul.f32 %v5678_v45, %v11704_v29 }
 0xb7e   :  { %v5656_v22 = vpop.permute.xlu0 %5655  ;;  %v5661_v53 = vmul.f32 %v5660_v41, %v5652_v8 }
 0xb7f   :  { %v5663_v9 = vmul.f32 %v5660_v41, %v5656_v22 }
 0xb80   :  { %v5665_v17 = vadd.f32 %v5661_v53, %v5629_v58 }
 0xb81   :  { %v5667_v28 = vadd.f32 %v5663_v9, %v5631_v31 }
 0xb84   :  { %v5692_v38 = vpop.permute.xlu2 %5691 }
 0xb85   :  { %v11706_v34 = vpop.permute.xlu1 %5657  ;;  %v5699_v42 = vmul.f32 %v5696_v10, %v5692_v38 }
 0xb86   :  { %v11708_v27 = vpop.permute.xlu0 %5671 }
 0xb87   :  { %v5703_v2 = vadd.f32 %v5699_v42, %v5667_v28  ;;  %v5680_v35 = vmul.f32 %v5678_v45, %v11708_v27  ;;  %v5664_v27 = vmul.f32 %v5660_v41, %v11706_v34 }
 0xb89   :  { %v5668_v34 = vadd.f32 %v5664_v27, %v5632_v15 }
 0xb8c   :  { %v11710_v7 = vpop.permute.xlu2 %5707 }
 0xb8d   :  { %v5674_v25 = vpop.permute.xlu1 %5673  ;;  %v5716_v61 = vmul.f32 %v5714_v6, %v11710_v7 }
 0xb8e   :  { %v5688_v12 = vpop.permute.xlu0 %5687  ;;  %v5681_v36 = vmul.f32 %v5678_v45, %v5674_v25  ;;  %v5644_v25 = vmul.f32 %v5642_v51, %v11700_v60  ;;  %v5764_v60 = vstv %s11761_s4  ;;  %s6179_s4 = smov [#allocation11]  }
 0xb8f   :  { %v5697_v37 = vmul.f32 %v5696_v10, %v5688_v12  ;;  %s5777_s1 = sshll.u32 %s6179_s4, 4  ;;  %s5778_s1 = int_to_ptr.vmem [resolvable:$true] %s5777_s1 }
 0xb90   :  { %v5685_v24 = vadd.f32 %v5681_v36, %v5649_v0  ;;  %v5648_v63 = vadd.f32 %v5644_v25, %v5612_v5  ;;  %v5650_v36 = vadd.f32 %v5646_v20, %v5614_v56 }
 0xb92   :  { %v5684_v62 = vadd.f32 %v5680_v35, %v5648_v63  ;;  %v5686_v45 = vadd.f32 %v5682_v21, %v5650_v36 }
 0xb94   :  { %v11714_v14 = vpop.permute.xlu2 %5723 }
 0xb95   :  { %v11712_v3 = vpop.permute.xlu1 %5689  ;;  %v5733_v8 = vmul.f32 %v5732_v1, %v11714_v14 }
 0xb96   :  { %v11716_v55 = vpop.permute.xlu0 %5693  ;;  %v5698_v14 = vmul.f32 %v5696_v10, %v11712_v3 }
 0xb97   :  { %v5700_v39 = vmul.f32 %v5696_v10, %v11716_v55 }
 0xb98   :  { %v5702_v3 = vadd.f32 %v5698_v14, %v5666_v57 }
 0xb9c   :  { %v11718_v44 = vpop.permute.xlu2 %5729 }
 0xb9d   :  { %v5706_v4 = vpop.permute.xlu1 %5705  ;;  %v5736_v41 = vmul.f32 %v5732_v1, %v11718_v44 }
 0xb9e   :  { %v5710_v18 = vpop.permute.xlu0 %5709  ;;  %v5715_v26 = vmul.f32 %v5714_v6, %v5706_v4  ;;  %v5701_v4 = vadd.f32 %v5697_v37, %v5665_v17 }
 0xb9f   :  { %v5717_v19 = vmul.f32 %v5714_v6, %v5710_v18 }
 0xba0   :  { %v5719_v30 = vadd.f32 %v5715_v26, %v5683_v33  ;;  %v5737_v51 = vadd.f32 %v5733_v8, %v5701_v4 }
 0xba1   :  { %v5721_v38 = vadd.f32 %v5717_v19, %v5685_v24  ;;  %v5704_v19 = vadd.f32 %v5700_v39, %v5668_v34 }
 0xba3   :  { %v5740_v10 = vadd.f32 %v5736_v41, %v5704_v19 }
 0xba4   :  { %v5746_v49 = vpop.permute.xlu2 %5745 }
 0xba5   :  { %v11726_v54 = vpop.permute.xlu1 %5711  ;;  %v5753_v23 = vmul.f32 %v11728_v50, %v5746_v49  ;;  %v5720_v49 = vadd.f32 %v5716_v61, %v5684_v62 }
 0xba6   :  { %v5726_v43 = vpop.permute.xlu0 %5725  ;;  %v5718_v5 = vmul.f32 %v5714_v6, %v11726_v54 }
 0xba7   :  { %v5757_v48 = vadd.f32 %v5753_v23, %v5721_v38  ;;  %v5734_v59 = vmul.f32 %v5732_v1, %v5726_v43 }
 0xba8   :  { %v5722_v56 = vadd.f32 %v5718_v5, %v5686_v45 }
 0xba9   :  { %v5738_v31 = vadd.f32 %v5734_v59, %v5702_v3 }
 0xbad   :  { %v5728_v22 = vpop.permute.xlu1 %5727 }
 0xbae   :  { %v5735_v18 = vmul.f32 %v5732_v1, %v5728_v22  ;;  %v5742_v12 = vpop.permute.xlu0 %5741 }
 0xbaf   :  { %v5751_v46 = vmul.f32 %v11728_v50, %v5742_v12 }
 0xbb0   :  { %v5739_v13 = vadd.f32 %v5735_v18, %v5703_v2 }
 0xbb1   :  { %v5755_v58 = vadd.f32 %v5751_v46, %v5719_v30 }
 0xbb2   :  { %v5761_v32 = vadd.f32 %v5757_v48, %v5739_v13 }
 0xbb3   :  { %v5759_v47 = vadd.f32 %v5755_v58, %v5737_v51 }
 0xbb4   :  { %v5767_v9 = vadd.f32 %v5764_v60, %v5761_v32 }
 0xbb5   :  { %v5744_v7 = vpop.permute.xlu1 %5743  ;;  %v5765_v0 = vadd.f32 %v5764_v60, %v5759_v47 }
 0xbb6   :  { %5771 = vst [vmem:[#allocation11 + $0x10] sm:$0xff] %v5767_v9  ;;  %v5752_v29 = vmul.f32 %v11728_v50, %v5744_v7  ;;  %v5748_v42 = vpop.permute.xlu0 %5747 }
 0xbb7   :  { %5769 = vst [vmem:[#allocation11] sm:$0xff] %v5765_v0  ;;  %v5754_v55 = vmul.f32 %v11728_v50, %v5748_v42 }
 0xbb8   :  { %v5756_v43 = vadd.f32 %v5752_v29, %v5720_v49 }
 0xbb9   :  { %v5758_v6 = vadd.f32 %v5754_v55, %v5722_v56 }
 0xbba   :  { %v5760_v54 = vadd.f32 %v5756_v43, %v5738_v31 }
 0xbbb   :  { %v5762_v44 = vadd.f32 %v5758_v6, %v5740_v10 }
 0xbbc   :  { %v5766_v40 = vadd.f32 %v5764_v60, %v5760_v54 }
 0xbbd   :  { %v5768_v15 = vadd.f32 %v5764_v60, %v5762_v44 }
 0xbbe   :  { %5770 = vst [vmem:[#allocation11 + $0x8] sm:$0xff] %v5766_v40 }
 0xbbf   :  { %5772 = vst [vmem:[#allocation11 + $0x18] sm:$0xff] %v5768_v15 }
 0xbc0   :  { %5785 = dma.vmem_to_hbm [thread:$0]  %s5778_s1, 512, %s5780_s13, [#allocation6], %s6177_s17, %s6177_s17, %s6178_s29  }
 0xbc1   :  { %6135 = dma.done.wait [#allocation6], 512  }
 0xbc2   :  { %6136 = vsyncadd [#allocation6], 4294966784 }
 0xbc3   :  { %6137 = dma.done.wait [#allocation13], 512  }
 0xbc4   :  { %6138 = vsyncadd [#allocation13], 4294966784 }
 0xbc5   :  { %5807 = vsyncpa [#allocation5], 1 }
 0xbc6   :  { %5808 = vsyncpa [#allocation6], 1 }
 0xbc7   :  { %5809 = vsyncpa [#allocation13], 1 }
 0xbc8   :  { %5810 = vsyncpa [#allocation7], 1 }
 0xbc9   :  { %5811 = vsyncpa [#allocation10], 1 }

</bundles_post_ra>
